<compile_context>
chip_gen: v6e
topology: v6e:2x2x1
jax: 0.10.0
libtpu: 0.0.40
codegen_flags: <defaults>
</compile_context>

<pallas_src>
import jax
import jax.numpy as jnp
from jax.experimental import pallas as pl
from jax.experimental.pallas import tpu as pltpu

# ---- fixed module hyper-params (from RecModel.__init__) ----
IMG_H, IMG_W = 32, 128
PATCH = 4
IN_CHANS = 256
EMBED_DIM = 384
D_EMBEDDING = 384   # decoder.d_embedding is decoder-defined; pick 384 deterministically
LN_EPS = 1e-5

NUM_PATCHES = (IMG_H // PATCH) * (IMG_W // PATCH)   # 8 * 32 = 256
K_PATCH = IN_CHANS * PATCH * PATCH                  # 4096


def _fused_kernel(xp_ref, w_ref, p_ref, o_ref):
    """grid = (N // tm,): one row tile per step; W_fused + params are VMEM-resident.

    p_ref rows: 0 = fused bias (b1@W2 + b2), 1 = LN gamma, 2 = LN beta.
    """
    # (patch_embed @ W1) @ W2 folded into a single bf16 matmul, f32 accumulation.
    h = jnp.dot(xp_ref[...], w_ref[...], preferred_element_type=jnp.float32)
    h = h + p_ref[0:1, :]
    # linear_norm[1]: LayerNorm(d_embedding), f32 epilogue.
    mu = jnp.mean(h, axis=-1, keepdims=True)
    c = h - mu
    var = jnp.mean(c * c, axis=-1, keepdims=True)
    hn = c * jax.lax.rsqrt(var + LN_EPS)
    o_ref[...] = (hn * p_ref[1:2, :] + p_ref[2:3, :]).astype(o_ref.dtype)


def rec_model_forward(x_nchw, params, *, tm=128):
    """x_nchw: (B, 256, 32, 128) float32. Returns (dec_output, None, None, None).

    dec_output == linear_norm(patch_embed(x)) of shape (B, 256, D_EMBEDDING).
    """
    B, C, H, W = x_nchw.shape
    assert (H, W) == (IMG_H, IMG_W) and C == IN_CHANS

    # glue: extract non-overlapping 4x4 patches, inner order (c, ph, pw) matching
    # torch Conv2d weight.reshape(embed_dim, -1); cast to bf16 for the MXU and to
    # halve the activation stream.  allow_input_fusion lets XLA pull this into
    # the pallas_call input DMA when it can.
    xp = x_nchw.reshape(B, C, H // PATCH, PATCH, W // PATCH, PATCH)
    xp = xp.transpose(0, 2, 4, 1, 3, 5)                     # (B, Hp, Wp, C, 4, 4)
    xp = xp.reshape(B * NUM_PATCHES, K_PATCH).astype(jnp.bfloat16)

    N = xp.shape[0]                   # B * 256, always a multiple of 256
    tm = min(tm, N)
    assert N % tm == 0

    # Fold Linear(384, d_embedding) into the patch-embed weight (f32, then bf16):
    #   (x@W1 + b1)@W2 + b2 == x@(W1@W2) + (b1@W2 + b2)
    w1 = params["proj_w"]                                   # (4096, 384) f32
    w2 = params["lin_w"]                                    # (384, D_EMBEDDING) f32
    w_fused = jnp.dot(w1, w2, preferred_element_type=jnp.float32,
                      precision=jax.lax.Precision.HIGHEST).astype(jnp.bfloat16)
    b_fused = jnp.dot(params["proj_b"], w2, preferred_element_type=jnp.float32,
                      precision=jax.lax.Precision.HIGHEST) + params["lin_b"]
    # Stack tiny per-feature vectors into one (8, D) operand: bias / gamma / beta.
    p_stacked = jnp.concatenate(
        [b_fused, params["ln_g"], params["ln_b"],
         jnp.zeros((5, D_EMBEDDING), jnp.float32)], axis=0)  # (8, D_EMBEDDING)

    out = pl.pallas_call(
        _fused_kernel,
        out_shape=jax.ShapeDtypeStruct((N, D_EMBEDDING), jnp.float32),
        grid=(N // tm,),
        in_specs=[
            pl.BlockSpec((tm, K_PATCH), lambda i: (i, 0)),              # patches (bf16)
            pl.BlockSpec((K_PATCH, D_EMBEDDING), lambda i: (0, 0)),     # W_fused (resident)
            pl.BlockSpec((8, D_EMBEDDING), lambda i: (0, 0)),           # bias/gamma/beta
        ],
        out_specs=pl.BlockSpec((tm, D_EMBEDDING), lambda i: (i, 0)),
        compiler_params=pltpu.CompilerParams(
            dimension_semantics=("parallel",),
            allow_input_fusion=[True, False, False],
            vmem_limit_bytes=32 * 1024 * 1024),
    )(xp, w_fused, p_stacked)

    dec_in = out.reshape(B, NUM_PATCHES, D_EMBEDDING)
    # TODO(synk): decoder(dec_in, dec_in, targets=tgt, ...) not available; pass through.
    dec_output, dec_attn_maps = dec_in, None
    return dec_output, None, None, dec_attn_maps


def init_params(key):
    k1, k2, k3, k4 = jax.random.split(key, 4)
    # Conv2d(256, 384, 4, stride=4) weight: torch shape (384, 256, 4, 4)
    proj_w_t = jax.random.normal(k1, (EMBED_DIM, IN_CHANS, PATCH, PATCH),
                                 jnp.float32) * 0.02
    proj_w = proj_w_t.reshape(EMBED_DIM, K_PATCH).T          # (4096, 384)
    proj_b = jax.random.normal(k2, (1, EMBED_DIM), jnp.float32) * 0.02
    # Linear(384, D_EMBEDDING)
    lin_w_t = jax.random.normal(k3, (D_EMBEDDING, EMBED_DIM), jnp.float32) * 0.02
    lin_w = lin_w_t.T                                        # (384, D_EMBEDDING)
    lin_b = jax.random.normal(k4, (1, D_EMBEDDING), jnp.float32) * 0.02
    # LayerNorm(D_EMBEDDING)
    ln_g = jnp.ones((1, D_EMBEDDING), jnp.float32)
    ln_b = jnp.zeros((1, D_EMBEDDING), jnp.float32)
    return dict(proj_w=proj_w, proj_b=proj_b, lin_w=lin_w, lin_b=lin_b,
                ln_g=ln_g, ln_b=ln_b)


def _patchify(x_nchw):
    B = x_nchw.shape[0]
    xp = x_nchw.reshape(B, IN_CHANS, IMG_H // PATCH, PATCH, IMG_W // PATCH, PATCH)
    return xp.transpose(0, 2, 4, 1, 3, 5).reshape(B * NUM_PATCHES, K_PATCH)


def _layernorm(h, g, b):
    mu = jnp.mean(h, axis=-1, keepdims=True)
    var = jnp.mean((h - mu) ** 2, axis=-1, keepdims=True)
    return (h - mu) * jax.lax.rsqrt(var + LN_EPS) * g + b


def _reference_matched(x_nchw, params):
    """Same math as the kernel (folded bf16 weight, f32 accumulation)."""
    B = x_nchw.shape[0]
    xp = _patchify(x_nchw).astype(jnp.bfloat16)
    w_fused = jnp.dot(params["proj_w"], params["lin_w"],
                      preferred_element_type=jnp.float32,
                      precision=jax.lax.Precision.HIGHEST).astype(jnp.bfloat16)
    b_fused = jnp.dot(params["proj_b"], params["lin_w"],
                      preferred_element_type=jnp.float32,
                      precision=jax.lax.Precision.HIGHEST) + params["lin_b"]
    h = jnp.dot(xp, w_fused, preferred_element_type=jnp.float32) + b_fused
    return _layernorm(h, params["ln_g"], params["ln_b"]).reshape(
        B, NUM_PATCHES, D_EMBEDDING)


def _reference_f32(x_nchw, params):
    """Unfused full-f32 path (the torch module's math)."""
    B = x_nchw.shape[0]
    xp = _patchify(x_nchw)
    enc = jnp.dot(xp, params["proj_w"], preferred_element_type=jnp.float32,
                  precision=jax.lax.Precision.HIGHEST) + params["proj_b"]
    h = jnp.dot(enc, params["lin_w"], preferred_element_type=jnp.float32,
                precision=jax.lax.Precision.HIGHEST) + params["lin_b"]
    return _layernorm(h, params["ln_g"], params["ln_b"]).reshape(
        B, NUM_PATCHES, D_EMBEDDING)


if __name__ == "__main__":
    key = jax.random.PRNGKey(0)
    kx, kp, kt = jax.random.split(key, 3)

    B = 2
    enc_x = jax.random.normal(kx, (B, IN_CHANS, IMG_H, IMG_W), jnp.float32)
    # tgt / tgt_lens are only consumed by the (untranslatable) decoder
    tgt = jax.random.randint(kt, (B, 8), 0, 97)
    tgt_lens = jnp.full((B,), 8, jnp.int32)

    params = init_params(kp)

    fwd = jax.jit(lambda x, p: rec_model_forward(x, p))
    dec_output, _, _, dec_attn_maps = fwd(enc_x, params)
    dec_output = jax.block_until_ready(dec_output)

    assert dec_output.shape == (B, NUM_PATCHES, D_EMBEDDING)
    # Exact-math check (same bf16 quantization + W2 fold as the kernel).
    ref_m = _reference_matched(enc_x, params)
    assert jnp.allclose(dec_output, ref_m, atol=5e-3, rtol=5e-3)
    # Semantic check against the unfused full-f32 module math (loose tolerance:
    # covers the bf16 weight/activation quantization + the W1@W2 fold).
    ref_f = _reference_f32(enc_x, params)
    assert jnp.allclose(dec_output, ref_f, atol=5e-2, rtol=5e-2)

    print("KERNEL_OK")
</pallas_src>

<mosaic_0001>
module attributes {stable_mosaic.version = 11 : i64} {
  func.func @_fused_kernel(%arg0: i32, %arg1: memref<128x4096xbf16, #tpu.memory_space<vmem>>, %arg2: memref<4096x384xbf16, #tpu.memory_space<vmem>>, %arg3: memref<8x384xf32, #tpu.memory_space<vmem>>, %arg4: memref<128x384xf32, #tpu.memory_space<vmem>>) attributes {dimension_semantics = [#tpu.dimension_semantics<parallel>], iteration_bounds = array<i64: 4>, scalar_prefetch = 0 : i64, scratch_operands = 0 : i64, tpu.core_type = #tpu.core_type<tc>, window_params = [{transform_indices = @transform_0, window_bounds = array<i64: 128, 4096>}, {pipeline_mode = #tpu.pipeline_mode<synchronous>, transform_indices = @transform_1, window_bounds = array<i64: 4096, 384>}, {pipeline_mode = #tpu.pipeline_mode<synchronous>, transform_indices = @transform_2, window_bounds = array<i64: 8, 384>}, {transform_indices = @transform_3, window_bounds = array<i64: 128, 384>}]} {
    %c0 = arith.constant 0 : index
    %c0_0 = arith.constant 0 : index
    %0 = vector.load %arg1[%c0, %c0_0] : memref<128x4096xbf16, #tpu.memory_space<vmem>>, vector<128x4096xbf16>
    %c0_1 = arith.constant 0 : index
    %c0_2 = arith.constant 0 : index
    %1 = vector.load %arg2[%c0_1, %c0_2] : memref<4096x384xbf16, #tpu.memory_space<vmem>>, vector<4096x384xbf16>
    %cst = arith.constant dense<0.000000e+00> : vector<128x384xf32>
    %2 = tpu.matmul %0, %1, %cst {dimension_numbers = #tpu.dot_dimension_numbers<[1], [0], [0], [1], [0, 0, 1, 1], [], []>} : vector<128x4096xbf16>, vector<4096x384xbf16>, vector<128x384xf32> -> vector<128x384xf32>
    %c0_3 = arith.constant 0 : index
    %c0_4 = arith.constant 0 : index
    %3 = vector.load %arg3[%c0_3, %c0_4] : memref<8x384xf32, #tpu.memory_space<vmem>>, vector<1x384xf32>
    %4 = vector.broadcast %3 : vector<1x384xf32> to vector<128x384xf32>
    %5 = arith.addf %2, %4 : vector<128x384xf32>
    %cst_5 = arith.constant dense<0.000000e+00> : vector<128xf32>
    %6 = vector.multi_reduction <add>, %5, %cst_5 [1] : vector<128x384xf32> to vector<128xf32>
    %7 = vector.shape_cast %6 : vector<128xf32> to vector<128x1xf32>
    %cst_6 = arith.constant 3.840000e+02 : f32
    %8 = vector.broadcast %cst_6 : f32 to vector<128x1xf32>
    %9 = arith.divf %7, %8 : vector<128x1xf32>
    %10 = vector.broadcast %9 : vector<128x1xf32> to vector<128x384xf32>
    %11 = arith.subf %5, %10 : vector<128x384xf32>
    %12 = arith.mulf %11, %11 : vector<128x384xf32>
    %cst_7 = arith.constant dense<0.000000e+00> : vector<128xf32>
    %13 = vector.multi_reduction <add>, %12, %cst_7 [1] : vector<128x384xf32> to vector<128xf32>
    %14 = vector.shape_cast %13 : vector<128xf32> to vector<128x1xf32>
    %cst_8 = arith.constant 3.840000e+02 : f32
    %15 = vector.broadcast %cst_8 : f32 to vector<128x1xf32>
    %16 = arith.divf %14, %15 : vector<128x1xf32>
    %cst_9 = arith.constant 9.99999974E-6 : f32
    %17 = vector.broadcast %cst_9 : f32 to vector<128x1xf32>
    %18 = arith.addf %16, %17 : vector<128x1xf32>
    %19 = math.rsqrt %18 : vector<128x1xf32>
    %20 = vector.broadcast %19 : vector<128x1xf32> to vector<128x384xf32>
    %21 = arith.mulf %11, %20 : vector<128x384xf32>
    %c1 = arith.constant 1 : index
    %c0_10 = arith.constant 0 : index
    %22 = vector.load %arg3[%c1, %c0_10] : memref<8x384xf32, #tpu.memory_space<vmem>>, vector<1x384xf32>
    %23 = vector.broadcast %22 : vector<1x384xf32> to vector<128x384xf32>
    %24 = arith.mulf %21, %23 : vector<128x384xf32>
    %c2 = arith.constant 2 : index
    %c0_11 = arith.constant 0 : index
    %25 = vector.load %arg3[%c2, %c0_11] : memref<8x384xf32, #tpu.memory_space<vmem>>, vector<1x384xf32>
    %26 = vector.broadcast %25 : vector<1x384xf32> to vector<128x384xf32>
    %27 = arith.addf %24, %26 : vector<128x384xf32>
    %c0_12 = arith.constant 0 : index
    %c0_13 = arith.constant 0 : index
    %28 = vector.load %arg4[%c0_12, %c0_13] : memref<128x384xf32, #tpu.memory_space<vmem>>, vector<128x384xf32>
    tpu.vector_store %arg4[%c0_12, %c0_13], %27 {strides = array<i32>} : memref<128x384xf32, #tpu.memory_space<vmem>>, vector<128x384xf32>,
    return
  }
  func.func @transform_0(%arg0: i32) -> (i32, i32) {
    %c0_i32 = arith.constant 0 : i32
    %c0_i32_0 = arith.constant 0 : i32
    return %arg0, %c0_i32 : i32, i32
  }
  func.func @transform_1(%arg0: i32) -> (i32, i32) {
    %c0_i32 = arith.constant 0 : i32
    %c0_i32_0 = arith.constant 0 : i32
    %c0_i32_1 = arith.constant 0 : i32
    return %c0_i32, %c0_i32_0 : i32, i32
  }
  func.func @transform_2(%arg0: i32) -> (i32, i32) {
    %c0_i32 = arith.constant 0 : i32
    %c0_i32_0 = arith.constant 0 : i32
    %c0_i32_1 = arith.constant 0 : i32
    return %c0_i32, %c0_i32_0 : i32, i32
  }
  func.func @transform_3(%arg0: i32) -> (i32, i32) {
    %c0_i32 = arith.constant 0 : i32
    %c0_i32_0 = arith.constant 0 : i32
    return %arg0, %c0_i32 : i32, i32
  }
}

</mosaic_0001>

<bundles_post_ra>
// kernel: _lambda_.1
= control target key start
LH: loop header
LB: loop body
LE: loop exit
PB: predicated region body
PF: predicated region fallthrough
CT: control target
= control target key end

     0   :  { %8 = vsyncpa [#allocation3], 0  ;;  %s19603_s0 = inlined_call_operand.vmem [shape: bf16[512,4096], index: 0, kind: input, shape index: {}]   ;;  %s19604_s1 = inlined_call_operand.vmem [shape: bf16[4096,384], index: 1, kind: input, shape index: {}]   ;;  %s19605_s2 = inlined_call_operand.vmem [shape: f32[8,384], index: 2, kind: input, shape index: {}]   ;;  %s19606_s3 = inlined_call_operand.hbm [shape: f32[512,384], index: 3, kind: output, shape index: {}]  }
   0x1   :  { %10 = vsyncpa [#allocation3 + $0x1], 0  ;;  %s14051_s12 = smov 0   ;;  %s14053_s13 = smov 0  }
   0x2   :  { %s14055_s14 = smov 0   ;;  %s14057_s15 = smov 0  }
   0x3 LB: > { %s14072_s16 = sadd.s32 4294967295, %s14026_s15   ;;  %s10803_s17 = sadd.s32 4294967294, %s14026_s15   ;;  %s14026_s15 = sphi %s14057_s15, %s20518_s15   ;;  %s14022_s14 = sphi %s14055_s14, %s20517_s14   ;;  %s14018_s13 = sphi %s14053_s13, %s20516_s13   ;;  %s14014_s12 = sphi %s14051_s12, %s20515_s12  }
   0x4   : > { %s14076_s18 = sadd.s32 1, %s14026_s15   ;;  %s91_s19 = sadd.s32 1, %s14022_s14 }
   0x5   : > { %s88_s20 = ssub.s32 %s14026_s15, %s14076_s18  ;;  %p101_p0 = scmp.ne.s32.totalorder %s14022_s14, %s14018_s13 }
   0x6   : > { %p89_p1 = scmp.eq.s32.totalorder %s88_s20, 0  ;;  %p102_p2 = scmp.eq.s32.totalorder %s14072_s16, 3 }
   0x7   : > { %p107_p3 = scmp.ne.s32.totalorder %s14018_s13, %s14014_s12  ;;  %p108_p4 = scmp.eq.s32.totalorder %s10803_s17, 3 }
   0x8   : > { %s14087_s21 = scalar_select %p89_p1, %s14022_s14, %s91_s19  }
   0x9   : > { %p14089_p5 = por %p102_p2, %p101_p0  ;;  %p14093_p6 = por %p108_p4, %p107_p3 }
   0xa   : > { %p10806_p7 = scmp.ge.s32.totalorder %s14026_s15, 1  ;;  %p142_p8 = scmp.lt.s32.totalorder %s14026_s15, 5 }
   0xc   : > { %p143_p9 = pnand %p10806_p7, %p142_p8 }
   0xe   : > { %146 = sbr.rel (%p143_p9) target bundleno = 1633 (0x661), region = 32 }
  0x13   : > { %v12909_v0 = vld [vmem:[%s19604_s1 + $0xac] ss:$12 sps:$4 sm:$0xff]   ;;  %v12913_v2 = vld [vmem:[%s19604_s1 + $0xa8] ss:$12 sps:$4 sm:$0xff]   ;;  %v12919_v6 = vld [vmem:[%s19604_s1 + $0x90] ss:$12 sps:$4 sm:$0xff]  }
  0x14   : > { %v12911_v1 = vld [vmem:[%s19604_s1 + $0x22c] ss:$12 sps:$4 sm:$0xff]   ;;  %6849 = vmatprep.subr.bf16.mxu0 %v12909_v0  ;;  %v12914_v3 = vld [vmem:[%s19604_s1 + $0x228] ss:$12 sps:$4 sm:$0xff]   ;;  %v12920_v7 = vld [vmem:[%s19604_s1 + $0x210] ss:$12 sps:$4 sm:$0xff]  }
  0x15   : > { %6962 = vmatprep.subr.bf16.mxu1 %v12911_v1  ;;  %v12915_v4 = vld [vmem:[%s19604_s1 + $0x94] ss:$12 sps:$4 sm:$0xff]   ;;  %6850 = vmatpush1.bf16.msra.mxu0 %v12913_v2  ;;  %v12921_v8 = vld [vmem:[%s19604_s1 + $0x7c] ss:$12 sps:$4 sm:$0xff]   ;;  %v12925_v10 = vld [vmem:[%s19604_s1 + $0x78] ss:$12 sps:$4 sm:$0xff]  }
  0x16   : > { %6963 = vmatpush1.bf16.msra.mxu1 %v12914_v3  ;;  %v12917_v5 = vld [vmem:[%s19604_s1 + $0x214] ss:$12 sps:$4 sm:$0xff]   ;;  %6851 = vmatprep.subr.bf16.mxu0 %v12915_v4  ;;  %v12923_v9 = vld [vmem:[%s19604_s1 + $0x1fc] ss:$12 sps:$4 sm:$0xff]   ;;  %v12926_v11 = vld [vmem:[%s19604_s1 + $0x1f8] ss:$12 sps:$4 sm:$0xff]  }
  0x17   : > { %6964 = vmatprep.subr.bf16.mxu1 %v12917_v5  ;;  %v12927_v12 = vld [vmem:[%s19604_s1 + $0x64] ss:$12 sps:$4 sm:$0xff]   ;;  %v12931_v14 = vld [vmem:[%s19604_s1 + $0x60] ss:$12 sps:$4 sm:$0xff]   ;;  %v12937_v18 = vld [vmem:[%s19604_s1 + $0x48] ss:$12 sps:$4 sm:$0xff]  }
  0x18   : > { %v12929_v13 = vld [vmem:[%s19604_s1 + $0x1e4] ss:$12 sps:$4 sm:$0xff]   ;;  %v12932_v15 = vld [vmem:[%s19604_s1 + $0x1e0] ss:$12 sps:$4 sm:$0xff]   ;;  %v12938_v19 = vld [vmem:[%s19604_s1 + $0x1c8] ss:$12 sps:$4 sm:$0xff]  }
  0x19   : > { %6852 = vmatpush1.bf16.msra.mxu0 %v12919_v6  ;;  %v12933_v16 = vld [vmem:[%s19604_s1 + $0x4c] ss:$12 sps:$4 sm:$0xff]   ;;  %v12939_v20 = vld [vmem:[%s19604_s1 + $0x34] ss:$12 sps:$4 sm:$0xff]   ;;  %v12943_v22 = vld [vmem:[%s19604_s1 + $0x30] ss:$12 sps:$4 sm:$0xff]  }
  0x1a   : > { %6965 = vmatpush1.bf16.msra.mxu1 %v12920_v7  ;;  %6853 = vmatprep.subr.bf16.mxu0 %v12921_v8  ;;  %v12935_v17 = vld [vmem:[%s19604_s1 + $0x1cc] ss:$12 sps:$4 sm:$0xff]   ;;  %v12941_v21 = vld [vmem:[%s19604_s1 + $0x1b4] ss:$12 sps:$4 sm:$0xff]   ;;  %v12944_v23 = vld [vmem:[%s19604_s1 + $0x1b0] ss:$12 sps:$4 sm:$0xff]  }
  0x1b   : > { %6966 = vmatprep.subr.bf16.mxu1 %v12923_v9  ;;  %v12945_v24 = vld [vmem:[%s19604_s1 + $0x1c] ss:$12 sps:$4 sm:$0xff]   ;;  %v12949_v26 = vld [vmem:[%s19604_s1 + $0x18] ss:$12 sps:$4 sm:$0xff]   ;;  %s10807_s30 = sshll.u32 %s14072_s16, 4  ;;  %s12867_s6 = smul.u32 6144, %s14072_s16 }
  0x1c   : > { %v12947_v25 = vld [vmem:[%s19604_s1 + $0x19c] ss:$12 sps:$4 sm:$0xff]   ;;  %v12950_v27 = vld [vmem:[%s19604_s1 + $0x198] ss:$12 sps:$4 sm:$0xff]   ;;  %v12955_v30 = vld [vmem:[%s19604_s1] ss:$12 sps:$4 sm:$0xff]  }
  0x1d   : > { %6854 = vmatpush1.bf16.msra.mxu0 %v12925_v10  ;;  %v12951_v28 = vld [vmem:[%s19604_s1 + $0x4] ss:$12 sps:$4 sm:$0xff]   ;;  %v12956_v31 = vld [vmem:[%s19604_s1 + $0x180] ss:$12 sps:$4 sm:$0xff]   ;;  %p168_p10 = scmp.lt.s32.totalorder %s10807_s30, 63  ;;  %s14028_s17 = smov [#allocation2]  }
  0x1e   : > { %6967 = vmatpush1.bf16.msra.mxu1 %v12926_v11  ;;  %6855 = vmatprep.subr.bf16.mxu0 %v12927_v12  ;;  %v12953_v29 = vld [vmem:[%s19604_s1 + $0x184] ss:$12 sps:$4 sm:$0xff]   ;;  %v12957_v32 = vld [vmem:[%s19604_s1 + $0x16c] ss:$12 sps:$4 sm:$0xff]   ;;  %v12961_v34 = vld [vmem:[%s19604_s1 + $0x168] ss:$12 sps:$4 sm:$0xff]  }
  0x1f   : > { %6968 = vmatprep.subr.bf16.mxu1 %v12929_v13  ;;  %v12959_v33 = vld [vmem:[%s19604_s1 + $0x2ec] ss:$12 sps:$4 sm:$0xff]   ;;  %v12962_v35 = vld [vmem:[%s19604_s1 + $0x2e8] ss:$12 sps:$4 sm:$0xff]   ;;  %s20520_s30 = smov (!%p168_p10, %s10807_s30), 63  ;;  %s13970_s19 = sshll.u32 %s14028_s17, 4  ;;  %s13971_s19 = int_to_ptr.vmem [resolvable:$false] %s13970_s19 }
  0x20   : > { %v12963_v36 = vld [vmem:[%s19604_s1 + $0x154] ss:$12 sps:$4 sm:$0xff]   ;;  %v12967_v38 = vld [vmem:[%s19604_s1 + $0x150] ss:$12 sps:$4 sm:$0xff]   ;;  %s11841_s9 = sshll.u32 %s20520_s30, 7  ;;  %s13972_s20 = scalar_lea.vmem %s13971_s19, 12288 }
  0x21   : > { %6856 = vmatpush1.bf16.msra.mxu0 %v12931_v14  ;;  %v12965_v37 = vld [vmem:[%s19604_s1 + $0x2d4] ss:$12 sps:$4 sm:$0xff]   ;;  %v12968_v39 = vld [vmem:[%s19604_s1 + $0x2d0] ss:$12 sps:$4 sm:$0xff]   ;;  %v12973_v42 = vld [vmem:[%s19604_s1 + $0x138] ss:$12 sps:$4 sm:$0xff]   ;;  %s14235_s27 = scalar_lea.vmem %s19603_s0, %s11841_s9  ;;  %s19551_s9 = scalar_lea.hbm %s19606_s3, %s12867_s6 }
  0x22   : > { %6969 = vmatpush1.bf16.msra.mxu1 %v12932_v15  ;;  %6857 = vmatprep.subr.bf16.mxu0 %v12933_v16  ;;  %v12969_v40 = vld [vmem:[%s19604_s1 + $0x13c] ss:$12 sps:$4 sm:$0xff]   ;;  %v12974_v43 = vld [vmem:[%s19604_s1 + $0x2b8] ss:$12 sps:$4 sm:$0xff]   ;;  %v12979_v46 = vld [vmem:[%s19604_s1 + $0x120] ss:$12 sps:$4 sm:$0xff]  }
  0x23   : > { %6970 = vmatprep.subr.bf16.mxu1 %v12935_v17  ;;  %v12971_v41 = vld [vmem:[%s19604_s1 + $0x2bc] ss:$12 sps:$4 sm:$0xff]   ;;  %v12975_v44 = vld [vmem:[%s19604_s1 + $0x124] ss:$12 sps:$4 sm:$0xff]   ;;  %v12980_v47 = vld [vmem:[%s19604_s1 + $0x2a0] ss:$12 sps:$4 sm:$0xff]  }
  0x24   : > { %v12977_v45 = vld [vmem:[%s19604_s1 + $0x2a4] ss:$12 sps:$4 sm:$0xff]   ;;  %v177_v50 = vld [vmem:[%s14235_s27 + $0x8] sm:$0xff]  ;;  %v12987_v58 = vld [vmem:[%s19604_s1 + $0xf4] ss:$12 sps:$4 sm:$0xff]  }
  0x25   : > { %6858 = vmatpush1.bf16.msra.mxu0 %v12937_v18  ;;  %v176_v48 = vld [vmem:[%s14235_s27] sm:$0xff]  ;;  %v193_v51 = vld [vmem:[%s14235_s27 + $0x88] sm:$0xff]  ;;  %v12991_v60 = vld [vmem:[%s19604_s1 + $0xf0] ss:$12 sps:$4 sm:$0xff]  }
  0x26   : > { %6971 = vmatpush1.bf16.msra.mxu1 %v12938_v19  ;;  %6859 = vmatprep.subr.bf16.mxu0 %v12939_v20  ;;  %v192_v49 = vld [vmem:[%s14235_s27 + $0x80] sm:$0xff]  ;;  %v12981_v52 = vld [vmem:[%s19604_s1 + $0x10c] ss:$12 sps:$4 sm:$0xff]   ;;  %v14261_v55 = vcombine.high %v177_v50, %v193_v51  ;;  %v12985_v56 = vld [vmem:[%s19604_s1 + $0x108] ss:$12 sps:$4 sm:$0xff]   ;;  %v14322_v12 = vcombine.low %v177_v50, %v193_v51 }
  0x27   : > { %6972 = vmatprep.subr.bf16.mxu1 %v12941_v21  ;;  %v14256_v53 = vcombine.high %v176_v48, %v192_v49  ;;  %v12983_v54 = vld [vmem:[%s19604_s1 + $0x28c] ss:$12 sps:$4 sm:$0xff]   ;;  %v12986_v57 = vld [vmem:[%s19604_s1 + $0x288] ss:$12 sps:$4 sm:$0xff]   ;;  %v12992_v61 = vld [vmem:[%s19604_s1 + $0x270] ss:$12 sps:$4 sm:$0xff]   ;;  %v14320_v11 = vcombine.low %v176_v48, %v192_v49 }
  0x28   : > { %6994 = vmatprep.mubr.bf16.mxu1 %v14261_v55  ;;  %v12989_v59 = vld [vmem:[%s19604_s1 + $0x274] ss:$12 sps:$4 sm:$0xff]   ;;  %v12993_v62 = vld [vmem:[%s19604_s1 + $0xdc] ss:$12 sps:$4 sm:$0xff]   ;;  %v12997_v0 = vld [vmem:[%s19604_s1 + $0xd8] ss:$12 sps:$4 sm:$0xff]  }
  0x29   : > { %6860 = vmatpush1.bf16.msra.mxu0 %v12943_v22  ;;  %6881 = vmatprep.mubr.bf16.mxu0 %v14256_v53  ;;  %v12995_v63 = vld [vmem:[%s19604_s1 + $0x25c] ss:$12 sps:$4 sm:$0xff]   ;;  %v12998_v1 = vld [vmem:[%s19604_s1 + $0x258] ss:$12 sps:$4 sm:$0xff]   ;;  %v13003_v4 = vld [vmem:[%s19604_s1 + $0xc0] ss:$12 sps:$4 sm:$0xff]  }
  0x2a   : > { %6973 = vmatpush1.bf16.msra.mxu1 %v12944_v23  ;;  %6861 = vmatprep.subr.bf16.mxu0 %v12945_v24  ;;  %v12999_v2 = vld [vmem:[%s19604_s1 + $0xc4] ss:$12 sps:$4 sm:$0xff]   ;;  %v13004_v5 = vld [vmem:[%s19604_s1 + $0x240] ss:$12 sps:$4 sm:$0xff]   ;;  %v13005_v8 = vld [vmem:[%s19604_s1 + $0x3a8] ss:$12 sps:$4 sm:$0xff]  }
  0x2b   : > { %6974 = vmatprep.subr.bf16.mxu1 %v12947_v25  ;;  %v13001_v3 = vld [vmem:[%s19604_s1 + $0x244] ss:$12 sps:$4 sm:$0xff]   ;;  %v13007_v6 = vld [vmem:[%s19604_s1 + $0x3ac] ss:$12 sps:$4 sm:$0xff]   ;;  %v13008_v9 = vld [vmem:[%s19604_s1 + $0x528] ss:$12 sps:$4 sm:$0xff]  }
  0x2c   : > { %v13010_v7 = vld [vmem:[%s19604_s1 + $0x52c] ss:$12 sps:$4 sm:$0xff]   ;;  %v208_v10 = vld [vmem:[%s14235_s27 + $0x100] sm:$0xff]  ;;  %19884 = vst [vmem:[#allocation5_spill] sm:$0xff] %v14322_v12  ;;  %v13011_v20 = vld [vmem:[%s19604_s1 + $0x390] ss:$12 sps:$4 sm:$0xff]  }
  0x2d   : > { %6862 = vmatpush1.bf16.msra.mxu0 %v12949_v26  ;;  %v224_v13 = vld [vmem:[%s14235_s27 + $0x180] sm:$0xff]  ;;  %v209_v14 = vld [vmem:[%s14235_s27 + $0x108] sm:$0xff]  ;;  %v13014_v21 = vld [vmem:[%s19604_s1 + $0x510] ss:$12 sps:$4 sm:$0xff]  }
  0x2e   : > { %6975 = vmatpush1.bf16.msra.mxu1 %v12950_v27  ;;  %6863 = vmatprep.subr.bf16.mxu0 %v12951_v28  ;;  %v225_v15 = vld [vmem:[%s14235_s27 + $0x188] sm:$0xff]  ;;  %v13013_v16 = vld [vmem:[%s19604_s1 + $0x394] ss:$12 sps:$4 sm:$0xff]   ;;  %v14333_v18 = vcombine.high %v208_v10, %v224_v13  ;;  %v13017_v24 = vld [vmem:[%s19604_s1 + $0x378] ss:$12 sps:$4 sm:$0xff]   ;;  %v14361_v28 = vcombine.low %v208_v10, %v224_v13 }
  0x2f   : > { %6976 = vmatprep.subr.bf16.mxu1 %v12953_v29  ;;  %v13016_v17 = vld [vmem:[%s19604_s1 + $0x514] ss:$12 sps:$4 sm:$0xff]   ;;  %v14335_v19 = vcombine.high %v209_v14, %v225_v15  ;;  %v13019_v22 = vld [vmem:[%s19604_s1 + $0x37c] ss:$12 sps:$4 sm:$0xff]   ;;  %v13020_v25 = vld [vmem:[%s19604_s1 + $0x4f8] ss:$12 sps:$4 sm:$0xff]   ;;  %v14363_v29 = vcombine.low %v209_v14, %v225_v15 }
  0x30   : > { %19885 = vst [vmem:[#allocation6_spill] sm:$0xff] %v14333_v18  ;;  %v13022_v23 = vld [vmem:[%s19604_s1 + $0x4fc] ss:$12 sps:$4 sm:$0xff]   ;;  %v240_v26 = vld [vmem:[%s14235_s27 + $0x200] sm:$0xff]  ;;  %19887 = vst [vmem:[#allocation8_spill] sm:$0xff] %v14361_v28 }
  0x31   : > { %6864 = vmatpush1.bf16.msra.mxu0 %v12955_v30  ;;  %19886 = vst [vmem:[#allocation7_spill] sm:$0xff] %v14335_v19  ;;  %v256_v27 = vld [vmem:[%s14235_s27 + $0x280] sm:$0xff]  ;;  %19888 = vst [vmem:[#allocation9_spill] sm:$0xff] %v14363_v29  ;;  %v241_v30 = vld [vmem:[%s14235_s27 + $0x208] sm:$0xff] }
  0x32   : > { %6977 = vmatpush1.bf16.msra.mxu1 %v12956_v31  ;;  %6865 = vmatprep.subr.bf16.mxu0 %v12957_v32  ;;  %v257_v31 = vld [vmem:[%s14235_s27 + $0x288] sm:$0xff]  ;;  %v13025_v32 = vld [vmem:[%s19604_s1 + $0x364] ss:$12 sps:$4 sm:$0xff]   ;;  %v13037_v48 = vld [vmem:[%s19604_s1 + $0x334] ss:$12 sps:$4 sm:$0xff]  }
  0x33   : > { %6978 = vmatprep.subr.bf16.mxu1 %v12959_v33  ;;  %v13028_v33 = vld [vmem:[%s19604_s1 + $0x4e4] ss:$12 sps:$4 sm:$0xff]   ;;  %v13040_v49 = vld [vmem:[%s19604_s1 + $0x4b4] ss:$12 sps:$4 sm:$0xff]  }
  0x34   : > { %v336_v10 = vld [vmem:[%s14235_s27 + $0x500] sm:$0xff] }
  0x35   : > { %6866 = vmatpush2.bf16.msra.mxu0 %v12961_v34  ;;  %v14373_v34 = vcombine.high %v240_v26, %v256_v27  ;;  %v352_v13 = vld [vmem:[%s14235_s27 + $0x580] sm:$0xff] }
  0x36   : > { %6979 = vmatpush2.bf16.msra.mxu1 %v12962_v35  ;;  %6867 = vmatprep.subr.bf16.mxu0 %v12963_v36  ;;  %v14375_v35 = vcombine.high %v241_v30, %v257_v31  ;;  %v13023_v36 = vld [vmem:[%s19604_s1 + $0x360] ss:$12 sps:$4 sm:$0xff]  }
  0x37   : > { %6980 = vmatprep.subr.bf16.mxu1 %v12965_v37  ;;  %19889 = vst [vmem:[#allocation10_spill] sm:$0xff] %v14373_v34  ;;  %v13026_v37 = vld [vmem:[%s19604_s1 + $0x4e0] ss:$12 sps:$4 sm:$0xff]  }
  0x38   : > { %19890 = vst [vmem:[#allocation11_spill] sm:$0xff] %v14375_v35 }
  0x39   : > { %6868 = vmatpush2.bf16.msra.mxu0 %v12967_v38  ;;  %v13031_v38 = vld [vmem:[%s19604_s1 + $0x34c] ss:$12 sps:$4 sm:$0xff]  }
  0x3a   : > { %6981 = vmatpush2.bf16.msra.mxu1 %v12968_v39  ;;  %6869 = vmatprep.subr.bf16.mxu0 %v12969_v40  ;;  %v13034_v39 = vld [vmem:[%s19604_s1 + $0x4cc] ss:$12 sps:$4 sm:$0xff]   ;;  %v13029_v40 = vld [vmem:[%s19604_s1 + $0x348] ss:$12 sps:$4 sm:$0xff]  }
  0x3b   : > { %6982 = vmatprep.subr.bf16.mxu1 %v12971_v41  ;;  %v13032_v41 = vld [vmem:[%s19604_s1 + $0x4c8] ss:$12 sps:$4 sm:$0xff]  }
  0x3d   : > { %6870 = vmatpush2.bf16.msra.mxu0 %v12973_v42  ;;  %v272_v42 = vld [vmem:[%s14235_s27 + $0x300] sm:$0xff] }
  0x3e   : > { %6983 = vmatpush2.bf16.msra.mxu1 %v12974_v43  ;;  %6871 = vmatprep.subr.bf16.mxu0 %v12975_v44  ;;  %v288_v43 = vld [vmem:[%s14235_s27 + $0x380] sm:$0xff]  ;;  %v14401_v44 = vcombine.low %v240_v26, %v256_v27  ;;  %v13059_v26 = vld [vmem:[%s19604_s1 + $0x450] ss:$12 sps:$4 sm:$0xff]  }
  0x3f   : > { %6984 = vmatprep.subr.bf16.mxu1 %v12977_v45  ;;  %v14403_v45 = vcombine.low %v241_v30, %v257_v31  ;;  %v14413_v50 = vcombine.high %v272_v42, %v288_v43  ;;  %v13062_v27 = vld [vmem:[%s19604_s1 + $0x5d0] ss:$12 sps:$4 sm:$0xff]  }
  0x40   : > { %19891 = vst [vmem:[#allocation12_spill] sm:$0xff] %v14401_v44  ;;  %v13067_v30 = vld [vmem:[%s19604_s1 + $0x43c] ss:$12 sps:$4 sm:$0xff]  }
  0x41   : > { %6872 = vmatpush2.bf16.msra.mxu0 %v12979_v46  ;;  %19892 = vst [vmem:[#allocation13_spill] sm:$0xff] %v14403_v45  ;;  %v273_v46 = vld [vmem:[%s14235_s27 + $0x308] sm:$0xff]  ;;  %19893 = vst [vmem:[#allocation14_spill] sm:$0xff] %v14413_v50 }
  0x42   : > { %6985 = vmatpush2.bf16.msra.mxu1 %v12980_v47  ;;  %6873 = vmatprep.subr.bf16.mxu0 %v12981_v52  ;;  %v289_v47 = vld [vmem:[%s14235_s27 + $0x388] sm:$0xff]  ;;  %v13035_v52 = vld [vmem:[%s19604_s1 + $0x330] ss:$12 sps:$4 sm:$0xff]  }
  0x43   : > { %6986 = vmatprep.subr.bf16.mxu1 %v12983_v54  ;;  %v14415_v51 = vcombine.high %v273_v46, %v289_v47  ;;  %v13038_v54 = vld [vmem:[%s19604_s1 + $0x4b0] ss:$12 sps:$4 sm:$0xff]  }
  0x44   : > { %v13070_v31 = vld [vmem:[%s19604_s1 + $0x5bc] ss:$12 sps:$4 sm:$0xff]  }
  0x45   : > { %6874 = vmatpush2.bf16.msra.mxu0 %v12985_v56  ;;  %19894 = vst [vmem:[#allocation15_spill] sm:$0xff] %v14415_v51  ;;  %v13043_v56 = vld [vmem:[%s19604_s1 + $0x31c] ss:$12 sps:$4 sm:$0xff]  }
  0x46   : > { %6987 = vmatpush2.bf16.msra.mxu1 %v12986_v57  ;;  %6875 = vmatprep.subr.bf16.mxu0 %v12987_v58  ;;  %v13046_v57 = vld [vmem:[%s19604_s1 + $0x49c] ss:$12 sps:$4 sm:$0xff]   ;;  %v13041_v58 = vld [vmem:[%s19604_s1 + $0x318] ss:$12 sps:$4 sm:$0xff]  }
  0x47   : > { %6988 = vmatprep.subr.bf16.mxu1 %v12989_v59  ;;  %v304_v59 = vld [vmem:[%s14235_s27 + $0x400] sm:$0xff] }
  0x49   : > { %6876 = vmatpush2.bf16.msra.mxu0 %v12991_v60  ;;  %v320_v60 = vld [vmem:[%s14235_s27 + $0x480] sm:$0xff] }
  0x4a   : > { %6989 = vmatpush2.bf16.msra.mxu1 %v12992_v61  ;;  %6877 = vmatprep.subr.bf16.mxu0 %v12993_v62  ;;  %v14438_v61 = vcombine.low %v272_v42, %v288_v43  ;;  %v14440_v62 = vcombine.low %v273_v46, %v289_v47  ;;  %v14475_v14 = vcombine.low %v304_v59, %v320_v60  ;;  %v13073_v42 = vld [vmem:[%s19604_s1 + $0x424] ss:$12 sps:$4 sm:$0xff]  }
  0x4b   : > { %6990 = vmatprep.subr.bf16.mxu1 %v12995_v63  ;;  %v305_v63 = vld [vmem:[%s14235_s27 + $0x408] sm:$0xff]  ;;  %v13076_v43 = vld [vmem:[%s19604_s1 + $0x5a4] ss:$12 sps:$4 sm:$0xff]  }
  0x4c   : > { %19895 = vst [vmem:[#allocation16_spill] sm:$0xff] %v14438_v61  ;;  %19896 = vst [vmem:[#allocation17_spill] sm:$0xff] %v14440_v62 }
  0x4d   : > { %6878 = vmatpush2.bf16.msra.mxu0 %v12997_v0  ;;  %v321_v0 = vld [vmem:[%s14235_s27 + $0x488] sm:$0xff]  ;;  %19899 = vst [vmem:[#allocation20_spill] sm:$0xff] %v14475_v14 }
  0x4e   : > { %6991 = vmatpush2.bf16.msra.mxu1 %v12998_v1  ;;  %6879 = vmatprep.subr.bf16.mxu0 %v12999_v2  ;;  %v13044_v1 = vld [vmem:[%s19604_s1 + $0x498] ss:$12 sps:$4 sm:$0xff]   ;;  %v14477_v15 = vcombine.low %v305_v63, %v321_v0 }
  0x4f   : > { %6992 = vmatprep.subr.bf16.mxu1 %v13001_v3  ;;  %v13049_v2 = vld [vmem:[%s19604_s1 + $0x304] ss:$12 sps:$4 sm:$0xff]  }
  0x50   : > { %v13052_v3 = vld [vmem:[%s19604_s1 + $0x484] ss:$12 sps:$4 sm:$0xff]   ;;  %19900 = vst [vmem:[#allocation21_spill] sm:$0xff] %v14477_v15 }
  0x51   : > { %6880 = vmatpush2.bf16.msra.mxu0 %v13003_v4  ;;  %v14453_v4 = vcombine.high %v304_v59, %v320_v60  ;;  %v416_v59 = vld [vmem:[%s14235_s27 + $0x780] sm:$0xff] }
  0x52   : > { %6993 = vmatpush2.bf16.msra.mxu1 %v13004_v5  ;;  %7075 = vmatprep.subr.bf16.mxu0 %v13007_v6  ;;  %v14455_v5 = vcombine.high %v305_v63, %v321_v0  ;;  %v13047_v6 = vld [vmem:[%s19604_s1 + $0x300] ss:$12 sps:$4 sm:$0xff]  }
  0x53   : > { %7188 = vmatprep.subr.bf16.mxu1 %v13010_v7  ;;  %19897 = vst [vmem:[#allocation18_spill] sm:$0xff] %v14453_v4  ;;  %v13050_v7 = vld [vmem:[%s19604_s1 + $0x480] ss:$12 sps:$4 sm:$0xff]  }
  0x54   : > { %6882 = vmatmul.mubr.bf16.vlgmr.msra.gmra.mxu0 %v14320_v11  ;;  %19898 = vst [vmem:[#allocation19_spill] sm:$0xff] %v14455_v5  ;;  %v401_v0 = vld [vmem:[%s14235_s27 + $0x708] sm:$0xff] }
  0x55   : > { %6995 = vmatmul.mubr.bf16.vlgmr.msra.gmra.mxu1 %v14322_v12  ;;  %7076 = vmatpush1.bf16.msra.mxu0 %v13005_v8  ;;  %v13055_v8 = vld [vmem:[%s19604_s1 + $0x46c] ss:$12 sps:$4 sm:$0xff]  }
  0x56   : > { %7189 = vmatpush1.bf16.msra.mxu1 %v13008_v9  ;;  %7077 = vmatprep.subr.bf16.mxu0 %v13013_v16  ;;  %v13058_v9 = vld [vmem:[%s19604_s1 + $0x5ec] ss:$12 sps:$4 sm:$0xff]  }
  0x57   : > { %7190 = vmatprep.subr.bf16.mxu1 %v13016_v17  ;;  %6891 = vmatprep.mubr.bf16.mxu0 %v14333_v18  ;;  %v337_v16 = vld [vmem:[%s14235_s27 + $0x508] sm:$0xff] }
  0x58   : > { %7004 = vmatprep.mubr.bf16.mxu1 %v14335_v19  ;;  %v353_v17 = vld [vmem:[%s14235_s27 + $0x588] sm:$0xff] }
  0x59   : > { %7078 = vmatpush1.bf16.msra.mxu0 %v13011_v20  ;;  %v13053_v20 = vld [vmem:[%s19604_s1 + $0x468] ss:$12 sps:$4 sm:$0xff]  }
  0x5a   : > { %7191 = vmatpush1.bf16.msra.mxu1 %v13014_v21  ;;  %7079 = vmatprep.subr.bf16.mxu0 %v13019_v22  ;;  %v13056_v21 = vld [vmem:[%s19604_s1 + $0x5e8] ss:$12 sps:$4 sm:$0xff]  }
  0x5b   : > { %7192 = vmatprep.subr.bf16.mxu1 %v13022_v23  ;;  %v13061_v22 = vld [vmem:[%s19604_s1 + $0x454] ss:$12 sps:$4 sm:$0xff]  }
  0x5c   : > { %6892 = vmatmul.mubr.bf16.gmra.mxu0 %v14361_v28  ;;  %v13064_v23 = vld [vmem:[%s19604_s1 + $0x5d4] ss:$12 sps:$4 sm:$0xff]  }
  0x5d   : > { %7005 = vmatmul.mubr.bf16.gmra.mxu1 %v14363_v29  ;;  %7080 = vmatpush1.bf16.msra.mxu0 %v13017_v24  ;;  %v14493_v24 = vcombine.high %v336_v10, %v352_v13  ;;  %v427_v29 = vld [vmem:[%s14235_s27 + $0x7d8] sm:$0xff] }
  0x5e   : > { %7193 = vmatpush1.bf16.msra.mxu1 %v13020_v25  ;;  %7081 = vmatprep.subr.bf16.mxu0 %v13025_v32  ;;  %v14495_v25 = vcombine.high %v337_v16, %v353_v17  ;;  %v13065_v32 = vld [vmem:[%s19604_s1 + $0x438] ss:$12 sps:$4 sm:$0xff]  }
  0x5f   : > { %7194 = vmatprep.subr.bf16.mxu1 %v13028_v33  ;;  %6901 = vmatprep.mubr.bf16.mxu0 %v14373_v34  ;;  %19901 = vst [vmem:[#allocation22_spill] sm:$0xff] %v14493_v24  ;;  %v13068_v33 = vld [vmem:[%s19604_s1 + $0x5b8] ss:$12 sps:$4 sm:$0xff]  }
  0x60   : > { %7014 = vmatprep.mubr.bf16.mxu1 %v14375_v35  ;;  %19902 = vst [vmem:[#allocation23_spill] sm:$0xff] %v14495_v25 }
  0x61   : > { %7082 = vmatpush1.bf16.msra.mxu0 %v13023_v36  ;;  %v368_v36 = vld [vmem:[%s14235_s27 + $0x600] sm:$0xff] }
  0x62   : > { %7195 = vmatpush1.bf16.msra.mxu1 %v13026_v37  ;;  %7083 = vmatprep.subr.bf16.mxu0 %v13031_v38  ;;  %v14520_v37 = vcombine.low %v336_v10, %v352_v13  ;;  %v14522_v38 = vcombine.low %v337_v16, %v353_v17  ;;  %v13091_v10 = vld [vmem:[%s19604_s1 + $0x3dc] ss:$12 sps:$4 sm:$0xff]   ;;  %v13089_v16 = vld [vmem:[%s19604_s1 + $0x3d8] ss:$12 sps:$4 sm:$0xff]  }
  0x63   : > { %7196 = vmatprep.subr.bf16.mxu1 %v13034_v39  ;;  %v384_v39 = vld [vmem:[%s14235_s27 + $0x680] sm:$0xff]  ;;  %v13094_v13 = vld [vmem:[%s19604_s1 + $0x55c] ss:$12 sps:$4 sm:$0xff]  }
  0x64   : > { %6902 = vmatmul.mubr.bf16.gmra.mxu0 %v14401_v44  ;;  %19903 = vst [vmem:[#allocation24_spill] sm:$0xff] %v14520_v37  ;;  %19904 = vst [vmem:[#allocation25_spill] sm:$0xff] %v14522_v38  ;;  %v14533_v46 = vcombine.high %v368_v36, %v384_v39  ;;  %v14561_v60 = vcombine.low %v368_v36, %v384_v39  ;;  %v13092_v17 = vld [vmem:[%s19604_s1 + $0x558] ss:$12 sps:$4 sm:$0xff]   ;;  %v13095_v36 = vld [vmem:[%s19604_s1 + $0x3c0] ss:$12 sps:$4 sm:$0xff]  }
  0x65   : > { %7015 = vmatmul.mubr.bf16.gmra.mxu1 %v14403_v45  ;;  %7084 = vmatpush1.bf16.msra.mxu0 %v13029_v40  ;;  %v369_v40 = vld [vmem:[%s14235_s27 + $0x608] sm:$0xff] }
  0x66   : > { %7197 = vmatpush1.bf16.msra.mxu1 %v13032_v41  ;;  %7085 = vmatprep.subr.bf16.mxu0 %v13037_v48  ;;  %v385_v41 = vld [vmem:[%s14235_s27 + $0x688] sm:$0xff]  ;;  %19905 = vst [vmem:[#allocation26_spill] sm:$0xff] %v14533_v46  ;;  %19907 = vst [vmem:[#allocation28_spill] sm:$0xff] %v14561_v60 }
  0x67   : > { %7198 = vmatprep.subr.bf16.mxu1 %v13040_v49  ;;  %6911 = vmatprep.mubr.bf16.mxu0 %v14413_v50  ;;  %v14535_v47 = vcombine.high %v369_v40, %v385_v41  ;;  %v13071_v48 = vld [vmem:[%s19604_s1 + $0x420] ss:$12 sps:$4 sm:$0xff]   ;;  %v14563_v63 = vcombine.low %v369_v40, %v385_v41 }
  0x68   : > { %7024 = vmatprep.mubr.bf16.mxu1 %v14415_v51  ;;  %v13074_v49 = vld [vmem:[%s19604_s1 + $0x5a0] ss:$12 sps:$4 sm:$0xff]  }
  0x69   : > { %7086 = vmatpush1.bf16.msra.mxu0 %v13035_v52  ;;  %19906 = vst [vmem:[#allocation27_spill] sm:$0xff] %v14535_v47  ;;  %v13079_v52 = vld [vmem:[%s19604_s1 + $0x40c] ss:$12 sps:$4 sm:$0xff]   ;;  %19908 = vst [vmem:[#allocation29_spill] sm:$0xff] %v14563_v63 }
  0x6a   : > { %7199 = vmatpush1.bf16.msra.mxu1 %v13038_v54  ;;  %7087 = vmatprep.subr.bf16.mxu0 %v13043_v56  ;;  %v13082_v54 = vld [vmem:[%s19604_s1 + $0x58c] ss:$12 sps:$4 sm:$0xff]   ;;  %v13077_v56 = vld [vmem:[%s19604_s1 + $0x408] ss:$12 sps:$4 sm:$0xff]  }
  0x6b   : > { %7200 = vmatprep.subr.bf16.mxu1 %v13046_v57  ;;  %v13080_v57 = vld [vmem:[%s19604_s1 + $0x588] ss:$12 sps:$4 sm:$0xff]   ;;  %v13098_v39 = vld [vmem:[%s19604_s1 + $0x540] ss:$12 sps:$4 sm:$0xff]  }
  0x6c   : > { %6912 = vmatmul.mubr.bf16.gmra.mxu0 %v14438_v61  ;;  %v13103_v40 = vld [vmem:[%s19604_s1 + $0x6ac] ss:$12 sps:$4 sm:$0xff]  }
  0x6d   : > { %7025 = vmatmul.mubr.bf16.gmra.mxu1 %v14440_v62  ;;  %7088 = vmatpush1.bf16.msra.mxu0 %v13041_v58  ;;  %v400_v58 = vld [vmem:[%s14235_s27 + $0x700] sm:$0xff]  ;;  %v13106_v41 = vld [vmem:[%s19604_s1 + $0x82c] ss:$12 sps:$4 sm:$0xff]  }
  0x6e   : > { %7201 = vmatpush1.bf16.msra.mxu1 %v13044_v1  ;;  %7089 = vmatprep.subr.bf16.mxu0 %v13049_v2  ;;  %v417_v1 = vld [vmem:[%s14235_s27 + $0x788] sm:$0xff]  ;;  %v13085_v2 = vld [vmem:[%s19604_s1 + $0x3f4] ss:$12 sps:$4 sm:$0xff]  }
  0x6f   : > { %7202 = vmatprep.subr.bf16.mxu1 %v13052_v3  ;;  %6921 = vmatprep.mubr.bf16.mxu0 %v14453_v4  ;;  %v13088_v3 = vld [vmem:[%s19604_s1 + $0x574] ss:$12 sps:$4 sm:$0xff]  }
  0x70   : > { %7034 = vmatprep.mubr.bf16.mxu1 %v14455_v5 }
  0x71   : > { %7090 = vmatpush1.bf16.msra.mxu0 %v13047_v6  ;;  %v14573_v6 = vcombine.high %v400_v58, %v416_v59 }
  0x72   : > { %7203 = vmatpush1.bf16.msra.mxu1 %v13050_v7  ;;  %7091 = vmatprep.subr.bf16.mxu0 %v13055_v8  ;;  %v14575_v7 = vcombine.high %v401_v0, %v417_v1  ;;  %v13083_v8 = vld [vmem:[%s19604_s1 + $0x3f0] ss:$12 sps:$4 sm:$0xff]  }
  0x73   : > { %7204 = vmatprep.subr.bf16.mxu1 %v13058_v9  ;;  %19909 = vst [vmem:[#allocation30_spill] sm:$0xff] %v14573_v6  ;;  %v13086_v9 = vld [vmem:[%s19604_s1 + $0x570] ss:$12 sps:$4 sm:$0xff]  }
  0x74   : > { %6922 = vmatmul.mubr.bf16.gmra.mxu0 %v14475_v14  ;;  %19910 = vst [vmem:[#allocation31_spill] sm:$0xff] %v14575_v7 }
  0x75   : > { %7035 = vmatmul.mubr.bf16.gmra.mxu1 %v14477_v15  ;;  %7092 = vmatpush2.bf16.msra.mxu0 %v13053_v20  ;;  %v178_v20 = vld [vmem:[%s14235_s27 + $0x10] sm:$0xff] }
  0x76   : > { %7205 = vmatpush2.bf16.msra.mxu1 %v13056_v21  ;;  %7093 = vmatprep.subr.bf16.mxu0 %v13061_v22  ;;  %v194_v21 = vld [vmem:[%s14235_s27 + $0x90] sm:$0xff]  ;;  %v14601_v22 = vcombine.low %v400_v58, %v416_v59 }
  0x77   : > { %7206 = vmatprep.subr.bf16.mxu1 %v13064_v23  ;;  %6931 = vmatprep.mubr.bf16.mxu0 %v14493_v24  ;;  %v14603_v23 = vcombine.low %v401_v0, %v417_v1  ;;  %v13109_v58 = vld [vmem:[%s19604_s1 + $0x694] ss:$12 sps:$4 sm:$0xff]  }
  0x78   : > { %7044 = vmatprep.mubr.bf16.mxu1 %v14495_v25  ;;  %19911 = vst [vmem:[#allocation32_spill] sm:$0xff] %v14601_v22  ;;  %v13112_v59 = vld [vmem:[%s19604_s1 + $0x814] ss:$12 sps:$4 sm:$0xff]  }
  0x79   : > { %7094 = vmatpush2.bf16.msra.mxu0 %v13059_v26  ;;  %19912 = vst [vmem:[#allocation33_spill] sm:$0xff] %v14603_v23  ;;  %v179_v26 = vld [vmem:[%s14235_s27 + $0x18] sm:$0xff]  ;;  %v422_v15 = vld [vmem:[%s14235_s27 + $0x7b0] sm:$0xff] }
  0x7a   : > { %7207 = vmatpush2.bf16.msra.mxu1 %v13062_v27  ;;  %7095 = vmatprep.subr.bf16.mxu0 %v13067_v30  ;;  %v195_v27 = vld [vmem:[%s14235_s27 + $0x98] sm:$0xff]  ;;  %v13097_v30 = vld [vmem:[%s19604_s1 + $0x3c4] ss:$12 sps:$4 sm:$0xff]  }
  0x7b   : > { %7208 = vmatprep.subr.bf16.mxu1 %v13070_v31  ;;  %v13100_v31 = vld [vmem:[%s19604_s1 + $0x544] ss:$12 sps:$4 sm:$0xff]  }
  0x7c   : > { %6932 = vmatmul.mubr.bf16.gmra.mxu0 %v14520_v37 }
  0x7d   : > { %7045 = vmatmul.mubr.bf16.gmra.mxu1 %v14522_v38  ;;  %7096 = vmatpush2.bf16.msra.mxu0 %v13065_v32  ;;  %v14613_v32 = vcombine.high %v178_v20, %v194_v21 }
  0x7e   : > { %7209 = vmatpush2.bf16.msra.mxu1 %v13068_v33  ;;  %7097 = vmatprep.subr.bf16.mxu0 %v13073_v42  ;;  %v14615_v33 = vcombine.high %v179_v26, %v195_v27  ;;  %v13101_v42 = vld [vmem:[%s19604_s1 + $0x6a8] ss:$12 sps:$4 sm:$0xff]  }
  0x7f   : > { %7210 = vmatprep.subr.bf16.mxu1 %v13076_v43  ;;  %6941 = vmatprep.mubr.bf16.mxu0 %v14533_v46  ;;  %19913 = vst [vmem:[#allocation34_spill] sm:$0xff] %v14613_v32  ;;  %v210_v43 = vld [vmem:[%s14235_s27 + $0x110] sm:$0xff] }
  0x80   : > { %7054 = vmatprep.mubr.bf16.mxu1 %v14535_v47  ;;  %19914 = vst [vmem:[#allocation35_spill] sm:$0xff] %v14615_v33 }
  0x81   : > { %7098 = vmatpush2.bf16.msra.mxu0 %v13071_v48  ;;  %v226_v48 = vld [vmem:[%s14235_s27 + $0x190] sm:$0xff] }
  0x82   : > { %7211 = vmatpush2.bf16.msra.mxu1 %v13074_v49  ;;  %7099 = vmatprep.subr.bf16.mxu0 %v13079_v52  ;;  %v14638_v49 = vcombine.low %v178_v20, %v194_v21  ;;  %v14640_v52 = vcombine.low %v179_v26, %v195_v27  ;;  %v14653_v0 = vcombine.high %v210_v43, %v226_v48  ;;  %v243_v20 = vld [vmem:[%s14235_s27 + $0x218] sm:$0xff] }
  0x83   : > { %7212 = vmatprep.subr.bf16.mxu1 %v13082_v54  ;;  %v211_v54 = vld [vmem:[%s14235_s27 + $0x118] sm:$0xff] }
  0x84   : > { %6942 = vmatmul.mubr.bf16.gmra.mxu0 %v14561_v60  ;;  %19915 = vst [vmem:[#allocation36_spill] sm:$0xff] %v14638_v49  ;;  %19916 = vst [vmem:[#allocation37_spill] sm:$0xff] %v14640_v52  ;;  %v259_v21 = vld [vmem:[%s14235_s27 + $0x298] sm:$0xff] }
  0x85   : > { %7055 = vmatmul.mubr.bf16.gmra.mxu1 %v14563_v63  ;;  %7100 = vmatpush2.bf16.msra.mxu0 %v13077_v56  ;;  %v227_v56 = vld [vmem:[%s14235_s27 + $0x198] sm:$0xff]  ;;  %19917 = vst [vmem:[#allocation38_spill] sm:$0xff] %v14653_v0 }
  0x86   : > { %7213 = vmatpush2.bf16.msra.mxu1 %v13080_v57  ;;  %7101 = vmatprep.subr.bf16.mxu0 %v13085_v2  ;;  %v13104_v57 = vld [vmem:[%s19604_s1 + $0x828] ss:$12 sps:$4 sm:$0xff]   ;;  %v14655_v1 = vcombine.high %v211_v54, %v227_v56  ;;  %v13107_v2 = vld [vmem:[%s19604_s1 + $0x690] ss:$12 sps:$4 sm:$0xff]   ;;  %v13113_v26 = vld [vmem:[%s19604_s1 + $0x678] ss:$12 sps:$4 sm:$0xff]  }
  0x87   : > { %7214 = vmatprep.subr.bf16.mxu1 %v13088_v3  ;;  %6951 = vmatprep.mubr.bf16.mxu0 %v14573_v6  ;;  %v13110_v3 = vld [vmem:[%s19604_s1 + $0x810] ss:$12 sps:$4 sm:$0xff]   ;;  %v13116_v27 = vld [vmem:[%s19604_s1 + $0x7f8] ss:$12 sps:$4 sm:$0xff]  }
  0x88   : > { %7064 = vmatprep.mubr.bf16.mxu1 %v14575_v7  ;;  %19918 = vst [vmem:[#allocation39_spill] sm:$0xff] %v14655_v1 }
  0x89   : > { %7102 = vmatpush2.bf16.msra.mxu0 %v13083_v8  ;;  %v13115_v8 = vld [vmem:[%s19604_s1 + $0x67c] ss:$12 sps:$4 sm:$0xff]  }
  0x8a   : > { %7215 = vmatpush2.bf16.msra.mxu1 %v13086_v9  ;;  %7103 = vmatprep.subr.bf16.mxu0 %v13091_v10  ;;  %v13118_v9 = vld [vmem:[%s19604_s1 + $0x7fc] ss:$12 sps:$4 sm:$0xff]   ;;  %v242_v10 = vld [vmem:[%s14235_s27 + $0x210] sm:$0xff] }
  0x8b   : > { %7216 = vmatprep.subr.bf16.mxu1 %v13094_v13  ;;  %v258_v13 = vld [vmem:[%s14235_s27 + $0x290] sm:$0xff] }
  0x8c   : > { %6952 = vmatmul.mubr.bf16.gmra.mxu0 %v14601_v22 }
  0x8d   : > { %7065 = vmatmul.mubr.bf16.gmra.mxu1 %v14603_v23  ;;  %7104 = vmatpush2.bf16.msra.mxu0 %v13089_v16  ;;  %v14675_v16 = vcombine.low %v210_v43, %v226_v48  ;;  %v13130_v43 = vld [vmem:[%s19604_s1 + $0x7cc] ss:$12 sps:$4 sm:$0xff]   ;;  %v13125_v48 = vld [vmem:[%s19604_s1 + $0x648] ss:$12 sps:$4 sm:$0xff]  }
  0x8e   : > { %7217 = vmatpush2.bf16.msra.mxu1 %v13092_v17  ;;  %7105 = vmatprep.subr.bf16.mxu0 %v13097_v30  ;;  %v14677_v17 = vcombine.low %v211_v54, %v227_v56  ;;  %v13121_v30 = vld [vmem:[%s19604_s1 + $0x664] ss:$12 sps:$4 sm:$0xff]   ;;  %v13128_v54 = vld [vmem:[%s19604_s1 + $0x7c8] ss:$12 sps:$4 sm:$0xff]  }
  0x8f   : > { %7218 = vmatprep.subr.bf16.mxu1 %v13100_v31  ;;  %7107 = vmatprep.mubr.bf16.mxu0 %v14613_v32  ;;  %19919 = vst [vmem:[#allocation40_spill] sm:$0xff] %v14675_v16  ;;  %v13124_v31 = vld [vmem:[%s19604_s1 + $0x7e4] ss:$12 sps:$4 sm:$0xff]  }
  0x90   : > { %7220 = vmatprep.mubr.bf16.mxu1 %v14615_v33  ;;  %19920 = vst [vmem:[#allocation41_spill] sm:$0xff] %v14677_v17  ;;  %v274_v56 = vld [vmem:[%s14235_s27 + $0x310] sm:$0xff] }
  0x91   : > { %7106 = vmatpush2.bf16.msra.mxu0 %v13095_v36  ;;  %v14693_v36 = vcombine.high %v242_v10, %v258_v13 }
  0x92   : > { %7219 = vmatpush2.bf16.msra.mxu1 %v13098_v39  ;;  %7301 = vmatprep.subr.bf16.mxu0 %v13103_v40  ;;  %v14695_v39 = vcombine.high %v243_v20, %v259_v21  ;;  %v13119_v40 = vld [vmem:[%s19604_s1 + $0x660] ss:$12 sps:$4 sm:$0xff]  }
  0x93   : > { %7414 = vmatprep.subr.bf16.mxu1 %v13106_v41  ;;  %19921 = vst [vmem:[#allocation42_spill] sm:$0xff] %v14693_v36  ;;  %v13122_v41 = vld [vmem:[%s19604_s1 + $0x7e0] ss:$12 sps:$4 sm:$0xff]  }
  0x94   : > { %7108 = vmatmul.mubr.bf16.vlgmr.msra.gmra.mxu0 %v14638_v49  ;;  %19922 = vst [vmem:[#allocation43_spill] sm:$0xff] %v14695_v39 }
  0x95   : > { %7221 = vmatmul.mubr.bf16.vlgmr.msra.gmra.mxu1 %v14640_v52  ;;  %7302 = vmatpush1.bf16.msra.mxu0 %v13101_v42  ;;  %v13127_v42 = vld [vmem:[%s19604_s1 + $0x64c] ss:$12 sps:$4 sm:$0xff]  }
  0x96   : > { %7415 = vmatpush1.bf16.msra.mxu1 %v13104_v57  ;;  %7303 = vmatprep.subr.bf16.mxu0 %v13109_v58  ;;  %v14720_v57 = vcombine.low %v242_v10, %v258_v13  ;;  %v14722_v58 = vcombine.low %v243_v20, %v259_v21  ;;  %v13131_v13 = vld [vmem:[%s19604_s1 + $0x630] ss:$12 sps:$4 sm:$0xff]  }
  0x97   : > { %7416 = vmatprep.subr.bf16.mxu1 %v13112_v59  ;;  %7117 = vmatprep.mubr.bf16.mxu0 %v14653_v0  ;;  %v290_v59 = vld [vmem:[%s14235_s27 + $0x390] sm:$0xff]  ;;  %v13139_v21 = vld [vmem:[%s19604_s1 + $0x61c] ss:$12 sps:$4 sm:$0xff]  }
  0x98   : > { %7230 = vmatprep.mubr.bf16.mxu1 %v14655_v1  ;;  %19923 = vst [vmem:[#allocation44_spill] sm:$0xff] %v14720_v57  ;;  %19924 = vst [vmem:[#allocation45_spill] sm:$0xff] %v14722_v58  ;;  %v13134_v20 = vld [vmem:[%s19604_s1 + $0x7b0] ss:$12 sps:$4 sm:$0xff]  }
  0x99   : > { %7304 = vmatpush1.bf16.msra.mxu0 %v13107_v2  ;;  %v275_v2 = vld [vmem:[%s14235_s27 + $0x318] sm:$0xff] }
  0x9a   : > { %7417 = vmatpush1.bf16.msra.mxu1 %v13110_v3  ;;  %7305 = vmatprep.subr.bf16.mxu0 %v13115_v8  ;;  %v291_v3 = vld [vmem:[%s14235_s27 + $0x398] sm:$0xff]  ;;  %v13133_v8 = vld [vmem:[%s19604_s1 + $0x634] ss:$12 sps:$4 sm:$0xff]  }
  0x9b   : > { %7418 = vmatprep.subr.bf16.mxu1 %v13118_v9  ;;  %v13136_v9 = vld [vmem:[%s19604_s1 + $0x7b4] ss:$12 sps:$4 sm:$0xff]   ;;  %v14735_v10 = vcombine.high %v275_v2, %v291_v3 }
  0x9c   : > { %7118 = vmatmul.mubr.bf16.gmra.mxu0 %v14675_v16 }
  0x9d   : > { %7231 = vmatmul.mubr.bf16.gmra.mxu1 %v14677_v17  ;;  %7306 = vmatpush1.bf16.msra.mxu0 %v13113_v26  ;;  %v14733_v26 = vcombine.high %v274_v56, %v290_v59  ;;  %19926 = vst [vmem:[#allocation47_spill] sm:$0xff] %v14735_v10  ;;  %v262_v17 = vld [vmem:[%s14235_s27 + $0x2b0] sm:$0xff] }
  0x9e   : > { %7419 = vmatpush1.bf16.msra.mxu1 %v13116_v27  ;;  %7307 = vmatprep.subr.bf16.mxu0 %v13121_v30  ;;  %v13142_v27 = vld [vmem:[%s19604_s1 + $0x79c] ss:$12 sps:$4 sm:$0xff]   ;;  %v13137_v30 = vld [vmem:[%s19604_s1 + $0x618] ss:$12 sps:$4 sm:$0xff]  }
  0x9f   : > { %7420 = vmatprep.subr.bf16.mxu1 %v13124_v31  ;;  %7127 = vmatprep.mubr.bf16.mxu0 %v14693_v36  ;;  %19925 = vst [vmem:[#allocation46_spill] sm:$0xff] %v14733_v26  ;;  %v13140_v31 = vld [vmem:[%s19604_s1 + $0x798] ss:$12 sps:$4 sm:$0xff]  }
  0xa0   : > { %7240 = vmatprep.mubr.bf16.mxu1 %v14695_v39 }
  0xa1   : > { %7308 = vmatpush1.bf16.msra.mxu0 %v13119_v40  ;;  %v306_v40 = vld [vmem:[%s14235_s27 + $0x410] sm:$0xff] }
  0xa2   : > { %7421 = vmatpush1.bf16.msra.mxu1 %v13122_v41  ;;  %7309 = vmatprep.subr.bf16.mxu0 %v13127_v42  ;;  %v322_v41 = vld [vmem:[%s14235_s27 + $0x490] sm:$0xff]  ;;  %v14761_v42 = vcombine.low %v274_v56, %v290_v59  ;;  %v13143_v59 = vld [vmem:[%s19604_s1 + $0x600] ss:$12 sps:$4 sm:$0xff]  }
  0xa3   : > { %7422 = vmatprep.subr.bf16.mxu1 %v13130_v43  ;;  %v14763_v43 = vcombine.low %v275_v2, %v291_v3  ;;  %v13146_v2 = vld [vmem:[%s19604_s1 + $0x780] ss:$12 sps:$4 sm:$0xff]  }
  0xa4   : > { %7128 = vmatmul.mubr.bf16.gmra.mxu0 %v14720_v57  ;;  %19927 = vst [vmem:[#allocation48_spill] sm:$0xff] %v14761_v42  ;;  %v13151_v3 = vld [vmem:[%s19604_s1 + $0x76c] ss:$12 sps:$4 sm:$0xff]  }
  0xa5   : > { %7241 = vmatmul.mubr.bf16.gmra.mxu1 %v14722_v58  ;;  %7310 = vmatpush1.bf16.msra.mxu0 %v13125_v48  ;;  %19928 = vst [vmem:[#allocation49_spill] sm:$0xff] %v14763_v43  ;;  %v307_v48 = vld [vmem:[%s14235_s27 + $0x418] sm:$0xff] }
  0xa6   : > { %7423 = vmatpush1.bf16.msra.mxu1 %v13128_v54  ;;  %7311 = vmatprep.subr.bf16.mxu0 %v13133_v8  ;;  %v323_v54 = vld [vmem:[%s14235_s27 + $0x498] sm:$0xff]  ;;  %v13145_v8 = vld [vmem:[%s19604_s1 + $0x604] ss:$12 sps:$4 sm:$0xff]  }
  0xa7   : > { %7424 = vmatprep.subr.bf16.mxu1 %v13136_v9  ;;  %7137 = vmatprep.mubr.bf16.mxu0 %v14733_v26  ;;  %v13148_v9 = vld [vmem:[%s19604_s1 + $0x784] ss:$12 sps:$4 sm:$0xff]   ;;  %v14775_v56 = vcombine.high %v307_v48, %v323_v54 }
  0xa8   : > { %7250 = vmatprep.mubr.bf16.mxu1 %v14735_v10  ;;  %v14773_v10 = vcombine.high %v306_v40, %v322_v41 }
  0xa9   : > { %7312 = vmatpush1.bf16.msra.mxu0 %v13131_v13  ;;  %19930 = vst [vmem:[#allocation51_spill] sm:$0xff] %v14775_v56  ;;  %v13154_v13 = vld [vmem:[%s19604_s1 + $0x8ec] ss:$12 sps:$4 sm:$0xff]  }
  0xaa   : > { %7425 = vmatpush1.bf16.msra.mxu1 %v13134_v20  ;;  %7313 = vmatprep.subr.bf16.mxu0 %v13139_v21  ;;  %19929 = vst [vmem:[#allocation50_spill] sm:$0xff] %v14773_v10  ;;  %v13149_v20 = vld [vmem:[%s19604_s1 + $0x768] ss:$12 sps:$4 sm:$0xff]  }
  0xab   : > { %7426 = vmatprep.subr.bf16.mxu1 %v13142_v27  ;;  %v13152_v21 = vld [vmem:[%s19604_s1 + $0x8e8] ss:$12 sps:$4 sm:$0xff]  }
  0xac   : > { %7138 = vmatmul.mubr.bf16.gmra.mxu0 %v14761_v42  ;;  %v338_v27 = vld [vmem:[%s14235_s27 + $0x510] sm:$0xff] }
  0xad   : > { %7251 = vmatmul.mubr.bf16.gmra.mxu1 %v14763_v43  ;;  %7314 = vmatpush1.bf16.msra.mxu0 %v13137_v30  ;;  %v354_v30 = vld [vmem:[%s14235_s27 + $0x590] sm:$0xff]  ;;  %v355_v43 = vld [vmem:[%s14235_s27 + $0x598] sm:$0xff] }
  0xae   : > { %7427 = vmatpush1.bf16.msra.mxu1 %v13140_v31  ;;  %7315 = vmatprep.subr.bf16.mxu0 %v13145_v8  ;;  %v14801_v31 = vcombine.low %v306_v40, %v322_v41  ;;  %v14803_v8 = vcombine.low %v307_v48, %v323_v54  ;;  %v14813_v42 = vcombine.high %v338_v27, %v354_v30  ;;  %v13155_v41 = vld [vmem:[%s19604_s1 + $0x750] ss:$12 sps:$4 sm:$0xff]  }
  0xaf   : > { %7428 = vmatprep.subr.bf16.mxu1 %v13148_v9  ;;  %7147 = vmatprep.mubr.bf16.mxu0 %v14773_v10  ;;  %v339_v9 = vld [vmem:[%s14235_s27 + $0x518] sm:$0xff]  ;;  %v13160_v10 = vld [vmem:[%s19604_s1 + $0x8d4] ss:$12 sps:$4 sm:$0xff]  }
  0xb0   : > { %7260 = vmatprep.mubr.bf16.mxu1 %v14775_v56  ;;  %19931 = vst [vmem:[#allocation52_spill] sm:$0xff] %v14801_v31  ;;  %19932 = vst [vmem:[#allocation53_spill] sm:$0xff] %v14803_v8  ;;  %v13157_v56 = vld [vmem:[%s19604_s1 + $0x754] ss:$12 sps:$4 sm:$0xff]   ;;  %v14815_v40 = vcombine.high %v339_v9, %v355_v43  ;;  %v13158_v48 = vld [vmem:[%s19604_s1 + $0x8d0] ss:$12 sps:$4 sm:$0xff]  }
  0xb1   : > { %7316 = vmatpush1.bf16.msra.mxu0 %v13143_v59  ;;  %19933 = vst [vmem:[#allocation54_spill] sm:$0xff] %v14813_v42  ;;  %v13163_v54 = vld [vmem:[%s19604_s1 + $0x73c] ss:$12 sps:$4 sm:$0xff]  }
  0xb2   : > { %7429 = vmatpush1.bf16.msra.mxu1 %v13146_v2  ;;  %7317 = vmatprep.subr.bf16.mxu0 %v13151_v3  ;;  %19934 = vst [vmem:[#allocation55_spill] sm:$0xff] %v14815_v40  ;;  %v13166_v59 = vld [vmem:[%s19604_s1 + $0x8bc] ss:$12 sps:$4 sm:$0xff]   ;;  %v13161_v2 = vld [vmem:[%s19604_s1 + $0x738] ss:$12 sps:$4 sm:$0xff]   ;;  %v370_v3 = vld [vmem:[%s14235_s27 + $0x610] sm:$0xff] }
  0xb3   : > { %7430 = vmatprep.subr.bf16.mxu1 %v13154_v13  ;;  %v386_v13 = vld [vmem:[%s14235_s27 + $0x690] sm:$0xff] }
  0xb4   : > { %7148 = vmatmul.mubr.bf16.gmra.mxu0 %v14801_v31 }
  0xb5   : > { %7261 = vmatmul.mubr.bf16.gmra.mxu1 %v14803_v8  ;;  %7318 = vmatpush2.bf16.msra.mxu0 %v13149_v20  ;;  %v14838_v20 = vcombine.low %v338_v27, %v354_v30  ;;  %v14853_v27 = vcombine.high %v370_v3, %v386_v13  ;;  %v419_v8 = vld [vmem:[%s14235_s27 + $0x798] sm:$0xff] }
  0xb6   : > { %7431 = vmatpush2.bf16.msra.mxu1 %v13152_v21  ;;  %7319 = vmatprep.subr.bf16.mxu0 %v13157_v56  ;;  %v14840_v21 = vcombine.low %v339_v9, %v355_v43  ;;  %v371_v56 = vld [vmem:[%s14235_s27 + $0x618] sm:$0xff]  ;;  %v13172_v43 = vld [vmem:[%s19604_s1 + $0x8a4] ss:$12 sps:$4 sm:$0xff]   ;;  %v13167_v9 = vld [vmem:[%s19604_s1 + $0x720] ss:$12 sps:$4 sm:$0xff]  }
  0xb7   : > { %7432 = vmatprep.subr.bf16.mxu1 %v13160_v10  ;;  %7157 = vmatprep.mubr.bf16.mxu0 %v14813_v42  ;;  %19935 = vst [vmem:[#allocation56_spill] sm:$0xff] %v14838_v20  ;;  %v387_v10 = vld [vmem:[%s14235_s27 + $0x698] sm:$0xff]  ;;  %19937 = vst [vmem:[#allocation58_spill] sm:$0xff] %v14853_v27 }
  0xb8   : > { %7270 = vmatprep.mubr.bf16.mxu1 %v14815_v40  ;;  %19936 = vst [vmem:[#allocation57_spill] sm:$0xff] %v14840_v21  ;;  %v13164_v42 = vld [vmem:[%s19604_s1 + $0x8b8] ss:$12 sps:$4 sm:$0xff]   ;;  %v14855_v30 = vcombine.high %v371_v56, %v387_v10 }
  0xb9   : > { %7320 = vmatpush2.bf16.msra.mxu0 %v13155_v41  ;;  %v13169_v40 = vld [vmem:[%s19604_s1 + $0x724] ss:$12 sps:$4 sm:$0xff]   ;;  %v13170_v41 = vld [vmem:[%s19604_s1 + $0x8a0] ss:$12 sps:$4 sm:$0xff]  }
  0xba   : > { %7433 = vmatpush2.bf16.msra.mxu1 %v13158_v48  ;;  %7321 = vmatprep.subr.bf16.mxu0 %v13163_v54  ;;  %19938 = vst [vmem:[#allocation59_spill] sm:$0xff] %v14855_v30  ;;  %v13175_v48 = vld [vmem:[%s19604_s1 + $0x70c] ss:$12 sps:$4 sm:$0xff]  }
  0xbb   : > { %7434 = vmatprep.subr.bf16.mxu1 %v13166_v59  ;;  %v13178_v54 = vld [vmem:[%s19604_s1 + $0x88c] ss:$12 sps:$4 sm:$0xff]   ;;  %v402_v59 = vld [vmem:[%s14235_s27 + $0x710] sm:$0xff] }
  0xbc   : > { %7158 = vmatmul.mubr.bf16.gmra.mxu0 %v14838_v20  ;;  %v14875_v20 = vcombine.low %v370_v3, %v386_v13  ;;  %v13184_v3 = vld [vmem:[%s19604_s1 + $0x874] ss:$12 sps:$4 sm:$0xff]  }
  0xbd   : > { %7271 = vmatmul.mubr.bf16.gmra.mxu1 %v14840_v21  ;;  %7322 = vmatpush2.bf16.msra.mxu0 %v13161_v2  ;;  %v418_v21 = vld [vmem:[%s14235_s27 + $0x790] sm:$0xff]  ;;  %v14877_v2 = vcombine.low %v371_v56, %v387_v10 }
  0xbe   : > { %7435 = vmatpush2.bf16.msra.mxu1 %v13164_v42  ;;  %7323 = vmatprep.subr.bf16.mxu0 %v13169_v40  ;;  %19939 = vst [vmem:[#allocation60_spill] sm:$0xff] %v14875_v20  ;;  %v403_v42 = vld [vmem:[%s14235_s27 + $0x718] sm:$0xff]  ;;  %v13173_v40 = vld [vmem:[%s19604_s1 + $0x708] ss:$12 sps:$4 sm:$0xff]   ;;  %v14893_v13 = vcombine.high %v402_v59, %v418_v21 }
  0xbf   : > { %7436 = vmatprep.subr.bf16.mxu1 %v13172_v43  ;;  %7167 = vmatprep.mubr.bf16.mxu0 %v14853_v27  ;;  %19940 = vst [vmem:[#allocation61_spill] sm:$0xff] %v14877_v2  ;;  %v13176_v43 = vld [vmem:[%s19604_s1 + $0x888] ss:$12 sps:$4 sm:$0xff]   ;;  %v14895_v56 = vcombine.high %v403_v42, %v419_v8  ;;  %v13179_v10 = vld [vmem:[%s19604_s1 + $0x6f0] ss:$12 sps:$4 sm:$0xff]  }
  0xc0   : > { %7280 = vmatprep.mubr.bf16.mxu1 %v14855_v30  ;;  %v13181_v30 = vld [vmem:[%s19604_s1 + $0x6f4] ss:$12 sps:$4 sm:$0xff]   ;;  %19941 = vst [vmem:[#allocation62_spill] sm:$0xff] %v14893_v13  ;;  %v197_v27 = vld [vmem:[%s14235_s27 + $0xa8] sm:$0xff] }
  0xc1   : > { %7324 = vmatpush2.bf16.msra.mxu0 %v13167_v9  ;;  %19942 = vst [vmem:[#allocation63_spill] sm:$0xff] %v14895_v56  ;;  %v13182_v9 = vld [vmem:[%s19604_s1 + $0x870] ss:$12 sps:$4 sm:$0xff]  }
  0xc2   : > { %7437 = vmatpush2.bf16.msra.mxu1 %v13170_v41  ;;  %7325 = vmatprep.subr.bf16.mxu0 %v13175_v48  ;;  %v13187_v41 = vld [vmem:[%s19604_s1 + $0x6dc] ss:$12 sps:$4 sm:$0xff]  }
  0xc3   : > { %7438 = vmatprep.subr.bf16.mxu1 %v13178_v54  ;;  %v13190_v48 = vld [vmem:[%s19604_s1 + $0x85c] ss:$12 sps:$4 sm:$0xff]   ;;  %v13185_v54 = vld [vmem:[%s19604_s1 + $0x6d8] ss:$12 sps:$4 sm:$0xff]  }
  0xc4   : > { %7168 = vmatmul.mubr.bf16.gmra.mxu0 %v14875_v20  ;;  %v181_v20 = vld [vmem:[%s14235_s27 + $0x28] sm:$0xff] }
  0xc5   : > { %7281 = vmatmul.mubr.bf16.gmra.mxu1 %v14877_v2  ;;  %7326 = vmatpush2.bf16.msra.mxu0 %v13173_v40  ;;  %v13188_v40 = vld [vmem:[%s19604_s1 + $0x858] ss:$12 sps:$4 sm:$0xff]   ;;  %v14920_v2 = vcombine.low %v402_v59, %v418_v21  ;;  %v13191_v21 = vld [vmem:[%s19604_s1 + $0x6c0] ss:$12 sps:$4 sm:$0xff]  }
  0xc6   : > { %7439 = vmatpush2.bf16.msra.mxu1 %v13176_v43  ;;  %7327 = vmatprep.subr.bf16.mxu0 %v13181_v30  ;;  %v180_v43 = vld [vmem:[%s14235_s27 + $0x20] sm:$0xff]  ;;  %v14922_v30 = vcombine.low %v403_v42, %v419_v8  ;;  %v14935_v8 = vcombine.high %v181_v20, %v197_v27  ;;  %v13199_v42 = vld [vmem:[%s19604_s1 + $0x9ac] ss:$12 sps:$4 sm:$0xff]  }
  0xc7   : > { %7440 = vmatprep.subr.bf16.mxu1 %v13184_v3  ;;  %7177 = vmatprep.mubr.bf16.mxu0 %v14893_v13  ;;  %19943 = vst [vmem:[#allocation64_spill] sm:$0xff] %v14920_v2  ;;  %v196_v3 = vld [vmem:[%s14235_s27 + $0xa0] sm:$0xff] }
  0xc8   : > { %7290 = vmatprep.mubr.bf16.mxu1 %v14895_v56  ;;  %19944 = vst [vmem:[#allocation65_spill] sm:$0xff] %v14922_v30  ;;  %v13193_v56 = vld [vmem:[%s19604_s1 + $0x6c4] ss:$12 sps:$4 sm:$0xff]   ;;  %v14933_v31 = vcombine.high %v180_v43, %v196_v3  ;;  %19946 = vst [vmem:[#allocation67_spill] sm:$0xff] %v14935_v8  ;;  %v13194_v59 = vld [vmem:[%s19604_s1 + $0x840] ss:$12 sps:$4 sm:$0xff]  }
  0xc9   : > { %7328 = vmatpush2.bf16.msra.mxu0 %v13179_v10  ;;  %v13196_v13 = vld [vmem:[%s19604_s1 + $0x844] ss:$12 sps:$4 sm:$0xff]   ;;  %v13202_v10 = vld [vmem:[%s19604_s1 + $0xb2c] ss:$12 sps:$4 sm:$0xff]  }
  0xca   : > { %7441 = vmatpush2.bf16.msra.mxu1 %v13182_v9  ;;  %7329 = vmatprep.subr.bf16.mxu0 %v13187_v41  ;;  %19945 = vst [vmem:[#allocation66_spill] sm:$0xff] %v14933_v31  ;;  %v13197_v9 = vld [vmem:[%s19604_s1 + $0x9a8] ss:$12 sps:$4 sm:$0xff]   ;;  %v228_v41 = vld [vmem:[%s14235_s27 + $0x1a0] sm:$0xff] }
  0xcb   : > { %7442 = vmatprep.subr.bf16.mxu1 %v13190_v48  ;;  %v14961_v48 = vcombine.low %v180_v43, %v196_v3  ;;  %v13211_v3 = vld [vmem:[%s19604_s1 + $0x97c] ss:$12 sps:$4 sm:$0xff]  }
  0xcc   : > { %7178 = vmatmul.mubr.bf16.gmra.mxu0 %v14920_v2 }
  0xcd   : > { %7291 = vmatmul.mubr.bf16.gmra.mxu1 %v14922_v30  ;;  %7330 = vmatpush2.bf16.msra.mxu0 %v13185_v54  ;;  %19947 = vst [vmem:[#allocation68_spill] sm:$0xff] %v14961_v48  ;;  %v14963_v54 = vcombine.low %v181_v20, %v197_v27  ;;  %v229_v30 = vld [vmem:[%s14235_s27 + $0x1a8] sm:$0xff]  ;;  %v13203_v20 = vld [vmem:[%s19604_s1 + $0x990] ss:$12 sps:$4 sm:$0xff]  }
  0xce   : > { %7443 = vmatpush2.bf16.msra.mxu1 %v13188_v40  ;;  %7331 = vmatprep.subr.bf16.mxu0 %v13193_v56  ;;  %v212_v56 = vld [vmem:[%s14235_s27 + $0x120] sm:$0xff]  ;;  %v213_v40 = vld [vmem:[%s14235_s27 + $0x128] sm:$0xff]  ;;  %v13206_v27 = vld [vmem:[%s19604_s1 + $0xb10] ss:$12 sps:$4 sm:$0xff]  }
  0xcf   : > { %7444 = vmatprep.subr.bf16.mxu1 %v13196_v13  ;;  %7333 = vmatprep.mubr.bf16.mxu0 %v14933_v31  ;;  %v13200_v13 = vld [vmem:[%s19604_s1 + $0xb28] ss:$12 sps:$4 sm:$0xff]   ;;  %19948 = vst [vmem:[#allocation69_spill] sm:$0xff] %v14963_v54  ;;  %v14973_v2 = vcombine.high %v212_v56, %v228_v41  ;;  %v14975_v43 = vcombine.high %v213_v40, %v229_v30 }
  0xd0   : > { %7446 = vmatprep.mubr.bf16.mxu1 %v14935_v8  ;;  %v13205_v8 = vld [vmem:[%s19604_s1 + $0x994] ss:$12 sps:$4 sm:$0xff]  }
  0xd1   : > { %7332 = vmatpush2.bf16.msra.mxu0 %v13191_v21  ;;  %v13208_v31 = vld [vmem:[%s19604_s1 + $0xb14] ss:$12 sps:$4 sm:$0xff]   ;;  %19949 = vst [vmem:[#allocation70_spill] sm:$0xff] %v14973_v2  ;;  %19950 = vst [vmem:[#allocation71_spill] sm:$0xff] %v14975_v43  ;;  %v13214_v21 = vld [vmem:[%s19604_s1 + $0xafc] ss:$12 sps:$4 sm:$0xff]  }
  0xd2   : > { %7445 = vmatpush2.bf16.msra.mxu1 %v13194_v59  ;;  %7527 = vmatprep.subr.bf16.mxu0 %v13199_v42  ;;  %v13209_v59 = vld [vmem:[%s19604_s1 + $0x978] ss:$12 sps:$4 sm:$0xff]  }
  0xd3   : > { %7640 = vmatprep.subr.bf16.mxu1 %v13202_v10  ;;  %v13212_v42 = vld [vmem:[%s19604_s1 + $0xaf8] ss:$12 sps:$4 sm:$0xff]  }
  0xd4   : > { %7334 = vmatmul.mubr.bf16.vlgmr.msra.gmra.mxu0 %v14961_v48  ;;  %v244_v10 = vld [vmem:[%s14235_s27 + $0x220] sm:$0xff] }
  0xd5   : > { %7447 = vmatmul.mubr.bf16.vlgmr.msra.gmra.mxu1 %v14963_v54  ;;  %7528 = vmatpush1.bf16.msra.mxu0 %v13197_v9  ;;  %v260_v9 = vld [vmem:[%s14235_s27 + $0x2a0] sm:$0xff]  ;;  %v261_v54 = vld [vmem:[%s14235_s27 + $0x2a8] sm:$0xff] }
  0xd6   : > { %7641 = vmatpush1.bf16.msra.mxu1 %v13200_v13  ;;  %7529 = vmatprep.subr.bf16.mxu0 %v13205_v8  ;;  %v15001_v8 = vcombine.low %v212_v56, %v228_v41  ;;  %v245_v13 = vld [vmem:[%s14235_s27 + $0x228] sm:$0xff]  ;;  %v15013_v48 = vcombine.high %v244_v10, %v260_v9 }
  0xd7   : > { %7642 = vmatprep.subr.bf16.mxu1 %v13208_v31  ;;  %7343 = vmatprep.mubr.bf16.mxu0 %v14973_v2  ;;  %v15003_v31 = vcombine.low %v213_v40, %v229_v30  ;;  %v13220_v2 = vld [vmem:[%s19604_s1 + $0xae4] ss:$12 sps:$4 sm:$0xff]   ;;  %v15015_v30 = vcombine.high %v245_v13, %v261_v54  ;;  %v13215_v56 = vld [vmem:[%s19604_s1 + $0x960] ss:$12 sps:$4 sm:$0xff]  }
  0xd8   : > { %7456 = vmatprep.mubr.bf16.mxu1 %v14975_v43  ;;  %19951 = vst [vmem:[#allocation72_spill] sm:$0xff] %v15001_v8  ;;  %v13217_v43 = vld [vmem:[%s19604_s1 + $0x964] ss:$12 sps:$4 sm:$0xff]   ;;  %19953 = vst [vmem:[#allocation74_spill] sm:$0xff] %v15013_v48  ;;  %v13218_v41 = vld [vmem:[%s19604_s1 + $0xae0] ss:$12 sps:$4 sm:$0xff]  }
  0xd9   : > { %19952 = vst [vmem:[#allocation73_spill] sm:$0xff] %v15003_v31  ;;  %7530 = vmatpush1.bf16.msra.mxu0 %v13203_v20  ;;  %19954 = vst [vmem:[#allocation75_spill] sm:$0xff] %v15015_v30  ;;  %v13223_v40 = vld [vmem:[%s19604_s1 + $0x94c] ss:$12 sps:$4 sm:$0xff]  }
  0xda   : > { %7643 = vmatpush1.bf16.msra.mxu1 %v13206_v27  ;;  %7531 = vmatprep.subr.bf16.mxu0 %v13211_v3  ;;  %v13226_v20 = vld [vmem:[%s19604_s1 + $0xacc] ss:$12 sps:$4 sm:$0xff]   ;;  %v276_v27 = vld [vmem:[%s14235_s27 + $0x320] sm:$0xff]  ;;  %v13221_v3 = vld [vmem:[%s19604_s1 + $0x948] ss:$12 sps:$4 sm:$0xff]  }
  0xdb   : > { %7644 = vmatprep.subr.bf16.mxu1 %v13214_v21  ;;  %v292_v21 = vld [vmem:[%s14235_s27 + $0x3a0] sm:$0xff] }
  0xdc   : > { %7344 = vmatmul.mubr.bf16.gmra.mxu0 %v15001_v8 }
  0xdd   : > { %7457 = vmatmul.mubr.bf16.gmra.mxu1 %v15003_v31  ;;  %7532 = vmatpush1.bf16.msra.mxu0 %v13209_v59  ;;  %v277_v59 = vld [vmem:[%s14235_s27 + $0x328] sm:$0xff]  ;;  %v15041_v31 = vcombine.low %v245_v13, %v261_v54  ;;  %v13227_v54 = vld [vmem:[%s19604_s1 + $0x930] ss:$12 sps:$4 sm:$0xff]  }
  0xde   : > { %7645 = vmatpush1.bf16.msra.mxu1 %v13212_v42  ;;  %7533 = vmatprep.subr.bf16.mxu0 %v13217_v43  ;;  %v15039_v42 = vcombine.low %v244_v10, %v260_v9  ;;  %v13224_v43 = vld [vmem:[%s19604_s1 + $0xac8] ss:$12 sps:$4 sm:$0xff]   ;;  %v15056_v9 = vcombine.high %v276_v27, %v292_v21 }
  0xdf   : > { %7646 = vmatprep.subr.bf16.mxu1 %v13220_v2  ;;  %7353 = vmatprep.mubr.bf16.mxu0 %v15013_v48  ;;  %19956 = vst [vmem:[#allocation77_spill] sm:$0xff] %v15041_v31  ;;  %v293_v2 = vld [vmem:[%s14235_s27 + $0x3a8] sm:$0xff]  ;;  %v13232_v10 = vld [vmem:[%s19604_s1 + $0xab4] ss:$12 sps:$4 sm:$0xff]   ;;  %v15076_v48 = vcombine.low %v276_v27, %v292_v21  ;;  %v13241_v27 = vld [vmem:[%s19604_s1 + $0x904] ss:$12 sps:$4 sm:$0xff]  }
  0xe0   : > { %7466 = vmatprep.mubr.bf16.mxu1 %v15015_v30  ;;  %19955 = vst [vmem:[#allocation76_spill] sm:$0xff] %v15039_v42  ;;  %v13229_v30 = vld [vmem:[%s19604_s1 + $0x934] ss:$12 sps:$4 sm:$0xff]   ;;  %19957 = vst [vmem:[#allocation78_spill] sm:$0xff] %v15056_v9  ;;  %v15058_v13 = vcombine.high %v277_v59, %v293_v2  ;;  %v13244_v21 = vld [vmem:[%s19604_s1 + $0xa84] ss:$12 sps:$4 sm:$0xff]  }
  0xe1   : > { %7534 = vmatpush1.bf16.msra.mxu0 %v13215_v56  ;;  %v13230_v56 = vld [vmem:[%s19604_s1 + $0xab0] ss:$12 sps:$4 sm:$0xff]   ;;  %19959 = vst [vmem:[#allocation80_spill] sm:$0xff] %v15076_v48 }
  0xe2   : > { %7647 = vmatpush1.bf16.msra.mxu1 %v13218_v41  ;;  %7535 = vmatprep.subr.bf16.mxu0 %v13223_v40  ;;  %19958 = vst [vmem:[#allocation79_spill] sm:$0xff] %v15058_v13  ;;  %v13235_v41 = vld [vmem:[%s19604_s1 + $0x91c] ss:$12 sps:$4 sm:$0xff]  }
  0xe3   : > { %7648 = vmatprep.subr.bf16.mxu1 %v13226_v20  ;;  %v13238_v40 = vld [vmem:[%s19604_s1 + $0xa9c] ss:$12 sps:$4 sm:$0xff]   ;;  %v308_v20 = vld [vmem:[%s14235_s27 + $0x420] sm:$0xff] }
  0xe4   : > { %7354 = vmatmul.mubr.bf16.gmra.mxu0 %v15039_v42  ;;  %v309_v42 = vld [vmem:[%s14235_s27 + $0x428] sm:$0xff] }
  0xe5   : > { %7467 = vmatmul.mubr.bf16.gmra.mxu1 %v15041_v31  ;;  %7536 = vmatpush1.bf16.msra.mxu0 %v13221_v3  ;;  %v324_v31 = vld [vmem:[%s14235_s27 + $0x4a0] sm:$0xff]  ;;  %v15078_v3 = vcombine.low %v277_v59, %v293_v2 }
  0xe6   : > { %7649 = vmatpush1.bf16.msra.mxu1 %v13224_v43  ;;  %7537 = vmatprep.subr.bf16.mxu0 %v13229_v30  ;;  %v325_v43 = vld [vmem:[%s14235_s27 + $0x4a8] sm:$0xff]  ;;  %v13233_v30 = vld [vmem:[%s19604_s1 + $0x918] ss:$12 sps:$4 sm:$0xff]   ;;  %v15093_v59 = vcombine.high %v308_v20, %v324_v31 }
  0xe7   : > { %7650 = vmatprep.subr.bf16.mxu1 %v13232_v10  ;;  %7363 = vmatprep.mubr.bf16.mxu0 %v15056_v9  ;;  %19960 = vst [vmem:[#allocation81_spill] sm:$0xff] %v15078_v3  ;;  %v13236_v10 = vld [vmem:[%s19604_s1 + $0xa98] ss:$12 sps:$4 sm:$0xff]   ;;  %v15095_v2 = vcombine.high %v309_v42, %v325_v43 }
  0xe8   : > { %7476 = vmatprep.mubr.bf16.mxu1 %v15058_v13  ;;  %19961 = vst [vmem:[#allocation82_spill] sm:$0xff] %v15093_v59  ;;  %v357_v13 = vld [vmem:[%s14235_s27 + $0x5a8] sm:$0xff] }
  0xe9   : > { %7538 = vmatpush1.bf16.msra.mxu0 %v13227_v54  ;;  %19962 = vst [vmem:[#allocation83_spill] sm:$0xff] %v15095_v2  ;;  %v13239_v54 = vld [vmem:[%s19604_s1 + $0x900] ss:$12 sps:$4 sm:$0xff]  }
  0xea   : > { %7651 = vmatpush1.bf16.msra.mxu1 %v13230_v56  ;;  %7539 = vmatprep.subr.bf16.mxu0 %v13235_v41  ;;  %v13242_v56 = vld [vmem:[%s19604_s1 + $0xa80] ss:$12 sps:$4 sm:$0xff]  }
  0xeb   : > { %7652 = vmatprep.subr.bf16.mxu1 %v13238_v40  ;;  %v13247_v41 = vld [vmem:[%s19604_s1 + $0xa6c] ss:$12 sps:$4 sm:$0xff]  }
  0xec   : > { %7364 = vmatmul.mubr.bf16.gmra.mxu0 %v15076_v48  ;;  %v13250_v40 = vld [vmem:[%s19604_s1 + $0xbec] ss:$12 sps:$4 sm:$0xff]  }
  0xed   : > { %7477 = vmatmul.mubr.bf16.gmra.mxu1 %v15078_v3  ;;  %7540 = vmatpush1.bf16.msra.mxu0 %v13233_v30  ;;  %v13245_v30 = vld [vmem:[%s19604_s1 + $0xa68] ss:$12 sps:$4 sm:$0xff]   ;;  %v15117_v3 = vcombine.low %v308_v20, %v324_v31 }
  0xee   : > { %7653 = vmatpush1.bf16.msra.mxu1 %v13236_v10  ;;  %7541 = vmatprep.subr.bf16.mxu0 %v13241_v27  ;;  %v340_v10 = vld [vmem:[%s14235_s27 + $0x520] sm:$0xff]  ;;  %v15119_v27 = vcombine.low %v309_v42, %v325_v43  ;;  %v341_v48 = vld [vmem:[%s14235_s27 + $0x528] sm:$0xff]  ;;  %v13251_v43 = vld [vmem:[%s19604_s1 + $0xa50] ss:$12 sps:$4 sm:$0xff]  }
  0xef   : > { %7654 = vmatprep.subr.bf16.mxu1 %v13244_v21  ;;  %7373 = vmatprep.mubr.bf16.mxu0 %v15093_v59  ;;  %19963 = vst [vmem:[#allocation84_spill] sm:$0xff] %v15117_v3  ;;  %v356_v21 = vld [vmem:[%s14235_s27 + $0x5a0] sm:$0xff]  ;;  %v13248_v59 = vld [vmem:[%s19604_s1 + $0xbe8] ss:$12 sps:$4 sm:$0xff]   ;;  %v15135_v20 = vcombine.high %v341_v48, %v357_v13 }
  0xf0   : > { %7486 = vmatprep.mubr.bf16.mxu1 %v15095_v2  ;;  %19964 = vst [vmem:[#allocation85_spill] sm:$0xff] %v15119_v27  ;;  %v13253_v2 = vld [vmem:[%s19604_s1 + $0xa54] ss:$12 sps:$4 sm:$0xff]   ;;  %v15133_v42 = vcombine.high %v340_v10, %v356_v21 }
  0xf1   : > { %7542 = vmatpush1.bf16.msra.mxu0 %v13239_v54  ;;  %v13256_v31 = vld [vmem:[%s19604_s1 + $0xbd4] ss:$12 sps:$4 sm:$0xff]   ;;  %19966 = vst [vmem:[#allocation87_spill] sm:$0xff] %v15135_v20  ;;  %v13254_v54 = vld [vmem:[%s19604_s1 + $0xbd0] ss:$12 sps:$4 sm:$0xff]  }
  0xf2   : > { %7655 = vmatpush1.bf16.msra.mxu1 %v13242_v56  ;;  %7543 = vmatprep.subr.bf16.mxu0 %v13247_v41  ;;  %19965 = vst [vmem:[#allocation86_spill] sm:$0xff] %v15133_v42  ;;  %v13259_v56 = vld [vmem:[%s19604_s1 + $0xa3c] ss:$12 sps:$4 sm:$0xff]  }
  0xf3   : > { %7656 = vmatprep.subr.bf16.mxu1 %v13250_v40  ;;  %v13262_v41 = vld [vmem:[%s19604_s1 + $0xbbc] ss:$12 sps:$4 sm:$0xff]   ;;  %v372_v40 = vld [vmem:[%s14235_s27 + $0x620] sm:$0xff] }
  0xf4   : > { %7374 = vmatmul.mubr.bf16.gmra.mxu0 %v15117_v3  ;;  %v389_v3 = vld [vmem:[%s14235_s27 + $0x6a8] sm:$0xff] }
  0xf5   : > { %7487 = vmatmul.mubr.bf16.gmra.mxu1 %v15119_v27  ;;  %7544 = vmatpush2.bf16.msra.mxu0 %v13245_v30  ;;  %v388_v30 = vld [vmem:[%s14235_s27 + $0x6a0] sm:$0xff]  ;;  %v15161_v27 = vcombine.low %v341_v48, %v357_v13 }
  0xf6   : > { %7657 = vmatpush2.bf16.msra.mxu1 %v13248_v59  ;;  %7545 = vmatprep.subr.bf16.mxu0 %v13253_v2  ;;  %v13257_v59 = vld [vmem:[%s19604_s1 + $0xa38] ss:$12 sps:$4 sm:$0xff]   ;;  %v373_v2 = vld [vmem:[%s14235_s27 + $0x628] sm:$0xff]  ;;  %v15173_v48 = vcombine.high %v372_v40, %v388_v30 }
  0xf7   : > { %7658 = vmatprep.subr.bf16.mxu1 %v13256_v31  ;;  %7383 = vmatprep.mubr.bf16.mxu0 %v15133_v42  ;;  %v15159_v31 = vcombine.low %v340_v10, %v356_v21  ;;  %19968 = vst [vmem:[#allocation89_spill] sm:$0xff] %v15161_v27  ;;  %v13260_v42 = vld [vmem:[%s19604_s1 + $0xbb8] ss:$12 sps:$4 sm:$0xff]   ;;  %v15175_v13 = vcombine.high %v373_v2, %v389_v3  ;;  %v13263_v21 = vld [vmem:[%s19604_s1 + $0xa20] ss:$12 sps:$4 sm:$0xff]  }
  0xf8   : > { %7496 = vmatprep.mubr.bf16.mxu1 %v15135_v20  ;;  %v13265_v20 = vld [vmem:[%s19604_s1 + $0xa24] ss:$12 sps:$4 sm:$0xff]   ;;  %19969 = vst [vmem:[#allocation90_spill] sm:$0xff] %v15173_v48  ;;  %v15201_v9 = vcombine.low %v373_v2, %v389_v3 }
  0xf9   : > { %19967 = vst [vmem:[#allocation88_spill] sm:$0xff] %v15159_v31  ;;  %7546 = vmatpush2.bf16.msra.mxu0 %v13251_v43  ;;  %v13268_v10 = vld [vmem:[%s19604_s1 + $0xba4] ss:$12 sps:$4 sm:$0xff]   ;;  %19970 = vst [vmem:[#allocation91_spill] sm:$0xff] %v15175_v13  ;;  %v13266_v43 = vld [vmem:[%s19604_s1 + $0xba0] ss:$12 sps:$4 sm:$0xff]  }
  0xfa   : > { %7659 = vmatpush2.bf16.msra.mxu1 %v13254_v54  ;;  %7547 = vmatprep.subr.bf16.mxu0 %v13259_v56  ;;  %v13271_v54 = vld [vmem:[%s19604_s1 + $0xa0c] ss:$12 sps:$4 sm:$0xff]   ;;  %19972 = vst [vmem:[#allocation93_spill] sm:$0xff] %v15201_v9  ;;  %v13275_v2 = vld [vmem:[%s19604_s1 + $0x9f0] ss:$12 sps:$4 sm:$0xff]  }
  0xfb   : > { %7660 = vmatprep.subr.bf16.mxu1 %v13262_v41  ;;  %v13274_v56 = vld [vmem:[%s19604_s1 + $0xb8c] ss:$12 sps:$4 sm:$0xff]   ;;  %v404_v41 = vld [vmem:[%s14235_s27 + $0x720] sm:$0xff] }
  0xfc   : > { %7384 = vmatmul.mubr.bf16.gmra.mxu0 %v15159_v31  ;;  %v15199_v31 = vcombine.low %v372_v40, %v388_v30  ;;  %v13280_v40 = vld [vmem:[%s19604_s1 + $0xb74] ss:$12 sps:$4 sm:$0xff]  }
  0xfd   : > { %7497 = vmatmul.mubr.bf16.gmra.mxu1 %v15161_v27  ;;  %7548 = vmatpush2.bf16.msra.mxu0 %v13257_v59  ;;  %v420_v59 = vld [vmem:[%s14235_s27 + $0x7a0] sm:$0xff]  ;;  %v405_v27 = vld [vmem:[%s14235_s27 + $0x728] sm:$0xff] }
  0xfe   : > { %7661 = vmatpush2.bf16.msra.mxu1 %v13260_v42  ;;  %7549 = vmatprep.subr.bf16.mxu0 %v13265_v20  ;;  %v13269_v42 = vld [vmem:[%s19604_s1 + $0xa08] ss:$12 sps:$4 sm:$0xff]   ;;  %19971 = vst [vmem:[#allocation92_spill] sm:$0xff] %v15199_v31  ;;  %v15213_v3 = vcombine.high %v404_v41, %v420_v59 }
  0xff   : > { %7662 = vmatprep.subr.bf16.mxu1 %v13268_v10  ;;  %7393 = vmatprep.mubr.bf16.mxu0 %v15173_v48  ;;  %v421_v20 = vld [vmem:[%s14235_s27 + $0x7a8] sm:$0xff]  ;;  %v15239_v48 = vcombine.low %v404_v41, %v420_v59 }
 0x100   : > { %7506 = vmatprep.mubr.bf16.mxu1 %v15175_v13  ;;  %v13272_v10 = vld [vmem:[%s19604_s1 + $0xb88] ss:$12 sps:$4 sm:$0xff]   ;;  %19973 = vst [vmem:[#allocation94_spill] sm:$0xff] %v15213_v3  ;;  %v15215_v30 = vcombine.high %v405_v27, %v421_v20  ;;  %v15241_v8 = vcombine.low %v405_v27, %v421_v20  ;;  %v13292_v27 = vld [vmem:[%s19604_s1 + $0xb44] ss:$12 sps:$4 sm:$0xff]  }
 0x101   : > { %7550 = vmatpush2.bf16.msra.mxu0 %v13263_v21  ;;  %v13277_v13 = vld [vmem:[%s19604_s1 + $0x9f4] ss:$12 sps:$4 sm:$0xff]   ;;  %v13278_v21 = vld [vmem:[%s19604_s1 + $0xb70] ss:$12 sps:$4 sm:$0xff]   ;;  %19975 = vst [vmem:[#allocation96_spill] sm:$0xff] %v15239_v48 }
 0x102   : > { %7663 = vmatpush2.bf16.msra.mxu1 %v13266_v43  ;;  %7551 = vmatprep.subr.bf16.mxu0 %v13271_v54  ;;  %19974 = vst [vmem:[#allocation95_spill] sm:$0xff] %v15215_v30  ;;  %v13283_v43 = vld [vmem:[%s19604_s1 + $0x9dc] ss:$12 sps:$4 sm:$0xff]   ;;  %v1458_v54 = vlaneseq  ;;  %19976 = vst [vmem:[#allocation97_spill] sm:$0xff] %v15241_v8  ;;  %v13287_v41 = vld [vmem:[%s19604_s1 + $0x9c0] ss:$12 sps:$4 sm:$0xff]  }
 0x103   : > { %7664 = vmatprep.subr.bf16.mxu1 %v13274_v56  ;;  %v13286_v56 = vld [vmem:[%s19604_s1 + $0xb5c] ss:$12 sps:$4 sm:$0xff]   ;;  %v13290_v59 = vld [vmem:[%s19604_s1 + $0xb40] ss:$12 sps:$4 sm:$0xff]  }
 0x104   : > { %7394 = vmatmul.mubr.bf16.gmra.mxu0 %v15199_v31  ;;  %v183_v31 = vld [vmem:[%s14235_s27 + $0x38] sm:$0xff] }
 0x105   : > { %7507 = vmatmul.mubr.bf16.gmra.mxu1 %v15201_v9  ;;  %7552 = vmatpush2.bf16.msra.mxu0 %v13269_v42  ;;  %v182_v9 = vld [vmem:[%s14235_s27 + $0x30] sm:$0xff]  ;;  %v13281_v42 = vld [vmem:[%s19604_s1 + $0x9d8] ss:$12 sps:$4 sm:$0xff]  }
 0x106   : > { %7665 = vmatpush2.bf16.msra.mxu1 %v13272_v10  ;;  %7553 = vmatprep.subr.bf16.mxu0 %v13277_v13  ;;  %v198_v10 = vld [vmem:[%s14235_s27 + $0xb0] sm:$0xff]  ;;  %v199_v13 = vld [vmem:[%s14235_s27 + $0xb8] sm:$0xff] }
 0x107   : > { %7666 = vmatprep.subr.bf16.mxu1 %v13280_v40  ;;  %7403 = vmatprep.mubr.bf16.mxu0 %v15213_v3  ;;  %v13284_v40 = vld [vmem:[%s19604_s1 + $0xb58] ss:$12 sps:$4 sm:$0xff]   ;;  %v15247_v3 = vshrl.u32 %v1458_v54, 7  ;;  %v15261_v20 = vcombine.high %v182_v9, %v198_v10  ;;  %v15287_v26 = vcombine.low %v182_v9, %v198_v10  ;;  %v15289_v58 = vcombine.low %v183_v31, %v199_v13  ;;  %v13301_v9 = vld [vmem:[%s19604_s1 + $0xc94] ss:$12 sps:$4 sm:$0xff]  }
 0x108   : > { %7516 = vmatprep.mubr.bf16.mxu1 %v15215_v30  ;;  %v13289_v30 = vld [vmem:[%s19604_s1 + $0x9c4] ss:$12 sps:$4 sm:$0xff]   ;;  %v13295_v54 = vld [vmem:[%s19604_s1 + $0xcac] ss:$12 sps:$4 sm:$0xff]  }
 0x109   : > { %7554 = vmatpush2.bf16.msra.mxu0 %v13275_v2  ;;  %19977 = vst [vmem:[#allocation98_spill] sm:$0xff] %v15247_v3  ;;  %19978 = vst [vmem:[#allocation99_spill] sm:$0xff] %v15261_v20  ;;  %v15263_v2 = vcombine.high %v183_v31, %v199_v13  ;;  %v13304_v31 = vld [vmem:[%s19604_s1 + $0xe14] ss:$12 sps:$4 sm:$0xff]  }
 0x10a   : > { %7667 = vmatpush2.bf16.msra.mxu1 %v13278_v21  ;;  %7555 = vmatprep.subr.bf16.mxu0 %v13283_v43  ;;  %v1456_v21 = vld [vmem:[%s19605_s2] ss:$8 sm:$0x7]  ;;  %v15271_v43 = vsub.s32 0, %v15247_v3  ;;  %19982 = vst [vmem:[#allocation103_spill] sm:$0xff] %v15287_v26  ;;  %19983 = vst [vmem:[#allocation104_spill] sm:$0xff] %v15289_v58 }
 0x10b   : > { %7668 = vmatprep.subr.bf16.mxu1 %v13286_v56  ;;  %19979 = vst [vmem:[#allocation100_spill] sm:$0xff] %v15263_v2  ;;  %v13298_v56 = vld [vmem:[%s19604_s1 + $0xe2c] ss:$12 sps:$4 sm:$0xff]  }
 0x10c   : > { %7404 = vmatmul.mubr.bf16.gmra.mxu0 %v15239_v48  ;;  %19980 = vst [vmem:[#allocation101_spill] sm:$0xff] %v15271_v43  ;;  %v215_v48 = vld [vmem:[%s14235_s27 + $0x138] sm:$0xff] }
 0x10d   : > { %7517 = vmatmul.mubr.bf16.gmra.mxu1 %v15241_v8  ;;  %7556 = vmatpush2.bf16.msra.mxu0 %v13281_v42  ;;  %v214_v8 = vld [vmem:[%s14235_s27 + $0x130] sm:$0xff]  ;;  %v15283_v42 = vsub.s32 1, %v15247_v3 }
 0x10e   : > { %7669 = vmatpush2.bf16.msra.mxu1 %v13284_v40  ;;  %7557 = vmatprep.subr.bf16.mxu0 %v13289_v30  ;;  %v230_v40 = vld [vmem:[%s14235_s27 + $0x1b0] sm:$0xff]  ;;  %v231_v30 = vld [vmem:[%s14235_s27 + $0x1b8] sm:$0xff] }
 0x10f   : > { %7670 = vmatprep.subr.bf16.mxu1 %v13292_v27  ;;  %7559 = vmatprep.mubr.bf16.mxu0 %v15261_v20  ;;  %19981 = vst [vmem:[#allocation102_spill] sm:$0xff] %v15283_v42  ;;  %v15293_v27 = vrot.slane %v1456_v21, %v15271_v43  ;;  %v13293_v20 = vld [vmem:[%s19604_s1 + $0xca8] ss:$12 sps:$4 sm:$0xff]   ;;  %v15308_v10 = vrot.slane %v1456_v21, %v15283_v42  ;;  %v13302_v21 = vld [vmem:[%s19604_s1 + $0xe10] ss:$12 sps:$4 sm:$0xff]  }
 0x110   : > { %7672 = vmatprep.mubr.bf16.mxu1 %v15263_v2  ;;  %v13296_v3 = vld [vmem:[%s19604_s1 + $0xe28] ss:$12 sps:$4 sm:$0xff]   ;;  %v15310_v13 = vcombine.high %v214_v8, %v230_v40  ;;  %v15338_v39 = vcombine.low %v214_v8, %v230_v40  ;;  %v15340_v36 = vcombine.low %v215_v48, %v231_v30  ;;  %v13313_v8 = vld [vmem:[%s19604_s1 + $0xc64] ss:$12 sps:$4 sm:$0xff]  }
 0x111   : > { %7558 = vmatpush2.bf16.msra.mxu0 %v13287_v41  ;;  %v15312_v41 = vcombine.high %v215_v48, %v231_v30  ;;  %v13316_v48 = vld [vmem:[%s19604_s1 + $0xde4] ss:$12 sps:$4 sm:$0xff]  }
 0x112   : > { %7671 = vmatpush2.bf16.msra.mxu1 %v13290_v59  ;;  %7753 = vmatprep.subr.bf16.mxu0 %v13295_v54  ;;  %19984 = vst [vmem:[#allocation105_spill] sm:$0xff] %v15310_v13  ;;  %v13299_v54 = vld [vmem:[%s19604_s1 + $0xc90] ss:$12 sps:$4 sm:$0xff]   ;;  %19986 = vst [vmem:[#allocation107_spill] sm:$0xff] %v15338_v39 }
 0x113   : > { %7866 = vmatprep.subr.bf16.mxu1 %v13298_v56  ;;  %19985 = vst [vmem:[#allocation106_spill] sm:$0xff] %v15312_v41  ;;  %19987 = vst [vmem:[#allocation108_spill] sm:$0xff] %v15340_v36 }
 0x114   : > { %v6883_v59 = vpop.f32.mrf.mxu0  ;;  %7560 = vmatmul.mubr.bf16.vlgmr.msra.gmra.mxu0 %v15287_v26 }
 0x115   : > { %v6996_v43 = vpop.f32.mrf.mxu1  ;;  %7673 = vmatmul.mubr.bf16.vlgmr.msra.gmra.mxu1 %v15289_v58  ;;  %v6884_v56 = vadd.f32 %v6883_v59, %v15293_v27  ;;  %7754 = vmatpush1.bf16.msra.mxu0 %v13293_v20  ;;  %v13307_v58 = vld [vmem:[%s19604_s1 + $0xc7c] ss:$12 sps:$4 sm:$0xff]  }
 0x116   : > { %7867 = vmatpush1.bf16.msra.mxu1 %v13296_v3  ;;  %v6885_v42 = vpop.f32.mrf.mxu0  ;;  %7755 = vmatprep.subr.bf16.mxu0 %v13301_v9  ;;  %v13310_v20 = vld [vmem:[%s19604_s1 + $0xdfc] ss:$12 sps:$4 sm:$0xff]   ;;  %v13305_v9 = vld [vmem:[%s19604_s1 + $0xc78] ss:$12 sps:$4 sm:$0xff]  }
 0x117   : > { %v6998_v2 = vpop.f32.mrf.mxu1  ;;  %7868 = vmatprep.subr.bf16.mxu1 %v13304_v31  ;;  %v15329_v3 = vadd.f32 %v6996_v43, %v6884_v56  ;;  %v6886_v59 = vadd.f32 %v6885_v42, %v15308_v10  ;;  %7569 = vmatprep.mubr.bf16.mxu0 %v15310_v13  ;;  %v246_v31 = vld [vmem:[%s14235_s27 + $0x230] sm:$0xff]  ;;  %v247_v43 = vld [vmem:[%s14235_s27 + $0x238] sm:$0xff] }
 0x118   : > { %7682 = vmatprep.mubr.bf16.mxu1 %v15312_v41  ;;  %v6887_v26 = vpop.f32.mrf.mxu0  ;;  %v263_v56 = vld [vmem:[%s14235_s27 + $0x2b8] sm:$0xff]  ;;  %v15360_v40 = vcombine.high %v246_v31, %v262_v17  ;;  %v15392_v52 = vcombine.low %v246_v31, %v262_v17  ;;  %v13325_v17 = vld [vmem:[%s19604_s1 + $0xc34] ss:$12 sps:$4 sm:$0xff]  }
 0x119   : > { %v7000_v57 = vpop.f32.mrf.mxu1  ;;  %v15345_v16 = vadd.f32 %v6998_v2, %v6886_v59  ;;  %v6888_v42 = vadd.f32 %v6887_v26, %v15293_v27  ;;  %7756 = vmatpush1.bf16.msra.mxu0 %v13299_v54  ;;  %v13308_v41 = vld [vmem:[%s19604_s1 + $0xdf8] ss:$12 sps:$4 sm:$0xff]   ;;  %v15362_v30 = vcombine.high %v247_v43, %v263_v56  ;;  %v15394_v49 = vcombine.low %v247_v43, %v263_v56  ;;  %v13328_v31 = vld [vmem:[%s19604_s1 + $0xdb4] ss:$12 sps:$4 sm:$0xff]  }
 0x11a   : > { %7869 = vmatpush1.bf16.msra.mxu1 %v13302_v21  ;;  %v6889_v13 = vpop.f32.mrf.mxu0  ;;  %7757 = vmatprep.subr.bf16.mxu0 %v13307_v58  ;;  %19988 = vst [vmem:[#allocation109_spill] sm:$0xff] %v15360_v40  ;;  %v13311_v58 = vld [vmem:[%s19604_s1 + $0xc60] ss:$12 sps:$4 sm:$0xff]   ;;  %19990 = vst [vmem:[#allocation111_spill] sm:$0xff] %v15392_v52 }
 0x11b   : > { %v7002_v1 = vpop.f32.mrf.mxu1  ;;  %7870 = vmatprep.subr.bf16.mxu1 %v13310_v20  ;;  %v15357_v2 = vadd.f32 %v7000_v57, %v6888_v42  ;;  %v6890_v26 = vadd.f32 %v6889_v13, %v15308_v10  ;;  %19989 = vst [vmem:[#allocation110_spill] sm:$0xff] %v15362_v30  ;;  %v13314_v13 = vld [vmem:[%s19604_s1 + $0xde0] ss:$12 sps:$4 sm:$0xff]   ;;  %19991 = vst [vmem:[#allocation112_spill] sm:$0xff] %v15394_v49 }
 0x11c   : > { %v6893_v54 = vpop.f32.mrf.mxu0  ;;  %7570 = vmatmul.mubr.bf16.gmra.mxu0 %v15338_v39 }
 0x11d   : > { %v7006_v21 = vpop.f32.mrf.mxu1  ;;  %7683 = vmatmul.mubr.bf16.gmra.mxu1 %v15340_v36  ;;  %v15369_v20 = vadd.f32 %v7002_v1, %v6890_v26  ;;  %v6894_v57 = vadd.f32 %v6893_v54, %v15293_v27  ;;  %7758 = vmatpush1.bf16.msra.mxu0 %v13305_v9  ;;  %v13319_v1 = vld [vmem:[%s19604_s1 + $0xc4c] ss:$12 sps:$4 sm:$0xff]   ;;  %v294_v54 = vld [vmem:[%s14235_s27 + $0x3b0] sm:$0xff] }
 0x11e   : > { %7871 = vmatpush1.bf16.msra.mxu1 %v13308_v41  ;;  %v6895_v59 = vpop.f32.mrf.mxu0  ;;  %7759 = vmatprep.subr.bf16.mxu0 %v13313_v8  ;;  %v13322_v26 = vld [vmem:[%s19604_s1 + $0xdcc] ss:$12 sps:$4 sm:$0xff]   ;;  %v13317_v8 = vld [vmem:[%s19604_s1 + $0xc48] ss:$12 sps:$4 sm:$0xff]  }
 0x11f   : > { %v7008_v42 = vpop.f32.mrf.mxu1  ;;  %7872 = vmatprep.subr.bf16.mxu1 %v13316_v48  ;;  %v15381_v9 = vadd.f32 %v7006_v21, %v6894_v57  ;;  %v6896_v41 = vadd.f32 %v6895_v59, %v15308_v10  ;;  %7579 = vmatprep.mubr.bf16.mxu0 %v15360_v40  ;;  %v278_v48 = vld [vmem:[%s14235_s27 + $0x330] sm:$0xff]  ;;  %v279_v36 = vld [vmem:[%s14235_s27 + $0x338] sm:$0xff] }
 0x120   : > { %7692 = vmatprep.mubr.bf16.mxu1 %v15362_v30  ;;  %v6897_v39 = vpop.f32.mrf.mxu0  ;;  %v295_v21 = vld [vmem:[%s14235_s27 + $0x3b8] sm:$0xff]  ;;  %v13320_v30 = vld [vmem:[%s19604_s1 + $0xdc8] ss:$12 sps:$4 sm:$0xff]   ;;  %v15412_v56 = vcombine.high %v278_v48, %v294_v54  ;;  %v15444_v23 = vcombine.low %v278_v48, %v294_v54  ;;  %v13340_v48 = vld [vmem:[%s19604_s1 + $0xd84] ss:$12 sps:$4 sm:$0xff]  }
 0x121   : > { %v7010_v0 = vpop.f32.mrf.mxu1  ;;  %v15397_v57 = vadd.f32 %v7008_v42, %v6896_v41  ;;  %v6898_v59 = vadd.f32 %v6897_v39, %v15293_v27  ;;  %7760 = vmatpush1.bf16.msra.mxu0 %v13311_v58  ;;  %v15414_v58 = vcombine.high %v279_v36, %v295_v21  ;;  %v13331_v41 = vld [vmem:[%s19604_s1 + $0xc1c] ss:$12 sps:$4 sm:$0xff]   ;;  %v15446_v22 = vcombine.low %v279_v36, %v295_v21  ;;  %v13337_v36 = vld [vmem:[%s19604_s1 + $0xc04] ss:$12 sps:$4 sm:$0xff]  }
 0x122   : > { %7873 = vmatpush1.bf16.msra.mxu1 %v13314_v13  ;;  %v6899_v40 = vpop.f32.mrf.mxu0  ;;  %7761 = vmatprep.subr.bf16.mxu0 %v13319_v1  ;;  %19992 = vst [vmem:[#allocation113_spill] sm:$0xff] %v15412_v56  ;;  %19994 = vst [vmem:[#allocation115_spill] sm:$0xff] %v15444_v23 }
 0x123   : > { %v7012_v33 = vpop.f32.mrf.mxu1  ;;  %7874 = vmatprep.subr.bf16.mxu1 %v13322_v26  ;;  %v15409_v43 = vadd.f32 %v7010_v0, %v6898_v59  ;;  %v6900_v39 = vadd.f32 %v6899_v40, %v15308_v10  ;;  %19993 = vst [vmem:[#allocation114_spill] sm:$0xff] %v15414_v58  ;;  %v13323_v0 = vld [vmem:[%s19604_s1 + $0xc30] ss:$12 sps:$4 sm:$0xff]   ;;  %19995 = vst [vmem:[#allocation116_spill] sm:$0xff] %v15446_v22 }
 0x124   : > { %v6903_v13 = vpop.f32.mrf.mxu0  ;;  %7580 = vmatmul.mubr.bf16.gmra.mxu0 %v15392_v52  ;;  %v13326_v40 = vld [vmem:[%s19604_s1 + $0xdb0] ss:$12 sps:$4 sm:$0xff]  }
 0x125   : > { %v7016_v42 = vpop.f32.mrf.mxu1  ;;  %7693 = vmatmul.mubr.bf16.gmra.mxu1 %v15394_v49  ;;  %v15418_v1 = vadd.f32 %v7012_v33, %v6900_v39  ;;  %v6904_v26 = vadd.f32 %v6903_v13, %v15293_v27  ;;  %7762 = vmatpush1.bf16.msra.mxu0 %v13317_v8  ;;  %v310_v8 = vld [vmem:[%s14235_s27 + $0x430] sm:$0xff]  ;;  %v13329_v49 = vld [vmem:[%s19604_s1 + $0xc18] ss:$12 sps:$4 sm:$0xff]  }
 0x126   : > { %7875 = vmatpush1.bf16.msra.mxu1 %v13320_v30  ;;  %v6905_v33 = vpop.f32.mrf.mxu0  ;;  %7763 = vmatprep.subr.bf16.mxu0 %v13325_v17  ;;  %v13334_v30 = vld [vmem:[%s19604_s1 + $0xd9c] ss:$12 sps:$4 sm:$0xff]   ;;  %v326_v52 = vld [vmem:[%s14235_s27 + $0x4b0] sm:$0xff] }
 0x127   : > { %v7018_v59 = vpop.f32.mrf.mxu1  ;;  %7876 = vmatprep.subr.bf16.mxu1 %v13328_v31  ;;  %v15434_v39 = vadd.f32 %v7016_v42, %v6904_v26  ;;  %v6906_v13 = vadd.f32 %v6905_v33, %v15308_v10  ;;  %7589 = vmatprep.mubr.bf16.mxu0 %v15412_v56  ;;  %v311_v17 = vld [vmem:[%s14235_s27 + $0x438] sm:$0xff]  ;;  %v15496_v63 = vcombine.low %v310_v8, %v326_v52 }
 0x128   : > { %7702 = vmatprep.mubr.bf16.mxu1 %v15414_v58  ;;  %v6907_v31 = vpop.f32.mrf.mxu0  ;;  %v327_v42 = vld [vmem:[%s14235_s27 + $0x4b8] sm:$0xff] }
 0x129   : > { %v7020_v32 = vpop.f32.mrf.mxu1  ;;  %v15449_v26 = vadd.f32 %v7018_v59, %v6906_v13  ;;  %v6908_v33 = vadd.f32 %v6907_v31, %v15293_v27  ;;  %7764 = vmatpush1.bf16.msra.mxu0 %v13323_v0  ;;  %v13332_v58 = vld [vmem:[%s19604_s1 + $0xd98] ss:$12 sps:$4 sm:$0xff]   ;;  %v15464_v0 = vcombine.high %v310_v8, %v326_v52  ;;  %19998 = vst [vmem:[#allocation119_spill] sm:$0xff] %v15496_v63  ;;  %v13349_v52 = vld [vmem:[%s19604_s1 + $0xd54] ss:$12 sps:$4 sm:$0xff]  }
 0x12a   : > { %7877 = vmatpush1.bf16.msra.mxu1 %v13326_v40  ;;  %v6909_v56 = vpop.f32.mrf.mxu0  ;;  %7765 = vmatprep.subr.bf16.mxu0 %v13331_v41  ;;  %v15466_v40 = vcombine.high %v311_v17, %v327_v42  ;;  %v13343_v31 = vld [vmem:[%s19604_s1 + $0xd6c] ss:$12 sps:$4 sm:$0xff]   ;;  %v15498_v60 = vcombine.low %v311_v17, %v327_v42  ;;  %v13347_v42 = vld [vmem:[%s19604_s1 + $0xd50] ss:$12 sps:$4 sm:$0xff]  }
 0x12b   : > { %v7022_v7 = vpop.f32.mrf.mxu1  ;;  %7878 = vmatprep.subr.bf16.mxu1 %v13334_v30  ;;  %v15461_v54 = vadd.f32 %v7020_v32, %v6908_v33  ;;  %v6910_v21 = vadd.f32 %v6909_v56, %v15308_v10  ;;  %19996 = vst [vmem:[#allocation117_spill] sm:$0xff] %v15464_v0  ;;  %v13335_v30 = vld [vmem:[%s19604_s1 + $0xc00] ss:$12 sps:$4 sm:$0xff]  }
 0x12c   : > { %19997 = vst [vmem:[#allocation118_spill] sm:$0xff] %v15466_v40  ;;  %v6913_v59 = vpop.f32.mrf.mxu0  ;;  %7590 = vmatmul.mubr.bf16.gmra.mxu0 %v15444_v23  ;;  %v13338_v32 = vld [vmem:[%s19604_s1 + $0xd80] ss:$12 sps:$4 sm:$0xff]   ;;  %19999 = vst [vmem:[#allocation120_spill] sm:$0xff] %v15498_v60 }
 0x12d   : > { %v7026_v41 = vpop.f32.mrf.mxu1  ;;  %7703 = vmatmul.mubr.bf16.gmra.mxu1 %v15446_v22  ;;  %v15476_v56 = vadd.f32 %v7022_v7, %v6910_v21  ;;  %v6914_v13 = vadd.f32 %v6913_v59, %v15293_v27  ;;  %7766 = vmatpush1.bf16.msra.mxu0 %v13329_v49  ;;  %v13346_v7 = vld [vmem:[%s19604_s1 + $0xeec] ss:$12 sps:$4 sm:$0xff]   ;;  %v342_v21 = vld [vmem:[%s14235_s27 + $0x530] sm:$0xff] }
 0x12e   : > { %7879 = vmatpush1.bf16.msra.mxu1 %v13332_v58  ;;  %v6915_v33 = vpop.f32.mrf.mxu0  ;;  %7767 = vmatprep.subr.bf16.mxu0 %v13337_v36  ;;  %v13341_v49 = vld [vmem:[%s19604_s1 + $0xd68] ss:$12 sps:$4 sm:$0xff]   ;;  %v343_v36 = vld [vmem:[%s14235_s27 + $0x538] sm:$0xff] }
 0x12f   : > { %v7028_v22 = vpop.f32.mrf.mxu1  ;;  %7880 = vmatprep.subr.bf16.mxu1 %v13340_v48  ;;  %v15486_v23 = vadd.f32 %v7026_v41, %v6914_v13  ;;  %v6916_v59 = vadd.f32 %v6915_v33, %v15308_v10  ;;  %7599 = vmatprep.mubr.bf16.mxu0 %v15464_v0  ;;  %v358_v58 = vld [vmem:[%s14235_s27 + $0x5b0] sm:$0xff]  ;;  %v359_v41 = vld [vmem:[%s14235_s27 + $0x5b8] sm:$0xff] }
 0x130   : > { %7712 = vmatprep.mubr.bf16.mxu1 %v15466_v40  ;;  %v6917_v48 = vpop.f32.mrf.mxu0  ;;  %v13344_v40 = vld [vmem:[%s19604_s1 + $0xee8] ss:$12 sps:$4 sm:$0xff]   ;;  %v15545_v37 = vcombine.low %v342_v21, %v358_v58 }
 0x131   : > { %v7030_v6 = vpop.f32.mrf.mxu1  ;;  %v15501_v13 = vadd.f32 %v7028_v22, %v6916_v59  ;;  %v6918_v33 = vadd.f32 %v6917_v48, %v15293_v27  ;;  %7768 = vmatpush1.bf16.msra.mxu0 %v13335_v30  ;;  %v13352_v22 = vld [vmem:[%s19604_s1 + $0xed4] ss:$12 sps:$4 sm:$0xff]   ;;  %v15519_v30 = vcombine.high %v342_v21, %v358_v58  ;;  %v13355_v48 = vld [vmem:[%s19604_s1 + $0xd3c] ss:$12 sps:$4 sm:$0xff]  }
 0x132   : > { %7881 = vmatpush1.bf16.msra.mxu1 %v13338_v32  ;;  %v6919_v0 = vpop.f32.mrf.mxu0  ;;  %7769 = vmatprep.subr.bf16.mxu0 %v13343_v31  ;;  %v15521_v32 = vcombine.high %v343_v36, %v359_v41  ;;  %20002 = vst [vmem:[#allocation123_spill] sm:$0xff] %v15545_v37 }
 0x133   : > { %v7032_v47 = vpop.f32.mrf.mxu1  ;;  %7882 = vmatprep.subr.bf16.mxu1 %v13346_v7  ;;  %v15513_v8 = vadd.f32 %v7030_v6, %v6918_v33  ;;  %v6920_v17 = vadd.f32 %v6919_v0, %v15308_v10  ;;  %20000 = vst [vmem:[#allocation121_spill] sm:$0xff] %v15519_v30  ;;  %v13350_v6 = vld [vmem:[%s19604_s1 + $0xed0] ss:$12 sps:$4 sm:$0xff]  }
 0x134   : > { %20001 = vst [vmem:[#allocation122_spill] sm:$0xff] %v15521_v32  ;;  %v6923_v31 = vpop.f32.mrf.mxu0  ;;  %7600 = vmatmul.mubr.bf16.gmra.mxu0 %v15496_v63 }
 0x135   : > { %v7036_v7 = vpop.f32.mrf.mxu1  ;;  %7713 = vmatmul.mubr.bf16.gmra.mxu1 %v15498_v60  ;;  %v15528_v0 = vadd.f32 %v7032_v47, %v6920_v17  ;;  %v6924_v59 = vadd.f32 %v6923_v31, %v15293_v27  ;;  %7770 = vmatpush2.bf16.msra.mxu0 %v13341_v49  ;;  %v13358_v60 = vld [vmem:[%s19604_s1 + $0xebc] ss:$12 sps:$4 sm:$0xff]   ;;  %v374_v47 = vld [vmem:[%s14235_s27 + $0x630] sm:$0xff] }
 0x136   : > { %7883 = vmatpush2.bf16.msra.mxu1 %v13344_v40  ;;  %v6925_v33 = vpop.f32.mrf.mxu0  ;;  %7771 = vmatprep.subr.bf16.mxu0 %v13349_v52  ;;  %v390_v40 = vld [vmem:[%s14235_s27 + $0x6b0] sm:$0xff]  ;;  %v375_v49 = vld [vmem:[%s14235_s27 + $0x638] sm:$0xff]  ;;  %v15547_v52 = vcombine.low %v343_v36, %v359_v41 }
 0x137   : > { %v7038_v63 = vpop.f32.mrf.mxu1  ;;  %7884 = vmatprep.subr.bf16.mxu1 %v13352_v22  ;;  %v15538_v17 = vadd.f32 %v7036_v7, %v6924_v59  ;;  %v6926_v31 = vadd.f32 %v6925_v33, %v15308_v10  ;;  %7609 = vmatprep.mubr.bf16.mxu0 %v15519_v30  ;;  %v391_v22 = vld [vmem:[%s14235_s27 + $0x6b8] sm:$0xff]  ;;  %v15568_v41 = vcombine.high %v374_v47, %v390_v40 }
 0x138   : > { %7722 = vmatprep.mubr.bf16.mxu1 %v15521_v32  ;;  %v6927_v46 = vpop.f32.mrf.mxu0  ;;  %20003 = vst [vmem:[#allocation124_spill] sm:$0xff] %v15547_v52  ;;  %v13353_v59 = vld [vmem:[%s19604_s1 + $0xd38] ss:$12 sps:$4 sm:$0xff]   ;;  %v15598_v30 = vcombine.low %v374_v47, %v390_v40  ;;  %v15600_v24 = vcombine.low %v375_v49, %v391_v22  ;;  %v13373_v47 = vld [vmem:[%s19604_s1 + $0xcf4] ss:$12 sps:$4 sm:$0xff]  }
 0x139   : > { %v7040_v38 = vpop.f32.mrf.mxu1  ;;  %v15550_v25 = vadd.f32 %v7038_v63, %v6926_v31  ;;  %v6928_v7 = vadd.f32 %v6927_v46, %v15293_v27  ;;  %7772 = vmatpush2.bf16.msra.mxu0 %v13347_v42  ;;  %v13356_v33 = vld [vmem:[%s19604_s1 + $0xeb8] ss:$12 sps:$4 sm:$0xff]   ;;  %20004 = vst [vmem:[#allocation125_spill] sm:$0xff] %v15568_v41  ;;  %v15570_v42 = vcombine.high %v375_v49, %v391_v22 }
 0x13a   : > { %7885 = vmatpush2.bf16.msra.mxu1 %v13350_v6  ;;  %v6929_v32 = vpop.f32.mrf.mxu0  ;;  %7773 = vmatprep.subr.bf16.mxu0 %v13355_v48  ;;  %v13361_v63 = vld [vmem:[%s19604_s1 + $0xd24] ss:$12 sps:$4 sm:$0xff]   ;;  %20006 = vst [vmem:[#allocation127_spill] sm:$0xff] %v15598_v30  ;;  %20007 = vst [vmem:[#allocation128_spill] sm:$0xff] %v15600_v24 }
 0x13b   : > { %v7042_v21 = vpop.f32.mrf.mxu1  ;;  %7886 = vmatprep.subr.bf16.mxu1 %v13358_v60  ;;  %v13364_v46 = vld [vmem:[%s19604_s1 + $0xea4] ss:$12 sps:$4 sm:$0xff]   ;;  %v15565_v58 = vadd.f32 %v7040_v38, %v6928_v7  ;;  %v6930_v36 = vadd.f32 %v6929_v32, %v15308_v10  ;;  %20005 = vst [vmem:[#allocation126_spill] sm:$0xff] %v15570_v42  ;;  %v13359_v60 = vld [vmem:[%s19604_s1 + $0xd20] ss:$12 sps:$4 sm:$0xff]  }
 0x13c   : > { %v6933_v6 = vpop.f32.mrf.mxu0  ;;  %7610 = vmatmul.mubr.bf16.gmra.mxu0 %v15545_v37  ;;  %v13362_v32 = vld [vmem:[%s19604_s1 + $0xea0] ss:$12 sps:$4 sm:$0xff]  }
 0x13d   : > { %v7046_v31 = vpop.f32.mrf.mxu1  ;;  %7723 = vmatmul.mubr.bf16.gmra.mxu1 %v15547_v52  ;;  %v15577_v48 = vadd.f32 %v7042_v21, %v6930_v36  ;;  %v6934_v38 = vadd.f32 %v6933_v6, %v15293_v27  ;;  %7774 = vmatpush2.bf16.msra.mxu0 %v13353_v59  ;;  %v13367_v21 = vld [vmem:[%s19604_s1 + $0xd0c] ss:$12 sps:$4 sm:$0xff]  }
 0x13e   : > { %7887 = vmatpush2.bf16.msra.mxu1 %v13356_v33  ;;  %v6935_v7 = vpop.f32.mrf.mxu0  ;;  %7775 = vmatprep.subr.bf16.mxu0 %v13361_v63  ;;  %v13370_v59 = vld [vmem:[%s19604_s1 + $0xe8c] ss:$12 sps:$4 sm:$0xff]   ;;  %v13365_v63 = vld [vmem:[%s19604_s1 + $0xd08] ss:$12 sps:$4 sm:$0xff]  }
 0x13f   : > { %v7048_v37 = vpop.f32.mrf.mxu1  ;;  %7888 = vmatprep.subr.bf16.mxu1 %v13364_v46  ;;  %v15589_v33 = vadd.f32 %v7046_v31, %v6934_v38  ;;  %v6936_v36 = vadd.f32 %v6935_v7, %v15308_v10  ;;  %7619 = vmatprep.mubr.bf16.mxu0 %v15568_v41  ;;  %v406_v46 = vld [vmem:[%s14235_s27 + $0x730] sm:$0xff]  ;;  %v407_v31 = vld [vmem:[%s14235_s27 + $0x738] sm:$0xff] }
 0x140   : > { %7732 = vmatprep.mubr.bf16.mxu1 %v15570_v42  ;;  %v6937_v6 = vpop.f32.mrf.mxu0  ;;  %v423_v38 = vld [vmem:[%s14235_s27 + $0x7b8] sm:$0xff]  ;;  %v13368_v42 = vld [vmem:[%s19604_s1 + $0xe88] ss:$12 sps:$4 sm:$0xff]   ;;  %v15620_v22 = vcombine.high %v406_v46, %v422_v15  ;;  %v15652_v62 = vcombine.low %v406_v46, %v422_v15  ;;  %v13385_v15 = vld [vmem:[%s19604_s1 + $0xcc4] ss:$12 sps:$4 sm:$0xff]  }
 0x141   : > { %v7050_v52 = vpop.f32.mrf.mxu1  ;;  %v15605_v14 = vadd.f32 %v7048_v37, %v6936_v36  ;;  %v6938_v7 = vadd.f32 %v6937_v6, %v15293_v27  ;;  %7776 = vmatpush2.bf16.msra.mxu0 %v13359_v60  ;;  %v13376_v37 = vld [vmem:[%s19604_s1 + $0xe74] ss:$12 sps:$4 sm:$0xff]   ;;  %v15622_v60 = vcombine.high %v407_v31, %v423_v38  ;;  %v15654_v61 = vcombine.low %v407_v31, %v423_v38  ;;  %v13388_v46 = vld [vmem:[%s19604_s1 + $0xe44] ss:$12 sps:$4 sm:$0xff]  }
 0x142   : > { %7889 = vmatpush2.bf16.msra.mxu1 %v13362_v32  ;;  %v6939_v41 = vpop.f32.mrf.mxu0  ;;  %7777 = vmatprep.subr.bf16.mxu0 %v13367_v21  ;;  %20008 = vst [vmem:[#allocation129_spill] sm:$0xff] %v15620_v22  ;;  %v13371_v21 = vld [vmem:[%s19604_s1 + $0xcf0] ss:$12 sps:$4 sm:$0xff]   ;;  %20010 = vst [vmem:[#allocation131_spill] sm:$0xff] %v15652_v62 }
 0x143   : > { %v7052_v5 = vpop.f32.mrf.mxu1  ;;  %7890 = vmatprep.subr.bf16.mxu1 %v13370_v59  ;;  %v15617_v40 = vadd.f32 %v7050_v52, %v6938_v7  ;;  %v6940_v49 = vadd.f32 %v6939_v41, %v15308_v10  ;;  %20009 = vst [vmem:[#allocation130_spill] sm:$0xff] %v15622_v60  ;;  %v13374_v41 = vld [vmem:[%s19604_s1 + $0xe70] ss:$12 sps:$4 sm:$0xff]   ;;  %20011 = vst [vmem:[#allocation132_spill] sm:$0xff] %v15654_v61 }
 0x144   : > { %v6943_v32 = vpop.f32.mrf.mxu0  ;;  %7620 = vmatmul.mubr.bf16.gmra.mxu0 %v15598_v30 }
 0x145   : > { %v7056_v36 = vpop.f32.mrf.mxu1  ;;  %7733 = vmatmul.mubr.bf16.gmra.mxu1 %v15600_v24  ;;  %v15629_v59 = vadd.f32 %v7052_v5, %v6940_v49  ;;  %v6944_v52 = vadd.f32 %v6943_v32, %v15293_v27  ;;  %7778 = vmatpush2.bf16.msra.mxu0 %v13365_v63  ;;  %v13379_v5 = vld [vmem:[%s19604_s1 + $0xcdc] ss:$12 sps:$4 sm:$0xff]   ;;  %v200_v32 = vld [vmem:[%s14235_s27 + $0xc0] sm:$0xff] }
 0x146   : > { %7891 = vmatpush2.bf16.msra.mxu1 %v13368_v42  ;;  %v6945_v6 = vpop.f32.mrf.mxu0  ;;  %7779 = vmatprep.subr.bf16.mxu0 %v13373_v47  ;;  %v13382_v49 = vld [vmem:[%s19604_s1 + $0xe5c] ss:$12 sps:$4 sm:$0xff]   ;;  %v13377_v47 = vld [vmem:[%s19604_s1 + $0xcd8] ss:$12 sps:$4 sm:$0xff]  }
 0x147   : > { %v7058_v7 = vpop.f32.mrf.mxu1  ;;  %7892 = vmatprep.subr.bf16.mxu1 %v13376_v37  ;;  %v15641_v63 = vadd.f32 %v7056_v36, %v6944_v52  ;;  %v6946_v42 = vadd.f32 %v6945_v6, %v15308_v10  ;;  %7629 = vmatprep.mubr.bf16.mxu0 %v15620_v22  ;;  %v184_v37 = vld [vmem:[%s14235_s27 + $0x40] sm:$0xff]  ;;  %v185_v24 = vld [vmem:[%s14235_s27 + $0x48] sm:$0xff] }
 0x148   : > { %7742 = vmatprep.mubr.bf16.mxu1 %v15622_v60  ;;  %v6947_v30 = vpop.f32.mrf.mxu0  ;;  %v201_v36 = vld [vmem:[%s14235_s27 + $0xc8] sm:$0xff]  ;;  %v13380_v60 = vld [vmem:[%s19604_s1 + $0xe58] ss:$12 sps:$4 sm:$0xff]   ;;  %v15672_v38 = vcombine.high %v184_v37, %v200_v32  ;;  %v15704_v45 = vcombine.low %v184_v37, %v200_v32  ;;  %v13400_v37 = vld [vmem:[%s19604_s1 + $0x1114] ss:$12 sps:$4 sm:$0xff]  }
 0x149   : > { %v7060_v4 = vpop.f32.mrf.mxu1  ;;  %v15657_v52 = vadd.f32 %v7058_v7, %v6946_v42  ;;  %v6948_v6 = vadd.f32 %v6947_v30, %v15293_v27  ;;  %7780 = vmatpush2.bf16.msra.mxu0 %v13371_v21  ;;  %v15674_v21 = vcombine.high %v185_v24, %v201_v36  ;;  %v13391_v42 = vld [vmem:[%s19604_s1 + $0xfac] ss:$12 sps:$4 sm:$0xff]   ;;  %v15706_v44 = vcombine.low %v185_v24, %v201_v36  ;;  %v13397_v24 = vld [vmem:[%s19604_s1 + $0xf94] ss:$12 sps:$4 sm:$0xff]  }
 0x14a   : > { %7893 = vmatpush2.bf16.msra.mxu1 %v13374_v41  ;;  %v6949_v22 = vpop.f32.mrf.mxu0  ;;  %7781 = vmatprep.subr.bf16.mxu0 %v13379_v5  ;;  %20012 = vst [vmem:[#allocation133_spill] sm:$0xff] %v15672_v38  ;;  %20014 = vst [vmem:[#allocation135_spill] sm:$0xff] %v15704_v45 }
 0x14b   : > { %v7062_v51 = vpop.f32.mrf.mxu1  ;;  %7894 = vmatprep.subr.bf16.mxu1 %v13382_v49  ;;  %v15669_v31 = vadd.f32 %v7060_v4, %v6948_v6  ;;  %v6950_v30 = vadd.f32 %v6949_v22, %v15308_v10  ;;  %20013 = vst [vmem:[#allocation134_spill] sm:$0xff] %v15674_v21  ;;  %v13383_v4 = vld [vmem:[%s19604_s1 + $0xcc0] ss:$12 sps:$4 sm:$0xff]   ;;  %20015 = vst [vmem:[#allocation136_spill] sm:$0xff] %v15706_v44 }
 0x14c   : > { %v6953_v41 = vpop.f32.mrf.mxu0  ;;  %7630 = vmatmul.mubr.bf16.gmra.mxu0 %v15652_v62  ;;  %v13386_v22 = vld [vmem:[%s19604_s1 + $0xe40] ss:$12 sps:$4 sm:$0xff]  }
 0x14d   : > { %v7066_v7 = vpop.f32.mrf.mxu1  ;;  %7743 = vmatmul.mubr.bf16.gmra.mxu1 %v15654_v61  ;;  %v15678_v5 = vadd.f32 %v7062_v51, %v6950_v30  ;;  %v6954_v49 = vadd.f32 %v6953_v41, %v15293_v27  ;;  %7782 = vmatpush2.bf16.msra.mxu0 %v13377_v47  ;;  %v216_v47 = vld [vmem:[%s14235_s27 + $0x140] sm:$0xff]  ;;  %v13389_v61 = vld [vmem:[%s19604_s1 + $0xfa8] ss:$12 sps:$4 sm:$0xff]  }
 0x14e   : > { %7895 = vmatpush2.bf16.msra.mxu1 %v13380_v60  ;;  %v6955_v51 = vpop.f32.mrf.mxu0  ;;  %7783 = vmatprep.subr.bf16.mxu0 %v13385_v15  ;;  %v13394_v60 = vld [vmem:[%s19604_s1 + $0x112c] ss:$12 sps:$4 sm:$0xff]   ;;  %v232_v62 = vld [vmem:[%s14235_s27 + $0x1c0] sm:$0xff] }
 0x14f   : > { %v7068_v6 = vpop.f32.mrf.mxu1  ;;  %7896 = vmatprep.subr.bf16.mxu1 %v13388_v46  ;;  %v15694_v30 = vadd.f32 %v7066_v7, %v6954_v49  ;;  %v6956_v41 = vadd.f32 %v6955_v51, %v15308_v10  ;;  %7785 = vmatprep.mubr.bf16.mxu0 %v15672_v38  ;;  %v217_v15 = vld [vmem:[%s14235_s27 + $0x148] sm:$0xff]  ;;  %v15724_v36 = vcombine.high %v216_v47, %v232_v62 }
 0x150   : > { %7898 = vmatprep.mubr.bf16.mxu1 %v15674_v21  ;;  %v6957_v46 = vpop.f32.mrf.mxu0  ;;  %v233_v7 = vld [vmem:[%s14235_s27 + $0x1c8] sm:$0xff] }
 0x151   : > { %v7070_v50 = vpop.f32.mrf.mxu1  ;;  %v15709_v49 = vadd.f32 %v7068_v6, %v6956_v41  ;;  %v6958_v51 = vadd.f32 %v6957_v46, %v15293_v27  ;;  %7784 = vmatpush2.bf16.msra.mxu0 %v13383_v4  ;;  %v13392_v21 = vld [vmem:[%s19604_s1 + $0x1128] ss:$12 sps:$4 sm:$0xff]   ;;  %20016 = vst [vmem:[#allocation137_spill] sm:$0xff] %v15724_v36  ;;  %v15726_v4 = vcombine.high %v217_v15, %v233_v7  ;;  %v13395_v6 = vld [vmem:[%s19604_s1 + $0xf90] ss:$12 sps:$4 sm:$0xff]  }
 0x152   : > { %7897 = vmatpush2.bf16.msra.mxu1 %v13386_v22  ;;  %v6959_v38 = vpop.f32.mrf.mxu0  ;;  %7979 = vmatprep.subr.bf16.mxu0 %v13391_v42 }
 0x153   : > { %v7072_v35 = vpop.f32.mrf.mxu1  ;;  %8092 = vmatprep.subr.bf16.mxu1 %v13394_v60  ;;  %v15721_v32 = vadd.f32 %v7070_v50, %v6958_v51  ;;  %v6960_v27 = vadd.f32 %v6959_v38, %v15308_v10  ;;  %20017 = vst [vmem:[#allocation138_spill] sm:$0xff] %v15726_v4  ;;  %v13398_v50 = vld [vmem:[%s19604_s1 + $0x1110] ss:$12 sps:$4 sm:$0xff]   ;;  %v248_v51 = vld [vmem:[%s14235_s27 + $0x240] sm:$0xff] }
 0x154   : > { %v7109_v22 = vpop.f32.mrf.mxu0  ;;  %7786 = vmatmul.mubr.bf16.vlgmr.msra.gmra.mxu0 %v15704_v45  ;;  %v13403_v60 = vld [vmem:[%s19604_s1 + $0xf7c] ss:$12 sps:$4 sm:$0xff]   ;;  %v15758_v45 = vcombine.low %v217_v15, %v233_v7  ;;  %v13407_v7 = vld [vmem:[%s19604_s1 + $0xf60] ss:$12 sps:$4 sm:$0xff]  }
 0x155   : > { %v7222_v42 = vpop.f32.mrf.mxu1  ;;  %7899 = vmatmul.mubr.bf16.vlgmr.msra.gmra.mxu1 %v15706_v44  ;;  %v15736_v10 = vadd.f32 %v7072_v35, %v6960_v27  ;;  %v7110_v38 = vadd.f32 %v7109_v22, %v15329_v3  ;;  %7980 = vmatpush1.bf16.msra.mxu0 %v13389_v61  ;;  %v13406_v35 = vld [vmem:[%s19604_s1 + $0x10fc] ss:$12 sps:$4 sm:$0xff]   ;;  %v13401_v61 = vld [vmem:[%s19604_s1 + $0xf78] ss:$12 sps:$4 sm:$0xff]   ;;  %v15756_v44 = vcombine.low %v216_v47, %v232_v62 }
 0x156   : > { %8093 = vmatpush1.bf16.msra.mxu1 %v13392_v21  ;;  %v7111_v41 = vpop.f32.mrf.mxu0  ;;  %7981 = vmatprep.subr.bf16.mxu0 %v13397_v24  ;;  %v264_v21 = vld [vmem:[%s14235_s27 + $0x2c0] sm:$0xff]  ;;  %v249_v24 = vld [vmem:[%s14235_s27 + $0x248] sm:$0xff]  ;;  %20019 = vst [vmem:[#allocation140_spill] sm:$0xff] %v15758_v45 }
 0x157   : > { %v7224_v46 = vpop.f32.mrf.mxu1  ;;  %8094 = vmatprep.subr.bf16.mxu1 %v13400_v37  ;;  %v15746_v27 = vadd.f32 %v7222_v42, %v7110_v38  ;;  %v7112_v3 = vadd.f32 %v7111_v41, %v15345_v16  ;;  %7795 = vmatprep.mubr.bf16.mxu0 %v15724_v36  ;;  %20018 = vst [vmem:[#allocation139_spill] sm:$0xff] %v15756_v44  ;;  %v265_v42 = vld [vmem:[%s14235_s27 + $0x2c8] sm:$0xff]  ;;  %v13404_v41 = vld [vmem:[%s19604_s1 + $0x10f8] ss:$12 sps:$4 sm:$0xff]  }
 0x158   : > { %7908 = vmatprep.mubr.bf16.mxu1 %v15726_v4  ;;  %v7113_v37 = vpop.f32.mrf.mxu0  ;;  %v13409_v62 = vld [vmem:[%s19604_s1 + $0xf64] ss:$12 sps:$4 sm:$0xff]  }
 0x159   : > { %v7226_v22 = vpop.f32.mrf.mxu1  ;;  %v15761_v38 = vadd.f32 %v7224_v46, %v7112_v3  ;;  %v7114_v16 = vadd.f32 %v7113_v37, %v15357_v2  ;;  %7982 = vmatpush1.bf16.msra.mxu0 %v13395_v6  ;;  %v13412_v47 = vld [vmem:[%s19604_s1 + $0x10e4] ss:$12 sps:$4 sm:$0xff]   ;;  %v15779_v6 = vcombine.high %v248_v51, %v264_v21  ;;  %v13415_v3 = vld [vmem:[%s19604_s1 + $0xf4c] ss:$12 sps:$4 sm:$0xff]  }
 0x15a   : > { %8095 = vmatpush1.bf16.msra.mxu1 %v13398_v50  ;;  %v7115_v4 = vpop.f32.mrf.mxu0  ;;  %7983 = vmatprep.subr.bf16.mxu0 %v13403_v60  ;;  %v15781_v50 = vcombine.high %v249_v24, %v265_v42 }
 0x15b   : > { %v7228_v36 = vpop.f32.mrf.mxu1  ;;  %8096 = vmatprep.subr.bf16.mxu1 %v13406_v35  ;;  %v15773_v15 = vadd.f32 %v7226_v22, %v7114_v16  ;;  %v7116_v2 = vadd.f32 %v7115_v4, %v15369_v20  ;;  %20020 = vst [vmem:[#allocation141_spill] sm:$0xff] %v15779_v6  ;;  %v13410_v35 = vld [vmem:[%s19604_s1 + $0x10e0] ss:$12 sps:$4 sm:$0xff]  }
 0x15c   : > { %20021 = vst [vmem:[#allocation142_spill] sm:$0xff] %v15781_v50  ;;  %v7119_v60 = vpop.f32.mrf.mxu0  ;;  %7796 = vmatmul.mubr.bf16.gmra.mxu0 %v15756_v44  ;;  %v13418_v16 = vld [vmem:[%s19604_s1 + $0x10cc] ss:$12 sps:$4 sm:$0xff]   ;;  %v15805_v44 = vcombine.low %v248_v51, %v264_v21  ;;  %v13421_v21 = vld [vmem:[%s19604_s1 + $0xf34] ss:$12 sps:$4 sm:$0xff]  }
 0x15d   : > { %v7232_v46 = vpop.f32.mrf.mxu1  ;;  %7909 = vmatmul.mubr.bf16.gmra.mxu1 %v15758_v45  ;;  %v15788_v20 = vadd.f32 %v7228_v36, %v7116_v2  ;;  %v7120_v4 = vadd.f32 %v7119_v60, %v15381_v9  ;;  %7984 = vmatpush1.bf16.msra.mxu0 %v13401_v61  ;;  %v280_v36 = vld [vmem:[%s14235_s27 + $0x340] sm:$0xff] }
 0x15e   : > { %8097 = vmatpush1.bf16.msra.mxu1 %v13404_v41  ;;  %v7121_v37 = vpop.f32.mrf.mxu0  ;;  %7985 = vmatprep.subr.bf16.mxu0 %v13409_v62  ;;  %v296_v61 = vld [vmem:[%s14235_s27 + $0x3c0] sm:$0xff]  ;;  %v281_v41 = vld [vmem:[%s14235_s27 + $0x348] sm:$0xff]  ;;  %20022 = vst [vmem:[#allocation143_spill] sm:$0xff] %v15805_v44  ;;  %v15807_v62 = vcombine.low %v249_v24, %v265_v42 }
 0x15f   : > { %v7234_v22 = vpop.f32.mrf.mxu1  ;;  %8098 = vmatprep.subr.bf16.mxu1 %v13412_v47  ;;  %v15798_v2 = vadd.f32 %v7232_v46, %v7120_v4  ;;  %v7122_v9 = vadd.f32 %v7121_v37, %v15397_v57  ;;  %7805 = vmatprep.mubr.bf16.mxu0 %v15779_v6  ;;  %v297_v47 = vld [vmem:[%s14235_s27 + $0x3c8] sm:$0xff] }
 0x160   : > { %7918 = vmatprep.mubr.bf16.mxu1 %v15781_v50  ;;  %v7123_v60 = vpop.f32.mrf.mxu0  ;;  %20023 = vst [vmem:[#allocation144_spill] sm:$0xff] %v15807_v62  ;;  %v13413_v57 = vld [vmem:[%s19604_s1 + $0xf48] ss:$12 sps:$4 sm:$0xff]  }
 0x161   : > { %v7236_v45 = vpop.f32.mrf.mxu1  ;;  %v15810_v34 = vadd.f32 %v7234_v22, %v7122_v9  ;;  %v7124_v46 = vadd.f32 %v7123_v60, %v15409_v43  ;;  %7986 = vmatpush1.bf16.msra.mxu0 %v13407_v7  ;;  %v13416_v4 = vld [vmem:[%s19604_s1 + $0x10c8] ss:$12 sps:$4 sm:$0xff]   ;;  %v15828_v7 = vcombine.high %v280_v36, %v296_v61 }
 0x162   : > { %8099 = vmatpush1.bf16.msra.mxu1 %v13410_v35  ;;  %v7125_v37 = vpop.f32.mrf.mxu0  ;;  %7987 = vmatprep.subr.bf16.mxu0 %v13415_v3  ;;  %v13424_v43 = vld [vmem:[%s19604_s1 + $0x10b4] ss:$12 sps:$4 sm:$0xff]   ;;  %v15830_v35 = vcombine.high %v281_v41, %v297_v47  ;;  %v13419_v3 = vld [vmem:[%s19604_s1 + $0xf30] ss:$12 sps:$4 sm:$0xff]  }
 0x163   : > { %v7238_v51 = vpop.f32.mrf.mxu1  ;;  %8100 = vmatprep.subr.bf16.mxu1 %v13418_v16  ;;  %v15825_v24 = vadd.f32 %v7236_v45, %v7124_v46  ;;  %v7126_v42 = vadd.f32 %v7125_v37, %v15418_v1  ;;  %20024 = vst [vmem:[#allocation145_spill] sm:$0xff] %v15828_v7  ;;  %v13422_v1 = vld [vmem:[%s19604_s1 + $0x10b0] ss:$12 sps:$4 sm:$0xff]  }
 0x164   : > { %20025 = vst [vmem:[#allocation146_spill] sm:$0xff] %v15830_v35  ;;  %v7129_v22 = vpop.f32.mrf.mxu0  ;;  %7806 = vmatmul.mubr.bf16.gmra.mxu0 %v15805_v44  ;;  %v13427_v37 = vld [vmem:[%s19604_s1 + $0xf1c] ss:$12 sps:$4 sm:$0xff]   ;;  %v328_v44 = vld [vmem:[%s14235_s27 + $0x4c0] sm:$0xff] }
 0x165   : > { %v7242_v9 = vpop.f32.mrf.mxu1  ;;  %7919 = vmatmul.mubr.bf16.gmra.mxu1 %v15807_v62  ;;  %v15837_v16 = vadd.f32 %v7238_v51, %v7126_v42  ;;  %v7130_v45 = vadd.f32 %v7129_v22, %v15434_v39  ;;  %7988 = vmatpush1.bf16.msra.mxu0 %v13413_v57  ;;  %v13430_v39 = vld [vmem:[%s19604_s1 + $0x109c] ss:$12 sps:$4 sm:$0xff]   ;;  %v13425_v51 = vld [vmem:[%s19604_s1 + $0xf18] ss:$12 sps:$4 sm:$0xff]   ;;  %v15858_v22 = vcombine.low %v280_v36, %v296_v61 }
 0x166   : > { %8101 = vmatpush1.bf16.msra.mxu1 %v13416_v4  ;;  %v7131_v60 = vpop.f32.mrf.mxu0  ;;  %7989 = vmatprep.subr.bf16.mxu0 %v13421_v21  ;;  %v312_v21 = vld [vmem:[%s14235_s27 + $0x440] sm:$0xff]  ;;  %v15860_v62 = vcombine.low %v281_v41, %v297_v47 }
 0x167   : > { %v7244_v46 = vpop.f32.mrf.mxu1  ;;  %8102 = vmatprep.subr.bf16.mxu1 %v13424_v43  ;;  %v15849_v57 = vadd.f32 %v7242_v9, %v7130_v45  ;;  %v7132_v4 = vadd.f32 %v7131_v60, %v15449_v26  ;;  %7815 = vmatprep.mubr.bf16.mxu0 %v15828_v7  ;;  %20026 = vst [vmem:[#allocation147_spill] sm:$0xff] %v15858_v22  ;;  %v313_v9 = vld [vmem:[%s14235_s27 + $0x448] sm:$0xff]  ;;  %v13428_v60 = vld [vmem:[%s19604_s1 + $0x1098] ss:$12 sps:$4 sm:$0xff]  }
 0x168   : > { %7928 = vmatprep.mubr.bf16.mxu1 %v15830_v35  ;;  %v7133_v43 = vpop.f32.mrf.mxu0  ;;  %20027 = vst [vmem:[#allocation148_spill] sm:$0xff] %v15860_v62  ;;  %v329_v45 = vld [vmem:[%s14235_s27 + $0x4c8] sm:$0xff]  ;;  %v13433_v36 = vld [vmem:[%s19604_s1 + $0xf04] ss:$12 sps:$4 sm:$0xff]   ;;  %v15880_v47 = vcombine.high %v312_v21, %v328_v44 }
 0x169   : > { %v7246_v42 = vpop.f32.mrf.mxu1  ;;  %v15865_v50 = vadd.f32 %v7244_v46, %v7132_v4  ;;  %v7134_v26 = vadd.f32 %v7133_v43, %v15461_v54  ;;  %7990 = vmatpush1.bf16.msra.mxu0 %v13419_v3  ;;  %v13436_v61 = vld [vmem:[%s19604_s1 + $0x1084] ss:$12 sps:$4 sm:$0xff]   ;;  %v15882_v3 = vcombine.high %v313_v9, %v329_v45 }
 0x16a   : > { %8103 = vmatpush1.bf16.msra.mxu1 %v13422_v1  ;;  %v7135_v35 = vpop.f32.mrf.mxu0  ;;  %7991 = vmatprep.subr.bf16.mxu0 %v13427_v37  ;;  %20028 = vst [vmem:[#allocation149_spill] sm:$0xff] %v15880_v47  ;;  %v13431_v37 = vld [vmem:[%s19604_s1 + $0xf00] ss:$12 sps:$4 sm:$0xff]  }
 0x16b   : > { %v7248_v7 = vpop.f32.mrf.mxu1  ;;  %8104 = vmatprep.subr.bf16.mxu1 %v13430_v39  ;;  %v15877_v41 = vadd.f32 %v7246_v42, %v7134_v26  ;;  %v7136_v54 = vadd.f32 %v7135_v35, %v15476_v56  ;;  %20029 = vst [vmem:[#allocation150_spill] sm:$0xff] %v15882_v3  ;;  %v13434_v56 = vld [vmem:[%s19604_s1 + $0x1080] ss:$12 sps:$4 sm:$0xff]   ;;  %v13437_v26 = vld [vmem:[%s19604_s1 + $0x1068] ss:$12 sps:$4 sm:$0xff]  }
 0x16c   : > { %v7139_v1 = vpop.f32.mrf.mxu0  ;;  %7816 = vmatmul.mubr.bf16.gmra.mxu0 %v15858_v22  ;;  %v15914_v22 = vcombine.low %v313_v9, %v329_v45 }
 0x16d   : > { %v7252_v46 = vpop.f32.mrf.mxu1  ;;  %7929 = vmatmul.mubr.bf16.gmra.mxu1 %v15860_v62  ;;  %v15889_v39 = vadd.f32 %v7248_v7, %v7136_v54  ;;  %v7140_v4 = vadd.f32 %v7139_v1, %v15486_v23  ;;  %7992 = vmatpush1.bf16.msra.mxu0 %v13425_v51  ;;  %v13439_v7 = vld [vmem:[%s19604_s1 + $0x106c] ss:$12 sps:$4 sm:$0xff]   ;;  %v15912_v62 = vcombine.low %v312_v21, %v328_v44  ;;  %v13445_v44 = vld [vmem:[%s19604_s1 + $0x1054] ss:$12 sps:$4 sm:$0xff]  }
 0x16e   : > { %8105 = vmatpush1.bf16.msra.mxu1 %v13428_v60  ;;  %v7141_v35 = vpop.f32.mrf.mxu0  ;;  %7993 = vmatprep.subr.bf16.mxu0 %v13433_v36  ;;  %v13442_v23 = vld [vmem:[%s19604_s1 + $0x11ec] ss:$12 sps:$4 sm:$0xff]   ;;  %v344_v60 = vld [vmem:[%s14235_s27 + $0x540] sm:$0xff]  ;;  %20031 = vst [vmem:[#allocation152_spill] sm:$0xff] %v15914_v22 }
 0x16f   : > { %v7254_v43 = vpop.f32.mrf.mxu1  ;;  %8106 = vmatprep.subr.bf16.mxu1 %v13436_v61  ;;  %v15901_v51 = vadd.f32 %v7252_v46, %v7140_v4  ;;  %v7142_v42 = vadd.f32 %v7141_v35, %v15501_v13  ;;  %7825 = vmatprep.mubr.bf16.mxu0 %v15880_v47  ;;  %v360_v36 = vld [vmem:[%s14235_s27 + $0x5c0] sm:$0xff]  ;;  %v345_v61 = vld [vmem:[%s14235_s27 + $0x548] sm:$0xff]  ;;  %20030 = vst [vmem:[#allocation151_spill] sm:$0xff] %v15912_v62 }
 0x170   : > { %7938 = vmatprep.mubr.bf16.mxu1 %v15882_v3  ;;  %v7143_v54 = vpop.f32.mrf.mxu0  ;;  %v361_v46 = vld [vmem:[%s14235_s27 + $0x5c8] sm:$0xff]  ;;  %v13448_v21 = vld [vmem:[%s19604_s1 + $0x11d4] ss:$12 sps:$4 sm:$0xff]   ;;  %v15932_v45 = vcombine.high %v344_v60, %v360_v36 }
 0x171   : > { %v7256_v1 = vpop.f32.mrf.mxu1  ;;  %v15917_v4 = vadd.f32 %v7254_v43, %v7142_v42  ;;  %v7144_v13 = vadd.f32 %v7143_v54, %v15513_v8  ;;  %7994 = vmatpush1.bf16.msra.mxu0 %v13431_v37  ;;  %v13440_v35 = vld [vmem:[%s19604_s1 + $0x11e8] ss:$12 sps:$4 sm:$0xff]   ;;  %v15934_v37 = vcombine.high %v345_v61, %v361_v46 }
 0x172   : > { %8107 = vmatpush1.bf16.msra.mxu1 %v13434_v56  ;;  %v7145_v3 = vpop.f32.mrf.mxu0  ;;  %7995 = vmatprep.subr.bf16.mxu0 %v13439_v7  ;;  %20032 = vst [vmem:[#allocation153_spill] sm:$0xff] %v15932_v45  ;;  %v13451_v42 = vld [vmem:[%s19604_s1 + $0x103c] ss:$12 sps:$4 sm:$0xff]  }
 0x173   : > { %v7258_v47 = vpop.f32.mrf.mxu1  ;;  %8108 = vmatprep.subr.bf16.mxu1 %v13442_v23  ;;  %v15929_v9 = vadd.f32 %v7256_v1, %v7144_v13  ;;  %v7146_v8 = vadd.f32 %v7145_v3, %v15528_v0  ;;  %20033 = vst [vmem:[#allocation154_spill] sm:$0xff] %v15934_v37  ;;  %v13443_v0 = vld [vmem:[%s19604_s1 + $0x1050] ss:$12 sps:$4 sm:$0xff]  }
 0x174   : > { %v7149_v56 = vpop.f32.mrf.mxu0  ;;  %7826 = vmatmul.mubr.bf16.gmra.mxu0 %v15912_v62  ;;  %v13446_v3 = vld [vmem:[%s19604_s1 + $0x11d0] ss:$12 sps:$4 sm:$0xff]   ;;  %v15966_v62 = vcombine.low %v345_v61, %v361_v46 }
 0x175   : > { %v7262_v43 = vpop.f32.mrf.mxu1  ;;  %7939 = vmatmul.mubr.bf16.gmra.mxu1 %v15914_v22  ;;  %v15938_v7 = vadd.f32 %v7258_v47, %v7146_v8  ;;  %v7150_v23 = vadd.f32 %v7149_v56, %v15538_v17  ;;  %7996 = vmatpush2.bf16.msra.mxu0 %v13437_v26  ;;  %v13454_v17 = vld [vmem:[%s19604_s1 + $0x11bc] ss:$12 sps:$4 sm:$0xff]   ;;  %v376_v26 = vld [vmem:[%s14235_s27 + $0x640] sm:$0xff]  ;;  %v15964_v22 = vcombine.low %v344_v60, %v360_v36 }
 0x176   : > { %8109 = vmatpush2.bf16.msra.mxu1 %v13440_v35  ;;  %v7151_v47 = vpop.f32.mrf.mxu0  ;;  %7997 = vmatprep.subr.bf16.mxu0 %v13445_v44  ;;  %v13449_v35 = vld [vmem:[%s19604_s1 + $0x1038] ss:$12 sps:$4 sm:$0xff]   ;;  %v377_v44 = vld [vmem:[%s14235_s27 + $0x648] sm:$0xff]  ;;  %20035 = vst [vmem:[#allocation156_spill] sm:$0xff] %v15966_v62 }
 0x177   : > { %v7264_v54 = vpop.f32.mrf.mxu1  ;;  %8110 = vmatprep.subr.bf16.mxu1 %v13448_v21  ;;  %v15954_v1 = vadd.f32 %v7262_v43, %v7150_v23  ;;  %v7152_v13 = vadd.f32 %v7151_v47, %v15550_v25  ;;  %7835 = vmatprep.mubr.bf16.mxu0 %v15932_v45  ;;  %v392_v8 = vld [vmem:[%s14235_s27 + $0x6c0] sm:$0xff]  ;;  %20034 = vst [vmem:[#allocation155_spill] sm:$0xff] %v15964_v22  ;;  %v393_v43 = vld [vmem:[%s14235_s27 + $0x6c8] sm:$0xff] }
 0x178   : > { %7948 = vmatprep.mubr.bf16.mxu1 %v15934_v37  ;;  %v7153_v21 = vpop.f32.mrf.mxu0  ;;  %v13452_v47 = vld [vmem:[%s19604_s1 + $0x11b8] ss:$12 sps:$4 sm:$0xff]   ;;  %v15984_v46 = vcombine.high %v376_v26, %v392_v8 }
 0x179   : > { %v7266_v56 = vpop.f32.mrf.mxu1  ;;  %v15969_v23 = vadd.f32 %v7264_v54, %v7152_v13  ;;  %v7154_v25 = vadd.f32 %v7153_v21, %v15565_v58  ;;  %7998 = vmatpush2.bf16.msra.mxu0 %v13443_v0  ;;  %v13457_v60 = vld [vmem:[%s19604_s1 + $0x1024] ss:$12 sps:$4 sm:$0xff]   ;;  %v15986_v0 = vcombine.high %v377_v44, %v393_v43  ;;  %v13455_v54 = vld [vmem:[%s19604_s1 + $0x1020] ss:$12 sps:$4 sm:$0xff]  }
 0x17a   : > { %8111 = vmatpush2.bf16.msra.mxu1 %v13446_v3  ;;  %v7155_v37 = vpop.f32.mrf.mxu0  ;;  %7999 = vmatprep.subr.bf16.mxu0 %v13451_v42  ;;  %v13460_v36 = vld [vmem:[%s19604_s1 + $0x11a4] ss:$12 sps:$4 sm:$0xff]   ;;  %20036 = vst [vmem:[#allocation157_spill] sm:$0xff] %v15984_v46  ;;  %v13463_v13 = vld [vmem:[%s19604_s1 + $0x100c] ss:$12 sps:$4 sm:$0xff]  }
 0x17b   : > { %v7268_v45 = vpop.f32.mrf.mxu1  ;;  %8112 = vmatprep.subr.bf16.mxu1 %v13454_v17  ;;  %v15981_v61 = vadd.f32 %v7266_v56, %v7154_v25  ;;  %v7156_v58 = vadd.f32 %v7155_v37, %v15577_v48  ;;  %20037 = vst [vmem:[#allocation158_spill] sm:$0xff] %v15986_v0  ;;  %v13458_v17 = vld [vmem:[%s19604_s1 + $0x11a0] ss:$12 sps:$4 sm:$0xff]  }
 0x17c   : > { %v7159_v3 = vpop.f32.mrf.mxu0  ;;  %7836 = vmatmul.mubr.bf16.gmra.mxu0 %v15964_v22  ;;  %v408_v25 = vld [vmem:[%s14235_s27 + $0x740] sm:$0xff]  ;;  %v16018_v22 = vcombine.low %v377_v44, %v393_v43  ;;  %v13467_v43 = vld [vmem:[%s19604_s1 + $0xff0] ss:$12 sps:$4 sm:$0xff]  }
 0x17d   : > { %v7272_v42 = vpop.f32.mrf.mxu1  ;;  %7949 = vmatmul.mubr.bf16.gmra.mxu1 %v15966_v62  ;;  %v15996_v48 = vadd.f32 %v7268_v45, %v7156_v58  ;;  %v7160_v37 = vadd.f32 %v7159_v3, %v15589_v33  ;;  %8000 = vmatpush2.bf16.msra.mxu0 %v13449_v35  ;;  %v13466_v45 = vld [vmem:[%s19604_s1 + $0x118c] ss:$12 sps:$4 sm:$0xff]   ;;  %v13461_v35 = vld [vmem:[%s19604_s1 + $0x1008] ss:$12 sps:$4 sm:$0xff]   ;;  %v16016_v62 = vcombine.low %v376_v26, %v392_v8 }
 0x17e   : > { %8113 = vmatpush2.bf16.msra.mxu1 %v13452_v47  ;;  %v7161_v21 = vpop.f32.mrf.mxu0  ;;  %8001 = vmatprep.subr.bf16.mxu0 %v13457_v60  ;;  %v424_v47 = vld [vmem:[%s14235_s27 + $0x7c0] sm:$0xff]  ;;  %v409_v60 = vld [vmem:[%s14235_s27 + $0x748] sm:$0xff]  ;;  %20039 = vst [vmem:[#allocation160_spill] sm:$0xff] %v16018_v22 }
 0x17f   : > { %v7274_v56 = vpop.f32.mrf.mxu1  ;;  %8114 = vmatprep.subr.bf16.mxu1 %v13460_v36  ;;  %v16006_v58 = vadd.f32 %v7272_v42, %v7160_v37  ;;  %v7162_v33 = vadd.f32 %v7161_v21, %v15605_v14  ;;  %7845 = vmatprep.mubr.bf16.mxu0 %v15984_v46  ;;  %20038 = vst [vmem:[#allocation159_spill] sm:$0xff] %v16016_v62  ;;  %v425_v42 = vld [vmem:[%s14235_s27 + $0x7c8] sm:$0xff]  ;;  %v13469_v26 = vld [vmem:[%s19604_s1 + $0xff4] ss:$12 sps:$4 sm:$0xff]  }
 0x180   : > { %7958 = vmatprep.mubr.bf16.mxu1 %v15986_v0  ;;  %v7163_v36 = vpop.f32.mrf.mxu0  ;;  %v13464_v21 = vld [vmem:[%s19604_s1 + $0x1188] ss:$12 sps:$4 sm:$0xff]  }
 0x181   : > { %v7276_v3 = vpop.f32.mrf.mxu1  ;;  %v16021_v37 = vadd.f32 %v7274_v56, %v7162_v33  ;;  %v7164_v14 = vadd.f32 %v7163_v36, %v15617_v40  ;;  %8002 = vmatpush2.bf16.msra.mxu0 %v13455_v54  ;;  %v13472_v8 = vld [vmem:[%s19604_s1 + $0x1174] ss:$12 sps:$4 sm:$0xff]   ;;  %v16039_v54 = vcombine.high %v408_v25, %v424_v47  ;;  %v13475_v33 = vld [vmem:[%s19604_s1 + $0xfdc] ss:$12 sps:$4 sm:$0xff]  }
 0x182   : > { %8115 = vmatpush2.bf16.msra.mxu1 %v13458_v17  ;;  %v7165_v0 = vpop.f32.mrf.mxu0  ;;  %8003 = vmatprep.subr.bf16.mxu0 %v13463_v13  ;;  %v16041_v17 = vcombine.high %v409_v60, %v425_v42 }
 0x183   : > { %v7278_v46 = vpop.f32.mrf.mxu1  ;;  %8116 = vmatprep.subr.bf16.mxu1 %v13466_v45  ;;  %v16033_v44 = vadd.f32 %v7276_v3, %v7164_v14  ;;  %v7166_v40 = vadd.f32 %v7165_v0, %v15629_v59  ;;  %20040 = vst [vmem:[#allocation161_spill] sm:$0xff] %v16039_v54  ;;  %v13470_v45 = vld [vmem:[%s19604_s1 + $0x1170] ss:$12 sps:$4 sm:$0xff]  }
 0x184   : > { %20041 = vst [vmem:[#allocation162_spill] sm:$0xff] %v16041_v17  ;;  %v7169_v13 = vpop.f32.mrf.mxu0  ;;  %7846 = vmatmul.mubr.bf16.gmra.mxu0 %v16016_v62  ;;  %v13478_v14 = vld [vmem:[%s19604_s1 + $0x115c] ss:$12 sps:$4 sm:$0xff]   ;;  %v16065_v62 = vcombine.low %v408_v25, %v424_v47  ;;  %v13481_v47 = vld [vmem:[%s19604_s1 + $0xfc4] ss:$12 sps:$4 sm:$0xff]  }
 0x185   : > { %v7282_v56 = vpop.f32.mrf.mxu1  ;;  %7959 = vmatmul.mubr.bf16.gmra.mxu1 %v16018_v22  ;;  %v16048_v59 = vadd.f32 %v7278_v46, %v7166_v40  ;;  %v7170_v0 = vadd.f32 %v7169_v13, %v15641_v63  ;;  %8004 = vmatpush2.bf16.msra.mxu0 %v13461_v35  ;;  %v186_v46 = vld [vmem:[%s14235_s27 + $0x50] sm:$0xff] }
 0x186   : > { %8117 = vmatpush2.bf16.msra.mxu1 %v13464_v21  ;;  %v7171_v36 = vpop.f32.mrf.mxu0  ;;  %8005 = vmatprep.subr.bf16.mxu0 %v13469_v26  ;;  %v202_v35 = vld [vmem:[%s14235_s27 + $0xd0] sm:$0xff]  ;;  %v187_v21 = vld [vmem:[%s14235_s27 + $0x58] sm:$0xff]  ;;  %20042 = vst [vmem:[#allocation163_spill] sm:$0xff] %v16065_v62  ;;  %v16067_v26 = vcombine.low %v409_v60, %v425_v42 }
 0x187   : > { %v7284_v3 = vpop.f32.mrf.mxu1  ;;  %8118 = vmatprep.subr.bf16.mxu1 %v13472_v8  ;;  %v16058_v40 = vadd.f32 %v7282_v56, %v7170_v0  ;;  %v7172_v63 = vadd.f32 %v7171_v36, %v15657_v52  ;;  %7855 = vmatprep.mubr.bf16.mxu0 %v16039_v54  ;;  %v203_v8 = vld [vmem:[%s14235_s27 + $0xd8] sm:$0xff] }
 0x188   : > { %7968 = vmatprep.mubr.bf16.mxu1 %v16041_v17  ;;  %v7173_v13 = vpop.f32.mrf.mxu0  ;;  %20043 = vst [vmem:[#allocation164_spill] sm:$0xff] %v16067_v26  ;;  %v13473_v52 = vld [vmem:[%s19604_s1 + $0xfd8] ss:$12 sps:$4 sm:$0xff]  }
 0x189   : > { %v7286_v22 = vpop.f32.mrf.mxu1  ;;  %v16070_v6 = vadd.f32 %v7284_v3, %v7172_v63  ;;  %v7174_v56 = vadd.f32 %v7173_v13, %v15669_v31  ;;  %8006 = vmatpush2.bf16.msra.mxu0 %v13467_v43  ;;  %v13476_v0 = vld [vmem:[%s19604_s1 + $0x1158] ss:$12 sps:$4 sm:$0xff]   ;;  %v16088_v43 = vcombine.high %v186_v46, %v202_v35 }
 0x18a   : > { %8119 = vmatpush2.bf16.msra.mxu1 %v13470_v45  ;;  %v7175_v36 = vpop.f32.mrf.mxu0  ;;  %8007 = vmatprep.subr.bf16.mxu0 %v13475_v33  ;;  %v13484_v31 = vld [vmem:[%s19604_s1 + $0x1144] ss:$12 sps:$4 sm:$0xff]   ;;  %v16090_v45 = vcombine.high %v187_v21, %v203_v8  ;;  %v13479_v33 = vld [vmem:[%s19604_s1 + $0xfc0] ss:$12 sps:$4 sm:$0xff]  }
 0x18b   : > { %v7288_v25 = vpop.f32.mrf.mxu1  ;;  %8120 = vmatprep.subr.bf16.mxu1 %v13478_v14  ;;  %v16085_v60 = vadd.f32 %v7286_v22, %v7174_v56  ;;  %v7176_v42 = vadd.f32 %v7175_v36, %v15678_v5  ;;  %20044 = vst [vmem:[#allocation165_spill] sm:$0xff] %v16088_v43  ;;  %v13482_v5 = vld [vmem:[%s19604_s1 + $0x1140] ss:$12 sps:$4 sm:$0xff]  }
 0x18c   : > { %20045 = vst [vmem:[#allocation166_spill] sm:$0xff] %v16090_v45  ;;  %v7179_v3 = vpop.f32.mrf.mxu0  ;;  %7856 = vmatmul.mubr.bf16.gmra.mxu0 %v16065_v62  ;;  %v13487_v36 = vld [vmem:[%s19604_s1 + $0x12ac] ss:$12 sps:$4 sm:$0xff]   ;;  %v234_v62 = vld [vmem:[%s14235_s27 + $0x1d0] sm:$0xff] }
 0x18d   : > { %v7292_v63 = vpop.f32.mrf.mxu1  ;;  %7969 = vmatmul.mubr.bf16.gmra.mxu1 %v16067_v26  ;;  %v16097_v14 = vadd.f32 %v7288_v25, %v7176_v42  ;;  %v7180_v22 = vadd.f32 %v7179_v3, %v15694_v30  ;;  %8008 = vmatpush2.bf16.msra.mxu0 %v13473_v52  ;;  %v13490_v30 = vld [vmem:[%s19604_s1 + $0x142c] ss:$12 sps:$4 sm:$0xff]   ;;  %v13485_v25 = vld [vmem:[%s19604_s1 + $0x12a8] ss:$12 sps:$4 sm:$0xff]   ;;  %v16118_v3 = vcombine.low %v186_v46, %v202_v35 }
 0x18e   : > { %8121 = vmatpush2.bf16.msra.mxu1 %v13476_v0  ;;  %v7181_v13 = vpop.f32.mrf.mxu0  ;;  %8009 = vmatprep.subr.bf16.mxu0 %v13481_v47  ;;  %v218_v47 = vld [vmem:[%s14235_s27 + $0x150] sm:$0xff]  ;;  %v16120_v26 = vcombine.low %v187_v21, %v203_v8 }
 0x18f   : > { %v7294_v56 = vpop.f32.mrf.mxu1  ;;  %8122 = vmatprep.subr.bf16.mxu1 %v13484_v31  ;;  %v16109_v52 = vadd.f32 %v7292_v63, %v7180_v22  ;;  %v7182_v0 = vadd.f32 %v7181_v13, %v15709_v49  ;;  %8011 = vmatprep.mubr.bf16.mxu0 %v16088_v43  ;;  %20046 = vst [vmem:[#allocation167_spill] sm:$0xff] %v16118_v3  ;;  %v219_v63 = vld [vmem:[%s14235_s27 + $0x158] sm:$0xff]  ;;  %v13488_v13 = vld [vmem:[%s19604_s1 + $0x1428] ss:$12 sps:$4 sm:$0xff]  }
 0x190   : > { %8124 = vmatprep.mubr.bf16.mxu1 %v16090_v45  ;;  %v7183_v31 = vpop.f32.mrf.mxu0  ;;  %20047 = vst [vmem:[#allocation168_spill] sm:$0xff] %v16120_v26  ;;  %v235_v22 = vld [vmem:[%s14235_s27 + $0x1d8] sm:$0xff]  ;;  %v13493_v46 = vld [vmem:[%s19604_s1 + $0x1294] ss:$12 sps:$4 sm:$0xff]   ;;  %v16140_v8 = vcombine.high %v218_v47, %v234_v62 }
 0x191   : > { %v7296_v42 = vpop.f32.mrf.mxu1  ;;  %v16125_v17 = vadd.f32 %v7294_v56, %v7182_v0  ;;  %v7184_v49 = vadd.f32 %v7183_v31, %v15721_v32  ;;  %8010 = vmatpush2.bf16.msra.mxu0 %v13479_v33  ;;  %v13496_v35 = vld [vmem:[%s19604_s1 + $0x1414] ss:$12 sps:$4 sm:$0xff]   ;;  %v16142_v33 = vcombine.high %v219_v63, %v235_v22 }
 0x192   : > { %8123 = vmatpush2.bf16.msra.mxu1 %v13482_v5  ;;  %v7185_v45 = vpop.f32.mrf.mxu0  ;;  %8205 = vmatprep.subr.bf16.mxu0 %v13487_v36  ;;  %20048 = vst [vmem:[#allocation169_spill] sm:$0xff] %v16140_v8  ;;  %v13491_v36 = vld [vmem:[%s19604_s1 + $0x1290] ss:$12 sps:$4 sm:$0xff]  }
 0x193   : > { %v7298_v43 = vpop.f32.mrf.mxu1  ;;  %8318 = vmatprep.subr.bf16.mxu1 %v13490_v30  ;;  %v16137_v21 = vadd.f32 %v7296_v42, %v7184_v49  ;;  %v7186_v32 = vadd.f32 %v7185_v45, %v15736_v10  ;;  %20049 = vst [vmem:[#allocation170_spill] sm:$0xff] %v16142_v33  ;;  %v13494_v10 = vld [vmem:[%s19604_s1 + $0x1410] ss:$12 sps:$4 sm:$0xff]   ;;  %v13497_v49 = vld [vmem:[%s19604_s1 + $0x1278] ss:$12 sps:$4 sm:$0xff]  }
 0x194   : > { %v7335_v5 = vpop.f32.mrf.mxu0  ;;  %8012 = vmatmul.mubr.bf16.vlgmr.msra.gmra.mxu0 %v16118_v3  ;;  %v16174_v3 = vcombine.low %v219_v63, %v235_v22 }
 0x195   : > { %v7448_v56 = vpop.f32.mrf.mxu1  ;;  %8125 = vmatmul.mubr.bf16.vlgmr.msra.gmra.mxu1 %v16120_v26  ;;  %v16149_v30 = vadd.f32 %v7298_v43, %v7186_v32  ;;  %v7336_v0 = vadd.f32 %v7335_v5, %v15746_v27  ;;  %8206 = vmatpush1.bf16.msra.mxu0 %v13485_v25  ;;  %v13499_v43 = vld [vmem:[%s19604_s1 + $0x127c] ss:$12 sps:$4 sm:$0xff]   ;;  %v16172_v26 = vcombine.low %v218_v47, %v234_v62  ;;  %v13505_v62 = vld [vmem:[%s19604_s1 + $0x1264] ss:$12 sps:$4 sm:$0xff]  }
 0x196   : > { %8319 = vmatpush1.bf16.msra.mxu1 %v13488_v13  ;;  %v7337_v45 = vpop.f32.mrf.mxu0  ;;  %8207 = vmatprep.subr.bf16.mxu0 %v13493_v46  ;;  %v13502_v27 = vld [vmem:[%s19604_s1 + $0x13fc] ss:$12 sps:$4 sm:$0xff]   ;;  %v250_v13 = vld [vmem:[%s14235_s27 + $0x250] sm:$0xff]  ;;  %20051 = vst [vmem:[#allocation172_spill] sm:$0xff] %v16174_v3 }
 0x197   : > { %v7450_v31 = vpop.f32.mrf.mxu1  ;;  %8320 = vmatprep.subr.bf16.mxu1 %v13496_v35  ;;  %v16161_v25 = vadd.f32 %v7448_v56, %v7336_v0  ;;  %v7338_v42 = vadd.f32 %v7337_v45, %v15761_v38  ;;  %8021 = vmatprep.mubr.bf16.mxu0 %v16140_v8  ;;  %v266_v46 = vld [vmem:[%s14235_s27 + $0x2d0] sm:$0xff]  ;;  %v251_v35 = vld [vmem:[%s14235_s27 + $0x258] sm:$0xff]  ;;  %20050 = vst [vmem:[#allocation171_spill] sm:$0xff] %v16172_v26 }
 0x198   : > { %8134 = vmatprep.mubr.bf16.mxu1 %v16142_v33  ;;  %v7339_v32 = vpop.f32.mrf.mxu0  ;;  %v267_v56 = vld [vmem:[%s14235_s27 + $0x2d8] sm:$0xff]  ;;  %v13508_v47 = vld [vmem:[%s19604_s1 + $0x13e4] ss:$12 sps:$4 sm:$0xff]   ;;  %v16192_v22 = vcombine.high %v250_v13, %v266_v46 }
 0x199   : > { %v7452_v5 = vpop.f32.mrf.mxu1  ;;  %v16177_v0 = vadd.f32 %v7450_v31, %v7338_v42  ;;  %v7340_v38 = vadd.f32 %v7339_v32, %v15773_v15  ;;  %8208 = vmatpush1.bf16.msra.mxu0 %v13491_v36  ;;  %v13500_v45 = vld [vmem:[%s19604_s1 + $0x13f8] ss:$12 sps:$4 sm:$0xff]   ;;  %v16194_v36 = vcombine.high %v251_v35, %v267_v56 }
 0x19a   : > { %8321 = vmatpush1.bf16.msra.mxu1 %v13494_v10  ;;  %v7341_v33 = vpop.f32.mrf.mxu0  ;;  %8209 = vmatprep.subr.bf16.mxu0 %v13499_v43  ;;  %20052 = vst [vmem:[#allocation173_spill] sm:$0xff] %v16192_v22  ;;  %v13511_v42 = vld [vmem:[%s19604_s1 + $0x124c] ss:$12 sps:$4 sm:$0xff]  }
 0x19b   : > { %v7454_v8 = vpop.f32.mrf.mxu1  ;;  %8322 = vmatprep.subr.bf16.mxu1 %v13502_v27  ;;  %v16189_v63 = vadd.f32 %v7452_v5, %v7340_v38  ;;  %v7342_v15 = vadd.f32 %v7341_v33, %v15788_v20  ;;  %20053 = vst [vmem:[#allocation174_spill] sm:$0xff] %v16194_v36  ;;  %v13503_v20 = vld [vmem:[%s19604_s1 + $0x1260] ss:$12 sps:$4 sm:$0xff]  }
 0x19c   : > { %v7345_v10 = vpop.f32.mrf.mxu0  ;;  %8022 = vmatmul.mubr.bf16.gmra.mxu0 %v16172_v26  ;;  %v13506_v33 = vld [vmem:[%s19604_s1 + $0x13e0] ss:$12 sps:$4 sm:$0xff]   ;;  %v16226_v26 = vcombine.low %v251_v35, %v267_v56 }
 0x19d   : > { %v7458_v31 = vpop.f32.mrf.mxu1  ;;  %8135 = vmatmul.mubr.bf16.gmra.mxu1 %v16174_v3  ;;  %v16198_v43 = vadd.f32 %v7454_v8, %v7342_v15  ;;  %v7346_v27 = vadd.f32 %v7345_v10, %v15798_v2  ;;  %8210 = vmatpush1.bf16.msra.mxu0 %v13497_v49  ;;  %v13514_v2 = vld [vmem:[%s19604_s1 + $0x13cc] ss:$12 sps:$4 sm:$0xff]   ;;  %v282_v49 = vld [vmem:[%s14235_s27 + $0x350] sm:$0xff]  ;;  %v16224_v3 = vcombine.low %v250_v13, %v266_v46 }
 0x19e   : > { %8323 = vmatpush1.bf16.msra.mxu1 %v13500_v45  ;;  %v7347_v8 = vpop.f32.mrf.mxu0  ;;  %8211 = vmatprep.subr.bf16.mxu0 %v13505_v62  ;;  %v13509_v45 = vld [vmem:[%s19604_s1 + $0x1248] ss:$12 sps:$4 sm:$0xff]   ;;  %v283_v62 = vld [vmem:[%s14235_s27 + $0x358] sm:$0xff]  ;;  %20055 = vst [vmem:[#allocation176_spill] sm:$0xff] %v16226_v26 }
 0x19f   : > { %v7460_v32 = vpop.f32.mrf.mxu1  ;;  %8324 = vmatprep.subr.bf16.mxu1 %v13508_v47  ;;  %v16214_v5 = vadd.f32 %v7458_v31, %v7346_v27  ;;  %v7348_v38 = vadd.f32 %v7347_v8, %v15810_v34  ;;  %8031 = vmatprep.mubr.bf16.mxu0 %v16192_v22  ;;  %v298_v15 = vld [vmem:[%s14235_s27 + $0x3d0] sm:$0xff]  ;;  %20054 = vst [vmem:[#allocation175_spill] sm:$0xff] %v16224_v3  ;;  %v299_v31 = vld [vmem:[%s14235_s27 + $0x3d8] sm:$0xff] }
 0x1a0   : > { %8144 = vmatprep.mubr.bf16.mxu1 %v16194_v36  ;;  %v7349_v47 = vpop.f32.mrf.mxu0  ;;  %v13512_v8 = vld [vmem:[%s19604_s1 + $0x13c8] ss:$12 sps:$4 sm:$0xff]   ;;  %v16244_v56 = vcombine.high %v282_v49, %v298_v15 }
 0x1a1   : > { %v7462_v10 = vpop.f32.mrf.mxu1  ;;  %v16229_v27 = vadd.f32 %v7460_v32, %v7348_v38  ;;  %v7350_v34 = vadd.f32 %v7349_v47, %v15825_v24  ;;  %8212 = vmatpush1.bf16.msra.mxu0 %v13503_v20  ;;  %v13517_v13 = vld [vmem:[%s19604_s1 + $0x1234] ss:$12 sps:$4 sm:$0xff]   ;;  %v16246_v20 = vcombine.high %v283_v62, %v299_v31  ;;  %v13515_v32 = vld [vmem:[%s19604_s1 + $0x1230] ss:$12 sps:$4 sm:$0xff]  }
 0x1a2   : > { %8325 = vmatpush1.bf16.msra.mxu1 %v13506_v33  ;;  %v7351_v36 = vpop.f32.mrf.mxu0  ;;  %8213 = vmatprep.subr.bf16.mxu0 %v13511_v42  ;;  %v13520_v46 = vld [vmem:[%s19604_s1 + $0x13b4] ss:$12 sps:$4 sm:$0xff]   ;;  %20056 = vst [vmem:[#allocation177_spill] sm:$0xff] %v16244_v56  ;;  %v13523_v38 = vld [vmem:[%s19604_s1 + $0x121c] ss:$12 sps:$4 sm:$0xff]  }
 0x1a3   : > { %v7464_v22 = vpop.f32.mrf.mxu1  ;;  %8326 = vmatprep.subr.bf16.mxu1 %v13514_v2  ;;  %v16241_v35 = vadd.f32 %v7462_v10, %v7350_v34  ;;  %v7352_v24 = vadd.f32 %v7351_v36, %v15837_v16  ;;  %20057 = vst [vmem:[#allocation178_spill] sm:$0xff] %v16246_v20  ;;  %v13518_v2 = vld [vmem:[%s19604_s1 + $0x13b0] ss:$12 sps:$4 sm:$0xff]  }
 0x1a4   : > { %v7355_v33 = vpop.f32.mrf.mxu0  ;;  %8032 = vmatmul.mubr.bf16.gmra.mxu0 %v16224_v3  ;;  %v314_v34 = vld [vmem:[%s14235_s27 + $0x450] sm:$0xff]  ;;  %v16278_v3 = vcombine.low %v283_v62, %v299_v31  ;;  %v13527_v31 = vld [vmem:[%s19604_s1 + $0x1200] ss:$12 sps:$4 sm:$0xff]  }
 0x1a5   : > { %v7468_v42 = vpop.f32.mrf.mxu1  ;;  %8145 = vmatmul.mubr.bf16.gmra.mxu1 %v16226_v26  ;;  %v16256_v16 = vadd.f32 %v7464_v22, %v7352_v24  ;;  %v7356_v36 = vadd.f32 %v7355_v33, %v15849_v57  ;;  %8214 = vmatpush1.bf16.msra.mxu0 %v13509_v45  ;;  %v13526_v22 = vld [vmem:[%s19604_s1 + $0x139c] ss:$12 sps:$4 sm:$0xff]   ;;  %v13521_v45 = vld [vmem:[%s19604_s1 + $0x1218] ss:$12 sps:$4 sm:$0xff]   ;;  %v16276_v26 = vcombine.low %v282_v49, %v298_v15 }
 0x1a6   : > { %8327 = vmatpush1.bf16.msra.mxu1 %v13512_v8  ;;  %v7357_v47 = vpop.f32.mrf.mxu0  ;;  %8215 = vmatprep.subr.bf16.mxu0 %v13517_v13  ;;  %v330_v8 = vld [vmem:[%s14235_s27 + $0x4d0] sm:$0xff]  ;;  %v315_v13 = vld [vmem:[%s14235_s27 + $0x458] sm:$0xff]  ;;  %20059 = vst [vmem:[#allocation180_spill] sm:$0xff] %v16278_v3 }
 0x1a7   : > { %v7470_v10 = vpop.f32.mrf.mxu1  ;;  %8328 = vmatprep.subr.bf16.mxu1 %v13520_v46  ;;  %v16266_v24 = vadd.f32 %v7468_v42, %v7356_v36  ;;  %v7358_v57 = vadd.f32 %v7357_v47, %v15865_v50  ;;  %8041 = vmatprep.mubr.bf16.mxu0 %v16244_v56  ;;  %20058 = vst [vmem:[#allocation179_spill] sm:$0xff] %v16276_v26  ;;  %v331_v42 = vld [vmem:[%s14235_s27 + $0x4d8] sm:$0xff]  ;;  %v13529_v49 = vld [vmem:[%s19604_s1 + $0x1204] ss:$12 sps:$4 sm:$0xff]  }
 0x1a8   : > { %8154 = vmatprep.mubr.bf16.mxu1 %v16246_v20  ;;  %v7359_v46 = vpop.f32.mrf.mxu0  ;;  %v13524_v47 = vld [vmem:[%s19604_s1 + $0x1398] ss:$12 sps:$4 sm:$0xff]  }
 0x1a9   : > { %v7472_v33 = vpop.f32.mrf.mxu1  ;;  %v16281_v36 = vadd.f32 %v7470_v10, %v7358_v57  ;;  %v7360_v50 = vadd.f32 %v7359_v46, %v15877_v41  ;;  %8216 = vmatpush1.bf16.msra.mxu0 %v13515_v32  ;;  %v13532_v15 = vld [vmem:[%s19604_s1 + $0x1384] ss:$12 sps:$4 sm:$0xff]   ;;  %v16299_v32 = vcombine.high %v314_v34, %v330_v8  ;;  %v13535_v57 = vld [vmem:[%s19604_s1 + $0x136c] ss:$12 sps:$4 sm:$0xff]  }
 0x1aa   : > { %8329 = vmatpush1.bf16.msra.mxu1 %v13518_v2  ;;  %v7361_v20 = vpop.f32.mrf.mxu0  ;;  %8217 = vmatprep.subr.bf16.mxu0 %v13523_v38  ;;  %v16301_v2 = vcombine.high %v315_v13, %v331_v42 }
 0x1ab   : > { %v7474_v56 = vpop.f32.mrf.mxu1  ;;  %8330 = vmatprep.subr.bf16.mxu1 %v13526_v22  ;;  %v16293_v62 = vadd.f32 %v7472_v33, %v7360_v50  ;;  %v7362_v41 = vadd.f32 %v7361_v20, %v15889_v39  ;;  %20060 = vst [vmem:[#allocation181_spill] sm:$0xff] %v16299_v32  ;;  %v13530_v22 = vld [vmem:[%s19604_s1 + $0x1380] ss:$12 sps:$4 sm:$0xff]  }
 0x1ac   : > { %20061 = vst [vmem:[#allocation182_spill] sm:$0xff] %v16301_v2  ;;  %v7365_v38 = vpop.f32.mrf.mxu0  ;;  %8042 = vmatmul.mubr.bf16.gmra.mxu0 %v16276_v26  ;;  %v13538_v50 = vld [vmem:[%s19604_s1 + $0x14ec] ss:$12 sps:$4 sm:$0xff]   ;;  %v16325_v26 = vcombine.low %v314_v34, %v330_v8  ;;  %v13541_v8 = vld [vmem:[%s19604_s1 + $0x1354] ss:$12 sps:$4 sm:$0xff]  }
 0x1ad   : > { %v7478_v10 = vpop.f32.mrf.mxu1  ;;  %8155 = vmatmul.mubr.bf16.gmra.mxu1 %v16278_v3  ;;  %v16308_v39 = vadd.f32 %v7474_v56, %v7362_v41  ;;  %v7366_v20 = vadd.f32 %v7365_v38, %v15901_v51  ;;  %8218 = vmatpush1.bf16.msra.mxu0 %v13521_v45  ;;  %v346_v56 = vld [vmem:[%s14235_s27 + $0x550] sm:$0xff] }
 0x1ae   : > { %8331 = vmatpush1.bf16.msra.mxu1 %v13524_v47  ;;  %v7367_v46 = vpop.f32.mrf.mxu0  ;;  %8219 = vmatprep.subr.bf16.mxu0 %v13529_v49  ;;  %v362_v45 = vld [vmem:[%s14235_s27 + $0x5d0] sm:$0xff]  ;;  %v347_v47 = vld [vmem:[%s14235_s27 + $0x558] sm:$0xff]  ;;  %20062 = vst [vmem:[#allocation183_spill] sm:$0xff] %v16325_v26  ;;  %v16327_v49 = vcombine.low %v315_v13, %v331_v42 }
 0x1af   : > { %v7480_v33 = vpop.f32.mrf.mxu1  ;;  %8332 = vmatprep.subr.bf16.mxu1 %v13532_v15  ;;  %v16318_v41 = vadd.f32 %v7478_v10, %v7366_v20  ;;  %v7368_v51 = vadd.f32 %v7367_v46, %v15917_v4  ;;  %8051 = vmatprep.mubr.bf16.mxu0 %v16299_v32  ;;  %v363_v15 = vld [vmem:[%s14235_s27 + $0x5d8] sm:$0xff]  ;;  %v13533_v4 = vld [vmem:[%s19604_s1 + $0x1368] ss:$12 sps:$4 sm:$0xff]  }
 0x1b0   : > { %8164 = vmatprep.mubr.bf16.mxu1 %v16301_v2  ;;  %v7369_v38 = vpop.f32.mrf.mxu0  ;;  %20063 = vst [vmem:[#allocation184_spill] sm:$0xff] %v16327_v49  ;;  %v13536_v20 = vld [vmem:[%s19604_s1 + $0x14e8] ss:$12 sps:$4 sm:$0xff]  }
 0x1b1   : > { %v7482_v3 = vpop.f32.mrf.mxu1  ;;  %v16330_v54 = vadd.f32 %v7480_v33, %v7368_v51  ;;  %v7370_v10 = vadd.f32 %v7369_v38, %v15929_v9  ;;  %8220 = vmatpush1.bf16.msra.mxu0 %v13527_v31  ;;  %v13544_v9 = vld [vmem:[%s19604_s1 + $0x14d4] ss:$12 sps:$4 sm:$0xff]   ;;  %v16348_v31 = vcombine.high %v346_v56, %v362_v45 }
 0x1b2   : > { %8333 = vmatpush1.bf16.msra.mxu1 %v13530_v22  ;;  %v7371_v46 = vpop.f32.mrf.mxu0  ;;  %8221 = vmatprep.subr.bf16.mxu0 %v13535_v57  ;;  %v16350_v22 = vcombine.high %v347_v47, %v363_v15  ;;  %v13539_v57 = vld [vmem:[%s19604_s1 + $0x1350] ss:$12 sps:$4 sm:$0xff]  }
 0x1b3   : > { %v7484_v34 = vpop.f32.mrf.mxu1  ;;  %8334 = vmatprep.subr.bf16.mxu1 %v13538_v50  ;;  %v16345_v13 = vadd.f32 %v7482_v3, %v7370_v10  ;;  %v7372_v42 = vadd.f32 %v7371_v46, %v15938_v7  ;;  %20064 = vst [vmem:[#allocation185_spill] sm:$0xff] %v16348_v31  ;;  %v13542_v7 = vld [vmem:[%s19604_s1 + $0x14d0] ss:$12 sps:$4 sm:$0xff]  }
 0x1b4   : > { %20065 = vst [vmem:[#allocation186_spill] sm:$0xff] %v16350_v22  ;;  %v7375_v33 = vpop.f32.mrf.mxu0  ;;  %8052 = vmatmul.mubr.bf16.gmra.mxu0 %v16325_v26  ;;  %v13547_v46 = vld [vmem:[%s19604_s1 + $0x133c] ss:$12 sps:$4 sm:$0xff]   ;;  %v13553_v26 = vld [vmem:[%s19604_s1 + $0x1324] ss:$12 sps:$4 sm:$0xff]  }
 0x1b5   : > { %v7488_v51 = vpop.f32.mrf.mxu1  ;;  %8165 = vmatmul.mubr.bf16.gmra.mxu1 %v16327_v49  ;;  %v16357_v50 = vadd.f32 %v7484_v34, %v7372_v42  ;;  %v7376_v3 = vadd.f32 %v7375_v33, %v15954_v1  ;;  %8222 = vmatpush2.bf16.msra.mxu0 %v13533_v4  ;;  %v13550_v1 = vld [vmem:[%s19604_s1 + $0x14bc] ss:$12 sps:$4 sm:$0xff]   ;;  %v13545_v34 = vld [vmem:[%s19604_s1 + $0x1338] ss:$12 sps:$4 sm:$0xff]   ;;  %v394_v42 = vld [vmem:[%s14235_s27 + $0x6d0] sm:$0xff] }
 0x1b6   : > { %8335 = vmatpush2.bf16.msra.mxu1 %v13536_v20  ;;  %v7377_v38 = vpop.f32.mrf.mxu0  ;;  %8223 = vmatprep.subr.bf16.mxu0 %v13541_v8  ;;  %v13548_v8 = vld [vmem:[%s19604_s1 + $0x14b8] ss:$12 sps:$4 sm:$0xff]  }
 0x1b7   : > { %v7490_v10 = vpop.f32.mrf.mxu1  ;;  %8336 = vmatprep.subr.bf16.mxu1 %v13544_v9  ;;  %v16369_v4 = vadd.f32 %v7488_v51, %v7376_v3  ;;  %v7378_v20 = vadd.f32 %v7377_v38, %v15969_v23  ;;  %8061 = vmatprep.mubr.bf16.mxu0 %v16348_v31  ;;  %v378_v9 = vld [vmem:[%s14235_s27 + $0x650] sm:$0xff]  ;;  %v379_v33 = vld [vmem:[%s14235_s27 + $0x658] sm:$0xff]  ;;  %v16383_v3 = vcombine.low %v346_v56, %v362_v45 }
 0x1b8   : > { %8174 = vmatprep.mubr.bf16.mxu1 %v16350_v22  ;;  %v7379_v49 = vpop.f32.mrf.mxu0  ;;  %v16385_v23 = vcombine.low %v347_v47, %v363_v15  ;;  %v395_v38 = vld [vmem:[%s14235_s27 + $0x6d8] sm:$0xff]  ;;  %v13556_v56 = vld [vmem:[%s19604_s1 + $0x14a4] ss:$12 sps:$4 sm:$0xff]   ;;  %v16400_v15 = vcombine.high %v378_v9, %v394_v42 }
 0x1b9   : > { %v7492_v51 = vpop.f32.mrf.mxu1  ;;  %20066 = vst [vmem:[#allocation187_spill] sm:$0xff] %v16383_v3  ;;  %v16388_v31 = vadd.f32 %v7490_v10, %v7378_v20  ;;  %v7380_v22 = vadd.f32 %v7379_v49, %v15981_v61  ;;  %8224 = vmatpush2.bf16.msra.mxu0 %v13539_v57  ;;  %v16402_v61 = vcombine.high %v379_v33, %v395_v38 }
 0x1ba   : > { %20067 = vst [vmem:[#allocation188_spill] sm:$0xff] %v16385_v23  ;;  %8337 = vmatpush2.bf16.msra.mxu1 %v13542_v7  ;;  %v7381_v2 = vpop.f32.mrf.mxu0  ;;  %8225 = vmatprep.subr.bf16.mxu0 %v13547_v46  ;;  %20068 = vst [vmem:[#allocation189_spill] sm:$0xff] %v16400_v15  ;;  %v13551_v7 = vld [vmem:[%s19604_s1 + $0x1320] ss:$12 sps:$4 sm:$0xff]  }
 0x1bb   : > { %v7494_v32 = vpop.f32.mrf.mxu1  ;;  %8338 = vmatprep.subr.bf16.mxu1 %v13550_v1  ;;  %v16397_v45 = vadd.f32 %v7492_v51, %v7380_v22  ;;  %v7382_v47 = vadd.f32 %v7381_v2, %v15996_v48  ;;  %20069 = vst [vmem:[#allocation190_spill] sm:$0xff] %v16402_v61  ;;  %v13554_v48 = vld [vmem:[%s19604_s1 + $0x14a0] ss:$12 sps:$4 sm:$0xff]   ;;  %v410_v51 = vld [vmem:[%s14235_s27 + $0x750] sm:$0xff] }
 0x1bc   : > { %v7385_v49 = vpop.f32.mrf.mxu0  ;;  %8062 = vmatmul.mubr.bf16.gmra.mxu0 %v16383_v3  ;;  %v13559_v2 = vld [vmem:[%s19604_s1 + $0x130c] ss:$12 sps:$4 sm:$0xff]  }
 0x1bd   : > { %v7498_v57 = vpop.f32.mrf.mxu1  ;;  %8175 = vmatmul.mubr.bf16.gmra.mxu1 %v16385_v23  ;;  %v16415_v22 = vadd.f32 %v7494_v32, %v7382_v47  ;;  %v7386_v10 = vadd.f32 %v7385_v49, %v16006_v58  ;;  %8226 = vmatpush2.bf16.msra.mxu0 %v13545_v34  ;;  %v13562_v46 = vld [vmem:[%s19604_s1 + $0x148c] ss:$12 sps:$4 sm:$0xff]   ;;  %v426_v23 = vld [vmem:[%s14235_s27 + $0x7d0] sm:$0xff]  ;;  %v16429_v47 = vcombine.low %v378_v9, %v394_v42 }
 0x1be   : > { %8339 = vmatpush2.bf16.msra.mxu1 %v13548_v8  ;;  %v7387_v1 = vpop.f32.mrf.mxu0  ;;  %8227 = vmatprep.subr.bf16.mxu0 %v13553_v26  ;;  %v411_v58 = vld [vmem:[%s14235_s27 + $0x758] sm:$0xff]  ;;  %v16431_v49 = vcombine.low %v379_v33, %v395_v38  ;;  %v13565_v42 = vld [vmem:[%s19604_s1 + $0x12f4] ss:$12 sps:$4 sm:$0xff]  }
 0x1bf   : > { %v7500_v20 = vpop.f32.mrf.mxu1  ;;  %8340 = vmatprep.subr.bf16.mxu1 %v13556_v56  ;;  %v16423_v3 = vadd.f32 %v7498_v57, %v7386_v10  ;;  %v7388_v32 = vadd.f32 %v7387_v1, %v16021_v37  ;;  %8071 = vmatprep.mubr.bf16.mxu0 %v16400_v15  ;;  %20070 = vst [vmem:[#allocation191_spill] sm:$0xff] %v16429_v47  ;;  %v13557_v37 = vld [vmem:[%s19604_s1 + $0x1308] ss:$12 sps:$4 sm:$0xff]  }
 0x1c0   : > { %8184 = vmatprep.mubr.bf16.mxu1 %v16402_v61  ;;  %v7389_v34 = vpop.f32.mrf.mxu0  ;;  %20071 = vst [vmem:[#allocation192_spill] sm:$0xff] %v16431_v49  ;;  %v13560_v57 = vld [vmem:[%s19604_s1 + $0x1488] ss:$12 sps:$4 sm:$0xff]  }
 0x1c1   : > { %v7502_v8 = vpop.f32.mrf.mxu1  ;;  %v16434_v26 = vadd.f32 %v7500_v20, %v7388_v32  ;;  %v7390_v56 = vadd.f32 %v7389_v34, %v16033_v44  ;;  %8228 = vmatpush2.bf16.msra.mxu0 %v13551_v7  ;;  %v13568_v44 = vld [vmem:[%s19604_s1 + $0x1474] ss:$12 sps:$4 sm:$0xff]   ;;  %v16452_v7 = vcombine.high %v410_v51, %v426_v23  ;;  %v237_v15 = vld [vmem:[%s14235_s27 + $0x1e8] sm:$0xff] }
 0x1c2   : > { %8341 = vmatpush2.bf16.msra.mxu1 %v13554_v48  ;;  %v7391_v10 = vpop.f32.mrf.mxu0  ;;  %8229 = vmatprep.subr.bf16.mxu0 %v13559_v2  ;;  %v16454_v48 = vcombine.high %v411_v58, %v427_v29  ;;  %v13563_v2 = vld [vmem:[%s19604_s1 + $0x12f0] ss:$12 sps:$4 sm:$0xff]  }
 0x1c3   : > { %v7504_v9 = vpop.f32.mrf.mxu1  ;;  %8342 = vmatprep.subr.bf16.mxu1 %v13562_v46  ;;  %v16449_v33 = vadd.f32 %v7502_v8, %v7390_v56  ;;  %v7392_v38 = vadd.f32 %v7391_v10, %v16048_v59  ;;  %20072 = vst [vmem:[#allocation193_spill] sm:$0xff] %v16452_v7  ;;  %v13566_v59 = vld [vmem:[%s19604_s1 + $0x1470] ss:$12 sps:$4 sm:$0xff]   ;;  %v13569_v10 = vld [vmem:[%s19604_s1 + $0x12d8] ss:$12 sps:$4 sm:$0xff]  }
 0x1c4   : > { %20073 = vst [vmem:[#allocation194_spill] sm:$0xff] %v16454_v48  ;;  %v7395_v1 = vpop.f32.mrf.mxu0  ;;  %8072 = vmatmul.mubr.bf16.gmra.mxu0 %v16429_v47  ;;  %v13571_v56 = vld [vmem:[%s19604_s1 + $0x12dc] ss:$12 sps:$4 sm:$0xff]  }
 0x1c5   : > { %v7508_v20 = vpop.f32.mrf.mxu1  ;;  %8185 = vmatmul.mubr.bf16.gmra.mxu1 %v16431_v49  ;;  %v16461_v46 = vadd.f32 %v7504_v9, %v7392_v38  ;;  %v7396_v32 = vadd.f32 %v7395_v1, %v16058_v40  ;;  %8230 = vmatpush2.bf16.msra.mxu0 %v13557_v37  ;;  %v13574_v40 = vld [vmem:[%s19604_s1 + $0x145c] ss:$12 sps:$4 sm:$0xff]   ;;  %v13572_v9 = vld [vmem:[%s19604_s1 + $0x1458] ss:$12 sps:$4 sm:$0xff]  }
 0x1c6   : > { %8343 = vmatpush2.bf16.msra.mxu1 %v13560_v57  ;;  %v7397_v34 = vpop.f32.mrf.mxu0  ;;  %8231 = vmatprep.subr.bf16.mxu0 %v13565_v42  ;;  %v188_v42 = vld [vmem:[%s14235_s27 + $0x60] sm:$0xff]  ;;  %v189_v38 = vld [vmem:[%s14235_s27 + $0x68] sm:$0xff] }
 0x1c7   : > { %v7510_v8 = vpop.f32.mrf.mxu1  ;;  %8344 = vmatprep.subr.bf16.mxu1 %v13568_v44  ;;  %v16473_v37 = vadd.f32 %v7508_v20, %v7396_v32  ;;  %v7398_v57 = vadd.f32 %v7397_v34, %v16070_v6  ;;  %8081 = vmatprep.mubr.bf16.mxu0 %v16452_v7  ;;  %v204_v44 = vld [vmem:[%s14235_s27 + $0xe0] sm:$0xff]  ;;  %v16487_v32 = vcombine.low %v410_v51, %v426_v23  ;;  %v205_v34 = vld [vmem:[%s14235_s27 + $0xe8] sm:$0xff] }
 0x1c8   : > { %8194 = vmatprep.mubr.bf16.mxu1 %v16454_v48  ;;  %v7399_v1 = vpop.f32.mrf.mxu0  ;;  %v16489_v6 = vcombine.low %v411_v58, %v427_v29  ;;  %v13577_v49 = vld [vmem:[%s19604_s1 + $0x12c4] ss:$12 sps:$4 sm:$0xff]   ;;  %v16504_v58 = vcombine.high %v188_v42, %v204_v44 }
 0x1c9   : > { %v7512_v20 = vpop.f32.mrf.mxu1  ;;  %20074 = vst [vmem:[#allocation195_spill] sm:$0xff] %v16487_v32  ;;  %v16492_v7 = vadd.f32 %v7510_v8, %v7398_v57  ;;  %v7400_v48 = vadd.f32 %v7399_v1, %v16085_v60  ;;  %8232 = vmatpush2.bf16.msra.mxu0 %v13563_v2  ;;  %v13580_v29 = vld [vmem:[%s19604_s1 + $0x1444] ss:$12 sps:$4 sm:$0xff]   ;;  %v16506_v60 = vcombine.high %v189_v38, %v205_v34  ;;  %v13575_v8 = vld [vmem:[%s19604_s1 + $0x12c0] ss:$12 sps:$4 sm:$0xff]  }
 0x1ca   : > { %20075 = vst [vmem:[#allocation196_spill] sm:$0xff] %v16489_v6  ;;  %8345 = vmatpush2.bf16.msra.mxu1 %v13566_v59  ;;  %v7401_v47 = vpop.f32.mrf.mxu0  ;;  %8233 = vmatprep.subr.bf16.mxu0 %v13571_v56  ;;  %20076 = vst [vmem:[#allocation197_spill] sm:$0xff] %v16504_v58 }
 0x1cb   : > { %v7514_v61 = vpop.f32.mrf.mxu1  ;;  %8346 = vmatprep.subr.bf16.mxu1 %v13574_v40  ;;  %v16501_v23 = vadd.f32 %v7512_v20, %v7400_v48  ;;  %v7402_v51 = vadd.f32 %v7401_v47, %v16097_v14  ;;  %20077 = vst [vmem:[#allocation198_spill] sm:$0xff] %v16506_v60  ;;  %v13578_v14 = vld [vmem:[%s19604_s1 + $0x1440] ss:$12 sps:$4 sm:$0xff]  }
 0x1cc   : > { %v7405_v2 = vpop.f32.mrf.mxu0  ;;  %8082 = vmatmul.mubr.bf16.gmra.mxu0 %v16487_v32  ;;  %v13583_v47 = vld [vmem:[%s19604_s1 + $0x15ac] ss:$12 sps:$4 sm:$0xff]   ;;  %v220_v20 = vld [vmem:[%s14235_s27 + $0x160] sm:$0xff] }
 0x1cd   : > { %v7518_v59 = vpop.f32.mrf.mxu1  ;;  %8195 = vmatmul.mubr.bf16.gmra.mxu1 %v16489_v6  ;;  %v16519_v48 = vadd.f32 %v7514_v61, %v7402_v51  ;;  %v7406_v56 = vadd.f32 %v7405_v2, %v16109_v52  ;;  %8234 = vmatpush2.bf16.msra.mxu0 %v13569_v10  ;;  %v13586_v40 = vld [vmem:[%s19604_s1 + $0x172c] ss:$12 sps:$4 sm:$0xff]   ;;  %v236_v6 = vld [vmem:[%s14235_s27 + $0x1e0] sm:$0xff]  ;;  %v16533_v51 = vcombine.low %v188_v42, %v204_v44 }
 0x1ce   : > { %8347 = vmatpush2.bf16.msra.mxu1 %v13572_v9  ;;  %v7407_v57 = vpop.f32.mrf.mxu0  ;;  %8235 = vmatprep.subr.bf16.mxu0 %v13577_v49  ;;  %v221_v52 = vld [vmem:[%s14235_s27 + $0x168] sm:$0xff]  ;;  %v16535_v2 = vcombine.low %v189_v38, %v205_v34  ;;  %v13589_v44 = vld [vmem:[%s19604_s1 + $0x1594] ss:$12 sps:$4 sm:$0xff]  }
 0x1cf   : > { %v7520_v1 = vpop.f32.mrf.mxu1  ;;  %8348 = vmatprep.subr.bf16.mxu1 %v13580_v29  ;;  %v16527_v32 = vadd.f32 %v7518_v59, %v7406_v56  ;;  %v7408_v61 = vadd.f32 %v7407_v57, %v16125_v17  ;;  %8237 = vmatprep.mubr.bf16.mxu0 %v16504_v58  ;;  %20078 = vst [vmem:[#allocation199_spill] sm:$0xff] %v16533_v51  ;;  %v13581_v17 = vld [vmem:[%s19604_s1 + $0x15a8] ss:$12 sps:$4 sm:$0xff]  }
 0x1d0   : > { %8350 = vmatprep.mubr.bf16.mxu1 %v16506_v60  ;;  %v7409_v10 = vpop.f32.mrf.mxu0  ;;  %20079 = vst [vmem:[#allocation200_spill] sm:$0xff] %v16535_v2  ;;  %v13584_v59 = vld [vmem:[%s19604_s1 + $0x1728] ss:$12 sps:$4 sm:$0xff]  }
 0x1d1   : > { %v7522_v9 = vpop.f32.mrf.mxu1  ;;  %v16538_v49 = vadd.f32 %v7520_v1, %v7408_v61  ;;  %v7410_v29 = vadd.f32 %v7409_v10, %v16137_v21  ;;  %8236 = vmatpush2.bf16.msra.mxu0 %v13575_v8  ;;  %v13592_v21 = vld [vmem:[%s19604_s1 + $0x1714] ss:$12 sps:$4 sm:$0xff]   ;;  %v16556_v8 = vcombine.high %v220_v20, %v236_v6 }
 0x1d2   : > { %8349 = vmatpush2.bf16.msra.mxu1 %v13578_v14  ;;  %v7411_v56 = vpop.f32.mrf.mxu0  ;;  %8431 = vmatprep.subr.bf16.mxu0 %v13583_v47  ;;  %v16558_v14 = vcombine.high %v221_v52, %v237_v15  ;;  %v13587_v47 = vld [vmem:[%s19604_s1 + $0x1590] ss:$12 sps:$4 sm:$0xff]  }
 0x1d3   : > { %v7524_v42 = vpop.f32.mrf.mxu1  ;;  %8544 = vmatprep.subr.bf16.mxu1 %v13586_v40  ;;  %v16553_v38 = vadd.f32 %v7522_v9, %v7410_v29  ;;  %v7412_v34 = vadd.f32 %v7411_v56, %v16149_v30  ;;  %20080 = vst [vmem:[#allocation201_spill] sm:$0xff] %v16556_v8  ;;  %v13590_v30 = vld [vmem:[%s19604_s1 + $0x1710] ss:$12 sps:$4 sm:$0xff]   ;;  %v13593_v56 = vld [vmem:[%s19604_s1 + $0x1578] ss:$12 sps:$4 sm:$0xff]  }
 0x1d4   : > { %20081 = vst [vmem:[#allocation202_spill] sm:$0xff] %v16558_v14  ;;  %v7561_v57 = vpop.f32.mrf.mxu0  ;;  %8238 = vmatmul.mubr.bf16.vlgmr.msra.gmra.mxu0 %v16533_v51  ;;  %v13595_v29 = vld [vmem:[%s19604_s1 + $0x157c] ss:$12 sps:$4 sm:$0xff]  }
 0x1d5   : > { %v7674_v1 = vpop.f32.mrf.mxu1  ;;  %8351 = vmatmul.mubr.bf16.vlgmr.msra.gmra.mxu1 %v16535_v2  ;;  %v16565_v40 = vadd.f32 %v7524_v42, %v7412_v34  ;;  %v7562_v61 = vadd.f32 %v7561_v57, %v16161_v25  ;;  %8432 = vmatpush1.bf16.msra.mxu0 %v13581_v17  ;;  %v13598_v25 = vld [vmem:[%s19604_s1 + $0x16fc] ss:$12 sps:$4 sm:$0xff]   ;;  %v13596_v42 = vld [vmem:[%s19604_s1 + $0x16f8] ss:$12 sps:$4 sm:$0xff]  }
 0x1d6   : > { %8545 = vmatpush1.bf16.msra.mxu1 %v13584_v59  ;;  %v7563_v10 = vpop.f32.mrf.mxu0  ;;  %8433 = vmatprep.subr.bf16.mxu0 %v13589_v44  ;;  %v252_v44 = vld [vmem:[%s14235_s27 + $0x260] sm:$0xff]  ;;  %v253_v34 = vld [vmem:[%s14235_s27 + $0x268] sm:$0xff] }
 0x1d7   : > { %v7676_v9 = vpop.f32.mrf.mxu1  ;;  %8546 = vmatprep.subr.bf16.mxu1 %v13592_v21  ;;  %v16577_v17 = vadd.f32 %v7674_v1, %v7562_v61  ;;  %v7564_v59 = vadd.f32 %v7563_v10, %v16177_v0  ;;  %8247 = vmatprep.mubr.bf16.mxu0 %v16556_v8  ;;  %v268_v21 = vld [vmem:[%s14235_s27 + $0x2e0] sm:$0xff]  ;;  %v16591_v61 = vcombine.low %v220_v20, %v236_v6  ;;  %v269_v10 = vld [vmem:[%s14235_s27 + $0x2e8] sm:$0xff] }
 0x1d8   : > { %8360 = vmatprep.mubr.bf16.mxu1 %v16558_v14  ;;  %v7565_v57 = vpop.f32.mrf.mxu0  ;;  %v16593_v0 = vcombine.low %v221_v52, %v237_v15  ;;  %v13601_v2 = vld [vmem:[%s19604_s1 + $0x1564] ss:$12 sps:$4 sm:$0xff]   ;;  %v13602_v52 = vld [vmem:[%s19604_s1 + $0x16e0] ss:$12 sps:$4 sm:$0xff]  }
 0x1d9   : > { %v7678_v1 = vpop.f32.mrf.mxu1  ;;  %20082 = vst [vmem:[#allocation203_spill] sm:$0xff] %v16591_v61  ;;  %v16596_v8 = vadd.f32 %v7676_v9, %v7564_v59  ;;  %v7566_v14 = vadd.f32 %v7565_v57, %v16189_v63  ;;  %8434 = vmatpush1.bf16.msra.mxu0 %v13587_v47  ;;  %v13604_v15 = vld [vmem:[%s19604_s1 + $0x16e4] ss:$12 sps:$4 sm:$0xff]   ;;  %v13599_v63 = vld [vmem:[%s19604_s1 + $0x1560] ss:$12 sps:$4 sm:$0xff]   ;;  %v16614_v47 = vcombine.high %v252_v44, %v268_v21 }
 0x1da   : > { %20083 = vst [vmem:[#allocation204_spill] sm:$0xff] %v16593_v0  ;;  %8547 = vmatpush1.bf16.msra.mxu1 %v13590_v30  ;;  %v7567_v51 = vpop.f32.mrf.mxu0  ;;  %8435 = vmatprep.subr.bf16.mxu0 %v13595_v29  ;;  %v16616_v30 = vcombine.high %v253_v34, %v269_v10 }
 0x1db   : > { %v7680_v60 = vpop.f32.mrf.mxu1  ;;  %8548 = vmatprep.subr.bf16.mxu1 %v13598_v25  ;;  %v16605_v6 = vadd.f32 %v7678_v1, %v7566_v14  ;;  %v7568_v20 = vadd.f32 %v7567_v51, %v16198_v43  ;;  %20084 = vst [vmem:[#allocation205_spill] sm:$0xff] %v16614_v47  ;;  %v13607_v43 = vld [vmem:[%s19604_s1 + $0x154c] ss:$12 sps:$4 sm:$0xff]   ;;  %v284_v1 = vld [vmem:[%s14235_s27 + $0x360] sm:$0xff] }
 0x1dc   : > { %20085 = vst [vmem:[#allocation206_spill] sm:$0xff] %v16616_v30  ;;  %v7571_v9 = vpop.f32.mrf.mxu0  ;;  %8248 = vmatmul.mubr.bf16.gmra.mxu0 %v16591_v61  ;;  %v13610_v25 = vld [vmem:[%s19604_s1 + $0x16cc] ss:$12 sps:$4 sm:$0xff]  }
 0x1dd   : > { %v7684_v29 = vpop.f32.mrf.mxu1  ;;  %8361 = vmatmul.mubr.bf16.gmra.mxu1 %v16593_v0  ;;  %v16623_v51 = vadd.f32 %v7680_v60, %v7568_v20  ;;  %v7572_v14 = vadd.f32 %v7571_v9, %v16214_v5  ;;  %8436 = vmatpush1.bf16.msra.mxu0 %v13593_v56  ;;  %v300_v0 = vld [vmem:[%s14235_s27 + $0x3e0] sm:$0xff]  ;;  %v13605_v5 = vld [vmem:[%s19604_s1 + $0x1548] ss:$12 sps:$4 sm:$0xff]   ;;  %v16643_v20 = vcombine.low %v252_v44, %v268_v21 }
 0x1de   : > { %8549 = vmatpush1.bf16.msra.mxu1 %v13596_v42  ;;  %v7573_v59 = vpop.f32.mrf.mxu0  ;;  %8437 = vmatprep.subr.bf16.mxu0 %v13601_v2  ;;  %v13608_v56 = vld [vmem:[%s19604_s1 + $0x16c8] ss:$12 sps:$4 sm:$0xff]   ;;  %v16645_v9 = vcombine.low %v253_v34, %v269_v10  ;;  %v13614_v10 = vld [vmem:[%s19604_s1 + $0x16b0] ss:$12 sps:$4 sm:$0xff]  }
 0x1df   : > { %v7686_v57 = vpop.f32.mrf.mxu1  ;;  %8550 = vmatprep.subr.bf16.mxu1 %v13604_v15  ;;  %v16631_v61 = vadd.f32 %v7684_v29, %v7572_v14  ;;  %v7574_v60 = vadd.f32 %v7573_v59, %v16229_v27  ;;  %8257 = vmatprep.mubr.bf16.mxu0 %v16614_v47  ;;  %v285_v2 = vld [vmem:[%s14235_s27 + $0x368] sm:$0xff]  ;;  %20086 = vst [vmem:[#allocation207_spill] sm:$0xff] %v16643_v20  ;;  %v13613_v59 = vld [vmem:[%s19604_s1 + $0x1534] ss:$12 sps:$4 sm:$0xff]  }
 0x1e0   : > { %8370 = vmatprep.mubr.bf16.mxu1 %v16616_v30  ;;  %v7575_v42 = vpop.f32.mrf.mxu0  ;;  %20087 = vst [vmem:[#allocation208_spill] sm:$0xff] %v16645_v9  ;;  %v301_v27 = vld [vmem:[%s14235_s27 + $0x3e8] sm:$0xff]  ;;  %v13616_v44 = vld [vmem:[%s19604_s1 + $0x16b4] ss:$12 sps:$4 sm:$0xff]  }
 0x1e1   : > { %v7688_v15 = vpop.f32.mrf.mxu1  ;;  %v16648_v29 = vadd.f32 %v7686_v57, %v7574_v60  ;;  %v7576_v14 = vadd.f32 %v7575_v42, %v16241_v35  ;;  %8438 = vmatpush1.bf16.msra.mxu0 %v13599_v63  ;;  %v13611_v35 = vld [vmem:[%s19604_s1 + $0x1530] ss:$12 sps:$4 sm:$0xff]   ;;  %v16666_v63 = vcombine.high %v284_v1, %v300_v0 }
 0x1e2   : > { %8551 = vmatpush1.bf16.msra.mxu1 %v13602_v52  ;;  %v7577_v30 = vpop.f32.mrf.mxu0  ;;  %8439 = vmatprep.subr.bf16.mxu0 %v13607_v43  ;;  %v16668_v52 = vcombine.high %v285_v2, %v301_v27 }
 0x1e3   : > { %v7690_v47 = vpop.f32.mrf.mxu1  ;;  %8552 = vmatprep.subr.bf16.mxu1 %v13610_v25  ;;  %v16657_v21 = vadd.f32 %v7688_v15, %v7576_v14  ;;  %v7578_v34 = vadd.f32 %v7577_v30, %v16256_v16  ;;  %20088 = vst [vmem:[#allocation209_spill] sm:$0xff] %v16666_v63  ;;  %v13619_v16 = vld [vmem:[%s19604_s1 + $0x151c] ss:$12 sps:$4 sm:$0xff]   ;;  %v316_v14 = vld [vmem:[%s14235_s27 + $0x460] sm:$0xff] }
 0x1e4   : > { %20089 = vst [vmem:[#allocation210_spill] sm:$0xff] %v16668_v52  ;;  %v7581_v43 = vpop.f32.mrf.mxu0  ;;  %8258 = vmatmul.mubr.bf16.gmra.mxu0 %v16643_v20  ;;  %v13622_v30 = vld [vmem:[%s19604_s1 + $0x169c] ss:$12 sps:$4 sm:$0xff]  }
 0x1e5   : > { %v7694_v25 = vpop.f32.mrf.mxu1  ;;  %8371 = vmatmul.mubr.bf16.gmra.mxu1 %v16645_v9  ;;  %v16678_v57 = vadd.f32 %v7690_v47, %v7578_v34  ;;  %v7582_v60 = vadd.f32 %v7581_v43, %v16266_v24  ;;  %8440 = vmatpush1.bf16.msra.mxu0 %v13605_v5  ;;  %v332_v9 = vld [vmem:[%s14235_s27 + $0x4e0] sm:$0xff]  ;;  %v317_v5 = vld [vmem:[%s14235_s27 + $0x468] sm:$0xff]  ;;  %v16696_v34 = vcombine.low %v284_v1, %v300_v0 }
 0x1e6   : > { %8553 = vmatpush1.bf16.msra.mxu1 %v13608_v56  ;;  %v7583_v42 = vpop.f32.mrf.mxu0  ;;  %8441 = vmatprep.subr.bf16.mxu0 %v13613_v59  ;;  %v13617_v24 = vld [vmem:[%s19604_s1 + $0x1518] ss:$12 sps:$4 sm:$0xff]   ;;  %v333_v56 = vld [vmem:[%s14235_s27 + $0x4e8] sm:$0xff]  ;;  %v16698_v43 = vcombine.low %v285_v2, %v301_v27  ;;  %v16718_v2 = vcombine.high %v316_v14, %v332_v9 }
 0x1e7   : > { %v7696_v15 = vpop.f32.mrf.mxu1  ;;  %8554 = vmatprep.subr.bf16.mxu1 %v13616_v44  ;;  %v16683_v20 = vadd.f32 %v7694_v25, %v7582_v60  ;;  %v7584_v58 = vadd.f32 %v7583_v42, %v16281_v36  ;;  %8267 = vmatprep.mubr.bf16.mxu0 %v16666_v63  ;;  %v13620_v47 = vld [vmem:[%s19604_s1 + $0x1698] ss:$12 sps:$4 sm:$0xff]   ;;  %20090 = vst [vmem:[#allocation211_spill] sm:$0xff] %v16696_v34  ;;  %v13626_v1 = vld [vmem:[%s19604_s1 + $0x1680] ss:$12 sps:$4 sm:$0xff]  }
 0x1e8   : > { %8380 = vmatprep.mubr.bf16.mxu1 %v16668_v52  ;;  %v7585_v59 = vpop.f32.mrf.mxu0  ;;  %20091 = vst [vmem:[#allocation212_spill] sm:$0xff] %v16698_v43  ;;  %v13625_v60 = vld [vmem:[%s19604_s1 + $0x1504] ss:$12 sps:$4 sm:$0xff]   ;;  %20092 = vst [vmem:[#allocation213_spill] sm:$0xff] %v16718_v2  ;;  %v16720_v27 = vcombine.high %v317_v5, %v333_v56 }
 0x1e9   : > { %v7698_v44 = vpop.f32.mrf.mxu1  ;;  %v16700_v36 = vadd.f32 %v7696_v15, %v7584_v58  ;;  %v7586_v25 = vadd.f32 %v7585_v59, %v16293_v62  ;;  %8442 = vmatpush1.bf16.msra.mxu0 %v13611_v35  ;;  %v13628_v42 = vld [vmem:[%s19604_s1 + $0x1684] ss:$12 sps:$4 sm:$0xff]   ;;  %v13623_v62 = vld [vmem:[%s19604_s1 + $0x1500] ss:$12 sps:$4 sm:$0xff]  }
 0x1ea   : > { %8555 = vmatpush1.bf16.msra.mxu1 %v13614_v10  ;;  %v7587_v52 = vpop.f32.mrf.mxu0  ;;  %8443 = vmatprep.subr.bf16.mxu0 %v13619_v16  ;;  %20093 = vst [vmem:[#allocation214_spill] sm:$0xff] %v16720_v27 }
 0x1eb   : > { %v7700_v63 = vpop.f32.mrf.mxu1  ;;  %8556 = vmatprep.subr.bf16.mxu1 %v13622_v30  ;;  %v16709_v0 = vadd.f32 %v7698_v44, %v7586_v25  ;;  %v7588_v58 = vadd.f32 %v7587_v52, %v16308_v39  ;;  %v13631_v39 = vld [vmem:[%s19604_s1 + $0x166c] ss:$12 sps:$4 sm:$0xff]   ;;  %v348_v44 = vld [vmem:[%s14235_s27 + $0x560] sm:$0xff] }
 0x1ec   : > { %v7591_v35 = vpop.f32.mrf.mxu0  ;;  %8268 = vmatmul.mubr.bf16.gmra.mxu0 %v16696_v34  ;;  %v13634_v52 = vld [vmem:[%s19604_s1 + $0x17ec] ss:$12 sps:$4 sm:$0xff]   ;;  %v364_v25 = vld [vmem:[%s14235_s27 + $0x5e0] sm:$0xff] }
 0x1ed   : > { %v7704_v10 = vpop.f32.mrf.mxu1  ;;  %8381 = vmatmul.mubr.bf16.gmra.mxu1 %v16698_v43  ;;  %v16730_v16 = vadd.f32 %v7700_v63, %v7588_v58  ;;  %v7592_v30 = vadd.f32 %v7591_v35, %v16318_v41  ;;  %8444 = vmatpush1.bf16.msra.mxu0 %v13617_v24  ;;  %v13629_v41 = vld [vmem:[%s19604_s1 + $0x1668] ss:$12 sps:$4 sm:$0xff]   ;;  %v16748_v58 = vcombine.low %v316_v14, %v332_v9 }
 0x1ee   : > { %8557 = vmatpush1.bf16.msra.mxu1 %v13620_v47  ;;  %v7593_v15 = vpop.f32.mrf.mxu0  ;;  %8445 = vmatprep.subr.bf16.mxu0 %v13625_v60  ;;  %v13632_v63 = vld [vmem:[%s19604_s1 + $0x17e8] ss:$12 sps:$4 sm:$0xff]   ;;  %v16750_v35 = vcombine.low %v317_v5, %v333_v56  ;;  %v13638_v5 = vld [vmem:[%s19604_s1 + $0x17d0] ss:$12 sps:$4 sm:$0xff]   ;;  %v16770_v56 = vcombine.high %v348_v44, %v364_v25 }
 0x1ef   : > { %v7706_v59 = vpop.f32.mrf.mxu1  ;;  %8558 = vmatprep.subr.bf16.mxu1 %v13628_v42  ;;  %v16735_v43 = vadd.f32 %v7704_v10, %v7592_v30  ;;  %v7594_v34 = vadd.f32 %v7593_v15, %v16330_v54  ;;  %8277 = vmatprep.mubr.bf16.mxu0 %v16718_v2  ;;  %v349_v24 = vld [vmem:[%s14235_s27 + $0x568] sm:$0xff]  ;;  %20094 = vst [vmem:[#allocation215_spill] sm:$0xff] %v16748_v58  ;;  %v13637_v30 = vld [vmem:[%s19604_s1 + $0x1654] ss:$12 sps:$4 sm:$0xff]  }
 0x1f0   : > { %8390 = vmatprep.mubr.bf16.mxu1 %v16720_v27  ;;  %v365_v47 = vld [vmem:[%s14235_s27 + $0x5e8] sm:$0xff]  ;;  %v7595_v60 = vpop.f32.mrf.mxu0  ;;  %20095 = vst [vmem:[#allocation216_spill] sm:$0xff] %v16750_v35  ;;  %v13640_v15 = vld [vmem:[%s19604_s1 + $0x17d4] ss:$12 sps:$4 sm:$0xff]   ;;  %20096 = vst [vmem:[#allocation217_spill] sm:$0xff] %v16770_v56 }
 0x1f1   : > { %v7708_v42 = vpop.f32.mrf.mxu1  ;;  %v16752_v54 = vadd.f32 %v7706_v59, %v7594_v34  ;;  %v7596_v10 = vadd.f32 %v7595_v60, %v16345_v13  ;;  %8446 = vmatpush1.bf16.msra.mxu0 %v13623_v62  ;;  %v13635_v13 = vld [vmem:[%s19604_s1 + $0x1650] ss:$12 sps:$4 sm:$0xff]   ;;  %v16772_v34 = vcombine.high %v349_v24, %v365_v47 }
 0x1f2   : > { %8559 = vmatpush1.bf16.msra.mxu1 %v13626_v1  ;;  %v7597_v27 = vpop.f32.mrf.mxu0  ;;  %8447 = vmatprep.subr.bf16.mxu0 %v13631_v39 }
 0x1f3   : > { %v7710_v2 = vpop.f32.mrf.mxu1  ;;  %8560 = vmatprep.subr.bf16.mxu1 %v13634_v52  ;;  %v16761_v9 = vadd.f32 %v7708_v42, %v7596_v10  ;;  %v7598_v14 = vadd.f32 %v7597_v27, %v16357_v50  ;;  %20097 = vst [vmem:[#allocation218_spill] sm:$0xff] %v16772_v34  ;;  %v13643_v50 = vld [vmem:[%s19604_s1 + $0x163c] ss:$12 sps:$4 sm:$0xff]   ;;  %v380_v42 = vld [vmem:[%s14235_s27 + $0x660] sm:$0xff] }
 0x1f4   : > { %v7601_v62 = vpop.f32.mrf.mxu0  ;;  %8278 = vmatmul.mubr.bf16.gmra.mxu0 %v16748_v58  ;;  %v13646_v27 = vld [vmem:[%s19604_s1 + $0x17bc] ss:$12 sps:$4 sm:$0xff]   ;;  %v396_v10 = vld [vmem:[%s14235_s27 + $0x6e0] sm:$0xff] }
 0x1f5   : > { %v7714_v1 = vpop.f32.mrf.mxu1  ;;  %8391 = vmatmul.mubr.bf16.gmra.mxu1 %v16750_v35  ;;  %v16782_v39 = vadd.f32 %v7710_v2, %v7598_v14  ;;  %v7602_v52 = vadd.f32 %v7601_v62, %v16369_v4  ;;  %8448 = vmatpush2.bf16.msra.mxu0 %v13629_v41  ;;  %v13641_v4 = vld [vmem:[%s19604_s1 + $0x1638] ss:$12 sps:$4 sm:$0xff]   ;;  %v381_v41 = vld [vmem:[%s14235_s27 + $0x668] sm:$0xff]  ;;  %v16800_v14 = vcombine.low %v348_v44, %v364_v25 }
 0x1f6   : > { %8561 = vmatpush2.bf16.msra.mxu1 %v13632_v63  ;;  %v7603_v59 = vpop.f32.mrf.mxu0  ;;  %8449 = vmatprep.subr.bf16.mxu0 %v13637_v30  ;;  %v13644_v2 = vld [vmem:[%s19604_s1 + $0x17b8] ss:$12 sps:$4 sm:$0xff]   ;;  %v397_v63 = vld [vmem:[%s14235_s27 + $0x6e8] sm:$0xff]  ;;  %v16802_v62 = vcombine.low %v349_v24, %v365_v47  ;;  %v16822_v47 = vcombine.high %v380_v42, %v396_v10 }
 0x1f7   : > { %v7716_v60 = vpop.f32.mrf.mxu1  ;;  %8562 = vmatprep.subr.bf16.mxu1 %v13640_v15  ;;  %v16787_v35 = vadd.f32 %v7714_v1, %v7602_v52  ;;  %v7604_v58 = vadd.f32 %v7603_v59, %v16388_v31  ;;  %8287 = vmatprep.mubr.bf16.mxu0 %v16770_v56  ;;  %20098 = vst [vmem:[#allocation219_spill] sm:$0xff] %v16800_v14  ;;  %v13649_v52 = vld [vmem:[%s19604_s1 + $0x1624] ss:$12 sps:$4 sm:$0xff]   ;;  %v13650_v24 = vld [vmem:[%s19604_s1 + $0x17a0] ss:$12 sps:$4 sm:$0xff]  }
 0x1f8   : > { %8400 = vmatprep.mubr.bf16.mxu1 %v16772_v34  ;;  %v7605_v30 = vpop.f32.mrf.mxu0  ;;  %20099 = vst [vmem:[#allocation220_spill] sm:$0xff] %v16802_v62  ;;  %v13652_v59 = vld [vmem:[%s19604_s1 + $0x17a4] ss:$12 sps:$4 sm:$0xff]   ;;  %20100 = vst [vmem:[#allocation221_spill] sm:$0xff] %v16822_v47 }
 0x1f9   : > { %v7718_v15 = vpop.f32.mrf.mxu1  ;;  %v16804_v31 = vadd.f32 %v7716_v60, %v7604_v58  ;;  %v7606_v1 = vadd.f32 %v7605_v30, %v16397_v45  ;;  %8450 = vmatpush2.bf16.msra.mxu0 %v13635_v13  ;;  %v13647_v45 = vld [vmem:[%s19604_s1 + $0x1620] ss:$12 sps:$4 sm:$0xff]   ;;  %v16824_v58 = vcombine.high %v381_v41, %v397_v63 }
 0x1fa   : > { %8563 = vmatpush2.bf16.msra.mxu1 %v13638_v5  ;;  %v7607_v34 = vpop.f32.mrf.mxu0  ;;  %8451 = vmatprep.subr.bf16.mxu0 %v13643_v50 }
 0x1fb   : > { %v7720_v56 = vpop.f32.mrf.mxu1  ;;  %8564 = vmatprep.subr.bf16.mxu1 %v13646_v27  ;;  %v16813_v44 = vadd.f32 %v7718_v15, %v7606_v1  ;;  %v7608_v25 = vadd.f32 %v7607_v34, %v16415_v22  ;;  %20101 = vst [vmem:[#allocation222_spill] sm:$0xff] %v16824_v58  ;;  %v13655_v22 = vld [vmem:[%s19604_s1 + $0x160c] ss:$12 sps:$4 sm:$0xff]   ;;  %v412_v15 = vld [vmem:[%s14235_s27 + $0x760] sm:$0xff] }
 0x1fc   : > { %v7611_v13 = vpop.f32.mrf.mxu0  ;;  %8288 = vmatmul.mubr.bf16.gmra.mxu0 %v16800_v14  ;;  %v13658_v34 = vld [vmem:[%s19604_s1 + $0x178c] ss:$12 sps:$4 sm:$0xff]   ;;  %v428_v1 = vld [vmem:[%s14235_s27 + $0x7e0] sm:$0xff] }
 0x1fd   : > { %v7724_v5 = vpop.f32.mrf.mxu1  ;;  %8401 = vmatmul.mubr.bf16.gmra.mxu1 %v16802_v62  ;;  %v16834_v50 = vadd.f32 %v7720_v56, %v7608_v25  ;;  %v7612_v27 = vadd.f32 %v7611_v13, %v16423_v3  ;;  %8452 = vmatpush2.bf16.msra.mxu0 %v13641_v4  ;;  %v13653_v3 = vld [vmem:[%s19604_s1 + $0x1608] ss:$12 sps:$4 sm:$0xff]   ;;  %v16852_v25 = vcombine.low %v380_v42, %v396_v10 }
 0x1fe   : > { %8565 = vmatpush2.bf16.msra.mxu1 %v13644_v2  ;;  %v7613_v60 = vpop.f32.mrf.mxu0  ;;  %8453 = vmatprep.subr.bf16.mxu0 %v13649_v52  ;;  %v13656_v56 = vld [vmem:[%s19604_s1 + $0x1788] ss:$12 sps:$4 sm:$0xff]   ;;  %v16854_v13 = vcombine.low %v381_v41, %v397_v63  ;;  %v13662_v41 = vld [vmem:[%s19604_s1 + $0x1770] ss:$12 sps:$4 sm:$0xff]   ;;  %v16874_v63 = vcombine.high %v412_v15, %v428_v1 }
 0x1ff   : > { %v7726_v30 = vpop.f32.mrf.mxu1  ;;  %8566 = vmatprep.subr.bf16.mxu1 %v13652_v59  ;;  %v16839_v62 = vadd.f32 %v7724_v5, %v7612_v27  ;;  %v7614_v14 = vadd.f32 %v7613_v60, %v16434_v26  ;;  %8297 = vmatprep.mubr.bf16.mxu0 %v16822_v47  ;;  %v413_v4 = vld [vmem:[%s14235_s27 + $0x768] sm:$0xff]  ;;  %20102 = vst [vmem:[#allocation223_spill] sm:$0xff] %v16852_v25  ;;  %v13661_v27 = vld [vmem:[%s19604_s1 + $0x15f4] ss:$12 sps:$4 sm:$0xff]  }
 0x200   : > { %8410 = vmatprep.mubr.bf16.mxu1 %v16824_v58  ;;  %v429_v2 = vld [vmem:[%s14235_s27 + $0x7e8] sm:$0xff]  ;;  %v7615_v52 = vpop.f32.mrf.mxu0  ;;  %20103 = vst [vmem:[#allocation224_spill] sm:$0xff] %v16854_v13  ;;  %v13664_v60 = vld [vmem:[%s19604_s1 + $0x1774] ss:$12 sps:$4 sm:$0xff]   ;;  %20104 = vst [vmem:[#allocation225_spill] sm:$0xff] %v16874_v63 }
 0x201   : > { %v7728_v59 = vpop.f32.mrf.mxu1  ;;  %v16856_v26 = vadd.f32 %v7726_v30, %v7614_v14  ;;  %v7616_v5 = vadd.f32 %v7615_v52, %v16449_v33  ;;  %8454 = vmatpush2.bf16.msra.mxu0 %v13647_v45  ;;  %v13659_v33 = vld [vmem:[%s19604_s1 + $0x15f0] ss:$12 sps:$4 sm:$0xff]   ;;  %v16876_v14 = vcombine.high %v413_v4, %v429_v2 }
 0x202   : > { %8567 = vmatpush2.bf16.msra.mxu1 %v13650_v24  ;;  %v7617_v58 = vpop.f32.mrf.mxu0  ;;  %8455 = vmatprep.subr.bf16.mxu0 %v13655_v22 }
 0x203   : > { %v7730_v47 = vpop.f32.mrf.mxu1  ;;  %8568 = vmatprep.subr.bf16.mxu1 %v13658_v34  ;;  %v16865_v42 = vadd.f32 %v7728_v59, %v7616_v5  ;;  %v7618_v10 = vadd.f32 %v7617_v58, %v16461_v46  ;;  %20105 = vst [vmem:[#allocation226_spill] sm:$0xff] %v16876_v14  ;;  %v13667_v46 = vld [vmem:[%s19604_s1 + $0x15dc] ss:$12 sps:$4 sm:$0xff]   ;;  %v190_v59 = vld [vmem:[%s14235_s27 + $0x70] sm:$0xff] }
 0x204   : > { %v7621_v45 = vpop.f32.mrf.mxu0  ;;  %8298 = vmatmul.mubr.bf16.gmra.mxu0 %v16852_v25  ;;  %v13670_v58 = vld [vmem:[%s19604_s1 + $0x175c] ss:$12 sps:$4 sm:$0xff]   ;;  %v206_v5 = vld [vmem:[%s14235_s27 + $0xf0] sm:$0xff] }
 0x205   : > { %v7734_v24 = vpop.f32.mrf.mxu1  ;;  %8411 = vmatmul.mubr.bf16.gmra.mxu1 %v16854_v13  ;;  %v16886_v22 = vadd.f32 %v7730_v47, %v7618_v10  ;;  %v7622_v34 = vadd.f32 %v7621_v45, %v16473_v37  ;;  %8456 = vmatpush2.bf16.msra.mxu0 %v13653_v3  ;;  %v13665_v37 = vld [vmem:[%s19604_s1 + $0x15d8] ss:$12 sps:$4 sm:$0xff]   ;;  %v16904_v10 = vcombine.low %v412_v15, %v428_v1 }
 0x206   : > { %8569 = vmatpush2.bf16.msra.mxu1 %v13656_v56  ;;  %v7623_v30 = vpop.f32.mrf.mxu0  ;;  %8457 = vmatprep.subr.bf16.mxu0 %v13661_v27  ;;  %v13668_v47 = vld [vmem:[%s19604_s1 + $0x1758] ss:$12 sps:$4 sm:$0xff]   ;;  %v16906_v45 = vcombine.low %v413_v4, %v429_v2  ;;  %v13674_v4 = vld [vmem:[%s19604_s1 + $0x1740] ss:$12 sps:$4 sm:$0xff]   ;;  %v16926_v2 = vcombine.high %v190_v59, %v206_v5 }
 0x207   : > { %v7736_v52 = vpop.f32.mrf.mxu1  ;;  %8570 = vmatprep.subr.bf16.mxu1 %v13664_v60  ;;  %v16891_v13 = vadd.f32 %v7734_v24, %v7622_v34  ;;  %v7624_v25 = vadd.f32 %v7623_v30, %v16492_v7  ;;  %8307 = vmatprep.mubr.bf16.mxu0 %v16874_v63  ;;  %v191_v3 = vld [vmem:[%s14235_s27 + $0x78] sm:$0xff]  ;;  %20106 = vst [vmem:[#allocation227_spill] sm:$0xff] %v16904_v10  ;;  %v13673_v34 = vld [vmem:[%s19604_s1 + $0x15c4] ss:$12 sps:$4 sm:$0xff]  }
 0x208   : > { %8420 = vmatprep.mubr.bf16.mxu1 %v16876_v14  ;;  %v207_v56 = vld [vmem:[%s14235_s27 + $0xf8] sm:$0xff]  ;;  %v7625_v27 = vpop.f32.mrf.mxu0  ;;  %20107 = vst [vmem:[#allocation228_spill] sm:$0xff] %v16906_v45  ;;  %v13676_v30 = vld [vmem:[%s19604_s1 + $0x1744] ss:$12 sps:$4 sm:$0xff]   ;;  %20108 = vst [vmem:[#allocation229_spill] sm:$0xff] %v16926_v2 }
 0x209   : > { %v7738_v60 = vpop.f32.mrf.mxu1  ;;  %v16908_v7 = vadd.f32 %v7736_v52, %v7624_v25  ;;  %v7626_v24 = vadd.f32 %v7625_v27, %v16501_v23  ;;  %8458 = vmatpush2.bf16.msra.mxu0 %v13659_v33  ;;  %v13671_v23 = vld [vmem:[%s19604_s1 + $0x15c0] ss:$12 sps:$4 sm:$0xff]   ;;  %v16928_v25 = vcombine.high %v191_v3, %v207_v56 }
 0x20a   : > { %8571 = vmatpush2.bf16.msra.mxu1 %v13662_v41  ;;  %v7627_v14 = vpop.f32.mrf.mxu0  ;;  %8459 = vmatprep.subr.bf16.mxu0 %v13667_v46 }
 0x20b   : > { %v7740_v63 = vpop.f32.mrf.mxu1  ;;  %8572 = vmatprep.subr.bf16.mxu1 %v13670_v58  ;;  %v16917_v15 = vadd.f32 %v7738_v60, %v7626_v24  ;;  %v7628_v1 = vadd.f32 %v7627_v14, %v16519_v48  ;;  %20109 = vst [vmem:[#allocation230_spill] sm:$0xff] %v16928_v25  ;;  %v13677_v48 = vld [vmem:[%s19604_s1 + $0x170] ss:$12 sps:$4 sm:$0xff]  }
 0x20c   : > { %v7631_v33 = vpop.f32.mrf.mxu0  ;;  %8308 = vmatmul.mubr.bf16.gmra.mxu0 %v16904_v10  ;;  %v13679_v14 = vld [vmem:[%s19604_s1 + $0x2f0] ss:$12 sps:$4 sm:$0xff]  }
 0x20d   : > { %v7744_v41 = vpop.f32.mrf.mxu1  ;;  %8421 = vmatmul.mubr.bf16.gmra.mxu1 %v16906_v45  ;;  %v16938_v46 = vadd.f32 %v7740_v63, %v7628_v1  ;;  %v7632_v58 = vadd.f32 %v7631_v33, %v16527_v32  ;;  %8460 = vmatpush2.bf16.msra.mxu0 %v13665_v37  ;;  %v222_v60 = vld [vmem:[%s14235_s27 + $0x170] sm:$0xff]  ;;  %v223_v37 = vld [vmem:[%s14235_s27 + $0x178] sm:$0xff]  ;;  %v16956_v1 = vcombine.low %v190_v59, %v206_v5 }
 0x20e   : > { %8573 = vmatpush2.bf16.msra.mxu1 %v13668_v47  ;;  %v7633_v52 = vpop.f32.mrf.mxu0  ;;  %8461 = vmatprep.subr.bf16.mxu0 %v13673_v34  ;;  %v238_v24 = vld [vmem:[%s14235_s27 + $0x1f0] sm:$0xff]  ;;  %v239_v47 = vld [vmem:[%s14235_s27 + $0x1f8] sm:$0xff]  ;;  %v16958_v33 = vcombine.low %v191_v3, %v207_v56 }
 0x20f   : > { %v7746_v27 = vpop.f32.mrf.mxu1  ;;  %8574 = vmatprep.subr.bf16.mxu1 %v13676_v30  ;;  %v16943_v45 = vadd.f32 %v7744_v41, %v7632_v58  ;;  %v7634_v10 = vadd.f32 %v7633_v52, %v16538_v49  ;;  %8463 = vmatprep.mubr.bf16.mxu0 %v16926_v2  ;;  %v13678_v32 = vld [vmem:[%s19604_s1 + $0xb0] ss:$12 sps:$4 sm:$0xff]   ;;  %20110 = vst [vmem:[#allocation231_spill] sm:$0xff] %v16956_v1  ;;  %v13681_v58 = vld [vmem:[%s19604_s1 + $0x158] ss:$12 sps:$4 sm:$0xff]  }
 0x210   : > { %8576 = vmatprep.mubr.bf16.mxu1 %v16928_v25  ;;  %v13680_v63 = vld [vmem:[%s19604_s1 + $0x230] ss:$12 sps:$4 sm:$0xff]   ;;  %v7635_v34 = vpop.f32.mrf.mxu0  ;;  %20111 = vst [vmem:[#allocation232_spill] sm:$0xff] %v16958_v33  ;;  %v13683_v52 = vld [vmem:[%s19604_s1 + $0x2d8] ss:$12 sps:$4 sm:$0xff]   ;;  %v16969_v3 = vcombine.high %v222_v60, %v238_v24 }
 0x211   : > { %v7748_v30 = vpop.f32.mrf.mxu1  ;;  %v16960_v49 = vadd.f32 %v7746_v27, %v7634_v10  ;;  %v7636_v41 = vadd.f32 %v7635_v34, %v16553_v38  ;;  %8462 = vmatpush2.bf16.msra.mxu0 %v13671_v23  ;;  %v16971_v38 = vcombine.high %v223_v37, %v239_v47  ;;  %v13682_v23 = vld [vmem:[%s19604_s1 + $0x98] ss:$12 sps:$4 sm:$0xff]   ;;  %v16983_v27 = vld [vmem:[%s14235_s27 + $0x270] sm:$0xff] }
 0x212   : > { %8575 = vmatpush2.bf16.msra.mxu1 %v13674_v4  ;;  %v7637_v59 = vpop.f32.mrf.mxu0  ;;  %11842 = vmatprep.subr.bf16.mxu0 %v13677_v48  ;;  %v13684_v4 = vld [vmem:[%s19604_s1 + $0x218] ss:$12 sps:$4 sm:$0xff]   ;;  %v16986_v48 = vld [vmem:[%s14235_s27 + $0x2f0] sm:$0xff] }
 0x213   : > { %v7750_v5 = vpop.f32.mrf.mxu1  ;;  %11906 = vmatprep.subr.bf16.mxu1 %v13679_v14  ;;  %v16973_v56 = vadd.f32 %v7748_v30, %v7636_v41  ;;  %v7638_v10 = vadd.f32 %v7637_v59, %v16565_v40  ;;  %v16991_v30 = vld [vmem:[%s14235_s27 + $0x278] sm:$0xff]  ;;  %v13685_v41 = vld [vmem:[%s19604_s1 + $0x140] ss:$12 sps:$4 sm:$0xff]  }
 0x214   : > { %v7787_v14 = vpop.f32.mrf.mxu0  ;;  %8464 = vmatmul.mubr.bf16.vlgmr.msra.gmra.mxu0 %v16956_v1  ;;  %v271_v40 = vld [vmem:[%s14235_s27 + $0x2f8] sm:$0xff]  ;;  %v13687_v59 = vld [vmem:[%s19604_s1 + $0x2c0] ss:$12 sps:$4 sm:$0xff]  }
 0x215   : > { %v7900_v34 = vpop.f32.mrf.mxu1  ;;  %8577 = vmatmul.mubr.bf16.vlgmr.msra.gmra.mxu1 %v16958_v33  ;;  %v17000_v25 = vadd.f32 %v7750_v5, %v7638_v10  ;;  %v7788_v2 = vadd.f32 %v7787_v14, %v16577_v17  ;;  %11843 = vmatpush3.bf16.msra.mxu0 %v13678_v32  ;;  %v17008_v5 = vcombine.low %v222_v60, %v238_v24  ;;  %v13686_v32 = vld [vmem:[%s19604_s1 + $0x80] ss:$12 sps:$4 sm:$0xff]   ;;  %v13689_v24 = vld [vmem:[%s19604_s1 + $0x128] ss:$12 sps:$4 sm:$0xff]  }
 0x216   : > { %11907 = vmatpush3.bf16.msra.mxu1 %v13680_v63  ;;  %v7789_v1 = vpop.f32.mrf.mxu0  ;;  %8473 = vmatprep.mubr.bf16.mxu0 %v16969_v3  ;;  %v17010_v10 = vcombine.low %v223_v37, %v239_v47  ;;  %v17014_v17 = vcombine.high %v16983_v27, %v16986_v48  ;;  %v17026_v60 = vcombine.high %v16991_v30, %v271_v40 }
 0x217   : > { %v7902_v28 = vpop.f32.mrf.mxu1  ;;  %8586 = vmatprep.mubr.bf16.mxu1 %v16971_v38  ;;  %v17005_v33 = vadd.f32 %v7900_v34, %v7788_v2  ;;  %v7790_v19 = vadd.f32 %v7789_v1, %v16596_v8  ;;  %11844 = vmatprep.subr.bf16.mxu0 %v13681_v58  ;;  %20112 = vst [vmem:[#allocation233_spill] sm:$0xff] %v17008_v5  ;;  %v13688_v8 = vld [vmem:[%s19604_s1 + $0x200] ss:$12 sps:$4 sm:$0xff]   ;;  %v17040_v58 = vld [vmem:[%s14235_s27 + $0x370] sm:$0xff] }
 0x218   : > { %11908 = vmatprep.subr.bf16.mxu1 %v13683_v52  ;;  %v7791_v18 = vpop.f32.mrf.mxu0  ;;  %20113 = vst [vmem:[#allocation234_spill] sm:$0xff] %v17010_v10  ;;  %20114 = vst [vmem:[#allocation235_spill] sm:$0xff] %v17014_v17  ;;  %v17043_v52 = vld [vmem:[%s14235_s27 + $0x3f0] sm:$0xff] }
 0x219   : > { %v7904_v12 = vpop.f32.mrf.mxu1  ;;  %v17022_v2 = vadd.f32 %v7902_v28, %v7790_v19  ;;  %v7792_v63 = vadd.f32 %v7791_v18, %v16605_v6  ;;  %11845 = vmatpush3.bf16.msra.mxu0 %v13682_v23  ;;  %20115 = vst [vmem:[#allocation236_spill] sm:$0xff] %v17026_v60  ;;  %v13691_v19 = vld [vmem:[%s19604_s1 + $0x2a8] ss:$12 sps:$4 sm:$0xff]   ;;  %v17046_v23 = vld [vmem:[%s14235_s27 + $0x378] sm:$0xff] }
 0x21a   : > { %11909 = vmatpush3.bf16.msra.mxu1 %v13684_v4  ;;  %v7793_v28 = vpop.f32.mrf.mxu0  ;;  %11846 = vmatprep.subr.bf16.mxu0 %v13685_v41  ;;  %v17049_v4 = vld [vmem:[%s14235_s27 + $0x3f8] sm:$0xff] }
 0x21b   : > { %v7906_v37 = vpop.f32.mrf.mxu1  ;;  %11910 = vmatprep.subr.bf16.mxu1 %v13687_v59  ;;  %v17034_v18 = vadd.f32 %v7904_v12, %v7792_v63  ;;  %v7794_v6 = vadd.f32 %v7793_v28, %v16623_v51  ;;  %v13690_v12 = vld [vmem:[%s19604_s1 + $0x68] ss:$12 sps:$4 sm:$0xff]  }
 0x21c   : > { %v7797_v47 = vpop.f32.mrf.mxu0  ;;  %8474 = vmatmul.mubr.bf16.gmra.mxu0 %v17008_v5  ;;  %v13692_v51 = vld [vmem:[%s19604_s1 + $0x1e8] ss:$12 sps:$4 sm:$0xff]   ;;  %v367_v5 = vld [vmem:[%s14235_s27 + $0x5f8] sm:$0xff] }
 0x21d   : > { %v7910_v1 = vpop.f32.mrf.mxu1  ;;  %8587 = vmatmul.mubr.bf16.gmra.mxu1 %v17010_v10  ;;  %v17057_v14 = vadd.f32 %v7906_v37, %v7794_v6  ;;  %v7798_v34 = vadd.f32 %v7797_v47, %v16631_v61  ;;  %8483 = vmatprep.mubr.bf16.mxu0 %v17014_v17  ;;  %v13693_v37 = vld [vmem:[%s19604_s1 + $0x110] ss:$12 sps:$4 sm:$0xff]  }
 0x21e   : > { %8596 = vmatprep.mubr.bf16.mxu1 %v17026_v60  ;;  %v7799_v41 = vpop.f32.mrf.mxu0  ;;  %11847 = vmatpush3.bf16.msra.mxu0 %v13686_v32  ;;  %v13695_v61 = vld [vmem:[%s19604_s1 + $0x290] ss:$12 sps:$4 sm:$0xff]   ;;  %v17073_v32 = vcombine.low %v16983_v27, %v16986_v48  ;;  %v17093_v27 = vcombine.high %v17046_v23, %v17049_v4  ;;  %v13697_v48 = vld [vmem:[%s19604_s1 + $0xf8] ss:$12 sps:$4 sm:$0xff]  }
 0x21f   : > { %v7912_v59 = vpop.f32.mrf.mxu1  ;;  %11911 = vmatpush3.bf16.msra.mxu1 %v13688_v8  ;;  %v17062_v63 = vadd.f32 %v7910_v1, %v7798_v34  ;;  %v7800_v28 = vadd.f32 %v7799_v41, %v16648_v29  ;;  %11848 = vmatprep.subr.bf16.mxu0 %v13689_v24  ;;  %v17076_v8 = vcombine.low %v16991_v30, %v271_v40  ;;  %v13694_v29 = vld [vmem:[%s19604_s1 + $0x50] ss:$12 sps:$4 sm:$0xff]   ;;  %v13699_v30 = vld [vmem:[%s19604_s1 + $0x278] ss:$12 sps:$4 sm:$0xff]  }
 0x220   : > { %11912 = vmatprep.subr.bf16.mxu1 %v13691_v19  ;;  %v7801_v6 = vpop.f32.mrf.mxu0  ;;  %20116 = vst [vmem:[#allocation237_spill] sm:$0xff] %v17073_v32  ;;  %v13696_v24 = vld [vmem:[%s19604_s1 + $0x1d0] ss:$12 sps:$4 sm:$0xff]   ;;  %v17089_v34 = vcombine.high %v17040_v58, %v17043_v52  ;;  %20119 = vst [vmem:[#allocation240_spill] sm:$0xff] %v17093_v27 }
 0x221   : > { %v7914_v47 = vpop.f32.mrf.mxu1  ;;  %20117 = vst [vmem:[#allocation238_spill] sm:$0xff] %v17076_v8  ;;  %v17084_v19 = vadd.f32 %v7912_v59, %v7800_v28  ;;  %v7802_v1 = vadd.f32 %v7801_v6, %v16657_v21  ;;  %v17107_v60 = vld [vmem:[%s14235_s27 + $0x470] sm:$0xff]  ;;  %v17113_v10 = vld [vmem:[%s14235_s27 + $0x478] sm:$0xff] }
 0x222   : > { %20118 = vst [vmem:[#allocation239_spill] sm:$0xff] %v17089_v34  ;;  %v7803_v21 = vpop.f32.mrf.mxu0  ;;  %11849 = vmatpush3.bf16.msra.mxu0 %v13690_v12  ;;  %v17110_v17 = vld [vmem:[%s14235_s27 + $0x4f0] sm:$0xff]  ;;  %v17116_v12 = vld [vmem:[%s14235_s27 + $0x4f8] sm:$0xff] }
 0x223   : > { %v7916_v40 = vpop.f32.mrf.mxu1  ;;  %11913 = vmatpush3.bf16.msra.mxu1 %v13692_v51  ;;  %v17101_v41 = vadd.f32 %v7914_v47, %v7802_v1  ;;  %v7804_v59 = vadd.f32 %v7803_v21, %v16678_v57  ;;  %11850 = vmatprep.subr.bf16.mxu0 %v13693_v37  ;;  %v13698_v57 = vld [vmem:[%s19604_s1 + $0x38] ss:$12 sps:$4 sm:$0xff]  }
 0x224   : > { %11914 = vmatprep.subr.bf16.mxu1 %v13695_v61  ;;  %v7807_v28 = vpop.f32.mrf.mxu0  ;;  %8484 = vmatmul.mubr.bf16.gmra.mxu0 %v17073_v32  ;;  %v13700_v51 = vld [vmem:[%s19604_s1 + $0x1b8] ss:$12 sps:$4 sm:$0xff]  }
 0x225   : > { %v7920_v6 = vpop.f32.mrf.mxu1  ;;  %8597 = vmatmul.mubr.bf16.gmra.mxu1 %v17076_v8  ;;  %v17124_v37 = vadd.f32 %v7916_v40, %v7804_v59  ;;  %v7808_v61 = vadd.f32 %v7807_v28, %v16683_v20  ;;  %8493 = vmatprep.mubr.bf16.mxu0 %v17089_v34  ;;  %v13701_v40 = vld [vmem:[%s19604_s1 + $0xe0] ss:$12 sps:$4 sm:$0xff]   ;;  %v366_v34 = vld [vmem:[%s14235_s27 + $0x5f0] sm:$0xff]  ;;  %v351_v32 = vld [vmem:[%s14235_s27 + $0x578] sm:$0xff] }
 0x226   : > { %8606 = vmatprep.mubr.bf16.mxu1 %v17093_v27  ;;  %v7809_v47 = vpop.f32.mrf.mxu0  ;;  %11851 = vmatpush3.bf16.msra.mxu0 %v13694_v29  ;;  %v13703_v20 = vld [vmem:[%s19604_s1 + $0x260] ss:$12 sps:$4 sm:$0xff]   ;;  %v17140_v29 = vcombine.low %v17040_v58, %v17043_v52  ;;  %v17157_v58 = vcombine.high %v17107_v60, %v17110_v17  ;;  %v17161_v52 = vcombine.high %v17113_v10, %v17116_v12  ;;  %v350_v27 = vld [vmem:[%s14235_s27 + $0x570] sm:$0xff] }
 0x227   : > { %v7922_v1 = vpop.f32.mrf.mxu1  ;;  %11915 = vmatpush3.bf16.msra.mxu1 %v13696_v24  ;;  %v17129_v21 = vadd.f32 %v7920_v6, %v7808_v61  ;;  %v7810_v8 = vadd.f32 %v7809_v47, %v16700_v36  ;;  %11852 = vmatprep.subr.bf16.mxu0 %v13697_v48  ;;  %v17144_v24 = vcombine.low %v17046_v23, %v17049_v4  ;;  %v13702_v36 = vld [vmem:[%s19604_s1 + $0x20] ss:$12 sps:$4 sm:$0xff]   ;;  %v13705_v23 = vld [vmem:[%s19604_s1 + $0xc8] ss:$12 sps:$4 sm:$0xff]  }
 0x228   : > { %11916 = vmatprep.subr.bf16.mxu1 %v13699_v30  ;;  %v7811_v59 = vpop.f32.mrf.mxu0  ;;  %v13704_v48 = vld [vmem:[%s19604_s1 + $0x1a0] ss:$12 sps:$4 sm:$0xff]   ;;  %20120 = vst [vmem:[#allocation241_spill] sm:$0xff] %v17161_v52  ;;  %v13707_v4 = vld [vmem:[%s19604_s1 + $0x248] ss:$12 sps:$4 sm:$0xff]  }
 0x229   : > { %v7924_v28 = vpop.f32.mrf.mxu1  ;;  %v17152_v30 = vadd.f32 %v7922_v1, %v7810_v8  ;;  %v7812_v6 = vadd.f32 %v7811_v59, %v16709_v0 }
 0x22a   : > { %v7813_v0 = vpop.f32.mrf.mxu0  ;;  %11853 = vmatpush3.bf16.msra.mxu0 %v13698_v57  ;;  %v13706_v57 = vld [vmem:[%s19604_s1 + $0x8] ss:$12 sps:$4 sm:$0xff]  }
 0x22b   : > { %v7926_v8 = vpop.f32.mrf.mxu1  ;;  %11917 = vmatpush3.bf16.msra.mxu1 %v13700_v51  ;;  %v17169_v61 = vadd.f32 %v7924_v28, %v7812_v6  ;;  %v7814_v47 = vadd.f32 %v7813_v0, %v16730_v16  ;;  %11854 = vmatprep.subr.bf16.mxu0 %v13701_v40  ;;  %v13708_v16 = vld [vmem:[%s19604_s1 + $0x188] ss:$12 sps:$4 sm:$0xff]  }
 0x22c   : > { %11918 = vmatprep.subr.bf16.mxu1 %v13703_v20  ;;  %v7817_v1 = vpop.f32.mrf.mxu0  ;;  %8494 = vmatmul.mubr.bf16.gmra.mxu0 %v17140_v29 }
 0x22d   : > { %v7930_v59 = vpop.f32.mrf.mxu1  ;;  %8607 = vmatmul.mubr.bf16.gmra.mxu1 %v17144_v24  ;;  %v17184_v51 = vadd.f32 %v7926_v8, %v7814_v47  ;;  %v7818_v40 = vadd.f32 %v7817_v1, %v16735_v43  ;;  %8503 = vmatprep.mubr.bf16.mxu0 %v17157_v58  ;;  %v13709_v8 = vld [vmem:[%s19604_s1 + $0x470] ss:$12 sps:$4 sm:$0xff]  }
 0x22e   : > { %8616 = vmatprep.mubr.bf16.mxu1 %v17161_v52  ;;  %v7819_v20 = vpop.f32.mrf.mxu0  ;;  %11855 = vmatpush3.bf16.msra.mxu0 %v13702_v36  ;;  %v13711_v43 = vld [vmem:[%s19604_s1 + $0x5f0] ss:$12 sps:$4 sm:$0xff]   ;;  %v17200_v36 = vcombine.low %v17107_v60, %v17110_v17 }
 0x22f   : > { %v7932_v28 = vpop.f32.mrf.mxu1  ;;  %11919 = vmatpush3.bf16.msra.mxu1 %v13704_v48  ;;  %v17189_v6 = vadd.f32 %v7930_v59, %v7818_v40  ;;  %v7820_v0 = vadd.f32 %v7819_v20, %v16752_v54  ;;  %11856 = vmatprep.subr.bf16.mxu0 %v13705_v23  ;;  %v17204_v48 = vcombine.low %v17113_v10, %v17116_v12 }
 0x230   : > { %11920 = vmatprep.subr.bf16.mxu1 %v13707_v4  ;;  %v7821_v47 = vpop.f32.mrf.mxu0  ;;  %v17209_v4 = vcombine.high %v350_v27, %v366_v34  ;;  %v17211_v59 = vcombine.high %v351_v32, %v367_v5 }
 0x231   : > { %v7934_v1 = vpop.f32.mrf.mxu1  ;;  %20121 = vst [vmem:[#allocation242_spill] sm:$0xff] %v17204_v48  ;;  %v17206_v54 = vadd.f32 %v7932_v28, %v7820_v0  ;;  %v7822_v23 = vadd.f32 %v7821_v47, %v16761_v9  ;;  %v382_v9 = vld [vmem:[%s14235_s27 + $0x670] sm:$0xff]  ;;  %v383_v0 = vld [vmem:[%s14235_s27 + $0x678] sm:$0xff] }
 0x232   : > { %20122 = vst [vmem:[#allocation243_spill] sm:$0xff] %v17209_v4  ;;  %20123 = vst [vmem:[#allocation244_spill] sm:$0xff] %v17211_v59  ;;  %v7823_v40 = vpop.f32.mrf.mxu0  ;;  %11857 = vmatpush3.bf16.msra.mxu0 %v13706_v57  ;;  %v398_v28 = vld [vmem:[%s14235_s27 + $0x6f0] sm:$0xff]  ;;  %v399_v47 = vld [vmem:[%s14235_s27 + $0x6f8] sm:$0xff] }
 0x233   : > { %v7936_v20 = vpop.f32.mrf.mxu1  ;;  %11921 = vmatpush3.bf16.msra.mxu1 %v13708_v16  ;;  %v17213_v17 = vadd.f32 %v7934_v1, %v7822_v23  ;;  %v7824_v10 = vadd.f32 %v7823_v40, %v16782_v39  ;;  %11970 = vmatprep.subr.bf16.mxu0 %v13709_v8  ;;  %v17230_v40 = vcombine.low %v350_v27, %v366_v34 }
 0x234   : > { %12034 = vmatprep.subr.bf16.mxu1 %v13711_v43  ;;  %v7827_v60 = vpop.f32.mrf.mxu0  ;;  %8504 = vmatmul.mubr.bf16.gmra.mxu0 %v17200_v36 }
 0x235   : > { %v7940_v12 = vpop.f32.mrf.mxu1  ;;  %8617 = vmatmul.mubr.bf16.gmra.mxu1 %v17204_v48  ;;  %v17222_v52 = vadd.f32 %v7936_v20, %v7824_v10  ;;  %v7828_v57 = vadd.f32 %v7827_v60, %v16787_v35  ;;  %8513 = vmatprep.mubr.bf16.mxu0 %v17209_v4  ;;  %20124 = vst [vmem:[#allocation245_spill] sm:$0xff] %v17230_v40 }
 0x236   : > { %8626 = vmatprep.mubr.bf16.mxu1 %v17211_v59  ;;  %v7829_v39 = vpop.f32.mrf.mxu0  ;;  %v17232_v20 = vcombine.low %v351_v32, %v367_v5  ;;  %v17237_v60 = vcombine.high %v382_v9, %v398_v28  ;;  %v414_v5 = vld [vmem:[%s14235_s27 + $0x770] sm:$0xff]  ;;  %v17258_v4 = vcombine.low %v382_v9, %v398_v28  ;;  %v17260_v48 = vcombine.low %v383_v0, %v399_v47 }
 0x237   : > { %v7942_v16 = vpop.f32.mrf.mxu1  ;;  %v17227_v8 = vadd.f32 %v7940_v12, %v7828_v57  ;;  %v7830_v43 = vadd.f32 %v7829_v39, %v16804_v31  ;;  %v17239_v12 = vcombine.high %v383_v0, %v399_v47  ;;  %v430_v32 = vld [vmem:[%s14235_s27 + $0x7f0] sm:$0xff] }
 0x238   : > { %v7831_v1 = vpop.f32.mrf.mxu0  ;;  %20125 = vst [vmem:[#allocation246_spill] sm:$0xff] %v17232_v20  ;;  %20126 = vst [vmem:[#allocation247_spill] sm:$0xff] %v17237_v60 }
 0x239   : > { %v7944_v23 = vpop.f32.mrf.mxu1  ;;  %v17234_v35 = vadd.f32 %v7942_v16, %v7830_v43  ;;  %v7832_v10 = vadd.f32 %v7831_v1, %v16813_v44  ;;  %20127 = vst [vmem:[#allocation248_spill] sm:$0xff] %v17239_v12  ;;  %v415_v16 = vld [vmem:[%s14235_s27 + $0x778] sm:$0xff] }
 0x23a   : > { %v7833_v57 = vpop.f32.mrf.mxu0  ;;  %v431_v44 = vld [vmem:[%s14235_s27 + $0x7f8] sm:$0xff]  ;;  %s164_s27 = sand.u32 1, %s14018_s13  }
 0x23b   : > { %v7946_v31 = vpop.f32.mrf.mxu1  ;;  %v17241_v39 = vadd.f32 %v7944_v23, %v7832_v10  ;;  %v7834_v59 = vadd.f32 %v7833_v57, %v16834_v50  ;;  %s12866_s4 = smul.u32 384, %s164_s27  ;;  %s19563_s10 = scalar_lea.sflag [#allocation3], %s164_s27 }
 0x23c   : > { %v7837_v34 = vpop.f32.mrf.mxu0  ;;  %8514 = vmatmul.mubr.bf16.gmra.mxu0 %v17230_v40 }
 0x23d   : > { %v7950_v27 = vpop.f32.mrf.mxu1  ;;  %8627 = vmatmul.mubr.bf16.gmra.mxu1 %v17232_v20  ;;  %v17250_v43 = vadd.f32 %v7946_v31, %v7834_v59  ;;  %v7838_v1 = vadd.f32 %v7837_v34, %v16839_v62  ;;  %8523 = vmatprep.mubr.bf16.mxu0 %v17237_v60  ;;  %v17265_v31 = vcombine.high %v414_v5, %v430_v32  ;;  %s19370_s5 = scalar_lea.vmem [#allocation2], %s12866_s4 }
 0x23e   : > { %8636 = vmatprep.mubr.bf16.mxu1 %v17239_v12  ;;  %v7839_v23 = vpop.f32.mrf.mxu0  ;;  %v17267_v34 = vcombine.high %v415_v16, %v431_v44  ;;  %s10741_s7 = sshll.u32 %s19370_s5, 4  ;;  %s19553_s7 = int_to_ptr.vmem [resolvable:$true] %s10741_s7 }
 0x23f   : > { %v7952_v50 = vpop.f32.mrf.mxu1  ;;  %v17255_v10 = vadd.f32 %v7950_v27, %v7838_v1  ;;  %v7840_v57 = vadd.f32 %v7839_v23, %v16856_v26  ;;  %s13966_s11 = scalar_lea.vmem %s19553_s7, 6144  ;;  %p13973_p0 = scmp.lt.s32.totalorder %s19553_s7, %s13971_s19 }
 0x240   : > { %v7841_v40 = vpop.f32.mrf.mxu0  ;;  %p13967_p11 = scmp.ne.s32.totalorder %s19553_s7, %s13966_s11  ;;  %p13974_p1 = scmp.lt.s32.totalorder %s13972_s20, %s13966_s11 }
 0x241   : > { %v7954_v20 = vpop.f32.mrf.mxu1  ;;  %v17262_v59 = vadd.f32 %v7952_v50, %v7840_v57  ;;  %v7842_v62 = vadd.f32 %v7841_v40, %v16865_v42  ;;  %v17284_v50 = vcombine.low %v415_v16, %v431_v44  ;;  %v13710_v44 = vld [vmem:[%s19604_s1 + $0x3b0] ss:$12 sps:$4 sm:$0xff]  }
 0x242   : > { %v7843_v12 = vpop.f32.mrf.mxu0  ;;  %p13968_p12 = pnand %p13967_p11, %p14089_p5  ;;  %p13975_p2 = por %p13974_p1, %p13973_p0 }
 0x243   : > { %v7956_v60 = vpop.f32.mrf.mxu1  ;;  %v17269_v27 = vadd.f32 %v7954_v20, %v7842_v62  ;;  %v7844_v26 = vadd.f32 %v7843_v12, %v16886_v22  ;;  %v17282_v12 = vcombine.low %v414_v5, %v430_v32  ;;  %20128 = vst [vmem:[#allocation249_spill] sm:$0xff] %v17284_v50 }
 0x244   : > { %v7847_v1 = vpop.f32.mrf.mxu0  ;;  %8524 = vmatmul.mubr.bf16.gmra.mxu0 %v17258_v4  ;;  %p13969_p13 = pneg %p13968_p12 }
 0x245   : > { %v7960_v23 = vpop.f32.mrf.mxu1  ;;  %8637 = vmatmul.mubr.bf16.gmra.mxu1 %v17260_v48  ;;  %v17274_v9 = vadd.f32 %v7956_v60, %v7844_v26  ;;  %v7848_v42 = vadd.f32 %v7847_v1, %v16891_v13  ;;  %8533 = vmatprep.mubr.bf16.mxu0 %v17265_v31 }
 0x246   : > { %8646 = vmatprep.mubr.bf16.mxu1 %v17267_v34  ;;  %v7849_v28 = vpop.f32.mrf.mxu0  ;;  %p13976_p3 = pnand %p13975_p2, %p13969_p13 }
 0x247   : > { %v7962_v0 = vpop.f32.mrf.mxu1  ;;  %v17279_v47 = vadd.f32 %v7960_v23, %v7848_v42  ;;  %v7850_v22 = vadd.f32 %v7849_v28, %v16908_v7  ;;  %v13712_v28 = vld [vmem:[%s19604_s1 + $0x530] ss:$12 sps:$4 sm:$0xff]  }
 0x248   : > { %v7851_v40 = vpop.f32.mrf.mxu0 }
 0x249   : > { %v7964_v20 = vpop.f32.mrf.mxu1  ;;  %v17286_v60 = vadd.f32 %v7962_v0, %v7850_v22  ;;  %v7852_v13 = vadd.f32 %v7851_v40, %v16917_v15 }
 0x24a   : > { %v7853_v57 = vpop.f32.mrf.mxu0 }
 0x24b   : > { %v7966_v62 = vpop.f32.mrf.mxu1  ;;  %v17289_v26 = vadd.f32 %v7964_v20, %v7852_v13  ;;  %v7854_v1 = vadd.f32 %v7853_v57, %v16938_v46 }
 0x24c   : > { %v7857_v23 = vpop.f32.mrf.mxu0  ;;  %8534 = vmatmul.mubr.bf16.gmra.mxu0 %v17282_v12 }
 0x24d   : > { %v7970_v42 = vpop.f32.mrf.mxu1  ;;  %8647 = vmatmul.mubr.bf16.gmra.mxu1 %v17284_v50  ;;  %v17294_v7 = vadd.f32 %v7966_v62, %v7854_v1  ;;  %v7858_v5 = vadd.f32 %v7857_v23, %v16943_v45  ;;  %8689 = vmatprep.mubr.bf16.mxu0 %v14256_v53  ;;  %v13714_v62 = vld [vmem:[%s19604_s1 + $0x398] ss:$12 sps:$4 sm:$0xff]  }
 0x24e   : > { %8786 = vmatprep.mubr.bf16.mxu1 %v14261_v55  ;;  %v7859_v15 = vpop.f32.mrf.mxu0  ;;  %v13713_v55 = vld [vmem:[%s19604_s1 + $0x458] ss:$12 sps:$4 sm:$0xff]  }
 0x24f   : > { %v7972_v32 = vpop.f32.mrf.mxu1  ;;  %v17299_v16 = vadd.f32 %v7970_v42, %v7858_v5  ;;  %v7860_v46 = vadd.f32 %v7859_v15, %v16960_v49  ;;  %v13715_v49 = vld [vmem:[%s19604_s1 + $0x5d8] ss:$12 sps:$4 sm:$0xff]   ;;  %v13717_v5 = vld [vmem:[%s19604_s1 + $0x440] ss:$12 sps:$4 sm:$0xff]  }
 0x250   : > { %v7861_v0 = vpop.f32.mrf.mxu0  ;;  %v20129_v42 = vld [vmem:[#allocation5_spill] sm:$0xff] }
 0x251   : > { %v7974_v45 = vpop.f32.mrf.mxu1  ;;  %v17308_v22 = vadd.f32 %v7972_v32, %v7860_v46  ;;  %v7862_v53 = vadd.f32 %v7861_v0, %v16973_v56  ;;  %v13716_v56 = vld [vmem:[%s19604_s1 + $0x518] ss:$12 sps:$4 sm:$0xff]  }
 0x252   : > { %v7863_v40 = vpop.f32.mrf.mxu0 }
 0x253   : > { %v7976_v20 = vpop.f32.mrf.mxu1  ;;  %v17317_v13 = vadd.f32 %v7974_v45, %v7862_v53  ;;  %v7864_v57 = vadd.f32 %v7863_v40, %v17000_v25  ;;  %v13719_v25 = vld [vmem:[%s19604_s1 + $0x5c0] ss:$12 sps:$4 sm:$0xff]  }
 0x254   : > { %v8013_v1 = vpop.f32.mrf.mxu0  ;;  %8690 = vmatmul.mubr.bf16.vlgmr.msra.gmra.mxu0 %v14320_v11  ;;  %v20130_v45 = vld [vmem:[#allocation6_spill] sm:$0xff]  ;;  %v20131_v11 = vld [vmem:[#allocation7_spill] sm:$0xff] }
 0x255   : > { %v8126_v23 = vpop.f32.mrf.mxu1  ;;  %8787 = vmatmul.mubr.bf16.vlgmr.msra.gmra.mxu1 %v20129_v42  ;;  %v17334_v15 = vadd.f32 %v7976_v20, %v7864_v57  ;;  %v8014_v32 = vadd.f32 %v8013_v1, %v17005_v33  ;;  %11971 = vmatpush3.bf16.msra.mxu0 %v13710_v44  ;;  %v13718_v33 = vld [vmem:[%s19604_s1 + $0x380] ss:$12 sps:$4 sm:$0xff]  }
 0x256   : > { %12035 = vmatpush3.bf16.msra.mxu1 %v13712_v28  ;;  %v8015_v46 = vpop.f32.mrf.mxu0  ;;  %8697 = vmatprep.mubr.bf16.mxu0 %v20130_v45  ;;  %v13720_v44 = vld [vmem:[%s19604_s1 + $0x500] ss:$12 sps:$4 sm:$0xff]  }
 0x257   : > { %v8128_v0 = vpop.f32.mrf.mxu1  ;;  %8794 = vmatprep.mubr.bf16.mxu1 %v20131_v11  ;;  %v17339_v53 = vadd.f32 %v8126_v23, %v8014_v32  ;;  %v8016_v40 = vadd.f32 %v8015_v46, %v17022_v2  ;;  %11972 = vmatprep.subr.bf16.mxu0 %v13713_v55  ;;  %v13721_v2 = vld [vmem:[%s19604_s1 + $0x428] ss:$12 sps:$4 sm:$0xff]  }
 0x258   : > { %12036 = vmatprep.subr.bf16.mxu1 %v13715_v49  ;;  %v8017_v42 = vpop.f32.mrf.mxu0  ;;  %v13723_v55 = vld [vmem:[%s19604_s1 + $0x5a8] ss:$12 sps:$4 sm:$0xff]  }
 0x259   : > { %v8130_v50 = vpop.f32.mrf.mxu1  ;;  %v17348_v28 = vadd.f32 %v8128_v0, %v8016_v40  ;;  %v8018_v20 = vadd.f32 %v8017_v42, %v17034_v18  ;;  %11973 = vmatpush3.bf16.msra.mxu0 %v13714_v62  ;;  %v20132_v62 = vld [vmem:[#allocation8_spill] sm:$0xff]  ;;  %v13722_v46 = vld [vmem:[%s19604_s1 + $0x368] ss:$12 sps:$4 sm:$0xff]  }
 0x25a   : > { %12037 = vmatpush3.bf16.msra.mxu1 %v13716_v56  ;;  %v8019_v49 = vpop.f32.mrf.mxu0  ;;  %11974 = vmatprep.subr.bf16.mxu0 %v13717_v5  ;;  %v20133_v56 = vld [vmem:[#allocation9_spill] sm:$0xff]  ;;  %v13724_v0 = vld [vmem:[%s19604_s1 + $0x4e8] ss:$12 sps:$4 sm:$0xff]  }
 0x25b   : > { %v8132_v57 = vpop.f32.mrf.mxu1  ;;  %12038 = vmatprep.subr.bf16.mxu1 %v13719_v25  ;;  %v17357_v1 = vadd.f32 %v8130_v50, %v8018_v20  ;;  %v8020_v23 = vadd.f32 %v8019_v49, %v17057_v14  ;;  %v20134_v25 = vld [vmem:[#allocation10_spill] sm:$0xff]  ;;  %v20135_v14 = vld [vmem:[#allocation11_spill] sm:$0xff] }
 0x25c   : > { %v8023_v32 = vpop.f32.mrf.mxu0  ;;  %8698 = vmatmul.mubr.bf16.gmra.mxu0 %v20132_v62  ;;  %v13725_v20 = vld [vmem:[%s19604_s1 + $0x410] ss:$12 sps:$4 sm:$0xff]  }
 0x25d   : > { %v8136_v18 = vpop.f32.mrf.mxu1  ;;  %8795 = vmatmul.mubr.bf16.gmra.mxu1 %v20133_v56  ;;  %v17368_v5 = vadd.f32 %v8132_v57, %v8020_v23  ;;  %v8024_v50 = vadd.f32 %v8023_v32, %v17062_v63  ;;  %8705 = vmatprep.mubr.bf16.mxu0 %v20134_v25  ;;  %v13727_v63 = vld [vmem:[%s19604_s1 + $0x590] ss:$12 sps:$4 sm:$0xff]   ;;  %v13731_v23 = vld [vmem:[%s19604_s1 + $0x578] ss:$12 sps:$4 sm:$0xff]  }
 0x25e   : > { %8802 = vmatprep.mubr.bf16.mxu1 %v20135_v14  ;;  %v8025_v45 = vpop.f32.mrf.mxu0  ;;  %11975 = vmatpush3.bf16.msra.mxu0 %v13718_v33  ;;  %v13726_v33 = vld [vmem:[%s19604_s1 + $0x350] ss:$12 sps:$4 sm:$0xff]   ;;  %v20137_v14 = vld [vmem:[#allocation13_spill] sm:$0xff] }
 0x25f   : > { %v8138_v11 = vpop.f32.mrf.mxu1  ;;  %12039 = vmatpush3.bf16.msra.mxu1 %v13720_v44  ;;  %v17373_v40 = vadd.f32 %v8136_v18, %v8024_v50  ;;  %v8026_v42 = vadd.f32 %v8025_v45, %v17084_v19  ;;  %11976 = vmatprep.subr.bf16.mxu0 %v13721_v2  ;;  %v13728_v19 = vld [vmem:[%s19604_s1 + $0x4d0] ss:$12 sps:$4 sm:$0xff]   ;;  %v13730_v45 = vld [vmem:[%s19604_s1 + $0x338] ss:$12 sps:$4 sm:$0xff]  }
 0x260   : > { %12040 = vmatprep.subr.bf16.mxu1 %v13723_v55  ;;  %v8027_v49 = vpop.f32.mrf.mxu0  ;;  %v13729_v55 = vld [vmem:[%s19604_s1 + $0x3f8] ss:$12 sps:$4 sm:$0xff]  }
 0x261   : > { %v8140_v57 = vpop.f32.mrf.mxu1  ;;  %v17388_v44 = vadd.f32 %v8138_v11, %v8026_v42  ;;  %v8028_v2 = vadd.f32 %v8027_v49, %v17101_v41  ;;  %v20136_v25 = vld [vmem:[#allocation12_spill] sm:$0xff]  ;;  %v20138_v11 = vld [vmem:[#allocation14_spill] sm:$0xff]  ;;  %v20139_v42 = vld [vmem:[#allocation15_spill] sm:$0xff] }
 0x262   : > { %v8029_v32 = vpop.f32.mrf.mxu0  ;;  %11977 = vmatpush3.bf16.msra.mxu0 %v13722_v46  ;;  %v13732_v46 = vld [vmem:[%s19604_s1 + $0x4b8] ss:$12 sps:$4 sm:$0xff]  }
 0x263   : > { %v8142_v18 = vpop.f32.mrf.mxu1  ;;  %12041 = vmatpush3.bf16.msra.mxu1 %v13724_v0  ;;  %v17397_v62 = vadd.f32 %v8140_v57, %v8028_v2  ;;  %v8030_v56 = vadd.f32 %v8029_v32, %v17124_v37  ;;  %11978 = vmatprep.subr.bf16.mxu0 %v13725_v20  ;;  %v13733_v2 = vld [vmem:[%s19604_s1 + $0x3e0] ss:$12 sps:$4 sm:$0xff]  }
 0x264   : > { %12042 = vmatprep.subr.bf16.mxu1 %v13727_v63  ;;  %v8033_v50 = vpop.f32.mrf.mxu0  ;;  %8706 = vmatmul.mubr.bf16.gmra.mxu0 %v20136_v25  ;;  %v13737_v25 = vld [vmem:[%s19604_s1 + $0x3c8] ss:$12 sps:$4 sm:$0xff]  }
 0x265   : > { %v8146_v41 = vpop.f32.mrf.mxu1  ;;  %8803 = vmatmul.mubr.bf16.gmra.mxu1 %v20137_v14  ;;  %v17408_v0 = vadd.f32 %v8142_v18, %v8030_v56  ;;  %v8034_v37 = vadd.f32 %v8033_v50, %v17129_v21  ;;  %8713 = vmatprep.mubr.bf16.mxu0 %v20138_v11  ;;  %v13735_v21 = vld [vmem:[%s19604_s1 + $0x560] ss:$12 sps:$4 sm:$0xff]   ;;  %v13739_v14 = vld [vmem:[%s19604_s1 + $0x548] ss:$12 sps:$4 sm:$0xff]   ;;  %v20140_v11 = vld [vmem:[#allocation16_spill] sm:$0xff] }
 0x266   : > { %8810 = vmatprep.mubr.bf16.mxu1 %v20139_v42  ;;  %v8035_v20 = vpop.f32.mrf.mxu0  ;;  %11979 = vmatpush3.bf16.msra.mxu0 %v13726_v33  ;;  %v13734_v33 = vld [vmem:[%s19604_s1 + $0x320] ss:$12 sps:$4 sm:$0xff]  }
 0x267   : > { %v8148_v63 = vpop.f32.mrf.mxu1  ;;  %12043 = vmatpush3.bf16.msra.mxu1 %v13728_v19  ;;  %v17413_v49 = vadd.f32 %v8146_v41, %v8034_v37  ;;  %v8036_v57 = vadd.f32 %v8035_v20, %v17152_v30  ;;  %11980 = vmatprep.subr.bf16.mxu0 %v13729_v55  ;;  %v13736_v30 = vld [vmem:[%s19604_s1 + $0x4a0] ss:$12 sps:$4 sm:$0xff]  }
 0x268   : > { %12044 = vmatprep.subr.bf16.mxu1 %v13731_v23  ;;  %v8037_v32 = vpop.f32.mrf.mxu0 }
 0x269   : > { %v8150_v18 = vpop.f32.mrf.mxu1  ;;  %v17428_v19 = vadd.f32 %v8148_v63, %v8036_v57  ;;  %v8038_v55 = vadd.f32 %v8037_v32, %v17169_v61  ;;  %v20142_v63 = vld [vmem:[#allocation18_spill] sm:$0xff]  ;;  %v20143_v57 = vld [vmem:[#allocation19_spill] sm:$0xff] }
 0x26a   : > { %v8039_v23 = vpop.f32.mrf.mxu0  ;;  %11981 = vmatpush3.bf16.msra.mxu0 %v13730_v45  ;;  %v20141_v45 = vld [vmem:[#allocation17_spill] sm:$0xff] }
 0x26b   : > { %v8152_v56 = vpop.f32.mrf.mxu1  ;;  %12045 = vmatpush3.bf16.msra.mxu1 %v13732_v46  ;;  %v17431_v50 = vadd.f32 %v8150_v18, %v8038_v55  ;;  %v8040_v41 = vadd.f32 %v8039_v23, %v17184_v51  ;;  %11982 = vmatprep.subr.bf16.mxu0 %v13733_v2  ;;  %v13738_v51 = vld [vmem:[%s19604_s1 + $0x308] ss:$12 sps:$4 sm:$0xff]   ;;  %v13741_v55 = vld [vmem:[%s19604_s1 + $0x770] ss:$12 sps:$4 sm:$0xff]  }
 0x26c   : > { %12046 = vmatprep.subr.bf16.mxu1 %v13735_v21  ;;  %v8043_v37 = vpop.f32.mrf.mxu0  ;;  %8714 = vmatmul.mubr.bf16.gmra.mxu0 %v20140_v11  ;;  %v13740_v46 = vld [vmem:[%s19604_s1 + $0x488] ss:$12 sps:$4 sm:$0xff]   ;;  %v20144_v11 = vld [vmem:[#allocation20_spill] sm:$0xff] }
 0x26d   : > { %v8156_v61 = vpop.f32.mrf.mxu1  ;;  %8811 = vmatmul.mubr.bf16.gmra.mxu1 %v20141_v45  ;;  %v17448_v42 = vadd.f32 %v8152_v56, %v8040_v41  ;;  %v8044_v20 = vadd.f32 %v8043_v37, %v17189_v6  ;;  %8721 = vmatprep.mubr.bf16.mxu0 %v20142_v63  ;;  %v13743_v6 = vld [vmem:[%s19604_s1 + $0x8f0] ss:$12 sps:$4 sm:$0xff]   ;;  %v20145_v45 = vld [vmem:[#allocation21_spill] sm:$0xff]  ;;  %v20146_v63 = vld [vmem:[#allocation22_spill] sm:$0xff] }
 0x26e   : > { %8818 = vmatprep.mubr.bf16.mxu1 %v20143_v57  ;;  %v8045_v2 = vpop.f32.mrf.mxu0  ;;  %11983 = vmatpush3.bf16.msra.mxu0 %v13734_v33 }
 0x26f   : > { %v8158_v21 = vpop.f32.mrf.mxu1  ;;  %12047 = vmatpush3.bf16.msra.mxu1 %v13736_v30  ;;  %v17453_v32 = vadd.f32 %v8156_v61, %v8044_v20  ;;  %v8046_v18 = vadd.f32 %v8045_v2, %v17206_v54  ;;  %11984 = vmatprep.subr.bf16.mxu0 %v13737_v25 }
 0x270   : > { %12048 = vmatprep.subr.bf16.mxu1 %v13739_v14  ;;  %v8047_v23 = vpop.f32.mrf.mxu0 }
 0x271   : > { %v8160_v56 = vpop.f32.mrf.mxu1  ;;  %v17462_v41 = vadd.f32 %v8158_v21, %v8046_v18  ;;  %v8048_v33 = vadd.f32 %v8047_v23, %v17213_v17 }
 0x272   : > { %v8049_v30 = vpop.f32.mrf.mxu0  ;;  %11985 = vmatpush3.bf16.msra.mxu0 %v13738_v51  ;;  %v20147_v51 = vld [vmem:[#allocation23_spill] sm:$0xff] }
 0x273   : > { %v8162_v37 = vpop.f32.mrf.mxu1  ;;  %12049 = vmatpush3.bf16.msra.mxu1 %v13740_v46  ;;  %v17465_v54 = vadd.f32 %v8160_v56, %v8048_v33  ;;  %v8050_v25 = vadd.f32 %v8049_v30, %v17222_v52  ;;  %12098 = vmatprep.subr.bf16.mxu0 %v13741_v55 }
 0x274   : > { %12162 = vmatprep.subr.bf16.mxu1 %v13743_v6  ;;  %v8053_v14 = vpop.f32.mrf.mxu0  ;;  %8722 = vmatmul.mubr.bf16.gmra.mxu0 %v20144_v11  ;;  %v20150_v11 = vld [vmem:[#allocation26_spill] sm:$0xff] }
 0x275   : > { %v8166_v61 = vpop.f32.mrf.mxu1  ;;  %8819 = vmatmul.mubr.bf16.gmra.mxu1 %v20145_v45  ;;  %v17470_v20 = vadd.f32 %v8162_v37, %v8050_v25  ;;  %v8054_v17 = vadd.f32 %v8053_v14, %v17227_v8  ;;  %8729 = vmatprep.mubr.bf16.mxu0 %v20146_v63  ;;  %v20148_v25 = vld [vmem:[#allocation24_spill] sm:$0xff]  ;;  %v20149_v14 = vld [vmem:[#allocation25_spill] sm:$0xff]  ;;  %v20151_v45 = vld [vmem:[#allocation27_spill] sm:$0xff] }
 0x276   : > { %8826 = vmatprep.mubr.bf16.mxu1 %v20147_v51  ;;  %v8055_v46 = vpop.f32.mrf.mxu0 }
 0x277   : > { %v8168_v57 = vpop.f32.mrf.mxu1  ;;  %v17475_v2 = vadd.f32 %v8166_v61, %v8054_v17  ;;  %v8056_v52 = vadd.f32 %v8055_v46, %v17234_v35 }
 0x278   : > { %v8057_v21 = vpop.f32.mrf.mxu0 }
 0x279   : > { %v8170_v18 = vpop.f32.mrf.mxu1  ;;  %v17478_v55 = vadd.f32 %v8168_v57, %v8056_v52  ;;  %v8058_v6 = vadd.f32 %v8057_v21, %v17241_v39 }
 0x27a   : > { %v8059_v23 = vpop.f32.mrf.mxu0 }
 0x27b   : > { %v8172_v56 = vpop.f32.mrf.mxu1  ;;  %v17481_v33 = vadd.f32 %v8170_v18, %v8058_v6  ;;  %v8060_v8 = vadd.f32 %v8059_v23, %v17250_v43 }
 0x27c   : > { %v8063_v30 = vpop.f32.mrf.mxu0  ;;  %8730 = vmatmul.mubr.bf16.gmra.mxu0 %v20148_v25  ;;  %v20154_v25 = vld [vmem:[#allocation30_spill] sm:$0xff] }
 0x27d   : > { %v8176_v37 = vpop.f32.mrf.mxu1  ;;  %8827 = vmatmul.mubr.bf16.gmra.mxu1 %v20149_v14  ;;  %v17486_v61 = vadd.f32 %v8172_v56, %v8060_v8  ;;  %v8064_v35 = vadd.f32 %v8063_v30, %v17255_v10  ;;  %8737 = vmatprep.mubr.bf16.mxu0 %v20150_v11  ;;  %v20152_v8 = vld [vmem:[#allocation28_spill] sm:$0xff]  ;;  %v20153_v30 = vld [vmem:[#allocation29_spill] sm:$0xff]  ;;  %v20155_v14 = vld [vmem:[#allocation31_spill] sm:$0xff] }
 0x27e   : > { %8834 = vmatprep.mubr.bf16.mxu1 %v20151_v45  ;;  %v8065_v39 = vpop.f32.mrf.mxu0 }
 0x27f   : > { %v8178_v17 = vpop.f32.mrf.mxu1  ;;  %v17491_v63 = vadd.f32 %v8176_v37, %v8064_v35  ;;  %v8066_v43 = vadd.f32 %v8065_v39, %v17262_v59 }
 0x280   : > { %v8067_v51 = vpop.f32.mrf.mxu0 }
 0x281   : > { %v8180_v46 = vpop.f32.mrf.mxu1  ;;  %v17494_v57 = vadd.f32 %v8178_v17, %v8066_v43  ;;  %v8068_v52 = vadd.f32 %v8067_v51, %v17269_v27 }
 0x282   : > { %v8069_v21 = vpop.f32.mrf.mxu0 }
 0x283   : > { %v8182_v18 = vpop.f32.mrf.mxu1  ;;  %v17497_v6 = vadd.f32 %v8180_v46, %v8068_v52  ;;  %v8070_v10 = vadd.f32 %v8069_v21, %v17274_v9 }
 0x284   : > { %v8073_v23 = vpop.f32.mrf.mxu0  ;;  %8738 = vmatmul.mubr.bf16.gmra.mxu0 %v20152_v8  ;;  %v20158_v8 = vld [vmem:[#allocation34_spill] sm:$0xff] }
 0x285   : > { %v8186_v56 = vpop.f32.mrf.mxu1  ;;  %8835 = vmatmul.mubr.bf16.gmra.mxu1 %v20153_v30  ;;  %v17502_v37 = vadd.f32 %v8182_v18, %v8070_v10  ;;  %v8074_v59 = vadd.f32 %v8073_v23, %v17279_v47  ;;  %8745 = vmatprep.mubr.bf16.mxu0 %v20154_v25  ;;  %v20156_v10 = vld [vmem:[#allocation32_spill] sm:$0xff]  ;;  %v20157_v23 = vld [vmem:[#allocation33_spill] sm:$0xff]  ;;  %v20159_v30 = vld [vmem:[#allocation35_spill] sm:$0xff] }
 0x286   : > { %8842 = vmatprep.mubr.bf16.mxu1 %v20155_v14  ;;  %v8075_v27 = vpop.f32.mrf.mxu0 }
 0x287   : > { %v8188_v35 = vpop.f32.mrf.mxu1  ;;  %v17507_v11 = vadd.f32 %v8186_v56, %v8074_v59  ;;  %v8076_v9 = vadd.f32 %v8075_v27, %v17286_v60 }
 0x288   : > { %v8077_v45 = vpop.f32.mrf.mxu0 }
 0x289   : > { %v8190_v39 = vpop.f32.mrf.mxu1  ;;  %v17510_v17 = vadd.f32 %v8188_v35, %v8076_v9  ;;  %v8078_v43 = vadd.f32 %v8077_v45, %v17289_v26  ;;  %v13744_v45 = vld [vmem:[%s19604_s1 + $0x830] ss:$12 sps:$4 sm:$0xff]  }
 0x28a   : > { %v8079_v51 = vpop.f32.mrf.mxu0 }
 0x28b   : > { %v8192_v46 = vpop.f32.mrf.mxu1  ;;  %v17513_v52 = vadd.f32 %v8190_v39, %v8078_v43  ;;  %v8080_v47 = vadd.f32 %v8079_v51, %v17294_v7 }
 0x28c   : > { %v8083_v21 = vpop.f32.mrf.mxu0  ;;  %8746 = vmatmul.mubr.bf16.gmra.mxu0 %v20156_v10  ;;  %v20161_v10 = vld [vmem:[#allocation37_spill] sm:$0xff] }
 0x28d   : > { %v8196_v18 = vpop.f32.mrf.mxu1  ;;  %8843 = vmatmul.mubr.bf16.gmra.mxu1 %v20157_v23  ;;  %v17518_v56 = vadd.f32 %v8192_v46, %v8080_v47  ;;  %v8084_v60 = vadd.f32 %v8083_v21, %v17299_v16  ;;  %8883 = vmatprep.mubr.bf16.mxu0 %v20158_v8  ;;  %v13742_v16 = vld [vmem:[%s19604_s1 + $0x6b0] ss:$12 sps:$4 sm:$0xff]   ;;  %v13745_v46 = vld [vmem:[%s19604_s1 + $0x758] ss:$12 sps:$4 sm:$0xff]  }
 0x28e   : > { %8980 = vmatprep.mubr.bf16.mxu1 %v20159_v30  ;;  %v8085_v26 = vpop.f32.mrf.mxu0  ;;  %v13748_v8 = vld [vmem:[%s19604_s1 + $0x818] ss:$12 sps:$4 sm:$0xff]  }
 0x28f   : > { %v8198_v59 = vpop.f32.mrf.mxu1  ;;  %v17523_v25 = vadd.f32 %v8196_v18, %v8084_v60  ;;  %v8086_v7 = vadd.f32 %v8085_v26, %v17308_v22  ;;  %v20160_v18 = vld [vmem:[#allocation36_spill] sm:$0xff] }
 0x290   : > { %v8087_v14 = vpop.f32.mrf.mxu0 }
 0x291   : > { %v8200_v27 = vpop.f32.mrf.mxu1  ;;  %v17526_v35 = vadd.f32 %v8198_v59, %v8086_v7  ;;  %v8088_v9 = vadd.f32 %v8087_v14, %v17317_v13  ;;  %v13747_v13 = vld [vmem:[%s19604_s1 + $0x8d8] ss:$12 sps:$4 sm:$0xff]   ;;  %v20162_v59 = vld [vmem:[#allocation38_spill] sm:$0xff]  ;;  %v20163_v7 = vld [vmem:[#allocation39_spill] sm:$0xff] }
 0x292   : > { %v8089_v39 = vpop.f32.mrf.mxu0  ;;  %v13751_v14 = vld [vmem:[%s19604_s1 + $0x8c0] ss:$12 sps:$4 sm:$0xff]  }
 0x293   : > { %v8202_v43 = vpop.f32.mrf.mxu1  ;;  %v17535_v51 = vadd.f32 %v8200_v27, %v8088_v9  ;;  %v8090_v22 = vadd.f32 %v8089_v39, %v17334_v15  ;;  %v13746_v15 = vld [vmem:[%s19604_s1 + $0x698] ss:$12 sps:$4 sm:$0xff]  }
 0x294   : > { %v8239_v47 = vpop.f32.mrf.mxu0  ;;  %8884 = vmatmul.mubr.bf16.vlgmr.msra.gmra.mxu0 %v20160_v18  ;;  %v13755_v18 = vld [vmem:[%s19604_s1 + $0x8a8] ss:$12 sps:$4 sm:$0xff]  }
 0x295   : > { %v8352_v21 = vpop.f32.mrf.mxu1  ;;  %8981 = vmatmul.mubr.bf16.vlgmr.msra.gmra.mxu1 %v20161_v10  ;;  %v17546_v23 = vadd.f32 %v8202_v43, %v8090_v22  ;;  %v8240_v60 = vadd.f32 %v8239_v47, %v17339_v53  ;;  %12099 = vmatpush3.bf16.msra.mxu0 %v13742_v16  ;;  %v13749_v53 = vld [vmem:[%s19604_s1 + $0x740] ss:$12 sps:$4 sm:$0xff]  }
 0x296   : > { %12163 = vmatpush3.bf16.msra.mxu1 %v13744_v45  ;;  %v8241_v30 = vpop.f32.mrf.mxu0  ;;  %8891 = vmatprep.mubr.bf16.mxu0 %v20162_v59  ;;  %v20166_v59 = vld [vmem:[#allocation42_spill] sm:$0xff] }
 0x297   : > { %v8354_v26 = vpop.f32.mrf.mxu1  ;;  %8988 = vmatprep.mubr.bf16.mxu1 %v20163_v7  ;;  %v17563_v27 = vadd.f32 %v8352_v21, %v8240_v60  ;;  %v8242_v9 = vadd.f32 %v8241_v30, %v17348_v28  ;;  %12100 = vmatprep.subr.bf16.mxu0 %v13745_v46  ;;  %v13750_v21 = vld [vmem:[%s19604_s1 + $0x680] ss:$12 sps:$4 sm:$0xff]  }
 0x298   : > { %12164 = vmatprep.subr.bf16.mxu1 %v13747_v13  ;;  %v8243_v16 = vpop.f32.mrf.mxu0  ;;  %v13752_v28 = vld [vmem:[%s19604_s1 + $0x800] ss:$12 sps:$4 sm:$0xff]  }
 0x299   : > { %v8356_v45 = vpop.f32.mrf.mxu1  ;;  %v17566_v39 = vadd.f32 %v8354_v26, %v8242_v9  ;;  %v8244_v43 = vadd.f32 %v8243_v16, %v17357_v1  ;;  %12101 = vmatpush3.bf16.msra.mxu0 %v13746_v15  ;;  %v13753_v1 = vld [vmem:[%s19604_s1 + $0x728] ss:$12 sps:$4 sm:$0xff]   ;;  %v20164_v15 = vld [vmem:[#allocation40_spill] sm:$0xff] }
 0x29a   : > { %12165 = vmatpush3.bf16.msra.mxu1 %v13748_v8  ;;  %v8245_v22 = vpop.f32.mrf.mxu0  ;;  %12102 = vmatprep.subr.bf16.mxu0 %v13749_v53  ;;  %v20165_v8 = vld [vmem:[#allocation41_spill] sm:$0xff]  ;;  %v13756_v9 = vld [vmem:[%s19604_s1 + $0x7e8] ss:$12 sps:$4 sm:$0xff]  }
 0x29b   : > { %v8358_v47 = vpop.f32.mrf.mxu1  ;;  %12166 = vmatprep.subr.bf16.mxu1 %v13751_v14  ;;  %v17575_v46 = vadd.f32 %v8356_v45, %v8244_v43  ;;  %v8246_v13 = vadd.f32 %v8245_v22, %v17368_v5  ;;  %v20167_v5 = vld [vmem:[#allocation43_spill] sm:$0xff] }
 0x29c   : > { %v8249_v10 = vpop.f32.mrf.mxu0  ;;  %8892 = vmatmul.mubr.bf16.gmra.mxu0 %v20164_v15  ;;  %v13754_v14 = vld [vmem:[%s19604_s1 + $0x668] ss:$12 sps:$4 sm:$0xff]   ;;  %v13757_v45 = vld [vmem:[%s19604_s1 + $0x710] ss:$12 sps:$4 sm:$0xff]   ;;  %v13763_v15 = vld [vmem:[%s19604_s1 + $0x878] ss:$12 sps:$4 sm:$0xff]  }
 0x29d   : > { %v8362_v60 = vpop.f32.mrf.mxu1  ;;  %8989 = vmatmul.mubr.bf16.gmra.mxu1 %v20165_v8  ;;  %v17586_v30 = vadd.f32 %v8358_v47, %v8246_v13  ;;  %v8250_v26 = vadd.f32 %v8249_v10, %v17373_v40  ;;  %8899 = vmatprep.mubr.bf16.mxu0 %v20166_v59  ;;  %v13759_v43 = vld [vmem:[%s19604_s1 + $0x890] ss:$12 sps:$4 sm:$0xff]  }
 0x29e   : > { %8996 = vmatprep.mubr.bf16.mxu1 %v20167_v5  ;;  %v8251_v7 = vpop.f32.mrf.mxu0  ;;  %12103 = vmatpush3.bf16.msra.mxu0 %v13750_v21  ;;  %v20168_v59 = vld [vmem:[#allocation44_spill] sm:$0xff]  ;;  %v20169_v5 = vld [vmem:[#allocation45_spill] sm:$0xff] }
 0x29f   : > { %v8364_v53 = vpop.f32.mrf.mxu1  ;;  %12167 = vmatpush3.bf16.msra.mxu1 %v13752_v28  ;;  %v17597_v16 = vadd.f32 %v8362_v60, %v8250_v26  ;;  %v8252_v40 = vadd.f32 %v8251_v7, %v17388_v44  ;;  %12104 = vmatprep.subr.bf16.mxu0 %v13753_v1  ;;  %v13758_v44 = vld [vmem:[%s19604_s1 + $0x650] ss:$12 sps:$4 sm:$0xff]  }
 0x2a0   : > { %12168 = vmatprep.subr.bf16.mxu1 %v13755_v18  ;;  %v8253_v22 = vpop.f32.mrf.mxu0  ;;  %v13760_v1 = vld [vmem:[%s19604_s1 + $0x7d0] ss:$12 sps:$4 sm:$0xff]  }
 0x2a1   : > { %v8366_v47 = vpop.f32.mrf.mxu1  ;;  %v17606_v21 = vadd.f32 %v8364_v53, %v8252_v40  ;;  %v8254_v28 = vadd.f32 %v8253_v22, %v17397_v62  ;;  %v13761_v62 = vld [vmem:[%s19604_s1 + $0x6f8] ss:$12 sps:$4 sm:$0xff]   ;;  %v20170_v53 = vld [vmem:[#allocation46_spill] sm:$0xff] }
 0x2a2   : > { %v8255_v13 = vpop.f32.mrf.mxu0  ;;  %12105 = vmatpush3.bf16.msra.mxu0 %v13754_v14  ;;  %v20171_v14 = vld [vmem:[#allocation47_spill] sm:$0xff] }
 0x2a3   : > { %v8368_v10 = vpop.f32.mrf.mxu1  ;;  %12169 = vmatpush3.bf16.msra.mxu1 %v13756_v9  ;;  %v17615_v18 = vadd.f32 %v8366_v47, %v8254_v28  ;;  %v8256_v60 = vadd.f32 %v8255_v13, %v17408_v0  ;;  %12106 = vmatprep.subr.bf16.mxu0 %v13757_v45  ;;  %v13762_v45 = vld [vmem:[%s19604_s1 + $0x638] ss:$12 sps:$4 sm:$0xff]   ;;  %v13765_v47 = vld [vmem:[%s19604_s1 + $0x6e0] ss:$12 sps:$4 sm:$0xff]  }
 0x2a4   : > { %12170 = vmatprep.subr.bf16.mxu1 %v13759_v43  ;;  %v8259_v8 = vpop.f32.mrf.mxu0  ;;  %8900 = vmatmul.mubr.bf16.gmra.mxu0 %v20168_v59  ;;  %v13764_v43 = vld [vmem:[%s19604_s1 + $0x7b8] ss:$12 sps:$4 sm:$0xff]   ;;  %v13767_v28 = vld [vmem:[%s19604_s1 + $0x860] ss:$12 sps:$4 sm:$0xff]   ;;  %v13771_v59 = vld [vmem:[%s19604_s1 + $0x848] ss:$12 sps:$4 sm:$0xff]  }
 0x2a5   : > { %v8372_v26 = vpop.f32.mrf.mxu1  ;;  %8997 = vmatmul.mubr.bf16.gmra.mxu1 %v20169_v5  ;;  %v17626_v7 = vadd.f32 %v8368_v10, %v8256_v60  ;;  %v8260_v0 = vadd.f32 %v8259_v8, %v17413_v49  ;;  %8907 = vmatprep.mubr.bf16.mxu0 %v20170_v53  ;;  %v20172_v53 = vld [vmem:[#allocation48_spill] sm:$0xff] }
 0x2a6   : > { %9004 = vmatprep.mubr.bf16.mxu1 %v20171_v14  ;;  %v8261_v9 = vpop.f32.mrf.mxu0  ;;  %12107 = vmatpush3.bf16.msra.mxu0 %v13758_v44  ;;  %v20173_v14 = vld [vmem:[#allocation49_spill] sm:$0xff] }
 0x2a7   : > { %v8374_v40 = vpop.f32.mrf.mxu1  ;;  %12171 = vmatpush3.bf16.msra.mxu1 %v13760_v1  ;;  %v17637_v22 = vadd.f32 %v8372_v26, %v8260_v0  ;;  %v8262_v49 = vadd.f32 %v8261_v9, %v17428_v19  ;;  %12108 = vmatprep.subr.bf16.mxu0 %v13761_v62  ;;  %v13766_v19 = vld [vmem:[%s19604_s1 + $0x620] ss:$12 sps:$4 sm:$0xff]  }
 0x2a8   : > { %12172 = vmatprep.subr.bf16.mxu1 %v13763_v15  ;;  %v8263_v13 = vpop.f32.mrf.mxu0  ;;  %v13768_v62 = vld [vmem:[%s19604_s1 + $0x7a0] ss:$12 sps:$4 sm:$0xff]  }
 0x2a9   : > { %v8376_v10 = vpop.f32.mrf.mxu1  ;;  %v17646_v44 = vadd.f32 %v8374_v40, %v8262_v49  ;;  %v8264_v1 = vadd.f32 %v8263_v13, %v17431_v50  ;;  %v13769_v50 = vld [vmem:[%s19604_s1 + $0x6c8] ss:$12 sps:$4 sm:$0xff]  }
 0x2aa   : > { %v8265_v60 = vpop.f32.mrf.mxu0  ;;  %12109 = vmatpush3.bf16.msra.mxu0 %v13762_v45  ;;  %v20174_v40 = vld [vmem:[#allocation50_spill] sm:$0xff]  ;;  %v20175_v45 = vld [vmem:[#allocation51_spill] sm:$0xff] }
 0x2ab   : > { %v8378_v8 = vpop.f32.mrf.mxu1  ;;  %12173 = vmatpush3.bf16.msra.mxu1 %v13764_v43  ;;  %v17655_v15 = vadd.f32 %v8376_v10, %v8264_v1  ;;  %v8266_v26 = vadd.f32 %v8265_v60, %v17448_v42  ;;  %12110 = vmatprep.subr.bf16.mxu0 %v13765_v47  ;;  %v13770_v47 = vld [vmem:[%s19604_s1 + $0x608] ss:$12 sps:$4 sm:$0xff]   ;;  %v13773_v10 = vld [vmem:[%s19604_s1 + $0xa70] ss:$12 sps:$4 sm:$0xff]  }
 0x2ac   : > { %12174 = vmatprep.subr.bf16.mxu1 %v13767_v28  ;;  %v8269_v5 = vpop.f32.mrf.mxu0  ;;  %8908 = vmatmul.mubr.bf16.gmra.mxu0 %v20172_v53  ;;  %v13772_v28 = vld [vmem:[%s19604_s1 + $0x788] ss:$12 sps:$4 sm:$0xff]   ;;  %v13775_v1 = vld [vmem:[%s19604_s1 + $0xbf0] ss:$12 sps:$4 sm:$0xff]  }
 0x2ad   : > { %v8382_v0 = vpop.f32.mrf.mxu1  ;;  %9005 = vmatmul.mubr.bf16.gmra.mxu1 %v20173_v14  ;;  %v17666_v9 = vadd.f32 %v8378_v8, %v8266_v26  ;;  %v8270_v42 = vadd.f32 %v8269_v5, %v17453_v32  ;;  %8915 = vmatprep.mubr.bf16.mxu0 %v20174_v40  ;;  %v20176_v53 = vld [vmem:[#allocation52_spill] sm:$0xff]  ;;  %v20177_v14 = vld [vmem:[#allocation53_spill] sm:$0xff]  ;;  %v20178_v40 = vld [vmem:[#allocation54_spill] sm:$0xff] }
 0x2ae   : > { %9012 = vmatprep.mubr.bf16.mxu1 %v20175_v45  ;;  %v8271_v43 = vpop.f32.mrf.mxu0  ;;  %12111 = vmatpush3.bf16.msra.mxu0 %v13766_v19  ;;  %v20179_v45 = vld [vmem:[#allocation55_spill] sm:$0xff] }
 0x2af   : > { %v8384_v49 = vpop.f32.mrf.mxu1  ;;  %12175 = vmatpush3.bf16.msra.mxu1 %v13768_v62  ;;  %v17677_v13 = vadd.f32 %v8382_v0, %v8270_v42  ;;  %v8272_v32 = vadd.f32 %v8271_v43, %v17462_v41  ;;  %12112 = vmatprep.subr.bf16.mxu0 %v13769_v50 }
 0x2b0   : > { %12176 = vmatprep.subr.bf16.mxu1 %v13771_v59  ;;  %v8273_v60 = vpop.f32.mrf.mxu0 }
 0x2b1   : > { %v8386_v8 = vpop.f32.mrf.mxu1  ;;  %v17686_v19 = vadd.f32 %v8384_v49, %v8272_v32  ;;  %v8274_v62 = vadd.f32 %v8273_v60, %v17465_v54 }
 0x2b2   : > { %v8275_v26 = vpop.f32.mrf.mxu0  ;;  %12113 = vmatpush3.bf16.msra.mxu0 %v13770_v47 }
 0x2b3   : > { %v8388_v5 = vpop.f32.mrf.mxu1  ;;  %12177 = vmatpush3.bf16.msra.mxu1 %v13772_v28  ;;  %v17689_v41 = vadd.f32 %v8386_v8, %v8274_v62  ;;  %v8276_v50 = vadd.f32 %v8275_v26, %v17470_v20  ;;  %12226 = vmatprep.subr.bf16.mxu0 %v13773_v10 }
 0x2b4   : > { %12290 = vmatprep.subr.bf16.mxu1 %v13775_v1  ;;  %v8279_v59 = vpop.f32.mrf.mxu0  ;;  %8916 = vmatmul.mubr.bf16.gmra.mxu0 %v20176_v53  ;;  %v20182_v53 = vld [vmem:[#allocation58_spill] sm:$0xff] }
 0x2b5   : > { %v8392_v0 = vpop.f32.mrf.mxu1  ;;  %9013 = vmatmul.mubr.bf16.gmra.mxu1 %v20177_v14  ;;  %v17694_v42 = vadd.f32 %v8388_v5, %v8276_v50  ;;  %v8280_v54 = vadd.f32 %v8279_v59, %v17475_v2  ;;  %8923 = vmatprep.mubr.bf16.mxu0 %v20178_v40  ;;  %v20180_v50 = vld [vmem:[#allocation56_spill] sm:$0xff]  ;;  %v20181_v59 = vld [vmem:[#allocation57_spill] sm:$0xff]  ;;  %v20183_v14 = vld [vmem:[#allocation59_spill] sm:$0xff] }
 0x2b6   : > { %9020 = vmatprep.mubr.bf16.mxu1 %v20179_v45  ;;  %v8281_v43 = vpop.f32.mrf.mxu0 }
 0x2b7   : > { %v8394_v49 = vpop.f32.mrf.mxu1  ;;  %v17699_v47 = vadd.f32 %v8392_v0, %v8280_v54  ;;  %v8282_v20 = vadd.f32 %v8281_v43, %v17478_v55 }
 0x2b8   : > { %v8283_v28 = vpop.f32.mrf.mxu0 }
 0x2b9   : > { %v8396_v32 = vpop.f32.mrf.mxu1  ;;  %v17702_v10 = vadd.f32 %v8394_v49, %v8282_v20  ;;  %v8284_v1 = vadd.f32 %v8283_v28, %v17481_v33 }
 0x2ba   : > { %v8285_v60 = vpop.f32.mrf.mxu0 }
 0x2bb   : > { %v8398_v8 = vpop.f32.mrf.mxu1  ;;  %v17705_v62 = vadd.f32 %v8396_v32, %v8284_v1  ;;  %v8286_v2 = vadd.f32 %v8285_v60, %v17486_v61 }
 0x2bc   : > { %v8289_v26 = vpop.f32.mrf.mxu0  ;;  %8924 = vmatmul.mubr.bf16.gmra.mxu0 %v20180_v50  ;;  %v20186_v50 = vld [vmem:[#allocation62_spill] sm:$0xff] }
 0x2bd   : > { %v8402_v5 = vpop.f32.mrf.mxu1  ;;  %9021 = vmatmul.mubr.bf16.gmra.mxu1 %v20181_v59  ;;  %v17710_v0 = vadd.f32 %v8398_v8, %v8286_v2  ;;  %v8290_v55 = vadd.f32 %v8289_v26, %v17491_v63  ;;  %8931 = vmatprep.mubr.bf16.mxu0 %v20182_v53  ;;  %v20184_v2 = vld [vmem:[#allocation60_spill] sm:$0xff]  ;;  %v20185_v26 = vld [vmem:[#allocation61_spill] sm:$0xff]  ;;  %v20187_v59 = vld [vmem:[#allocation63_spill] sm:$0xff] }
 0x2be   : > { %9028 = vmatprep.mubr.bf16.mxu1 %v20183_v14  ;;  %v8291_v33 = vpop.f32.mrf.mxu0 }
 0x2bf   : > { %v8404_v54 = vpop.f32.mrf.mxu1  ;;  %v17715_v40 = vadd.f32 %v8402_v5, %v8290_v55  ;;  %v8292_v61 = vadd.f32 %v8291_v33, %v17494_v57 }
 0x2c0   : > { %v8293_v45 = vpop.f32.mrf.mxu0 }
 0x2c1   : > { %v8406_v43 = vpop.f32.mrf.mxu1  ;;  %v17718_v49 = vadd.f32 %v8404_v54, %v8292_v61  ;;  %v8294_v20 = vadd.f32 %v8293_v45, %v17497_v6 }
 0x2c2   : > { %v8295_v28 = vpop.f32.mrf.mxu0 }
 0x2c3   : > { %v8408_v32 = vpop.f32.mrf.mxu1  ;;  %v17721_v1 = vadd.f32 %v8406_v43, %v8294_v20  ;;  %v8296_v63 = vadd.f32 %v8295_v28, %v17502_v37 }
 0x2c4   : > { %v8299_v60 = vpop.f32.mrf.mxu0  ;;  %8932 = vmatmul.mubr.bf16.gmra.mxu0 %v20184_v2  ;;  %v20190_v2 = vld [vmem:[#allocation66_spill] sm:$0xff] }
 0x2c5   : > { %v8412_v8 = vpop.f32.mrf.mxu1  ;;  %9029 = vmatmul.mubr.bf16.gmra.mxu1 %v20185_v26  ;;  %v17726_v5 = vadd.f32 %v8408_v32, %v8296_v63  ;;  %v8300_v57 = vadd.f32 %v8299_v60, %v17507_v11  ;;  %8939 = vmatprep.mubr.bf16.mxu0 %v20186_v50  ;;  %v20188_v63 = vld [vmem:[#allocation64_spill] sm:$0xff]  ;;  %v20189_v60 = vld [vmem:[#allocation65_spill] sm:$0xff]  ;;  %v20191_v26 = vld [vmem:[#allocation67_spill] sm:$0xff] }
 0x2c6   : > { %9036 = vmatprep.mubr.bf16.mxu1 %v20187_v59  ;;  %v8301_v6 = vpop.f32.mrf.mxu0 }
 0x2c7   : > { %v8414_v55 = vpop.f32.mrf.mxu1  ;;  %v17731_v53 = vadd.f32 %v8412_v8, %v8300_v57  ;;  %v8302_v37 = vadd.f32 %v8301_v6, %v17510_v17 }
 0x2c8   : > { %v8303_v14 = vpop.f32.mrf.mxu0 }
 0x2c9   : > { %v8416_v33 = vpop.f32.mrf.mxu1  ;;  %v17734_v54 = vadd.f32 %v8414_v55, %v8302_v37  ;;  %v8304_v61 = vadd.f32 %v8303_v14, %v17513_v52  ;;  %v13776_v14 = vld [vmem:[%s19604_s1 + $0xb30] ss:$12 sps:$4 sm:$0xff]  }
 0x2ca   : > { %v8305_v45 = vpop.f32.mrf.mxu0 }
 0x2cb   : > { %v8418_v43 = vpop.f32.mrf.mxu1  ;;  %v17737_v20 = vadd.f32 %v8416_v33, %v8304_v61  ;;  %v8306_v11 = vadd.f32 %v8305_v45, %v17518_v56 }
 0x2cc   : > { %v8309_v28 = vpop.f32.mrf.mxu0  ;;  %8940 = vmatmul.mubr.bf16.gmra.mxu0 %v20188_v63  ;;  %v20193_v63 = vld [vmem:[#allocation69_spill] sm:$0xff] }
 0x2cd   : > { %v8422_v32 = vpop.f32.mrf.mxu1  ;;  %9037 = vmatmul.mubr.bf16.gmra.mxu1 %v20189_v60  ;;  %v17742_v8 = vadd.f32 %v8418_v43, %v8306_v11  ;;  %v8310_v17 = vadd.f32 %v8309_v28, %v17523_v25  ;;  %9077 = vmatprep.mubr.bf16.mxu0 %v20190_v2  ;;  %v13774_v25 = vld [vmem:[%s19604_s1 + $0x9b0] ss:$12 sps:$4 sm:$0xff]   ;;  %v13777_v43 = vld [vmem:[%s19604_s1 + $0xa58] ss:$12 sps:$4 sm:$0xff]  }
 0x2ce   : > { %9174 = vmatprep.mubr.bf16.mxu1 %v20191_v26  ;;  %v8311_v52 = vpop.f32.mrf.mxu0  ;;  %v13780_v2 = vld [vmem:[%s19604_s1 + $0xb18] ss:$12 sps:$4 sm:$0xff]  }
 0x2cf   : > { %v8424_v57 = vpop.f32.mrf.mxu1  ;;  %v17747_v50 = vadd.f32 %v8422_v32, %v8310_v17  ;;  %v8312_v56 = vadd.f32 %v8311_v52, %v17526_v35  ;;  %v20192_v32 = vld [vmem:[#allocation68_spill] sm:$0xff] }
 0x2d0   : > { %v8313_v59 = vpop.f32.mrf.mxu0 }
 0x2d1   : > { %v8426_v6 = vpop.f32.mrf.mxu1  ;;  %v17750_v55 = vadd.f32 %v8424_v57, %v8312_v56  ;;  %v8314_v37 = vadd.f32 %v8313_v59, %v17535_v51  ;;  %v13779_v51 = vld [vmem:[%s19604_s1 + $0xbd8] ss:$12 sps:$4 sm:$0xff]   ;;  %v20194_v57 = vld [vmem:[#allocation70_spill] sm:$0xff]  ;;  %v20195_v56 = vld [vmem:[#allocation71_spill] sm:$0xff] }
 0x2d2   : > { %v8315_v33 = vpop.f32.mrf.mxu0  ;;  %v13783_v59 = vld [vmem:[%s19604_s1 + $0xbc0] ss:$12 sps:$4 sm:$0xff]  }
 0x2d3   : > { %v8428_v61 = vpop.f32.mrf.mxu1  ;;  %v17759_v45 = vadd.f32 %v8426_v6, %v8314_v37  ;;  %v8316_v35 = vadd.f32 %v8315_v33, %v17546_v23  ;;  %v13778_v23 = vld [vmem:[%s19604_s1 + $0x998] ss:$12 sps:$4 sm:$0xff]  }
 0x2d4   : > { %v8465_v11 = vpop.f32.mrf.mxu0  ;;  %9078 = vmatmul.mubr.bf16.vlgmr.msra.gmra.mxu0 %v20192_v32  ;;  %v13787_v32 = vld [vmem:[%s19604_s1 + $0xba8] ss:$12 sps:$4 sm:$0xff]  }
 0x2d5   : > { %v8578_v28 = vpop.f32.mrf.mxu1  ;;  %9175 = vmatmul.mubr.bf16.vlgmr.msra.gmra.mxu1 %v20193_v63  ;;  %v17770_v60 = vadd.f32 %v8428_v61, %v8316_v35  ;;  %v8466_v17 = vadd.f32 %v8465_v11, %v17563_v27  ;;  %12227 = vmatpush3.bf16.msra.mxu0 %v13774_v25  ;;  %v13781_v27 = vld [vmem:[%s19604_s1 + $0xa40] ss:$12 sps:$4 sm:$0xff]  }
 0x2d6   : > { %12291 = vmatpush3.bf16.msra.mxu1 %v13776_v14  ;;  %v8467_v26 = vpop.f32.mrf.mxu0  ;;  %9085 = vmatprep.mubr.bf16.mxu0 %v20194_v57  ;;  %v20198_v57 = vld [vmem:[#allocation74_spill] sm:$0xff] }
 0x2d7   : > { %v8580_v52 = vpop.f32.mrf.mxu1  ;;  %9182 = vmatprep.mubr.bf16.mxu1 %v20195_v56  ;;  %v17787_v6 = vadd.f32 %v8578_v28, %v8466_v17  ;;  %v8468_v37 = vadd.f32 %v8467_v26, %v17566_v39  ;;  %12228 = vmatprep.subr.bf16.mxu0 %v13777_v43  ;;  %v13782_v28 = vld [vmem:[%s19604_s1 + $0x980] ss:$12 sps:$4 sm:$0xff]  }
 0x2d8   : > { %12292 = vmatprep.subr.bf16.mxu1 %v13779_v51  ;;  %v8469_v25 = vpop.f32.mrf.mxu0  ;;  %v13784_v39 = vld [vmem:[%s19604_s1 + $0xb00] ss:$12 sps:$4 sm:$0xff]  }
 0x2d9   : > { %v8582_v14 = vpop.f32.mrf.mxu1  ;;  %v17790_v33 = vadd.f32 %v8580_v52, %v8468_v37  ;;  %v8470_v61 = vadd.f32 %v8469_v25, %v17575_v46  ;;  %12229 = vmatpush3.bf16.msra.mxu0 %v13778_v23  ;;  %v13785_v46 = vld [vmem:[%s19604_s1 + $0xa28] ss:$12 sps:$4 sm:$0xff]   ;;  %v20196_v23 = vld [vmem:[#allocation72_spill] sm:$0xff] }
 0x2da   : > { %12293 = vmatpush3.bf16.msra.mxu1 %v13780_v2  ;;  %v8471_v35 = vpop.f32.mrf.mxu0  ;;  %12230 = vmatprep.subr.bf16.mxu0 %v13781_v27  ;;  %v20197_v2 = vld [vmem:[#allocation73_spill] sm:$0xff]  ;;  %v13788_v37 = vld [vmem:[%s19604_s1 + $0xae8] ss:$12 sps:$4 sm:$0xff]  }
 0x2db   : > { %v8584_v11 = vpop.f32.mrf.mxu1  ;;  %12294 = vmatprep.subr.bf16.mxu1 %v13783_v59  ;;  %v17799_v43 = vadd.f32 %v8582_v14, %v8470_v61  ;;  %v8472_v51 = vadd.f32 %v8471_v35, %v17586_v30  ;;  %v20199_v30 = vld [vmem:[#allocation75_spill] sm:$0xff] }
 0x2dc   : > { %v8475_v63 = vpop.f32.mrf.mxu0  ;;  %9086 = vmatmul.mubr.bf16.gmra.mxu0 %v20196_v23  ;;  %v13786_v59 = vld [vmem:[%s19604_s1 + $0x968] ss:$12 sps:$4 sm:$0xff]   ;;  %v13789_v14 = vld [vmem:[%s19604_s1 + $0xa10] ss:$12 sps:$4 sm:$0xff]   ;;  %v13795_v23 = vld [vmem:[%s19604_s1 + $0xb78] ss:$12 sps:$4 sm:$0xff]  }
 0x2dd   : > { %v8588_v17 = vpop.f32.mrf.mxu1  ;;  %9183 = vmatmul.mubr.bf16.gmra.mxu1 %v20197_v2  ;;  %v17810_v26 = vadd.f32 %v8584_v11, %v8472_v51  ;;  %v8476_v52 = vadd.f32 %v8475_v63, %v17597_v16  ;;  %9093 = vmatprep.mubr.bf16.mxu0 %v20198_v57  ;;  %v13791_v61 = vld [vmem:[%s19604_s1 + $0xb90] ss:$12 sps:$4 sm:$0xff]  }
 0x2de   : > { %9190 = vmatprep.mubr.bf16.mxu1 %v20199_v30  ;;  %v8477_v56 = vpop.f32.mrf.mxu0  ;;  %12231 = vmatpush3.bf16.msra.mxu0 %v13782_v28  ;;  %v20200_v57 = vld [vmem:[#allocation76_spill] sm:$0xff]  ;;  %v20201_v30 = vld [vmem:[#allocation77_spill] sm:$0xff] }
 0x2df   : > { %v8590_v27 = vpop.f32.mrf.mxu1  ;;  %12295 = vmatpush3.bf16.msra.mxu1 %v13784_v39  ;;  %v17821_v25 = vadd.f32 %v8588_v17, %v8476_v52  ;;  %v8478_v16 = vadd.f32 %v8477_v56, %v17606_v21  ;;  %12232 = vmatprep.subr.bf16.mxu0 %v13785_v46  ;;  %v13790_v21 = vld [vmem:[%s19604_s1 + $0x950] ss:$12 sps:$4 sm:$0xff]  }
 0x2e0   : > { %12296 = vmatprep.subr.bf16.mxu1 %v13787_v32  ;;  %v8479_v35 = vpop.f32.mrf.mxu0  ;;  %v13792_v46 = vld [vmem:[%s19604_s1 + $0xad0] ss:$12 sps:$4 sm:$0xff]  }
 0x2e1   : > { %v8592_v11 = vpop.f32.mrf.mxu1  ;;  %v17830_v28 = vadd.f32 %v8590_v27, %v8478_v16  ;;  %v8480_v39 = vadd.f32 %v8479_v35, %v17615_v18  ;;  %v13793_v18 = vld [vmem:[%s19604_s1 + $0x9f8] ss:$12 sps:$4 sm:$0xff]   ;;  %v20202_v27 = vld [vmem:[#allocation78_spill] sm:$0xff] }
 0x2e2   : > { %v8481_v51 = vpop.f32.mrf.mxu0  ;;  %12233 = vmatpush3.bf16.msra.mxu0 %v13786_v59  ;;  %v20203_v59 = vld [vmem:[#allocation79_spill] sm:$0xff] }
 0x2e3   : > { %v8594_v63 = vpop.f32.mrf.mxu1  ;;  %12297 = vmatpush3.bf16.msra.mxu1 %v13788_v37  ;;  %v17839_v32 = vadd.f32 %v8592_v11, %v8480_v39  ;;  %v8482_v17 = vadd.f32 %v8481_v51, %v17626_v7  ;;  %12234 = vmatprep.subr.bf16.mxu0 %v13789_v14  ;;  %v13794_v14 = vld [vmem:[%s19604_s1 + $0x938] ss:$12 sps:$4 sm:$0xff]   ;;  %v13797_v11 = vld [vmem:[%s19604_s1 + $0x9e0] ss:$12 sps:$4 sm:$0xff]  }
 0x2e4   : > { %12298 = vmatprep.subr.bf16.mxu1 %v13791_v61  ;;  %v8485_v2 = vpop.f32.mrf.mxu0  ;;  %9094 = vmatmul.mubr.bf16.gmra.mxu0 %v20200_v57  ;;  %v13796_v61 = vld [vmem:[%s19604_s1 + $0xab8] ss:$12 sps:$4 sm:$0xff]   ;;  %v13799_v39 = vld [vmem:[%s19604_s1 + $0xb60] ss:$12 sps:$4 sm:$0xff]   ;;  %v13803_v57 = vld [vmem:[%s19604_s1 + $0xb48] ss:$12 sps:$4 sm:$0xff]  }
 0x2e5   : > { %v8598_v52 = vpop.f32.mrf.mxu1  ;;  %9191 = vmatmul.mubr.bf16.gmra.mxu1 %v20201_v30  ;;  %v17850_v56 = vadd.f32 %v8594_v63, %v8482_v17  ;;  %v8486_v7 = vadd.f32 %v8485_v2, %v17637_v22  ;;  %9101 = vmatprep.mubr.bf16.mxu0 %v20202_v27  ;;  %v20204_v27 = vld [vmem:[#allocation80_spill] sm:$0xff] }
 0x2e6   : > { %9198 = vmatprep.mubr.bf16.mxu1 %v20203_v59  ;;  %v8487_v37 = vpop.f32.mrf.mxu0  ;;  %12235 = vmatpush3.bf16.msra.mxu0 %v13790_v21  ;;  %v20205_v59 = vld [vmem:[#allocation81_spill] sm:$0xff] }
 0x2e7   : > { %v8600_v16 = vpop.f32.mrf.mxu1  ;;  %12299 = vmatpush3.bf16.msra.mxu1 %v13792_v46  ;;  %v17861_v35 = vadd.f32 %v8598_v52, %v8486_v7  ;;  %v8488_v22 = vadd.f32 %v8487_v37, %v17646_v44  ;;  %12236 = vmatprep.subr.bf16.mxu0 %v13793_v18  ;;  %v13798_v44 = vld [vmem:[%s19604_s1 + $0x920] ss:$12 sps:$4 sm:$0xff]  }
 0x2e8   : > { %12300 = vmatprep.subr.bf16.mxu1 %v13795_v23  ;;  %v8489_v51 = vpop.f32.mrf.mxu0  ;;  %v13800_v18 = vld [vmem:[%s19604_s1 + $0xaa0] ss:$12 sps:$4 sm:$0xff]  }
 0x2e9   : > { %v8602_v63 = vpop.f32.mrf.mxu1  ;;  %v17870_v21 = vadd.f32 %v8600_v16, %v8488_v22  ;;  %v8490_v46 = vadd.f32 %v8489_v51, %v17655_v15  ;;  %v13801_v15 = vld [vmem:[%s19604_s1 + $0x9c8] ss:$12 sps:$4 sm:$0xff]  }
 0x2ea   : > { %v8491_v17 = vpop.f32.mrf.mxu0  ;;  %12237 = vmatpush3.bf16.msra.mxu0 %v13794_v14  ;;  %v20206_v16 = vld [vmem:[#allocation82_spill] sm:$0xff]  ;;  %v20207_v14 = vld [vmem:[#allocation83_spill] sm:$0xff] }
 0x2eb   : > { %v8604_v2 = vpop.f32.mrf.mxu1  ;;  %12301 = vmatpush3.bf16.msra.mxu1 %v13796_v61  ;;  %v17879_v23 = vadd.f32 %v8602_v63, %v8490_v46  ;;  %v8492_v52 = vadd.f32 %v8491_v17, %v17666_v9  ;;  %12238 = vmatprep.subr.bf16.mxu0 %v13797_v11  ;;  %v13802_v11 = vld [vmem:[%s19604_s1 + $0x908] ss:$12 sps:$4 sm:$0xff]   ;;  %v13805_v63 = vld [vmem:[%s19604_s1 + $0xd70] ss:$12 sps:$4 sm:$0xff]  }
 0x2ec   : > { %12302 = vmatprep.subr.bf16.mxu1 %v13799_v39  ;;  %v8495_v30 = vpop.f32.mrf.mxu0  ;;  %9102 = vmatmul.mubr.bf16.gmra.mxu0 %v20204_v27  ;;  %v13804_v39 = vld [vmem:[%s19604_s1 + $0xa88] ss:$12 sps:$4 sm:$0xff]   ;;  %v13807_v46 = vld [vmem:[%s19604_s1 + $0xef0] ss:$12 sps:$4 sm:$0xff]  }
 0x2ed   : > { %v8608_v7 = vpop.f32.mrf.mxu1  ;;  %9199 = vmatmul.mubr.bf16.gmra.mxu1 %v20205_v59  ;;  %v17890_v37 = vadd.f32 %v8604_v2, %v8492_v52  ;;  %v8496_v9 = vadd.f32 %v8495_v30, %v17677_v13  ;;  %9109 = vmatprep.mubr.bf16.mxu0 %v20206_v16  ;;  %v20211_v27 = vld [vmem:[#allocation84_spill] sm:$0xff]  ;;  %v20212_v59 = vld [vmem:[#allocation85_spill] sm:$0xff]  ;;  %v20214_v16 = vld [vmem:[#allocation86_spill] sm:$0xff] }
 0x2ee   : > { %9206 = vmatprep.mubr.bf16.mxu1 %v20207_v14  ;;  %v8497_v61 = vpop.f32.mrf.mxu0  ;;  %12239 = vmatpush3.bf16.msra.mxu0 %v13798_v44  ;;  %v20215_v14 = vld [vmem:[#allocation87_spill] sm:$0xff] }
 0x2ef   : > { %v8610_v22 = vpop.f32.mrf.mxu1  ;;  %12303 = vmatpush3.bf16.msra.mxu1 %v13800_v18  ;;  %v17901_v51 = vadd.f32 %v8608_v7, %v8496_v9  ;;  %v8498_v13 = vadd.f32 %v8497_v61, %v17686_v19  ;;  %12240 = vmatprep.subr.bf16.mxu0 %v13801_v15 }
 0x2f0   : > { %12304 = vmatprep.subr.bf16.mxu1 %v13803_v57  ;;  %v8499_v17 = vpop.f32.mrf.mxu0 }
 0x2f1   : > { %20208 = vst [vmem:[#allocation5_spill] sm:$0xff] %v17901_v51  ;;  %v8612_v2 = vpop.f32.mrf.mxu1  ;;  %v17910_v44 = vadd.f32 %v8610_v22, %v8498_v13  ;;  %v8500_v18 = vadd.f32 %v8499_v17, %v17689_v41 }
 0x2f2   : > { %v8501_v52 = vpop.f32.mrf.mxu0  ;;  %12241 = vmatpush3.bf16.msra.mxu0 %v13802_v11 }
 0x2f3   : > { %20209 = vst [vmem:[#allocation6_spill] sm:$0xff] %v17910_v44  ;;  %v8614_v30 = vpop.f32.mrf.mxu1  ;;  %12305 = vmatpush3.bf16.msra.mxu1 %v13804_v39  ;;  %v17913_v19 = vadd.f32 %v8612_v2, %v8500_v18  ;;  %v8502_v15 = vadd.f32 %v8501_v52, %v17694_v42  ;;  %12354 = vmatprep.subr.bf16.mxu0 %v13805_v63 }
 0x2f4   : > { %12418 = vmatprep.subr.bf16.mxu1 %v13807_v46  ;;  %v8505_v57 = vpop.f32.mrf.mxu0  ;;  %9110 = vmatmul.mubr.bf16.gmra.mxu0 %v20211_v27  ;;  %v20222_v27 = vld [vmem:[#allocation90_spill] sm:$0xff] }
 0x2f5   : > { %20210 = vst [vmem:[#allocation7_spill] sm:$0xff] %v17913_v19  ;;  %v8618_v7 = vpop.f32.mrf.mxu1  ;;  %9207 = vmatmul.mubr.bf16.gmra.mxu1 %v20212_v59  ;;  %v17918_v9 = vadd.f32 %v8614_v30, %v8502_v15  ;;  %v8506_v41 = vadd.f32 %v8505_v57, %v17699_v47  ;;  %9117 = vmatprep.mubr.bf16.mxu0 %v20214_v16  ;;  %v20219_v15 = vld [vmem:[#allocation88_spill] sm:$0xff]  ;;  %v20220_v57 = vld [vmem:[#allocation89_spill] sm:$0xff]  ;;  %v20223_v59 = vld [vmem:[#allocation91_spill] sm:$0xff] }
 0x2f6   : > { %9214 = vmatprep.mubr.bf16.mxu1 %v20215_v14  ;;  %v8507_v61 = vpop.f32.mrf.mxu0 }
 0x2f7   : > { %20213 = vst [vmem:[#allocation8_spill] sm:$0xff] %v17918_v9  ;;  %v8620_v22 = vpop.f32.mrf.mxu1  ;;  %v17923_v11 = vadd.f32 %v8618_v7, %v8506_v41  ;;  %v8508_v42 = vadd.f32 %v8507_v61, %v17702_v10 }
 0x2f8   : > { %v8509_v39 = vpop.f32.mrf.mxu0 }
 0x2f9   : > { %20216 = vst [vmem:[#allocation9_spill] sm:$0xff] %v17923_v11  ;;  %v8622_v13 = vpop.f32.mrf.mxu1  ;;  %v17926_v63 = vadd.f32 %v8620_v22, %v8508_v42  ;;  %v8510_v46 = vadd.f32 %v8509_v39, %v17705_v62 }
 0x2fa   : > { %v8511_v17 = vpop.f32.mrf.mxu0 }
 0x2fb   : > { %20217 = vst [vmem:[#allocation10_spill] sm:$0xff] %v17926_v63  ;;  %v8624_v2 = vpop.f32.mrf.mxu1  ;;  %v17929_v18 = vadd.f32 %v8622_v13, %v8510_v46  ;;  %v8512_v47 = vadd.f32 %v8511_v17, %v17710_v0  ;;  %v13846_v63 = vld [vmem:[%s19604_s1 + $0xf80] ss:$12 sps:$4 sm:$0xff]  }
 0x2fc   : > { %v8515_v52 = vpop.f32.mrf.mxu0  ;;  %9118 = vmatmul.mubr.bf16.gmra.mxu0 %v20219_v15  ;;  %v20230_v15 = vld [vmem:[#allocation94_spill] sm:$0xff] }
 0x2fd   : > { %20218 = vst [vmem:[#allocation11_spill] sm:$0xff] %v17929_v18  ;;  %v8628_v30 = vpop.f32.mrf.mxu1  ;;  %9215 = vmatmul.mubr.bf16.gmra.mxu1 %v20220_v57  ;;  %v17934_v7 = vadd.f32 %v8624_v2, %v8512_v47  ;;  %v8516_v10 = vadd.f32 %v8515_v52, %v17715_v40  ;;  %9125 = vmatprep.mubr.bf16.mxu0 %v20222_v27  ;;  %v20227_v47 = vld [vmem:[#allocation92_spill] sm:$0xff]  ;;  %v20228_v52 = vld [vmem:[#allocation93_spill] sm:$0xff]  ;;  %v20231_v57 = vld [vmem:[#allocation95_spill] sm:$0xff] }
 0x2fe   : > { %9222 = vmatprep.mubr.bf16.mxu1 %v20223_v59  ;;  %v8517_v62 = vpop.f32.mrf.mxu0 }
 0x2ff   : > { %20221 = vst [vmem:[#allocation12_spill] sm:$0xff] %v17934_v7  ;;  %v8630_v41 = vpop.f32.mrf.mxu1  ;;  %v17939_v16 = vadd.f32 %v8628_v30, %v8516_v10  ;;  %v8518_v0 = vadd.f32 %v8517_v62, %v17718_v49 }
 0x300   : > { %v8519_v14 = vpop.f32.mrf.mxu0 }
 0x301   : > { %20224 = vst [vmem:[#allocation13_spill] sm:$0xff] %v17939_v16  ;;  %v8632_v61 = vpop.f32.mrf.mxu1  ;;  %v17942_v22 = vadd.f32 %v8630_v41, %v8518_v0  ;;  %v8520_v42 = vadd.f32 %v8519_v14, %v17721_v1  ;;  %v20274_v16 = vld [vmem:[#allocation131_spill] sm:$0xff] }
 0x302   : > { %v8521_v39 = vpop.f32.mrf.mxu0 }
 0x303   : > { %20225 = vst [vmem:[#allocation14_spill] sm:$0xff] %v17942_v22  ;;  %v8634_v13 = vpop.f32.mrf.mxu1  ;;  %v17945_v46 = vadd.f32 %v8632_v61, %v8520_v42  ;;  %v8522_v40 = vadd.f32 %v8521_v39, %v17726_v5 }
 0x304   : > { %v8525_v17 = vpop.f32.mrf.mxu0  ;;  %9126 = vmatmul.mubr.bf16.gmra.mxu0 %v20227_v47  ;;  %v20238_v47 = vld [vmem:[#allocation99_spill] sm:$0xff] }
 0x305   : > { %20226 = vst [vmem:[#allocation15_spill] sm:$0xff] %v17945_v46  ;;  %v8638_v2 = vpop.f32.mrf.mxu1  ;;  %9223 = vmatmul.mubr.bf16.gmra.mxu1 %v20228_v52  ;;  %v17950_v30 = vadd.f32 %v8634_v13, %v8522_v40  ;;  %v8526_v49 = vadd.f32 %v8525_v17, %v17731_v53  ;;  %9133 = vmatprep.mubr.bf16.mxu0 %v20230_v15  ;;  %v20235_v40 = vld [vmem:[#allocation96_spill] sm:$0xff]  ;;  %v20236_v17 = vld [vmem:[#allocation97_spill] sm:$0xff]  ;;  %v20270_v46 = vld [vmem:[#allocation127_spill] sm:$0xff] }
 0x306   : > { %9230 = vmatprep.mubr.bf16.mxu1 %v20231_v57  ;;  %v8527_v1 = vpop.f32.mrf.mxu0  ;;  %v20239_v52 = vld [vmem:[#allocation100_spill] sm:$0xff] }
 0x307   : > { %20229 = vst [vmem:[#allocation16_spill] sm:$0xff] %v17950_v30  ;;  %v8640_v10 = vpop.f32.mrf.mxu1  ;;  %v17955_v27 = vadd.f32 %v8638_v2, %v8526_v49  ;;  %v8528_v5 = vadd.f32 %v8527_v1, %v17734_v54 }
 0x308   : > { %v8529_v59 = vpop.f32.mrf.mxu0 }
 0x309   : > { %20232 = vst [vmem:[#allocation17_spill] sm:$0xff] %v17955_v27  ;;  %v8642_v62 = vpop.f32.mrf.mxu1  ;;  %v17958_v41 = vadd.f32 %v8640_v10, %v8528_v5  ;;  %v8530_v0 = vadd.f32 %v8529_v59, %v17737_v20  ;;  %v20242_v59 = vld [vmem:[#allocation98_spill] sm:$0xff]  ;;  %v20266_v27 = vld [vmem:[#allocation123_spill] sm:$0xff] }
 0x30a   : > { %v8531_v14 = vpop.f32.mrf.mxu0 }
 0x30b   : > { %20233 = vst [vmem:[#allocation18_spill] sm:$0xff] %v17958_v41  ;;  %v8644_v61 = vpop.f32.mrf.mxu1  ;;  %v17961_v42 = vadd.f32 %v8642_v62, %v8530_v0  ;;  %v8532_v53 = vadd.f32 %v8531_v14, %v17742_v8  ;;  %v17981_v62 = vsub.s32 2, %v20242_v59  ;;  %v13808_v0 = vld [vmem:[%s19604_s1 + $0xe30] ss:$12 sps:$4 sm:$0xff]   ;;  %v13815_v59 = vld [vmem:[%s19604_s1 + $0xec0] ss:$12 sps:$4 sm:$0xff]  }
 0x30c   : > { %v8535_v39 = vpop.f32.mrf.mxu0  ;;  %9134 = vmatmul.mubr.bf16.gmra.mxu0 %v20235_v40 }
 0x30d   : > { %20234 = vst [vmem:[#allocation19_spill] sm:$0xff] %v17961_v42  ;;  %v8648_v13 = vpop.f32.mrf.mxu1  ;;  %9231 = vmatmul.mubr.bf16.gmra.mxu1 %v20236_v17  ;;  %v17966_v2 = vadd.f32 %v8644_v61, %v8532_v53  ;;  %v8536_v54 = vadd.f32 %v8535_v39, %v17747_v50  ;;  %9271 = vmatprep.mubr.bf16.mxu0 %v20238_v47  ;;  %v13806_v50 = vld [vmem:[%s19604_s1 + $0xcb0] ss:$12 sps:$4 sm:$0xff]   ;;  %20243 = vst [vmem:[#allocation23_spill] sm:$0xff] %v17981_v62  ;;  %v13811_v39 = vld [vmem:[%s19604_s1 + $0xed8] ss:$12 sps:$4 sm:$0xff]  }
 0x30e   : > { %9368 = vmatprep.mubr.bf16.mxu1 %v20239_v52  ;;  %v8537_v20 = vpop.f32.mrf.mxu0  ;;  %v20245_v17 = vld [vmem:[#allocation103_spill] sm:$0xff]  ;;  %v20264_v42 = vld [vmem:[#allocation121_spill] sm:$0xff] }
 0x30f   : > { %20237 = vst [vmem:[#allocation20_spill] sm:$0xff] %v17966_v2  ;;  %v8650_v49 = vpop.f32.mrf.mxu1  ;;  %v17971_v15 = vadd.f32 %v8648_v13, %v8536_v54  ;;  %v8538_v8 = vadd.f32 %v8537_v20, %v17750_v55  ;;  %v20246_v54 = vld [vmem:[#allocation104_spill] sm:$0xff] }
 0x310   : > { %v8539_v57 = vpop.f32.mrf.mxu0  ;;  %v13810_v20 = vld [vmem:[%s19604_s1 + $0xc98] ss:$12 sps:$4 sm:$0xff]  }
 0x311   : > { %20240 = vst [vmem:[#allocation21_spill] sm:$0xff] %v17971_v15  ;;  %v8652_v1 = vpop.f32.mrf.mxu1  ;;  %v17974_v10 = vadd.f32 %v8650_v49, %v8538_v8  ;;  %v8540_v5 = vadd.f32 %v8539_v57, %v17759_v45  ;;  %v13809_v45 = vld [vmem:[%s19604_s1 + $0xd58] ss:$12 sps:$4 sm:$0xff]  }
 0x312   : > { %v8541_v14 = vpop.f32.mrf.mxu0  ;;  %v13812_v49 = vld [vmem:[%s19604_s1 + $0xe18] ss:$12 sps:$4 sm:$0xff]  }
 0x313   : > { %20241 = vst [vmem:[#allocation22_spill] sm:$0xff] %v17974_v10  ;;  %v8654_v61 = vpop.f32.mrf.mxu1  ;;  %v17986_v55 = vadd.f32 %v8652_v1, %v8540_v5  ;;  %v8542_v53 = vadd.f32 %v8541_v14, %v17770_v60  ;;  %v13965_v60 = vld [vmem:[%s19605_s2] ss:$8 sm:$0x7] }
 0x314   : > { %v11858_v13 = vpop.f32.mrf.mxu0  ;;  %9272 = vmatmul.mubr.bf16.vlgmr.msra.gmra.mxu0 %v20245_v17  ;;  %v18003_v52 = vrot.slane %v13965_v60, %v17981_v62  ;;  %v20248_v1 = vld [vmem:[#allocation105_spill] sm:$0xff]  ;;  %v20249_v5 = vld [vmem:[#allocation106_spill] sm:$0xff] }
 0x315   : > { %20244 = vst [vmem:[#allocation24_spill] sm:$0xff] %v17986_v55  ;;  %v11922_v40 = vpop.f32.mrf.mxu1  ;;  %9369 = vmatmul.mubr.bf16.vlgmr.msra.gmra.mxu1 %v20246_v54  ;;  %v17997_v47 = vadd.f32 %v8654_v61, %v8542_v53  ;;  %12355 = vmatpush3.bf16.msra.mxu0 %v13806_v50  ;;  %v13813_v50 = vld [vmem:[%s19604_s1 + $0xd40] ss:$12 sps:$4 sm:$0xff]  }
 0x316   : > { %12419 = vmatpush3.bf16.msra.mxu1 %v13808_v0  ;;  %v11859_v8 = vpop.f32.mrf.mxu0  ;;  %9279 = vmatprep.mubr.bf16.mxu0 %v20248_v1  ;;  %v13814_v1 = vld [vmem:[%s19604_s1 + $0xc80] ss:$12 sps:$4 sm:$0xff]  }
 0x317   : > { %20247 = vst [vmem:[#allocation25_spill] sm:$0xff] %v17997_v47  ;;  %v11923_v57 = vpop.f32.mrf.mxu1  ;;  %9376 = vmatprep.mubr.bf16.mxu1 %v20249_v5  ;;  %v11860_v0 = vadd.f32 %v11859_v8, %v11858_v13  ;;  %12356 = vmatprep.subr.bf16.mxu0 %v13809_v45  ;;  %v13816_v13 = vld [vmem:[%s19604_s1 + $0xe00] ss:$12 sps:$4 sm:$0xff]   ;;  %v20250_v5 = vld [vmem:[#allocation107_spill] sm:$0xff] }
 0x318   : > { %v11924_v14 = vadd.f32 %v11923_v57, %v11922_v40  ;;  %12420 = vmatprep.subr.bf16.mxu1 %v13811_v39  ;;  %v11861_v61 = vpop.f32.mrf.mxu0 }
 0x319   : > { %v11925_v53 = vpop.f32.mrf.mxu1  ;;  %v8692_v17 = vadd.f32 %v11860_v0, %v18003_v52  ;;  %12357 = vmatpush3.bf16.msra.mxu0 %v13810_v20  ;;  %v13817_v20 = vld [vmem:[%s19604_s1 + $0xd28] ss:$12 sps:$4 sm:$0xff]   ;;  %v20252_v0 = vld [vmem:[#allocation109_spill] sm:$0xff] }
 0x31a   : > { %12421 = vmatpush3.bf16.msra.mxu1 %v13812_v49  ;;  %v11862_v54 = vpop.f32.mrf.mxu0  ;;  %12358 = vmatprep.subr.bf16.mxu0 %v13813_v50  ;;  %v13819_v49 = vld [vmem:[%s19604_s1 + $0xea8] ss:$12 sps:$4 sm:$0xff]   ;;  %v20251_v50 = vld [vmem:[#allocation108_spill] sm:$0xff] }
 0x31b   : > { %v11926_v60 = vpop.f32.mrf.mxu1  ;;  %12422 = vmatprep.subr.bf16.mxu1 %v13815_v59  ;;  %v18026_v45 = vadd.f32 %v11924_v14, %v8692_v17  ;;  %v11863_v39 = vadd.f32 %v11862_v54, %v11861_v61  ;;  %v20253_v14 = vld [vmem:[#allocation110_spill] sm:$0xff] }
 0x31c   : > { %v11927_v40 = vadd.f32 %v11926_v60, %v11925_v53  ;;  %v11864_v8 = vpop.f32.mrf.mxu0  ;;  %9280 = vmatmul.mubr.bf16.gmra.mxu0 %v20250_v5  ;;  %v13818_v17 = vld [vmem:[%s19604_s1 + $0xc68] ss:$12 sps:$4 sm:$0xff]  }
 0x31d   : > { %v11928_v57 = vpop.f32.mrf.mxu1  ;;  %9377 = vmatmul.mubr.bf16.gmra.mxu1 %v20251_v50  ;;  %v8695_v59 = vadd.f32 %v11863_v39, %v18003_v52  ;;  %9287 = vmatprep.mubr.bf16.mxu0 %v20252_v0  ;;  %v13820_v54 = vld [vmem:[%s19604_s1 + $0xde8] ss:$12 sps:$4 sm:$0xff]   ;;  %v13821_v50 = vld [vmem:[%s19604_s1 + $0xd10] ss:$12 sps:$4 sm:$0xff]  }
 0x31e   : > { %9384 = vmatprep.mubr.bf16.mxu1 %v20253_v14  ;;  %v11865_v61 = vpop.f32.mrf.mxu0  ;;  %12359 = vmatpush3.bf16.msra.mxu0 %v13814_v1  ;;  %v13823_v1 = vld [vmem:[%s19604_s1 + $0xe90] ss:$12 sps:$4 sm:$0xff]  }
 0x31f   : > { %v11929_v53 = vpop.f32.mrf.mxu1  ;;  %12423 = vmatpush3.bf16.msra.mxu1 %v13816_v13  ;;  %v18045_v60 = vadd.f32 %v11927_v40, %v8695_v59  ;;  %v11866_v5 = vadd.f32 %v11865_v61, %v11864_v8  ;;  %12360 = vmatprep.subr.bf16.mxu0 %v13817_v20  ;;  %v13822_v40 = vld [vmem:[%s19604_s1 + $0xc50] ss:$12 sps:$4 sm:$0xff]   ;;  %v13825_v59 = vld [vmem:[%s19604_s1 + $0xcf8] ss:$12 sps:$4 sm:$0xff]  }
 0x320   : > { %v11930_v39 = vadd.f32 %v11929_v53, %v11928_v57  ;;  %12424 = vmatprep.subr.bf16.mxu1 %v13819_v49  ;;  %v11867_v13 = vpop.f32.mrf.mxu0  ;;  %v13824_v20 = vld [vmem:[%s19604_s1 + $0xdd0] ss:$12 sps:$4 sm:$0xff]   ;;  %v13827_v61 = vld [vmem:[%s19604_s1 + $0xe78] ss:$12 sps:$4 sm:$0xff]  }
 0x321   : > { %v11931_v0 = vpop.f32.mrf.mxu1  ;;  %v8700_v14 = vadd.f32 %v11866_v5, %v18003_v52  ;;  %v20255_v5 = vld [vmem:[#allocation112_spill] sm:$0xff] }
 0x322   : > { %v11868_v62 = vpop.f32.mrf.mxu0  ;;  %12361 = vmatpush3.bf16.msra.mxu0 %v13818_v17 }
 0x323   : > { %v11932_v47 = vpop.f32.mrf.mxu1  ;;  %12425 = vmatpush3.bf16.msra.mxu1 %v13820_v54  ;;  %v18060_v49 = vadd.f32 %v11930_v39, %v8700_v14  ;;  %v11869_v8 = vadd.f32 %v11868_v62, %v11867_v13  ;;  %12362 = vmatprep.subr.bf16.mxu0 %v13821_v50  ;;  %v20254_v54 = vld [vmem:[#allocation111_spill] sm:$0xff]  ;;  %v20256_v62 = vld [vmem:[#allocation113_spill] sm:$0xff] }
 0x324   : > { %v11933_v57 = vadd.f32 %v11932_v47, %v11931_v0  ;;  %12426 = vmatprep.subr.bf16.mxu1 %v13823_v1  ;;  %v11870_v53 = vpop.f32.mrf.mxu0  ;;  %9288 = vmatmul.mubr.bf16.gmra.mxu0 %v20254_v54  ;;  %v20257_v47 = vld [vmem:[#allocation114_spill] sm:$0xff]  ;;  %v13826_v13 = vld [vmem:[%s19604_s1 + $0xc38] ss:$12 sps:$4 sm:$0xff]  }
 0x325   : > { %v11934_v17 = vpop.f32.mrf.mxu1  ;;  %9385 = vmatmul.mubr.bf16.gmra.mxu1 %v20255_v5  ;;  %v8703_v39 = vadd.f32 %v11869_v8, %v18003_v52  ;;  %9295 = vmatprep.mubr.bf16.mxu0 %v20256_v62  ;;  %v13828_v0 = vld [vmem:[%s19604_s1 + $0xdb8] ss:$12 sps:$4 sm:$0xff]   ;;  %v13829_v5 = vld [vmem:[%s19604_s1 + $0xce0] ss:$12 sps:$4 sm:$0xff]  }
 0x326   : > { %9392 = vmatprep.mubr.bf16.mxu1 %v20257_v47  ;;  %v11871_v50 = vpop.f32.mrf.mxu0  ;;  %12363 = vmatpush3.bf16.msra.mxu0 %v13822_v40  ;;  %v13831_v40 = vld [vmem:[%s19604_s1 + $0xe60] ss:$12 sps:$4 sm:$0xff]  }
 0x327   : > { %v11935_v1 = vpop.f32.mrf.mxu1  ;;  %12427 = vmatpush3.bf16.msra.mxu1 %v13824_v20  ;;  %v18079_v14 = vadd.f32 %v11933_v57, %v8703_v39  ;;  %v11872_v54 = vadd.f32 %v11871_v50, %v11870_v53  ;;  %12364 = vmatprep.subr.bf16.mxu0 %v13825_v59  ;;  %v13830_v57 = vld [vmem:[%s19604_s1 + $0xc20] ss:$12 sps:$4 sm:$0xff]   ;;  %v13833_v39 = vld [vmem:[%s19604_s1 + $0xcc8] ss:$12 sps:$4 sm:$0xff]  }
 0x328   : > { %v11936_v8 = vadd.f32 %v11935_v1, %v11934_v17  ;;  %12428 = vmatprep.subr.bf16.mxu1 %v13827_v61  ;;  %v11873_v20 = vpop.f32.mrf.mxu0  ;;  %v13832_v59 = vld [vmem:[%s19604_s1 + $0xda0] ss:$12 sps:$4 sm:$0xff]   ;;  %v13835_v50 = vld [vmem:[%s19604_s1 + $0xe48] ss:$12 sps:$4 sm:$0xff]  }
 0x329   : > { %v11937_v62 = vpop.f32.mrf.mxu1  ;;  %v8708_v47 = vadd.f32 %v11872_v54, %v18003_v52  ;;  %v20259_v54 = vld [vmem:[#allocation116_spill] sm:$0xff] }
 0x32a   : > { %v11874_v55 = vpop.f32.mrf.mxu0  ;;  %12365 = vmatpush3.bf16.msra.mxu0 %v13826_v13 }
 0x32b   : > { %v11938_v10 = vpop.f32.mrf.mxu1  ;;  %12429 = vmatpush3.bf16.msra.mxu1 %v13828_v0  ;;  %v18094_v61 = vadd.f32 %v11936_v8, %v8708_v47  ;;  %v11875_v53 = vadd.f32 %v11874_v55, %v11873_v20  ;;  %12366 = vmatprep.subr.bf16.mxu0 %v13829_v5  ;;  %v20258_v0 = vld [vmem:[#allocation115_spill] sm:$0xff]  ;;  %v20260_v55 = vld [vmem:[#allocation117_spill] sm:$0xff] }
 0x32c   : > { %v11939_v17 = vadd.f32 %v11938_v10, %v11937_v62  ;;  %12430 = vmatprep.subr.bf16.mxu1 %v13831_v40  ;;  %v11876_v1 = vpop.f32.mrf.mxu0  ;;  %9296 = vmatmul.mubr.bf16.gmra.mxu0 %v20258_v0  ;;  %v20261_v10 = vld [vmem:[#allocation118_spill] sm:$0xff] }
 0x32d   : > { %v11940_v13 = vpop.f32.mrf.mxu1  ;;  %9393 = vmatmul.mubr.bf16.gmra.mxu1 %v20259_v54  ;;  %v8711_v8 = vadd.f32 %v11875_v53, %v18003_v52  ;;  %9303 = vmatprep.mubr.bf16.mxu0 %v20260_v55  ;;  %v13834_v20 = vld [vmem:[%s19604_s1 + $0xc08] ss:$12 sps:$4 sm:$0xff]   ;;  %v13837_v54 = vld [vmem:[%s19604_s1 + $0x1070] ss:$12 sps:$4 sm:$0xff]  }
 0x32e   : > { %9400 = vmatprep.mubr.bf16.mxu1 %v20261_v10  ;;  %v11877_v5 = vpop.f32.mrf.mxu0  ;;  %12367 = vmatpush3.bf16.msra.mxu0 %v13830_v57  ;;  %v13836_v62 = vld [vmem:[%s19604_s1 + $0xd88] ss:$12 sps:$4 sm:$0xff]   ;;  %v13839_v57 = vld [vmem:[%s19604_s1 + $0x11f0] ss:$12 sps:$4 sm:$0xff]  }
 0x32f   : > { %v11941_v40 = vpop.f32.mrf.mxu1  ;;  %12431 = vmatpush3.bf16.msra.mxu1 %v13832_v59  ;;  %v18113_v47 = vadd.f32 %v11939_v17, %v8711_v8  ;;  %v11878_v0 = vadd.f32 %v11877_v5, %v11876_v1  ;;  %12368 = vmatprep.subr.bf16.mxu0 %v13833_v39  ;;  %v20262_v8 = vld [vmem:[#allocation119_spill] sm:$0xff]  ;;  %v20263_v5 = vld [vmem:[#allocation120_spill] sm:$0xff] }
 0x330   : > { %v11942_v53 = vadd.f32 %v11941_v40, %v11940_v13  ;;  %12432 = vmatprep.subr.bf16.mxu1 %v13835_v50  ;;  %v11879_v59 = vpop.f32.mrf.mxu0 }
 0x331   : > { %v11943_v55 = vpop.f32.mrf.mxu1  ;;  %v8716_v10 = vadd.f32 %v11878_v0, %v18003_v52  ;;  %v20265_v0 = vld [vmem:[#allocation122_spill] sm:$0xff] }
 0x332   : > { %v11880_v15 = vpop.f32.mrf.mxu0  ;;  %12369 = vmatpush3.bf16.msra.mxu0 %v13834_v20 }
 0x333   : > { %v11944_v2 = vpop.f32.mrf.mxu1  ;;  %12433 = vmatpush3.bf16.msra.mxu1 %v13836_v62  ;;  %v18122_v17 = vadd.f32 %v11942_v53, %v8716_v10  ;;  %v11881_v39 = vadd.f32 %v11880_v15, %v11879_v59  ;;  %12482 = vmatprep.subr.bf16.mxu0 %v13837_v54 }
 0x334   : > { %v11945_v50 = vadd.f32 %v11944_v2, %v11943_v55  ;;  %12546 = vmatprep.subr.bf16.mxu1 %v13839_v57  ;;  %v11882_v1 = vpop.f32.mrf.mxu0  ;;  %9304 = vmatmul.mubr.bf16.gmra.mxu0 %v20262_v8 }
 0x335   : > { %v11946_v13 = vpop.f32.mrf.mxu1  ;;  %9401 = vmatmul.mubr.bf16.gmra.mxu1 %v20263_v5  ;;  %v8719_v40 = vadd.f32 %v11881_v39, %v18003_v52  ;;  %9311 = vmatprep.mubr.bf16.mxu0 %v20264_v42 }
 0x336   : > { %9408 = vmatprep.mubr.bf16.mxu1 %v20265_v0  ;;  %v11883_v20 = vpop.f32.mrf.mxu0  ;;  %v20267_v0 = vld [vmem:[#allocation124_spill] sm:$0xff] }
 0x337   : > { %v11947_v62 = vpop.f32.mrf.mxu1  ;;  %v18129_v53 = vadd.f32 %v11945_v50, %v8719_v40  ;;  %v11884_v15 = vadd.f32 %v11883_v20, %v11882_v1  ;;  %v20268_v1 = vld [vmem:[#allocation125_spill] sm:$0xff] }
 0x338   : > { %v11948_v2 = vadd.f32 %v11947_v62, %v11946_v13  ;;  %v11885_v54 = vpop.f32.mrf.mxu0  ;;  %v20269_v13 = vld [vmem:[#allocation126_spill] sm:$0xff] }
 0x339   : > { %v11949_v57 = vpop.f32.mrf.mxu1  ;;  %v8724_v59 = vadd.f32 %v11884_v15, %v18003_v52 }
 0x33a   : > { %v11886_v55 = vpop.f32.mrf.mxu0 }
 0x33b   : > { %v11950_v10 = vpop.f32.mrf.mxu1  ;;  %v18132_v8 = vadd.f32 %v11948_v2, %v8724_v59  ;;  %v11887_v5 = vadd.f32 %v11886_v55, %v11885_v54 }
 0x33c   : > { %v11951_v39 = vadd.f32 %v11950_v10, %v11949_v57  ;;  %v11888_v41 = vpop.f32.mrf.mxu0  ;;  %9312 = vmatmul.mubr.bf16.gmra.mxu0 %v20266_v27 }
 0x33d   : > { %v11952_v42 = vpop.f32.mrf.mxu1  ;;  %9409 = vmatmul.mubr.bf16.gmra.mxu1 %v20267_v0  ;;  %v8727_v50 = vadd.f32 %v11887_v5, %v18003_v52  ;;  %9319 = vmatprep.mubr.bf16.mxu0 %v20268_v1 }
 0x33e   : > { %9416 = vmatprep.mubr.bf16.mxu1 %v20269_v13  ;;  %v11889_v40 = vpop.f32.mrf.mxu0  ;;  %v20271_v13 = vld [vmem:[#allocation128_spill] sm:$0xff] }
 0x33f   : > { %v11953_v20 = vpop.f32.mrf.mxu1  ;;  %v18139_v62 = vadd.f32 %v11951_v39, %v8727_v50  ;;  %v11890_v15 = vadd.f32 %v11889_v40, %v11888_v41  ;;  %v20272_v41 = vld [vmem:[#allocation129_spill] sm:$0xff] }
 0x340   : > { %v11954_v2 = vadd.f32 %v11953_v20, %v11952_v42  ;;  %v11891_v54 = vpop.f32.mrf.mxu0  ;;  %v20273_v42 = vld [vmem:[#allocation130_spill] sm:$0xff] }
 0x341   : > { %v11955_v57 = vpop.f32.mrf.mxu1  ;;  %v8732_v59 = vadd.f32 %v11890_v15, %v18003_v52 }
 0x342   : > { %v11892_v55 = vpop.f32.mrf.mxu0 }
 0x343   : > { %v11956_v27 = vpop.f32.mrf.mxu1  ;;  %v18142_v10 = vadd.f32 %v11954_v2, %v8732_v59  ;;  %v11893_v0 = vadd.f32 %v11892_v55, %v11891_v54 }
 0x344   : > { %v11957_v5 = vadd.f32 %v11956_v27, %v11955_v57  ;;  %v11894_v30 = vpop.f32.mrf.mxu0  ;;  %9320 = vmatmul.mubr.bf16.gmra.mxu0 %v20270_v46 }
 0x345   : > { %v11958_v1 = vpop.f32.mrf.mxu1  ;;  %9417 = vmatmul.mubr.bf16.gmra.mxu1 %v20271_v13  ;;  %v8735_v39 = vadd.f32 %v11893_v0, %v18003_v52  ;;  %9327 = vmatprep.mubr.bf16.mxu0 %v20272_v41 }
 0x346   : > { %9424 = vmatprep.mubr.bf16.mxu1 %v20273_v42  ;;  %v11895_v50 = vpop.f32.mrf.mxu0  ;;  %v20275_v42 = vld [vmem:[#allocation132_spill] sm:$0xff] }
 0x347   : > { %v11959_v40 = vpop.f32.mrf.mxu1  ;;  %v18149_v20 = vadd.f32 %v11957_v5, %v8735_v39  ;;  %v11896_v15 = vadd.f32 %v11895_v50, %v11894_v30  ;;  %v20276_v30 = vld [vmem:[#allocation133_spill] sm:$0xff] }
 0x348   : > { %v11960_v2 = vadd.f32 %v11959_v40, %v11958_v1  ;;  %v11897_v54 = vpop.f32.mrf.mxu0  ;;  %v20277_v1 = vld [vmem:[#allocation134_spill] sm:$0xff] }
 0x349   : > { %v11961_v57 = vpop.f32.mrf.mxu1  ;;  %v8740_v59 = vadd.f32 %v11896_v15, %v18003_v52 }
 0x34a   : > { %v11898_v55 = vpop.f32.mrf.mxu0 }
 0x34b   : > { %v11962_v46 = vpop.f32.mrf.mxu1  ;;  %v18152_v27 = vadd.f32 %v11960_v2, %v8740_v59  ;;  %v11899_v13 = vadd.f32 %v11898_v55, %v11897_v54  ;;  %v13840_v55 = vld [vmem:[%s19604_s1 + $0x1130] ss:$12 sps:$4 sm:$0xff]  }
 0x34c   : > { %v11963_v0 = vadd.f32 %v11962_v46, %v11961_v57  ;;  %v11900_v22 = vpop.f32.mrf.mxu0  ;;  %9328 = vmatmul.mubr.bf16.gmra.mxu0 %v20274_v16  ;;  %v13838_v16 = vld [vmem:[%s19604_s1 + $0xfb0] ss:$12 sps:$4 sm:$0xff]  }
 0x34d   : > { %v11964_v41 = vpop.f32.mrf.mxu1  ;;  %9425 = vmatmul.mubr.bf16.gmra.mxu1 %v20275_v42  ;;  %v8743_v5 = vadd.f32 %v11899_v13, %v18003_v52  ;;  %9465 = vmatprep.mubr.bf16.mxu0 %v20276_v30 }
 0x34e   : > { %9562 = vmatprep.mubr.bf16.mxu1 %v20277_v1  ;;  %v11901_v39 = vpop.f32.mrf.mxu0 }
 0x34f   : > { %v11965_v50 = vpop.f32.mrf.mxu1  ;;  %v18159_v40 = vadd.f32 %v11963_v0, %v8743_v5  ;;  %v11902_v15 = vadd.f32 %v11901_v39, %v11900_v22  ;;  %v13841_v22 = vld [vmem:[%s19604_s1 + $0x1058] ss:$12 sps:$4 sm:$0xff]   ;;  %v20278_v39 = vld [vmem:[#allocation135_spill] sm:$0xff] }
 0x350   : > { %v11966_v2 = vadd.f32 %v11965_v50, %v11964_v41  ;;  %v11903_v54 = vpop.f32.mrf.mxu0  ;;  %v13843_v41 = vld [vmem:[%s19604_s1 + $0x11d8] ss:$12 sps:$4 sm:$0xff]  }
 0x351   : > { %v11967_v57 = vpop.f32.mrf.mxu1  ;;  %v8748_v59 = vadd.f32 %v11902_v15, %v18003_v52  ;;  %v20279_v50 = vld [vmem:[#allocation136_spill] sm:$0xff] }
 0x352   : > { %v11904_v46 = vpop.f32.mrf.mxu0 }
 0x353   : > { %v11968_v13 = vpop.f32.mrf.mxu1  ;;  %v18168_v42 = vadd.f32 %v11966_v2, %v8748_v59  ;;  %v11905_v0 = vadd.f32 %v11904_v46, %v11903_v54  ;;  %v13842_v2 = vld [vmem:[%s19604_s1 + $0xf98] ss:$12 sps:$4 sm:$0xff]  }
 0x354   : > { %v11969_v5 = vadd.f32 %v11968_v13, %v11967_v57  ;;  %v11986_v30 = vpop.f32.mrf.mxu0  ;;  %9466 = vmatmul.mubr.bf16.vlgmr.msra.gmra.mxu0 %v20278_v39  ;;  %v13844_v54 = vld [vmem:[%s19604_s1 + $0x1118] ss:$12 sps:$4 sm:$0xff]   ;;  %v20281_v13 = vld [vmem:[#allocation138_spill] sm:$0xff] }
 0x355   : > { %v12050_v1 = vpop.f32.mrf.mxu1  ;;  %9563 = vmatmul.mubr.bf16.vlgmr.msra.gmra.mxu1 %v20279_v50  ;;  %v8751_v15 = vadd.f32 %v11905_v0, %v18003_v52  ;;  %12483 = vmatpush3.bf16.msra.mxu0 %v13838_v16  ;;  %v20280_v46 = vld [vmem:[#allocation137_spill] sm:$0xff] }
 0x356   : > { %12547 = vmatpush3.bf16.msra.mxu1 %v13840_v55  ;;  %v11987_v57 = vpop.f32.mrf.mxu0  ;;  %9473 = vmatprep.mubr.bf16.mxu0 %v20280_v46  ;;  %v13845_v52 = vld [vmem:[%s19604_s1 + $0x1040] ss:$12 sps:$4 sm:$0xff]  }
 0x357   : > { %v12051_v59 = vpop.f32.mrf.mxu1  ;;  %9570 = vmatprep.mubr.bf16.mxu1 %v20281_v13  ;;  %v13847_v16 = vld [vmem:[%s19604_s1 + $0x11c0] ss:$12 sps:$4 sm:$0xff]   ;;  %v18193_v55 = vadd.f32 %v11969_v5, %v8751_v15  ;;  %v11988_v0 = vadd.f32 %v11987_v57, %v11986_v30  ;;  %12484 = vmatprep.subr.bf16.mxu0 %v13841_v22  ;;  %v20283_v57 = vld [vmem:[#allocation140_spill] sm:$0xff] }
 0x358   : > { %v12052_v39 = vadd.f32 %v12051_v59, %v12050_v1  ;;  %12548 = vmatprep.subr.bf16.mxu1 %v13843_v41  ;;  %v11989_v50 = vpop.f32.mrf.mxu0  ;;  %v13848_v5 = vld [vmem:[%s19604_s1 + $0x1100] ss:$12 sps:$4 sm:$0xff]   ;;  %v13851_v1 = vld [vmem:[%s19604_s1 + $0x11a8] ss:$12 sps:$4 sm:$0xff]  }
 0x359   : > { %v12053_v7 = vpop.f32.mrf.mxu1  ;;  %v8886_v46 = vadd.f32 %v11988_v0, %v18026_v45  ;;  %12485 = vmatpush3.bf16.msra.mxu0 %v13842_v2  ;;  %v13849_v45 = vld [vmem:[%s19604_s1 + $0x1028] ss:$12 sps:$4 sm:$0xff]  }
 0x35a   : > { %12549 = vmatpush3.bf16.msra.mxu1 %v13844_v54  ;;  %v11990_v13 = vpop.f32.mrf.mxu0  ;;  %12486 = vmatprep.subr.bf16.mxu0 %v13845_v52  ;;  %v20282_v54 = vld [vmem:[#allocation139_spill] sm:$0xff]  ;;  %v20284_v52 = vld [vmem:[#allocation141_spill] sm:$0xff] }
 0x35b   : > { %v12054_v18 = vpop.f32.mrf.mxu1  ;;  %12550 = vmatprep.subr.bf16.mxu1 %v13847_v16  ;;  %v18202_v22 = vadd.f32 %v12052_v39, %v8886_v46  ;;  %v11991_v41 = vadd.f32 %v11990_v13, %v11989_v50  ;;  %v20285_v16 = vld [vmem:[#allocation142_spill] sm:$0xff]  ;;  %v13853_v13 = vld [vmem:[%s19604_s1 + $0x1010] ss:$12 sps:$4 sm:$0xff]  }
 0x35c   : > { %v12055_v30 = vadd.f32 %v12054_v18, %v12053_v7  ;;  %v11992_v15 = vpop.f32.mrf.mxu0  ;;  %9474 = vmatmul.mubr.bf16.gmra.mxu0 %v20282_v54  ;;  %v13850_v0 = vld [vmem:[%s19604_s1 + $0xf68] ss:$12 sps:$4 sm:$0xff]  }
 0x35d   : > { %v12056_v2 = vpop.f32.mrf.mxu1  ;;  %9571 = vmatmul.mubr.bf16.gmra.mxu1 %v20283_v57  ;;  %v8889_v59 = vadd.f32 %v11991_v41, %v18045_v60  ;;  %9481 = vmatprep.mubr.bf16.mxu0 %v20284_v52  ;;  %v13852_v39 = vld [vmem:[%s19604_s1 + $0x10e8] ss:$12 sps:$4 sm:$0xff]  }
 0x35e   : > { %9578 = vmatprep.mubr.bf16.mxu1 %v20285_v16  ;;  %v11993_v18 = vpop.f32.mrf.mxu0  ;;  %12487 = vmatpush3.bf16.msra.mxu0 %v13846_v63  ;;  %v13855_v63 = vld [vmem:[%s19604_s1 + $0x1190] ss:$12 sps:$4 sm:$0xff]  }
 0x35f   : > { %v12057_v7 = vpop.f32.mrf.mxu1  ;;  %12551 = vmatpush3.bf16.msra.mxu1 %v13848_v5  ;;  %v18221_v50 = vadd.f32 %v12055_v30, %v8889_v59  ;;  %v11994_v46 = vadd.f32 %v11993_v18, %v11992_v15  ;;  %12488 = vmatprep.subr.bf16.mxu0 %v13849_v45  ;;  %v13854_v30 = vld [vmem:[%s19604_s1 + $0xf50] ss:$12 sps:$4 sm:$0xff]   ;;  %v13859_v59 = vld [vmem:[%s19604_s1 + $0x1178] ss:$12 sps:$4 sm:$0xff]  }
 0x360   : > { %v12058_v60 = vadd.f32 %v12057_v7, %v12056_v2  ;;  %12552 = vmatprep.subr.bf16.mxu1 %v13851_v1  ;;  %v11995_v5 = vpop.f32.mrf.mxu0  ;;  %v13856_v45 = vld [vmem:[%s19604_s1 + $0x10d0] ss:$12 sps:$4 sm:$0xff]  }
 0x361   : > { %v12059_v41 = vpop.f32.mrf.mxu1  ;;  %v8894_v54 = vadd.f32 %v11994_v46, %v18060_v49  ;;  %v13857_v49 = vld [vmem:[%s19604_s1 + $0xff8] ss:$12 sps:$4 sm:$0xff]   ;;  %v20286_v7 = vld [vmem:[#allocation143_spill] sm:$0xff] }
 0x362   : > { %v11996_v57 = vpop.f32.mrf.mxu0  ;;  %12489 = vmatpush3.bf16.msra.mxu0 %v13850_v0  ;;  %v20287_v0 = vld [vmem:[#allocation144_spill] sm:$0xff]  ;;  %v20288_v46 = vld [vmem:[#allocation145_spill] sm:$0xff] }
 0x363   : > { %v12060_v52 = vpop.f32.mrf.mxu1  ;;  %12553 = vmatpush3.bf16.msra.mxu1 %v13852_v39  ;;  %v18236_v1 = vadd.f32 %v12058_v60, %v8894_v54  ;;  %v11997_v15 = vadd.f32 %v11996_v57, %v11995_v5  ;;  %12490 = vmatprep.subr.bf16.mxu0 %v13853_v13  ;;  %v20289_v60 = vld [vmem:[#allocation146_spill] sm:$0xff]  ;;  %v13858_v5 = vld [vmem:[%s19604_s1 + $0xf38] ss:$12 sps:$4 sm:$0xff]  }
 0x364   : > { %v12061_v2 = vadd.f32 %v12060_v52, %v12059_v41  ;;  %12554 = vmatprep.subr.bf16.mxu1 %v13855_v63  ;;  %v11998_v16 = vpop.f32.mrf.mxu0  ;;  %9482 = vmatmul.mubr.bf16.gmra.mxu0 %v20286_v7  ;;  %v13860_v41 = vld [vmem:[%s19604_s1 + $0x10b8] ss:$12 sps:$4 sm:$0xff]   ;;  %v13861_v52 = vld [vmem:[%s19604_s1 + $0xfe0] ss:$12 sps:$4 sm:$0xff]  }
 0x365   : > { %v12062_v18 = vpop.f32.mrf.mxu1  ;;  %9579 = vmatmul.mubr.bf16.gmra.mxu1 %v20287_v0  ;;  %v8897_v39 = vadd.f32 %v11997_v15, %v18079_v14  ;;  %9489 = vmatprep.mubr.bf16.mxu0 %v20288_v46 }
 0x366   : > { %9586 = vmatprep.mubr.bf16.mxu1 %v20289_v60  ;;  %v11999_v13 = vpop.f32.mrf.mxu0  ;;  %12491 = vmatpush3.bf16.msra.mxu0 %v13854_v30  ;;  %v13863_v30 = vld [vmem:[%s19604_s1 + $0x1160] ss:$12 sps:$4 sm:$0xff]  }
 0x367   : > { %v12063_v63 = vpop.f32.mrf.mxu1  ;;  %12555 = vmatpush3.bf16.msra.mxu1 %v13856_v45  ;;  %v18255_v54 = vadd.f32 %v12061_v2, %v8897_v39  ;;  %v12000_v57 = vadd.f32 %v11999_v13, %v11998_v16  ;;  %12492 = vmatprep.subr.bf16.mxu0 %v13857_v49  ;;  %v13862_v2 = vld [vmem:[%s19604_s1 + $0xf20] ss:$12 sps:$4 sm:$0xff]   ;;  %v13867_v39 = vld [vmem:[%s19604_s1 + $0x1148] ss:$12 sps:$4 sm:$0xff]  }
 0x368   : > { %v12064_v14 = vadd.f32 %v12063_v63, %v12062_v18  ;;  %12556 = vmatprep.subr.bf16.mxu1 %v13859_v59  ;;  %v12001_v45 = vpop.f32.mrf.mxu0  ;;  %v13864_v49 = vld [vmem:[%s19604_s1 + $0x10a0] ss:$12 sps:$4 sm:$0xff]   ;;  %v20290_v63 = vld [vmem:[#allocation147_spill] sm:$0xff] }
 0x369   : > { %v12065_v15 = vpop.f32.mrf.mxu1  ;;  %v8902_v7 = vadd.f32 %v12000_v57, %v18094_v61  ;;  %v13865_v61 = vld [vmem:[%s19604_s1 + $0xfc8] ss:$12 sps:$4 sm:$0xff]   ;;  %v20292_v57 = vld [vmem:[#allocation149_spill] sm:$0xff] }
 0x36a   : > { %v12002_v0 = vpop.f32.mrf.mxu0  ;;  %12493 = vmatpush3.bf16.msra.mxu0 %v13858_v5  ;;  %v20291_v5 = vld [vmem:[#allocation148_spill] sm:$0xff] }
 0x36b   : > { %v12066_v46 = vpop.f32.mrf.mxu1  ;;  %12557 = vmatpush3.bf16.msra.mxu1 %v13860_v41  ;;  %v18270_v59 = vadd.f32 %v12064_v14, %v8902_v7  ;;  %v12003_v16 = vadd.f32 %v12002_v0, %v12001_v45  ;;  %12494 = vmatprep.subr.bf16.mxu0 %v13861_v52  ;;  %v20293_v14 = vld [vmem:[#allocation150_spill] sm:$0xff] }
 0x36c   : > { %v12067_v18 = vadd.f32 %v12066_v46, %v12065_v15  ;;  %12558 = vmatprep.subr.bf16.mxu1 %v13863_v30  ;;  %v12004_v60 = vpop.f32.mrf.mxu0  ;;  %9490 = vmatmul.mubr.bf16.gmra.mxu0 %v20290_v63  ;;  %v13866_v45 = vld [vmem:[%s19604_s1 + $0xf08] ss:$12 sps:$4 sm:$0xff]   ;;  %v13869_v46 = vld [vmem:[%s19604_s1 + $0x1370] ss:$12 sps:$4 sm:$0xff]  }
 0x36d   : > { %v12068_v13 = vpop.f32.mrf.mxu1  ;;  %9587 = vmatmul.mubr.bf16.gmra.mxu1 %v20291_v5  ;;  %v8905_v41 = vadd.f32 %v12003_v16, %v18113_v47  ;;  %9497 = vmatprep.mubr.bf16.mxu0 %v20292_v57  ;;  %v13868_v15 = vld [vmem:[%s19604_s1 + $0x1088] ss:$12 sps:$4 sm:$0xff]  }
 0x36e   : > { %9594 = vmatprep.mubr.bf16.mxu1 %v20293_v14  ;;  %v12005_v52 = vpop.f32.mrf.mxu0  ;;  %12495 = vmatpush3.bf16.msra.mxu0 %v13862_v2  ;;  %v13871_v2 = vld [vmem:[%s19604_s1 + $0x14f0] ss:$12 sps:$4 sm:$0xff]  }
 0x36f   : > { %v12069_v30 = vpop.f32.mrf.mxu1  ;;  %12559 = vmatpush3.bf16.msra.mxu1 %v13864_v49  ;;  %v18289_v7 = vadd.f32 %v12067_v18, %v8905_v41  ;;  %v12006_v0 = vadd.f32 %v12005_v52, %v12004_v60  ;;  %12496 = vmatprep.subr.bf16.mxu0 %v13865_v61  ;;  %v20294_v41 = vld [vmem:[#allocation151_spill] sm:$0xff]  ;;  %v20295_v14 = vld [vmem:[#allocation152_spill] sm:$0xff] }
 0x370   : > { %v12070_v47 = vadd.f32 %v12069_v30, %v12068_v13  ;;  %12560 = vmatprep.subr.bf16.mxu1 %v13867_v39  ;;  %v12007_v49 = vpop.f32.mrf.mxu0  ;;  %v20296_v30 = vld [vmem:[#allocation153_spill] sm:$0xff] }
 0x371   : > { %v12071_v16 = vpop.f32.mrf.mxu1  ;;  %v8910_v63 = vadd.f32 %v12006_v0, %v18122_v17  ;;  %v20297_v17 = vld [vmem:[#allocation154_spill] sm:$0xff] }
 0x372   : > { %v12008_v5 = vpop.f32.mrf.mxu0  ;;  %12497 = vmatpush3.bf16.msra.mxu0 %v13866_v45 }
 0x373   : > { %v12072_v57 = vpop.f32.mrf.mxu1  ;;  %12561 = vmatpush3.bf16.msra.mxu1 %v13868_v15  ;;  %v18298_v18 = vadd.f32 %v12070_v47, %v8910_v63  ;;  %v12009_v61 = vadd.f32 %v12008_v5, %v12007_v49  ;;  %12610 = vmatprep.subr.bf16.mxu0 %v13869_v46 }
 0x374   : > { %v12073_v39 = vadd.f32 %v12072_v57, %v12071_v16  ;;  %12674 = vmatprep.subr.bf16.mxu1 %v13871_v2  ;;  %v12010_v60 = vpop.f32.mrf.mxu0  ;;  %9498 = vmatmul.mubr.bf16.gmra.mxu0 %v20294_v41 }
 0x375   : > { %v12074_v13 = vpop.f32.mrf.mxu1  ;;  %9595 = vmatmul.mubr.bf16.gmra.mxu1 %v20295_v14  ;;  %v8913_v52 = vadd.f32 %v12009_v61, %v18129_v53  ;;  %9505 = vmatprep.mubr.bf16.mxu0 %v20296_v30  ;;  %v20298_v30 = vld [vmem:[#allocation155_spill] sm:$0xff] }
 0x376   : > { %9602 = vmatprep.mubr.bf16.mxu1 %v20297_v17  ;;  %v12011_v45 = vpop.f32.mrf.mxu0  ;;  %v20299_v17 = vld [vmem:[#allocation156_spill] sm:$0xff] }
 0x377   : > { %v12075_v15 = vpop.f32.mrf.mxu1  ;;  %v18305_v0 = vadd.f32 %v12073_v39, %v8913_v52  ;;  %v12012_v47 = vadd.f32 %v12011_v45, %v12010_v60  ;;  %v20300_v60 = vld [vmem:[#allocation157_spill] sm:$0xff] }
 0x378   : > { %v12076_v49 = vadd.f32 %v12075_v15, %v12074_v13  ;;  %v12013_v46 = vpop.f32.mrf.mxu0  ;;  %v20301_v13 = vld [vmem:[#allocation158_spill] sm:$0xff] }
 0x379   : > { %v12077_v2 = vpop.f32.mrf.mxu1  ;;  %v8918_v16 = vadd.f32 %v12012_v47, %v18132_v8 }
 0x37a   : > { %v12014_v63 = vpop.f32.mrf.mxu0 }
 0x37b   : > { %v12078_v5 = vpop.f32.mrf.mxu1  ;;  %v18308_v57 = vadd.f32 %v12076_v49, %v8918_v16  ;;  %v12015_v41 = vadd.f32 %v12014_v63, %v12013_v46 }
 0x37c   : > { %v12079_v53 = vadd.f32 %v12078_v5, %v12077_v2  ;;  %v12016_v61 = vpop.f32.mrf.mxu0  ;;  %9506 = vmatmul.mubr.bf16.gmra.mxu0 %v20298_v30 }
 0x37d   : > { %v12080_v14 = vpop.f32.mrf.mxu1  ;;  %9603 = vmatmul.mubr.bf16.gmra.mxu1 %v20299_v17  ;;  %v8921_v39 = vadd.f32 %v12015_v41, %v18139_v62  ;;  %9513 = vmatprep.mubr.bf16.mxu0 %v20300_v60  ;;  %v20302_v60 = vld [vmem:[#allocation159_spill] sm:$0xff] }
 0x37e   : > { %9610 = vmatprep.mubr.bf16.mxu1 %v20301_v13  ;;  %v12017_v52 = vpop.f32.mrf.mxu0  ;;  %v20303_v13 = vld [vmem:[#allocation160_spill] sm:$0xff] }
 0x37f   : > { %v12081_v8 = vpop.f32.mrf.mxu1  ;;  %v18315_v45 = vadd.f32 %v12079_v53, %v8921_v39  ;;  %v12018_v15 = vadd.f32 %v12017_v52, %v12016_v61  ;;  %v20304_v61 = vld [vmem:[#allocation161_spill] sm:$0xff] }
 0x380   : > { %v12082_v47 = vadd.f32 %v12081_v8, %v12080_v14  ;;  %v12019_v49 = vpop.f32.mrf.mxu0  ;;  %v20305_v14 = vld [vmem:[#allocation162_spill] sm:$0xff] }
 0x381   : > { %v12083_v46 = vpop.f32.mrf.mxu1  ;;  %v8926_v2 = vadd.f32 %v12018_v15, %v18142_v10 }
 0x382   : > { %v12020_v16 = vpop.f32.mrf.mxu0 }
 0x383   : > { %v12084_v63 = vpop.f32.mrf.mxu1  ;;  %v18318_v5 = vadd.f32 %v12082_v47, %v8926_v2  ;;  %v12021_v30 = vadd.f32 %v12020_v16, %v12019_v49 }
 0x384   : > { %v12085_v62 = vadd.f32 %v12084_v63, %v12083_v46  ;;  %v12022_v41 = vpop.f32.mrf.mxu0  ;;  %9514 = vmatmul.mubr.bf16.gmra.mxu0 %v20302_v60 }
 0x385   : > { %v12086_v17 = vpop.f32.mrf.mxu1  ;;  %9611 = vmatmul.mubr.bf16.gmra.mxu1 %v20303_v13  ;;  %v8929_v53 = vadd.f32 %v12021_v30, %v18149_v20  ;;  %9521 = vmatprep.mubr.bf16.mxu0 %v20304_v61  ;;  %v20306_v61 = vld [vmem:[#allocation163_spill] sm:$0xff] }
 0x386   : > { %9618 = vmatprep.mubr.bf16.mxu1 %v20305_v14  ;;  %v12023_v39 = vpop.f32.mrf.mxu0  ;;  %v20307_v14 = vld [vmem:[#allocation164_spill] sm:$0xff] }
 0x387   : > { %v12087_v10 = vpop.f32.mrf.mxu1  ;;  %v18325_v52 = vadd.f32 %v12085_v62, %v8929_v53  ;;  %v12024_v8 = vadd.f32 %v12023_v39, %v12022_v41  ;;  %v20308_v41 = vld [vmem:[#allocation165_spill] sm:$0xff] }
 0x388   : > { %v12088_v15 = vadd.f32 %v12087_v10, %v12086_v17  ;;  %v12025_v47 = vpop.f32.mrf.mxu0  ;;  %v20309_v17 = vld [vmem:[#allocation166_spill] sm:$0xff] }
 0x389   : > { %v12089_v49 = vpop.f32.mrf.mxu1  ;;  %v8934_v46 = vadd.f32 %v12024_v8, %v18152_v27 }
 0x38a   : > { %v12026_v2 = vpop.f32.mrf.mxu0 }
 0x38b   : > { %v12090_v16 = vpop.f32.mrf.mxu1  ;;  %v18328_v63 = vadd.f32 %v12088_v15, %v8934_v46  ;;  %v12027_v60 = vadd.f32 %v12026_v2, %v12025_v47  ;;  %v13870_v46 = vld [vmem:[%s19604_s1 + $0x12b0] ss:$12 sps:$4 sm:$0xff]  }
 0x38c   : > { %v12091_v20 = vadd.f32 %v12090_v16, %v12089_v49  ;;  %v12028_v30 = vpop.f32.mrf.mxu0  ;;  %9522 = vmatmul.mubr.bf16.gmra.mxu0 %v20306_v61 }
 0x38d   : > { %v12092_v13 = vpop.f32.mrf.mxu1  ;;  %9619 = vmatmul.mubr.bf16.gmra.mxu1 %v20307_v14  ;;  %v8937_v62 = vadd.f32 %v12027_v60, %v18159_v40  ;;  %9659 = vmatprep.mubr.bf16.mxu0 %v20308_v41  ;;  %v13872_v40 = vld [vmem:[%s19604_s1 + $0x1430] ss:$12 sps:$4 sm:$0xff]  }
 0x38e   : > { %9756 = vmatprep.mubr.bf16.mxu1 %v20309_v17  ;;  %v12029_v53 = vpop.f32.mrf.mxu0  ;;  %v20311_v41 = vld [vmem:[#allocation168_spill] sm:$0xff] }
 0x38f   : > { %v12093_v27 = vpop.f32.mrf.mxu1  ;;  %v18335_v39 = vadd.f32 %v12091_v20, %v8937_v62  ;;  %v12030_v10 = vadd.f32 %v12029_v53, %v12028_v30  ;;  %v13873_v30 = vld [vmem:[%s19604_s1 + $0x1358] ss:$12 sps:$4 sm:$0xff]   ;;  %v20310_v62 = vld [vmem:[#allocation167_spill] sm:$0xff] }
 0x390   : > { %v12094_v8 = vadd.f32 %v12093_v27, %v12092_v13  ;;  %v12031_v15 = vpop.f32.mrf.mxu0  ;;  %v13874_v53 = vld [vmem:[%s19604_s1 + $0x1298] ss:$12 sps:$4 sm:$0xff]  }
 0x391   : > { %v12095_v47 = vpop.f32.mrf.mxu1  ;;  %v8942_v49 = vadd.f32 %v12030_v10, %v18168_v42  ;;  %v13875_v42 = vld [vmem:[%s19604_s1 + $0x14d8] ss:$12 sps:$4 sm:$0xff]  }
 0x392   : > { %v12032_v2 = vpop.f32.mrf.mxu0  ;;  %v13876_v27 = vld [vmem:[%s19604_s1 + $0x1418] ss:$12 sps:$4 sm:$0xff]  }
 0x393   : > { %v12096_v16 = vpop.f32.mrf.mxu1  ;;  %v18344_v60 = vadd.f32 %v12094_v8, %v8942_v49  ;;  %v12033_v20 = vadd.f32 %v12032_v2, %v12031_v15  ;;  %v20312_v15 = vld [vmem:[#allocation169_spill] sm:$0xff] }
 0x394   : > { %v12097_v61 = vadd.f32 %v12096_v16, %v12095_v47  ;;  %v12114_v13 = vpop.f32.mrf.mxu0  ;;  %9660 = vmatmul.mubr.bf16.vlgmr.msra.gmra.mxu0 %v20310_v62  ;;  %v20313_v47 = vld [vmem:[#allocation170_spill] sm:$0xff] }
 0x395   : > { %v12178_v14 = vpop.f32.mrf.mxu1  ;;  %9757 = vmatmul.mubr.bf16.vlgmr.msra.gmra.mxu1 %v20311_v41  ;;  %v8945_v17 = vadd.f32 %v12033_v20, %v18193_v55  ;;  %12611 = vmatpush3.bf16.msra.mxu0 %v13870_v46  ;;  %v13877_v55 = vld [vmem:[%s19604_s1 + $0x1340] ss:$12 sps:$4 sm:$0xff]  }
 0x396   : > { %12675 = vmatpush3.bf16.msra.mxu1 %v13872_v40  ;;  %v12115_v10 = vpop.f32.mrf.mxu0  ;;  %9667 = vmatprep.mubr.bf16.mxu0 %v20312_v15  ;;  %v13879_v49 = vld [vmem:[%s19604_s1 + $0x14c0] ss:$12 sps:$4 sm:$0xff]  }
 0x397   : > { %v12179_v8 = vpop.f32.mrf.mxu1  ;;  %9764 = vmatprep.mubr.bf16.mxu1 %v20313_v47  ;;  %v18369_v46 = vadd.f32 %v12097_v61, %v8945_v17  ;;  %v12116_v40 = vadd.f32 %v12115_v10, %v12114_v13  ;;  %12612 = vmatprep.subr.bf16.mxu0 %v13873_v30  ;;  %v13878_v47 = vld [vmem:[%s19604_s1 + $0x1280] ss:$12 sps:$4 sm:$0xff]   ;;  %v20315_v10 = vld [vmem:[#allocation172_spill] sm:$0xff] }
 0x398   : > { %v12180_v2 = vadd.f32 %v12179_v8, %v12178_v14  ;;  %12676 = vmatprep.subr.bf16.mxu1 %v13875_v42  ;;  %v12117_v16 = vpop.f32.mrf.mxu0  ;;  %v13880_v61 = vld [vmem:[%s19604_s1 + $0x1400] ss:$12 sps:$4 sm:$0xff]   ;;  %v13883_v14 = vld [vmem:[%s19604_s1 + $0x14a8] ss:$12 sps:$4 sm:$0xff]  }
 0x399   : > { %v12181_v20 = vpop.f32.mrf.mxu1  ;;  %v9080_v62 = vadd.f32 %v12116_v40, %v18202_v22  ;;  %12613 = vmatpush3.bf16.msra.mxu0 %v13874_v53  ;;  %v13881_v22 = vld [vmem:[%s19604_s1 + $0x1328] ss:$12 sps:$4 sm:$0xff]  }
 0x39a   : > { %12677 = vmatpush3.bf16.msra.mxu1 %v13876_v27  ;;  %v12118_v41 = vpop.f32.mrf.mxu0  ;;  %12614 = vmatprep.subr.bf16.mxu0 %v13877_v55  ;;  %v20314_v27 = vld [vmem:[#allocation171_spill] sm:$0xff]  ;;  %v20316_v55 = vld [vmem:[#allocation173_spill] sm:$0xff] }
 0x39b   : > { %v12182_v15 = vpop.f32.mrf.mxu1  ;;  %12678 = vmatprep.subr.bf16.mxu1 %v13879_v49  ;;  %v18378_v30 = vadd.f32 %v12180_v2, %v9080_v62  ;;  %v12119_v42 = vadd.f32 %v12118_v41, %v12117_v16  ;;  %v20317_v49 = vld [vmem:[#allocation174_spill] sm:$0xff] }
 0x39c   : > { %v12183_v13 = vadd.f32 %v12182_v15, %v12181_v20  ;;  %v12120_v17 = vpop.f32.mrf.mxu0  ;;  %9668 = vmatmul.mubr.bf16.gmra.mxu0 %v20314_v27  ;;  %v13882_v16 = vld [vmem:[%s19604_s1 + $0x1268] ss:$12 sps:$4 sm:$0xff]   ;;  %v13885_v15 = vld [vmem:[%s19604_s1 + $0x1310] ss:$12 sps:$4 sm:$0xff]  }
 0x39d   : > { %v12184_v53 = vpop.f32.mrf.mxu1  ;;  %9765 = vmatmul.mubr.bf16.gmra.mxu1 %v20315_v10  ;;  %v9083_v8 = vadd.f32 %v12119_v42, %v18221_v50  ;;  %9675 = vmatprep.mubr.bf16.mxu0 %v20316_v55  ;;  %v13884_v20 = vld [vmem:[%s19604_s1 + $0x13e8] ss:$12 sps:$4 sm:$0xff]  }
 0x39e   : > { %9772 = vmatprep.mubr.bf16.mxu1 %v20317_v49  ;;  %v12121_v40 = vpop.f32.mrf.mxu0  ;;  %12615 = vmatpush3.bf16.msra.mxu0 %v13878_v47  ;;  %v13887_v47 = vld [vmem:[%s19604_s1 + $0x1490] ss:$12 sps:$4 sm:$0xff]  }
 0x39f   : > { %v12185_v2 = vpop.f32.mrf.mxu1  ;;  %12679 = vmatpush3.bf16.msra.mxu1 %v13880_v61  ;;  %v18397_v62 = vadd.f32 %v12183_v13, %v9083_v8  ;;  %v12122_v41 = vadd.f32 %v12121_v40, %v12120_v17  ;;  %12616 = vmatprep.subr.bf16.mxu0 %v13881_v22  ;;  %v13886_v13 = vld [vmem:[%s19604_s1 + $0x1250] ss:$12 sps:$4 sm:$0xff]   ;;  %v13891_v8 = vld [vmem:[%s19604_s1 + $0x1478] ss:$12 sps:$4 sm:$0xff]  }
 0x3a0   : > { %v12186_v50 = vadd.f32 %v12185_v2, %v12184_v53  ;;  %12680 = vmatprep.subr.bf16.mxu1 %v13883_v14  ;;  %v12123_v61 = vpop.f32.mrf.mxu0  ;;  %v13888_v22 = vld [vmem:[%s19604_s1 + $0x13d0] ss:$12 sps:$4 sm:$0xff]  }
 0x3a1   : > { %v12187_v42 = vpop.f32.mrf.mxu1  ;;  %v9088_v27 = vadd.f32 %v12122_v41, %v18236_v1  ;;  %v13889_v1 = vld [vmem:[%s19604_s1 + $0x12f8] ss:$12 sps:$4 sm:$0xff]   ;;  %v20318_v2 = vld [vmem:[#allocation175_spill] sm:$0xff] }
 0x3a2   : > { %v12124_v10 = vpop.f32.mrf.mxu0  ;;  %12617 = vmatpush3.bf16.msra.mxu0 %v13882_v16  ;;  %v20319_v16 = vld [vmem:[#allocation176_spill] sm:$0xff]  ;;  %v20320_v41 = vld [vmem:[#allocation177_spill] sm:$0xff] }
 0x3a3   : > { %v12188_v55 = vpop.f32.mrf.mxu1  ;;  %12681 = vmatpush3.bf16.msra.mxu1 %v13884_v20  ;;  %v18412_v14 = vadd.f32 %v12186_v50, %v9088_v27  ;;  %v12125_v17 = vadd.f32 %v12124_v10, %v12123_v61  ;;  %12618 = vmatprep.subr.bf16.mxu0 %v13885_v15  ;;  %v20321_v50 = vld [vmem:[#allocation178_spill] sm:$0xff]  ;;  %v13890_v61 = vld [vmem:[%s19604_s1 + $0x1238] ss:$12 sps:$4 sm:$0xff]  }
 0x3a4   : > { %v12189_v53 = vadd.f32 %v12188_v55, %v12187_v42  ;;  %12682 = vmatprep.subr.bf16.mxu1 %v13887_v47  ;;  %v12126_v49 = vpop.f32.mrf.mxu0  ;;  %9676 = vmatmul.mubr.bf16.gmra.mxu0 %v20318_v2  ;;  %v13892_v42 = vld [vmem:[%s19604_s1 + $0x13b8] ss:$12 sps:$4 sm:$0xff]   ;;  %v13893_v55 = vld [vmem:[%s19604_s1 + $0x12e0] ss:$12 sps:$4 sm:$0xff]  }
 0x3a5   : > { %v12190_v40 = vpop.f32.mrf.mxu1  ;;  %9773 = vmatmul.mubr.bf16.gmra.mxu1 %v20319_v16  ;;  %v9091_v20 = vadd.f32 %v12125_v17, %v18255_v54  ;;  %9683 = vmatprep.mubr.bf16.mxu0 %v20320_v41 }
 0x3a6   : > { %9780 = vmatprep.mubr.bf16.mxu1 %v20321_v50  ;;  %v12127_v15 = vpop.f32.mrf.mxu0  ;;  %12619 = vmatpush3.bf16.msra.mxu0 %v13886_v13  ;;  %v13895_v13 = vld [vmem:[%s19604_s1 + $0x1460] ss:$12 sps:$4 sm:$0xff]  }
 0x3a7   : > { %v12191_v47 = vpop.f32.mrf.mxu1  ;;  %12683 = vmatpush3.bf16.msra.mxu1 %v13888_v22  ;;  %v18431_v27 = vadd.f32 %v12189_v53, %v9091_v20  ;;  %v12128_v10 = vadd.f32 %v12127_v15, %v12126_v49  ;;  %12620 = vmatprep.subr.bf16.mxu0 %v13889_v1  ;;  %v13894_v53 = vld [vmem:[%s19604_s1 + $0x1220] ss:$12 sps:$4 sm:$0xff]   ;;  %v13899_v20 = vld [vmem:[%s19604_s1 + $0x1448] ss:$12 sps:$4 sm:$0xff]  }
 0x3a8   : > { %v12192_v54 = vadd.f32 %v12191_v47, %v12190_v40  ;;  %12684 = vmatprep.subr.bf16.mxu1 %v13891_v8  ;;  %v12129_v22 = vpop.f32.mrf.mxu0  ;;  %v13896_v1 = vld [vmem:[%s19604_s1 + $0x13a0] ss:$12 sps:$4 sm:$0xff]   ;;  %v20322_v47 = vld [vmem:[#allocation179_spill] sm:$0xff] }
 0x3a9   : > { %v12193_v17 = vpop.f32.mrf.mxu1  ;;  %v9096_v2 = vadd.f32 %v12128_v10, %v18270_v59  ;;  %v13897_v59 = vld [vmem:[%s19604_s1 + $0x12c8] ss:$12 sps:$4 sm:$0xff]   ;;  %v20324_v10 = vld [vmem:[#allocation181_spill] sm:$0xff] }
 0x3aa   : > { %v12130_v16 = vpop.f32.mrf.mxu0  ;;  %12621 = vmatpush3.bf16.msra.mxu0 %v13890_v61  ;;  %v20323_v61 = vld [vmem:[#allocation180_spill] sm:$0xff] }
 0x3ab   : > { %v12194_v41 = vpop.f32.mrf.mxu1  ;;  %12685 = vmatpush3.bf16.msra.mxu1 %v13892_v42  ;;  %v18446_v8 = vadd.f32 %v12192_v54, %v9096_v2  ;;  %v12131_v49 = vadd.f32 %v12130_v16, %v12129_v22  ;;  %12622 = vmatprep.subr.bf16.mxu0 %v13893_v55  ;;  %v20325_v54 = vld [vmem:[#allocation182_spill] sm:$0xff] }
 0x3ac   : > { %v12195_v40 = vadd.f32 %v12194_v41, %v12193_v17  ;;  %12686 = vmatprep.subr.bf16.mxu1 %v13895_v13  ;;  %v12132_v50 = vpop.f32.mrf.mxu0  ;;  %9684 = vmatmul.mubr.bf16.gmra.mxu0 %v20322_v47  ;;  %v13898_v22 = vld [vmem:[%s19604_s1 + $0x1208] ss:$12 sps:$4 sm:$0xff]   ;;  %v13901_v41 = vld [vmem:[%s19604_s1 + $0x1670] ss:$12 sps:$4 sm:$0xff]  }
 0x3ad   : > { %v12196_v15 = vpop.f32.mrf.mxu1  ;;  %9781 = vmatmul.mubr.bf16.gmra.mxu1 %v20323_v61  ;;  %v9099_v42 = vadd.f32 %v12131_v49, %v18289_v7  ;;  %9691 = vmatprep.mubr.bf16.mxu0 %v20324_v10  ;;  %v13900_v17 = vld [vmem:[%s19604_s1 + $0x1388] ss:$12 sps:$4 sm:$0xff]  }
 0x3ae   : > { %9788 = vmatprep.mubr.bf16.mxu1 %v20325_v54  ;;  %v12133_v55 = vpop.f32.mrf.mxu0  ;;  %12623 = vmatpush3.bf16.msra.mxu0 %v13894_v53  ;;  %v13903_v53 = vld [vmem:[%s19604_s1 + $0x17f0] ss:$12 sps:$4 sm:$0xff]  }
 0x3af   : > { %v12197_v13 = vpop.f32.mrf.mxu1  ;;  %12687 = vmatpush3.bf16.msra.mxu1 %v13896_v1  ;;  %v18465_v2 = vadd.f32 %v12195_v40, %v9099_v42  ;;  %v12134_v16 = vadd.f32 %v12133_v55, %v12132_v50  ;;  %12624 = vmatprep.subr.bf16.mxu0 %v13897_v59  ;;  %v20326_v42 = vld [vmem:[#allocation183_spill] sm:$0xff]  ;;  %v20327_v54 = vld [vmem:[#allocation184_spill] sm:$0xff] }
 0x3b0   : > { %v12198_v7 = vadd.f32 %v12197_v13, %v12196_v15  ;;  %12688 = vmatprep.subr.bf16.mxu1 %v13899_v20  ;;  %v12135_v1 = vpop.f32.mrf.mxu0  ;;  %v20328_v13 = vld [vmem:[#allocation185_spill] sm:$0xff] }
 0x3b1   : > { %v12199_v49 = vpop.f32.mrf.mxu1  ;;  %v9104_v47 = vadd.f32 %v12134_v16, %v18298_v18  ;;  %v20329_v18 = vld [vmem:[#allocation186_spill] sm:$0xff] }
 0x3b2   : > { %v12136_v61 = vpop.f32.mrf.mxu0  ;;  %12625 = vmatpush3.bf16.msra.mxu0 %v13898_v22 }
 0x3b3   : > { %v12200_v10 = vpop.f32.mrf.mxu1  ;;  %12689 = vmatpush3.bf16.msra.mxu1 %v13900_v17  ;;  %v18474_v40 = vadd.f32 %v12198_v7, %v9104_v47  ;;  %v12137_v59 = vadd.f32 %v12136_v61, %v12135_v1  ;;  %12738 = vmatprep.subr.bf16.mxu0 %v13901_v41 }
 0x3b4   : > { %v12201_v20 = vadd.f32 %v12200_v10, %v12199_v49  ;;  %12802 = vmatprep.subr.bf16.mxu1 %v13903_v53  ;;  %v12138_v50 = vpop.f32.mrf.mxu0  ;;  %9692 = vmatmul.mubr.bf16.gmra.mxu0 %v20326_v42 }
 0x3b5   : > { %v12202_v15 = vpop.f32.mrf.mxu1  ;;  %9789 = vmatmul.mubr.bf16.gmra.mxu1 %v20327_v54  ;;  %v9107_v55 = vadd.f32 %v12137_v59, %v18305_v0  ;;  %9699 = vmatprep.mubr.bf16.mxu0 %v20328_v13  ;;  %v20330_v13 = vld [vmem:[#allocation187_spill] sm:$0xff] }
 0x3b6   : > { %9796 = vmatprep.mubr.bf16.mxu1 %v20329_v18  ;;  %v12139_v22 = vpop.f32.mrf.mxu0  ;;  %v20331_v18 = vld [vmem:[#allocation188_spill] sm:$0xff] }
 0x3b7   : > { %v12203_v17 = vpop.f32.mrf.mxu1  ;;  %v18481_v16 = vadd.f32 %v12201_v20, %v9107_v55  ;;  %v12140_v7 = vadd.f32 %v12139_v22, %v12138_v50  ;;  %v20332_v50 = vld [vmem:[#allocation189_spill] sm:$0xff] }
 0x3b8   : > { %v12204_v1 = vadd.f32 %v12203_v17, %v12202_v15  ;;  %v12141_v41 = vpop.f32.mrf.mxu0  ;;  %v20333_v15 = vld [vmem:[#allocation190_spill] sm:$0xff] }
 0x3b9   : > { %v12205_v53 = vpop.f32.mrf.mxu1  ;;  %v9112_v49 = vadd.f32 %v12140_v7, %v18308_v57 }
 0x3ba   : > { %v12142_v47 = vpop.f32.mrf.mxu0 }
 0x3bb   : > { %v12206_v61 = vpop.f32.mrf.mxu1  ;;  %v18484_v10 = vadd.f32 %v12204_v1, %v9112_v49  ;;  %v12143_v42 = vadd.f32 %v12142_v47, %v12141_v41 }
 0x3bc   : > { %v12207_v0 = vadd.f32 %v12206_v61, %v12205_v53  ;;  %v12144_v59 = vpop.f32.mrf.mxu0  ;;  %9700 = vmatmul.mubr.bf16.gmra.mxu0 %v20330_v13 }
 0x3bd   : > { %v12208_v54 = vpop.f32.mrf.mxu1  ;;  %9797 = vmatmul.mubr.bf16.gmra.mxu1 %v20331_v18  ;;  %v9115_v20 = vadd.f32 %v12143_v42, %v18315_v45  ;;  %9707 = vmatprep.mubr.bf16.mxu0 %v20332_v50  ;;  %v20334_v50 = vld [vmem:[#allocation191_spill] sm:$0xff] }
 0x3be   : > { %9804 = vmatprep.mubr.bf16.mxu1 %v20333_v15  ;;  %v12145_v55 = vpop.f32.mrf.mxu0  ;;  %v20335_v15 = vld [vmem:[#allocation192_spill] sm:$0xff] }
 0x3bf   : > { %v12209_v57 = vpop.f32.mrf.mxu1  ;;  %v18491_v22 = vadd.f32 %v12207_v0, %v9115_v20  ;;  %v12146_v17 = vadd.f32 %v12145_v55, %v12144_v59  ;;  %v20336_v59 = vld [vmem:[#allocation193_spill] sm:$0xff] }
 0x3c0   : > { %v12210_v7 = vadd.f32 %v12209_v57, %v12208_v54  ;;  %v12147_v1 = vpop.f32.mrf.mxu0  ;;  %v20337_v54 = vld [vmem:[#allocation194_spill] sm:$0xff] }
 0x3c1   : > { %v12211_v41 = vpop.f32.mrf.mxu1  ;;  %v9120_v53 = vadd.f32 %v12146_v17, %v18318_v5 }
 0x3c2   : > { %v12148_v49 = vpop.f32.mrf.mxu0 }
 0x3c3   : > { %v12212_v47 = vpop.f32.mrf.mxu1  ;;  %v18494_v61 = vadd.f32 %v12210_v7, %v9120_v53  ;;  %v12149_v13 = vadd.f32 %v12148_v49, %v12147_v1 }
 0x3c4   : > { %v12213_v45 = vadd.f32 %v12212_v47, %v12211_v41  ;;  %v12150_v42 = vpop.f32.mrf.mxu0  ;;  %9708 = vmatmul.mubr.bf16.gmra.mxu0 %v20334_v50 }
 0x3c5   : > { %v12214_v18 = vpop.f32.mrf.mxu1  ;;  %9805 = vmatmul.mubr.bf16.gmra.mxu1 %v20335_v15  ;;  %v9123_v0 = vadd.f32 %v12149_v13, %v18325_v52  ;;  %9715 = vmatprep.mubr.bf16.mxu0 %v20336_v59  ;;  %v20338_v59 = vld [vmem:[#allocation195_spill] sm:$0xff] }
 0x3c6   : > { %9812 = vmatprep.mubr.bf16.mxu1 %v20337_v54  ;;  %v12151_v20 = vpop.f32.mrf.mxu0  ;;  %v20339_v54 = vld [vmem:[#allocation196_spill] sm:$0xff] }
 0x3c7   : > { %v12215_v5 = vpop.f32.mrf.mxu1  ;;  %v18501_v55 = vadd.f32 %v12213_v45, %v9123_v0  ;;  %v12152_v57 = vadd.f32 %v12151_v20, %v12150_v42  ;;  %v20340_v42 = vld [vmem:[#allocation197_spill] sm:$0xff] }
 0x3c8   : > { %v12216_v17 = vadd.f32 %v12215_v5, %v12214_v18  ;;  %v12153_v7 = vpop.f32.mrf.mxu0  ;;  %v20341_v18 = vld [vmem:[#allocation198_spill] sm:$0xff] }
 0x3c9   : > { %v12217_v1 = vpop.f32.mrf.mxu1  ;;  %v9128_v41 = vadd.f32 %v12152_v57, %v18328_v63 }
 0x3ca   : > { %v12154_v53 = vpop.f32.mrf.mxu0 }
 0x3cb   : > { %v12218_v49 = vpop.f32.mrf.mxu1  ;;  %v18504_v47 = vadd.f32 %v12216_v17, %v9128_v41  ;;  %v12155_v50 = vadd.f32 %v12154_v53, %v12153_v7  ;;  %v13902_v41 = vld [vmem:[%s19604_s1 + $0x15b0] ss:$12 sps:$4 sm:$0xff]  }
 0x3cc   : > { %v12219_v52 = vadd.f32 %v12218_v49, %v12217_v1  ;;  %v12156_v13 = vpop.f32.mrf.mxu0  ;;  %9716 = vmatmul.mubr.bf16.gmra.mxu0 %v20338_v59 }
 0x3cd   : > { %v12220_v15 = vpop.f32.mrf.mxu1  ;;  %9813 = vmatmul.mubr.bf16.gmra.mxu1 %v20339_v54  ;;  %v9131_v45 = vadd.f32 %v12155_v50, %v18335_v39  ;;  %9853 = vmatprep.mubr.bf16.mxu0 %v20340_v42  ;;  %v13904_v39 = vld [vmem:[%s19604_s1 + $0x1730] ss:$12 sps:$4 sm:$0xff]  }
 0x3ce   : > { %9950 = vmatprep.mubr.bf16.mxu1 %v20341_v18  ;;  %v12157_v0 = vpop.f32.mrf.mxu0  ;;  %v20343_v42 = vld [vmem:[#allocation200_spill] sm:$0xff] }
 0x3cf   : > { %v12221_v63 = vpop.f32.mrf.mxu1  ;;  %v18511_v20 = vadd.f32 %v12219_v52, %v9131_v45  ;;  %v12158_v5 = vadd.f32 %v12157_v0, %v12156_v13  ;;  %v13905_v13 = vld [vmem:[%s19604_s1 + $0x1658] ss:$12 sps:$4 sm:$0xff]   ;;  %v20342_v45 = vld [vmem:[#allocation199_spill] sm:$0xff] }
 0x3d0   : > { %v12222_v57 = vadd.f32 %v12221_v63, %v12220_v15  ;;  %v12159_v17 = vpop.f32.mrf.mxu0  ;;  %v13906_v0 = vld [vmem:[%s19604_s1 + $0x1598] ss:$12 sps:$4 sm:$0xff]  }
 0x3d1   : > { %v12223_v7 = vpop.f32.mrf.mxu1  ;;  %v9136_v1 = vadd.f32 %v12158_v5, %v18344_v60  ;;  %v13907_v60 = vld [vmem:[%s19604_s1 + $0x17d8] ss:$12 sps:$4 sm:$0xff]  }
 0x3d2   : > { %v12160_v53 = vpop.f32.mrf.mxu0  ;;  %v13908_v63 = vld [vmem:[%s19604_s1 + $0x1718] ss:$12 sps:$4 sm:$0xff]  }
 0x3d3   : > { %v12224_v49 = vpop.f32.mrf.mxu1  ;;  %v18520_v50 = vadd.f32 %v12222_v57, %v9136_v1  ;;  %v12161_v52 = vadd.f32 %v12160_v53, %v12159_v17  ;;  %v20344_v17 = vld [vmem:[#allocation201_spill] sm:$0xff] }
 0x3d4   : > { %v12225_v59 = vadd.f32 %v12224_v49, %v12223_v7  ;;  %v12242_v15 = vpop.f32.mrf.mxu0  ;;  %9854 = vmatmul.mubr.bf16.vlgmr.msra.gmra.mxu0 %v20342_v45  ;;  %v20345_v7 = vld [vmem:[#allocation202_spill] sm:$0xff] }
 0x3d5   : > { %v12306_v54 = vpop.f32.mrf.mxu1  ;;  %9951 = vmatmul.mubr.bf16.vlgmr.msra.gmra.mxu1 %v20343_v42  ;;  %v9139_v18 = vadd.f32 %v12161_v52, %v18369_v46  ;;  %12739 = vmatpush3.bf16.msra.mxu0 %v13902_v41  ;;  %v13909_v46 = vld [vmem:[%s19604_s1 + $0x1640] ss:$12 sps:$4 sm:$0xff]  }
 0x3d6   : > { %12803 = vmatpush3.bf16.msra.mxu1 %v13904_v39  ;;  %v12243_v5 = vpop.f32.mrf.mxu0  ;;  %9861 = vmatprep.mubr.bf16.mxu0 %v20344_v17  ;;  %v13911_v1 = vld [vmem:[%s19604_s1 + $0x17c0] ss:$12 sps:$4 sm:$0xff]  }
 0x3d7   : > { %v12307_v57 = vpop.f32.mrf.mxu1  ;;  %9958 = vmatprep.mubr.bf16.mxu1 %v20345_v7  ;;  %v18545_v41 = vadd.f32 %v12225_v59, %v9139_v18  ;;  %v12244_v39 = vadd.f32 %v12243_v5, %v12242_v15  ;;  %12740 = vmatprep.subr.bf16.mxu0 %v13905_v13  ;;  %v13910_v7 = vld [vmem:[%s19604_s1 + $0x1580] ss:$12 sps:$4 sm:$0xff]   ;;  %v20347_v5 = vld [vmem:[#allocation204_spill] sm:$0xff] }
 0x3d8   : > { %v12308_v53 = vadd.f32 %v12307_v57, %v12306_v54  ;;  %12804 = vmatprep.subr.bf16.mxu1 %v13907_v60  ;;  %v12245_v49 = vpop.f32.mrf.mxu0  ;;  %v13912_v59 = vld [vmem:[%s19604_s1 + $0x1700] ss:$12 sps:$4 sm:$0xff]   ;;  %v13915_v54 = vld [vmem:[%s19604_s1 + $0x17a8] ss:$12 sps:$4 sm:$0xff]  }
 0x3d9   : > { %v12309_v52 = vpop.f32.mrf.mxu1  ;;  %v9274_v45 = vadd.f32 %v12244_v39, %v18378_v30  ;;  %12741 = vmatpush3.bf16.msra.mxu0 %v13906_v0  ;;  %v13913_v30 = vld [vmem:[%s19604_s1 + $0x1628] ss:$12 sps:$4 sm:$0xff]  }
 0x3da   : > { %12805 = vmatpush3.bf16.msra.mxu1 %v13908_v63  ;;  %v12246_v42 = vpop.f32.mrf.mxu0  ;;  %12742 = vmatprep.subr.bf16.mxu0 %v13909_v46  ;;  %v20346_v63 = vld [vmem:[#allocation203_spill] sm:$0xff]  ;;  %v20348_v46 = vld [vmem:[#allocation205_spill] sm:$0xff] }
 0x3db   : > { %v12310_v17 = vpop.f32.mrf.mxu1  ;;  %12806 = vmatprep.subr.bf16.mxu1 %v13911_v1  ;;  %v18554_v13 = vadd.f32 %v12308_v53, %v9274_v45  ;;  %v12247_v60 = vadd.f32 %v12246_v42, %v12245_v49  ;;  %v20349_v1 = vld [vmem:[#allocation206_spill] sm:$0xff] }
 0x3dc   : > { %v12311_v15 = vadd.f32 %v12310_v17, %v12309_v52  ;;  %v12248_v18 = vpop.f32.mrf.mxu0  ;;  %9862 = vmatmul.mubr.bf16.gmra.mxu0 %v20346_v63  ;;  %v13914_v49 = vld [vmem:[%s19604_s1 + $0x1568] ss:$12 sps:$4 sm:$0xff]   ;;  %v13917_v17 = vld [vmem:[%s19604_s1 + $0x1610] ss:$12 sps:$4 sm:$0xff]  }
 0x3dd   : > { %v12312_v0 = vpop.f32.mrf.mxu1  ;;  %9959 = vmatmul.mubr.bf16.gmra.mxu1 %v20347_v5  ;;  %v9277_v57 = vadd.f32 %v12247_v60, %v18397_v62  ;;  %9869 = vmatprep.mubr.bf16.mxu0 %v20348_v46  ;;  %v13916_v52 = vld [vmem:[%s19604_s1 + $0x16e8] ss:$12 sps:$4 sm:$0xff]  }
 0x3de   : > { %9966 = vmatprep.mubr.bf16.mxu1 %v20349_v1  ;;  %v12249_v39 = vpop.f32.mrf.mxu0  ;;  %12743 = vmatpush3.bf16.msra.mxu0 %v13910_v7  ;;  %v13919_v7 = vld [vmem:[%s19604_s1 + $0x1790] ss:$12 sps:$4 sm:$0xff]  }
 0x3df   : > { %v12313_v53 = vpop.f32.mrf.mxu1  ;;  %12807 = vmatpush3.bf16.msra.mxu1 %v13912_v59  ;;  %v18573_v45 = vadd.f32 %v12311_v15, %v9277_v57  ;;  %v12250_v42 = vadd.f32 %v12249_v39, %v12248_v18  ;;  %12744 = vmatprep.subr.bf16.mxu0 %v13913_v30  ;;  %v13918_v15 = vld [vmem:[%s19604_s1 + $0x1550] ss:$12 sps:$4 sm:$0xff]   ;;  %v13923_v57 = vld [vmem:[%s19604_s1 + $0x1778] ss:$12 sps:$4 sm:$0xff]  }
 0x3e0   : > { %v12314_v62 = vadd.f32 %v12313_v53, %v12312_v0  ;;  %12808 = vmatprep.subr.bf16.mxu1 %v13915_v54  ;;  %v12251_v59 = vpop.f32.mrf.mxu0  ;;  %v13920_v30 = vld [vmem:[%s19604_s1 + $0x16d0] ss:$12 sps:$4 sm:$0xff]  }
 0x3e1   : > { %v12315_v60 = vpop.f32.mrf.mxu1  ;;  %v9282_v63 = vadd.f32 %v12250_v42, %v18412_v14  ;;  %v13921_v14 = vld [vmem:[%s19604_s1 + $0x15f8] ss:$12 sps:$4 sm:$0xff]   ;;  %v20350_v53 = vld [vmem:[#allocation207_spill] sm:$0xff] }
 0x3e2   : > { %v12252_v5 = vpop.f32.mrf.mxu0  ;;  %12745 = vmatpush3.bf16.msra.mxu0 %v13914_v49  ;;  %v20351_v49 = vld [vmem:[#allocation208_spill] sm:$0xff]  ;;  %v20352_v42 = vld [vmem:[#allocation209_spill] sm:$0xff] }
 0x3e3   : > { %v12316_v46 = vpop.f32.mrf.mxu1  ;;  %12809 = vmatpush3.bf16.msra.mxu1 %v13916_v52  ;;  %v18588_v54 = vadd.f32 %v12314_v62, %v9282_v63  ;;  %v12253_v18 = vadd.f32 %v12252_v5, %v12251_v59  ;;  %12746 = vmatprep.subr.bf16.mxu0 %v13917_v17  ;;  %v20353_v62 = vld [vmem:[#allocation210_spill] sm:$0xff]  ;;  %v13922_v59 = vld [vmem:[%s19604_s1 + $0x1538] ss:$12 sps:$4 sm:$0xff]  }
 0x3e4   : > { %v12317_v0 = vadd.f32 %v12316_v46, %v12315_v60  ;;  %12810 = vmatprep.subr.bf16.mxu1 %v13919_v7  ;;  %v12254_v1 = vpop.f32.mrf.mxu0  ;;  %9870 = vmatmul.mubr.bf16.gmra.mxu0 %v20350_v53  ;;  %v13924_v60 = vld [vmem:[%s19604_s1 + $0x16b8] ss:$12 sps:$4 sm:$0xff]   ;;  %v13925_v46 = vld [vmem:[%s19604_s1 + $0x15e0] ss:$12 sps:$4 sm:$0xff]  }
 0x3e5   : > { %v12318_v39 = vpop.f32.mrf.mxu1  ;;  %9967 = vmatmul.mubr.bf16.gmra.mxu1 %v20351_v49  ;;  %v9285_v52 = vadd.f32 %v12253_v18, %v18431_v27  ;;  %9877 = vmatprep.mubr.bf16.mxu0 %v20352_v42 }
 0x3e6   : > { %9974 = vmatprep.mubr.bf16.mxu1 %v20353_v62  ;;  %v12255_v17 = vpop.f32.mrf.mxu0  ;;  %12747 = vmatpush3.bf16.msra.mxu0 %v13918_v15  ;;  %v13927_v15 = vld [vmem:[%s19604_s1 + $0x1760] ss:$12 sps:$4 sm:$0xff]  }
 0x3e7   : > { %v12319_v7 = vpop.f32.mrf.mxu1  ;;  %12811 = vmatpush3.bf16.msra.mxu1 %v13920_v30  ;;  %v18607_v63 = vadd.f32 %v12317_v0, %v9285_v52  ;;  %v12256_v5 = vadd.f32 %v12255_v17, %v12254_v1  ;;  %12748 = vmatprep.subr.bf16.mxu0 %v13921_v14  ;;  %v13926_v0 = vld [vmem:[%s19604_s1 + $0x1520] ss:$12 sps:$4 sm:$0xff]   ;;  %v13931_v52 = vld [vmem:[%s19604_s1 + $0x1748] ss:$12 sps:$4 sm:$0xff]  }
 0x3e8   : > { %v12320_v27 = vadd.f32 %v12319_v7, %v12318_v39  ;;  %12812 = vmatprep.subr.bf16.mxu1 %v13923_v57  ;;  %v12257_v30 = vpop.f32.mrf.mxu0  ;;  %v13928_v14 = vld [vmem:[%s19604_s1 + $0x16a0] ss:$12 sps:$4 sm:$0xff]   ;;  %v20354_v7 = vld [vmem:[#allocation211_spill] sm:$0xff] }
 0x3e9   : > { %v12321_v18 = vpop.f32.mrf.mxu1  ;;  %v9290_v53 = vadd.f32 %v12256_v5, %v18446_v8  ;;  %v13929_v8 = vld [vmem:[%s19604_s1 + $0x15c8] ss:$12 sps:$4 sm:$0xff]   ;;  %v20356_v5 = vld [vmem:[#allocation213_spill] sm:$0xff] }
 0x3ea   : > { %v12258_v49 = vpop.f32.mrf.mxu0  ;;  %12749 = vmatpush3.bf16.msra.mxu0 %v13922_v59  ;;  %v20355_v59 = vld [vmem:[#allocation212_spill] sm:$0xff] }
 0x3eb   : > { %v12322_v42 = vpop.f32.mrf.mxu1  ;;  %12813 = vmatpush3.bf16.msra.mxu1 %v13924_v60  ;;  %v18622_v57 = vadd.f32 %v12320_v27, %v9290_v53  ;;  %v12259_v1 = vadd.f32 %v12258_v49, %v12257_v30  ;;  %12750 = vmatprep.subr.bf16.mxu0 %v13925_v46  ;;  %v20357_v27 = vld [vmem:[#allocation214_spill] sm:$0xff] }
 0x3ec   : > { %v12323_v39 = vadd.f32 %v12322_v42, %v12321_v18  ;;  %12814 = vmatprep.subr.bf16.mxu1 %v13927_v15  ;;  %v12260_v62 = vpop.f32.mrf.mxu0  ;;  %9878 = vmatmul.mubr.bf16.gmra.mxu0 %v20354_v7  ;;  %v13930_v30 = vld [vmem:[%s19604_s1 + $0x1508] ss:$12 sps:$4 sm:$0xff]  }
 0x3ed   : > { %v12324_v17 = vpop.f32.mrf.mxu1  ;;  %9975 = vmatmul.mubr.bf16.gmra.mxu1 %v20355_v59  ;;  %v9293_v60 = vadd.f32 %v12259_v1, %v18465_v2  ;;  %9885 = vmatprep.mubr.bf16.mxu0 %v20356_v5  ;;  %v13932_v18 = vld [vmem:[%s19604_s1 + $0x1688] ss:$12 sps:$4 sm:$0xff]  }
 0x3ee   : > { %9982 = vmatprep.mubr.bf16.mxu1 %v20357_v27  ;;  %v12261_v46 = vpop.f32.mrf.mxu0  ;;  %12751 = vmatpush3.bf16.msra.mxu0 %v13926_v0 }
 0x3ef   : > { %v12325_v15 = vpop.f32.mrf.mxu1  ;;  %12815 = vmatpush3.bf16.msra.mxu1 %v13928_v14  ;;  %v18641_v53 = vadd.f32 %v12323_v39, %v9293_v60  ;;  %v12262_v49 = vadd.f32 %v12261_v46, %v12260_v62  ;;  %12752 = vmatprep.subr.bf16.mxu0 %v13929_v8  ;;  %v20358_v39 = vld [vmem:[#allocation215_spill] sm:$0xff]  ;;  %v20359_v62 = vld [vmem:[#allocation216_spill] sm:$0xff] }
 0x3f0   : > { %v12326_v2 = vadd.f32 %v12325_v15, %v12324_v17  ;;  %12816 = vmatprep.subr.bf16.mxu1 %v13931_v52  ;;  %v12263_v42 = vpop.f32.mrf.mxu0  ;;  %v20360_v52 = vld [vmem:[#allocation217_spill] sm:$0xff]  ;;  %v20361_v17 = vld [vmem:[#allocation218_spill] sm:$0xff] }
 0x3f1   : > { %v12327_v1 = vpop.f32.mrf.mxu1  ;;  %v9298_v7 = vadd.f32 %v12262_v49, %v18474_v40 }
 0x3f2   : > { %v12264_v0 = vpop.f32.mrf.mxu0  ;;  %12753 = vmatpush3.bf16.msra.mxu0 %v13930_v30 }
 0x3f3   : > { %v12328_v14 = vpop.f32.mrf.mxu1  ;;  %12817 = vmatpush3.bf16.msra.mxu1 %v13932_v18  ;;  %v18644_v59 = vadd.f32 %v12326_v2, %v9298_v7  ;;  %v12265_v5 = vadd.f32 %v12264_v0, %v12263_v42 }
 0x3f4   : > { %v12329_v27 = vadd.f32 %v12328_v14, %v12327_v1  ;;  %v12266_v11 = vpop.f32.mrf.mxu0  ;;  %9886 = vmatmul.mubr.bf16.gmra.mxu0 %v20358_v39  ;;  %v20362_v39 = vld [vmem:[#allocation219_spill] sm:$0xff] }
 0x3f5   : > { %v12330_v9 = vpop.f32.mrf.mxu1  ;;  %9983 = vmatmul.mubr.bf16.gmra.mxu1 %v20359_v62  ;;  %v9301_v8 = vadd.f32 %v12265_v5, %v18481_v16  ;;  %9893 = vmatprep.mubr.bf16.mxu0 %v20360_v52  ;;  %v20363_v62 = vld [vmem:[#allocation220_spill] sm:$0xff] }
 0x3f6   : > { %9990 = vmatprep.mubr.bf16.mxu1 %v20361_v17  ;;  %v12267_v40 = vpop.f32.mrf.mxu0 }
 0x3f7   : > { %v12331_v60 = vpop.f32.mrf.mxu1  ;;  %v18651_v46 = vadd.f32 %v12329_v27, %v9301_v8  ;;  %v12268_v15 = vadd.f32 %v12267_v40, %v12266_v11  ;;  %v20364_v11 = vld [vmem:[#allocation221_spill] sm:$0xff] }
 0x3f8   : > { %v12332_v30 = vadd.f32 %v12331_v60, %v12330_v9  ;;  %v12269_v18 = vpop.f32.mrf.mxu0  ;;  %v20365_v9 = vld [vmem:[#allocation222_spill] sm:$0xff] }
 0x3f9   : > { %v12333_v49 = vpop.f32.mrf.mxu1  ;;  %v9306_v2 = vadd.f32 %v12268_v15, %v18484_v10 }
 0x3fa   : > { %v12270_v42 = vpop.f32.mrf.mxu0 }
 0x3fb   : > { %v12334_v1 = vpop.f32.mrf.mxu1  ;;  %v18654_v7 = vadd.f32 %v12332_v30, %v9306_v2  ;;  %v12271_v0 = vadd.f32 %v12270_v42, %v12269_v18 }
 0x3fc   : > { %v12335_v16 = vadd.f32 %v12334_v1, %v12333_v49  ;;  %v12272_v14 = vpop.f32.mrf.mxu0  ;;  %9894 = vmatmul.mubr.bf16.gmra.mxu0 %v20362_v39  ;;  %v20366_v39 = vld [vmem:[#allocation223_spill] sm:$0xff] }
 0x3fd   : > { %v12336_v5 = vpop.f32.mrf.mxu1  ;;  %9991 = vmatmul.mubr.bf16.gmra.mxu1 %v20363_v62  ;;  %v9309_v27 = vadd.f32 %v12271_v0, %v18491_v22  ;;  %9901 = vmatprep.mubr.bf16.mxu0 %v20364_v11  ;;  %v20367_v62 = vld [vmem:[#allocation224_spill] sm:$0xff] }
 0x3fe   : > { %9998 = vmatprep.mubr.bf16.mxu1 %v20365_v9  ;;  %v12273_v8 = vpop.f32.mrf.mxu0 }
 0x3ff   : > { %v12337_v10 = vpop.f32.mrf.mxu1  ;;  %v18661_v52 = vadd.f32 %v12335_v16, %v9309_v27  ;;  %v12274_v17 = vadd.f32 %v12273_v8, %v12272_v14  ;;  %v20368_v14 = vld [vmem:[#allocation225_spill] sm:$0xff] }
 0x400   : > { %v12338_v40 = vadd.f32 %v12337_v10, %v12336_v5  ;;  %v12275_v60 = vpop.f32.mrf.mxu0  ;;  %v20369_v5 = vld [vmem:[#allocation226_spill] sm:$0xff] }
 0x401   : > { %v12339_v15 = vpop.f32.mrf.mxu1  ;;  %v9314_v30 = vadd.f32 %v12274_v17, %v18494_v61 }
 0x402   : > { %v12276_v18 = vpop.f32.mrf.mxu0 }
 0x403   : > { %v12340_v49 = vpop.f32.mrf.mxu1  ;;  %v18664_v2 = vadd.f32 %v12338_v40, %v9314_v30  ;;  %v12277_v42 = vadd.f32 %v12276_v18, %v12275_v60 }
 0x404   : > { %v12341_v22 = vadd.f32 %v12340_v49, %v12339_v15  ;;  %v12278_v1 = vpop.f32.mrf.mxu0  ;;  %9902 = vmatmul.mubr.bf16.gmra.mxu0 %v20366_v39  ;;  %v20370_v39 = vld [vmem:[#allocation227_spill] sm:$0xff] }
 0x405   : > { %v12342_v0 = vpop.f32.mrf.mxu1  ;;  %9999 = vmatmul.mubr.bf16.gmra.mxu1 %v20367_v62  ;;  %v9317_v16 = vadd.f32 %v12277_v42, %v18501_v55  ;;  %9909 = vmatprep.mubr.bf16.mxu0 %v20368_v14  ;;  %v20371_v62 = vld [vmem:[#allocation228_spill] sm:$0xff] }
 0x406   : > { %10006 = vmatprep.mubr.bf16.mxu1 %v20369_v5  ;;  %v12279_v27 = vpop.f32.mrf.mxu0 }
 0x407   : > { %v12343_v61 = vpop.f32.mrf.mxu1  ;;  %v18671_v11 = vadd.f32 %v12341_v22, %v9317_v16  ;;  %v12280_v9 = vadd.f32 %v12279_v27, %v12278_v1  ;;  %v20372_v1 = vld [vmem:[#allocation229_spill] sm:$0xff] }
 0x408   : > { %v12344_v8 = vadd.f32 %v12343_v61, %v12342_v0  ;;  %v12281_v10 = vpop.f32.mrf.mxu0  ;;  %v20373_v0 = vld [vmem:[#allocation230_spill] sm:$0xff] }
 0x409   : > { %v12345_v17 = vpop.f32.mrf.mxu1  ;;  %v9322_v40 = vadd.f32 %v12280_v9, %v18504_v47 }
 0x40a   : > { %v12282_v60 = vpop.f32.mrf.mxu0 }
 0x40b   : > { %v12346_v15 = vpop.f32.mrf.mxu1  ;;  %v18674_v30 = vadd.f32 %v12344_v8, %v9322_v40  ;;  %v12283_v18 = vadd.f32 %v12282_v60, %v12281_v10 }
 0x40c   : > { %v12347_v55 = vadd.f32 %v12346_v15, %v12345_v17  ;;  %v12284_v49 = vpop.f32.mrf.mxu0  ;;  %9910 = vmatmul.mubr.bf16.gmra.mxu0 %v20370_v39  ;;  %v20374_v39 = vld [vmem:[#allocation231_spill] sm:$0xff] }
 0x40d   : > { %v12348_v42 = vpop.f32.mrf.mxu1  ;;  %10007 = vmatmul.mubr.bf16.gmra.mxu1 %v20371_v62  ;;  %v9325_v22 = vadd.f32 %v12283_v18, %v18511_v20  ;;  %10047 = vmatprep.mubr.bf16.mxu0 %v20372_v1  ;;  %v20375_v62 = vld [vmem:[#allocation232_spill] sm:$0xff] }
 0x40e   : > { %10144 = vmatprep.mubr.bf16.mxu1 %v20373_v0  ;;  %v12285_v16 = vpop.f32.mrf.mxu0 }
 0x40f   : > { %v12349_v47 = vpop.f32.mrf.mxu1  ;;  %v18681_v14 = vadd.f32 %v12347_v55, %v9325_v22  ;;  %v12286_v5 = vadd.f32 %v12285_v16, %v12284_v49 }
 0x410   : > { %v12350_v27 = vadd.f32 %v12349_v47, %v12348_v42  ;;  %v12287_v61 = vpop.f32.mrf.mxu0 }
 0x411   : > { %v12351_v9 = vpop.f32.mrf.mxu1  ;;  %v9330_v8 = vadd.f32 %v12286_v5, %v18520_v50 }
 0x412   : > { %v12288_v10 = vpop.f32.mrf.mxu0 }
 0x413   : > { %v12352_v17 = vpop.f32.mrf.mxu1  ;;  %v18684_v40 = vadd.f32 %v12350_v27, %v9330_v8  ;;  %v12289_v60 = vadd.f32 %v12288_v10, %v12287_v61  ;;  %v20376_v10 = vld [vmem:[#allocation233_spill] sm:$0xff] }
 0x414   : > { %v12353_v20 = vadd.f32 %v12352_v17, %v12351_v9  ;;  %v12370_v15 = vpop.f32.mrf.mxu0  ;;  %10048 = vmatmul.mubr.bf16.vlgmr.msra.gmra.mxu0 %v20374_v39 }
 0x415   : > { %v12434_v18 = vpop.f32.mrf.mxu1  ;;  %10145 = vmatmul.mubr.bf16.vlgmr.msra.gmra.mxu1 %v20375_v62  ;;  %v9333_v55 = vadd.f32 %v12289_v60, %v18545_v41  ;;  %10055 = vmatprep.mubr.bf16.mxu0 %v16969_v3  ;;  %v20378_v60 = vld [vmem:[#allocation235_spill] sm:$0xff] }
 0x416   : > { %10152 = vmatprep.mubr.bf16.mxu1 %v16971_v38  ;;  %v12371_v49 = vpop.f32.mrf.mxu0  ;;  %v20377_v38 = vld [vmem:[#allocation234_spill] sm:$0xff] }
 0x417   : > { %v12435_v50 = vpop.f32.mrf.mxu1  ;;  %v18691_v42 = vadd.f32 %v12353_v20, %v9333_v55  ;;  %v12372_v22 = vadd.f32 %v12371_v49, %v12370_v15  ;;  %v20379_v20 = vld [vmem:[#allocation236_spill] sm:$0xff] }
 0x418   : > { %v12436_v1 = vadd.f32 %v12435_v50, %v12434_v18  ;;  %v12373_v0 = vpop.f32.mrf.mxu0 }
 0x419   : > { %v12437_v16 = vpop.f32.mrf.mxu1  ;;  %v9468_v47 = vadd.f32 %v12372_v22, %v18554_v13 }
 0x41a   : > { %v12374_v5 = vpop.f32.mrf.mxu0 }
 0x41b   : > { %v12438_v27 = vpop.f32.mrf.mxu1  ;;  %v18694_v61 = vadd.f32 %v12436_v1, %v9468_v47  ;;  %v12375_v9 = vadd.f32 %v12374_v5, %v12373_v0 }
 0x41c   : > { %v12439_v41 = vadd.f32 %v12438_v27, %v12437_v16  ;;  %v12376_v8 = vpop.f32.mrf.mxu0  ;;  %10056 = vmatmul.mubr.bf16.gmra.mxu0 %v20376_v10  ;;  %v20380_v27 = vld [vmem:[#allocation237_spill] sm:$0xff] }
 0x41d   : > { %v12440_v3 = vpop.f32.mrf.mxu1  ;;  %10153 = vmatmul.mubr.bf16.gmra.mxu1 %v20377_v38  ;;  %v9471_v17 = vadd.f32 %v12375_v9, %v18573_v45  ;;  %10063 = vmatprep.mubr.bf16.mxu0 %v20378_v60  ;;  %v20381_v9 = vld [vmem:[#allocation238_spill] sm:$0xff] }
 0x41e   : > { %10160 = vmatprep.mubr.bf16.mxu1 %v20379_v20  ;;  %v12377_v15 = vpop.f32.mrf.mxu0 }
 0x41f   : > { %v12441_v13 = vpop.f32.mrf.mxu1  ;;  %v18701_v18 = vadd.f32 %v12439_v41, %v9471_v17  ;;  %v12378_v39 = vadd.f32 %v12377_v15, %v12376_v8  ;;  %v20382_v8 = vld [vmem:[#allocation239_spill] sm:$0xff] }
 0x420   : > { %v12442_v62 = vadd.f32 %v12441_v13, %v12440_v3  ;;  %v12379_v55 = vpop.f32.mrf.mxu0  ;;  %v20383_v3 = vld [vmem:[#allocation240_spill] sm:$0xff] }
 0x421   : > { %v12443_v49 = vpop.f32.mrf.mxu1  ;;  %v9476_v50 = vadd.f32 %v12378_v39, %v18588_v54 }
 0x422   : > { %v12380_v22 = vpop.f32.mrf.mxu0 }
 0x423   : > { %v12444_v1 = vpop.f32.mrf.mxu1  ;;  %v18704_v0 = vadd.f32 %v12442_v62, %v9476_v50  ;;  %v12381_v16 = vadd.f32 %v12380_v22, %v12379_v55 }
 0x424   : > { %v12445_v45 = vadd.f32 %v12444_v1, %v12443_v49  ;;  %v12382_v47 = vpop.f32.mrf.mxu0  ;;  %10064 = vmatmul.mubr.bf16.gmra.mxu0 %v20380_v27 }
 0x425   : > { %v12446_v5 = vpop.f32.mrf.mxu1  ;;  %10161 = vmatmul.mubr.bf16.gmra.mxu1 %v20381_v9  ;;  %v9479_v41 = vadd.f32 %v12381_v16, %v18607_v63  ;;  %10071 = vmatprep.mubr.bf16.mxu0 %v20382_v8  ;;  %v20384_v16 = vld [vmem:[#allocation241_spill] sm:$0xff] }
 0x426   : > { %10168 = vmatprep.mubr.bf16.mxu1 %v20383_v3  ;;  %v12383_v10 = vpop.f32.mrf.mxu0 }
 0x427   : > { %v12447_v54 = vpop.f32.mrf.mxu1  ;;  %v18711_v38 = vadd.f32 %v12445_v45, %v9479_v41  ;;  %v12384_v17 = vadd.f32 %v12383_v10, %v12382_v47 }
 0x428   : > { %v12448_v60 = vadd.f32 %v12447_v54, %v12446_v5  ;;  %v12385_v20 = vpop.f32.mrf.mxu0 }
 0x429   : > { %v12449_v15 = vpop.f32.mrf.mxu1  ;;  %v9484_v13 = vadd.f32 %v12384_v17, %v18622_v57  ;;  %v20385_v17 = vld [vmem:[#allocation242_spill] sm:$0xff] }
 0x42a   : > { %v12386_v39 = vpop.f32.mrf.mxu0 }
 0x42b   : > { %v12450_v62 = vpop.f32.mrf.mxu1  ;;  %v18714_v55 = vadd.f32 %v12448_v60, %v9484_v13  ;;  %v12387_v49 = vadd.f32 %v12386_v39, %v12385_v20  ;;  %v20386_v20 = vld [vmem:[#allocation243_spill] sm:$0xff] }
 0x42c   : > { %v12451_v63 = vadd.f32 %v12450_v62, %v12449_v15  ;;  %v12388_v50 = vpop.f32.mrf.mxu0  ;;  %10072 = vmatmul.mubr.bf16.gmra.mxu0 %v17140_v29  ;;  %v20387_v15 = vld [vmem:[#allocation244_spill] sm:$0xff] }
 0x42d   : > { %v12452_v22 = vpop.f32.mrf.mxu1  ;;  %10169 = vmatmul.mubr.bf16.gmra.mxu1 %v17144_v24  ;;  %v9487_v1 = vadd.f32 %v12387_v49, %v18641_v53  ;;  %10079 = vmatprep.mubr.bf16.mxu0 %v17157_v58 }
 0x42e   : > { %10176 = vmatprep.mubr.bf16.mxu1 %v20384_v16  ;;  %v12389_v45 = vpop.f32.mrf.mxu0 }
 0x42f   : > { %v12453_v57 = vpop.f32.mrf.mxu1  ;;  %v18721_v47 = vadd.f32 %v12451_v63, %v9487_v1  ;;  %v12390_v5 = vadd.f32 %v12389_v45, %v12388_v50 }
 0x430   : > { %v12454_v27 = vadd.f32 %v12453_v57, %v12452_v22  ;;  %v12391_v9 = vpop.f32.mrf.mxu0 }
 0x431   : > { %v12455_v41 = vpop.f32.mrf.mxu1  ;;  %v9492_v8 = vadd.f32 %v12390_v5, %v18644_v59 }
 0x432   : > { %v12392_v3 = vpop.f32.mrf.mxu0 }
 0x433   : > { %v12456_v29 = vpop.f32.mrf.mxu1  ;;  %v18724_v10 = vadd.f32 %v12454_v27, %v9492_v8  ;;  %v12393_v24 = vadd.f32 %v12392_v3, %v12391_v9  ;;  %v20388_v27 = vld [vmem:[#allocation245_spill] sm:$0xff]  ;;  %v20389_v9 = vld [vmem:[#allocation246_spill] sm:$0xff]  ;;  %v20390_v8 = vld [vmem:[#allocation247_spill] sm:$0xff] }
 0x434   : > { %v12457_v53 = vadd.f32 %v12456_v29, %v12455_v41  ;;  %v12394_v54 = vpop.f32.mrf.mxu0  ;;  %10080 = vmatmul.mubr.bf16.gmra.mxu0 %v17200_v36  ;;  %v20391_v3 = vld [vmem:[#allocation248_spill] sm:$0xff] }
 0x435   : > { %v12458_v58 = vpop.f32.mrf.mxu1  ;;  %10177 = vmatmul.mubr.bf16.gmra.mxu1 %v20385_v17  ;;  %v9495_v60 = vadd.f32 %v12393_v24, %v18651_v46  ;;  %10087 = vmatprep.mubr.bf16.mxu0 %v20386_v20 }
 0x436   : > { %10184 = vmatprep.mubr.bf16.mxu1 %v20387_v15  ;;  %v12395_v13 = vpop.f32.mrf.mxu0 }
 0x437   : > { %v12459_v59 = vpop.f32.mrf.mxu1  ;;  %v18731_v39 = vadd.f32 %v12457_v53, %v9495_v60  ;;  %v12396_v62 = vadd.f32 %v12395_v13, %v12394_v54 }
 0x438   : > { %v12460_v49 = vadd.f32 %v12459_v59, %v12458_v58  ;;  %v12397_v63 = vpop.f32.mrf.mxu0 }
 0x439   : > { %v12461_v50 = vpop.f32.mrf.mxu1  ;;  %v9500_v22 = vadd.f32 %v12396_v62, %v18654_v7 }
 0x43a   : > { %v12398_v1 = vpop.f32.mrf.mxu0 }
 0x43b   : > { %v12462_v36 = vpop.f32.mrf.mxu1  ;;  %v18734_v16 = vadd.f32 %v12460_v49, %v9500_v22  ;;  %v12399_v45 = vadd.f32 %v12398_v1, %v12397_v63 }
 0x43c   : > { %v12463_v46 = vadd.f32 %v12462_v36, %v12461_v50  ;;  %v12400_v57 = vpop.f32.mrf.mxu0  ;;  %10088 = vmatmul.mubr.bf16.gmra.mxu0 %v20388_v27 }
 0x43d   : > { %v12464_v5 = vpop.f32.mrf.mxu1  ;;  %10185 = vmatmul.mubr.bf16.gmra.mxu1 %v20389_v9  ;;  %v9503_v41 = vadd.f32 %v12399_v45, %v18661_v52  ;;  %10095 = vmatprep.mubr.bf16.mxu0 %v20390_v8 }
 0x43e   : > { %10192 = vmatprep.mubr.bf16.mxu1 %v20391_v3  ;;  %v12401_v29 = vpop.f32.mrf.mxu0 }
 0x43f   : > { %v12465_v7 = vpop.f32.mrf.mxu1  ;;  %v18741_v24 = vadd.f32 %v12463_v46, %v9503_v41  ;;  %v12402_v53 = vadd.f32 %v12401_v29, %v12400_v57 }
 0x440   : > { %v12466_v54 = vadd.f32 %v12465_v7, %v12464_v5  ;;  %v12403_v58 = vpop.f32.mrf.mxu0 }
 0x441   : > { %v12467_v17 = vpop.f32.mrf.mxu1  ;;  %v9508_v60 = vadd.f32 %v12402_v53, %v18664_v2 }
 0x442   : > { %v12404_v20 = vpop.f32.mrf.mxu0 }
 0x443   : > { %v12468_v15 = vpop.f32.mrf.mxu1  ;;  %v18744_v13 = vadd.f32 %v12466_v54, %v9508_v60  ;;  %v12405_v59 = vadd.f32 %v12404_v20, %v12403_v58 }
 0x444   : > { %v12469_v52 = vadd.f32 %v12468_v15, %v12467_v17  ;;  %v12406_v62 = vpop.f32.mrf.mxu0  ;;  %10096 = vmatmul.mubr.bf16.gmra.mxu0 %v17258_v4 }
 0x445   : > { %v12470_v49 = vpop.f32.mrf.mxu1  ;;  %10193 = vmatmul.mubr.bf16.gmra.mxu1 %v17260_v48  ;;  %v9511_v63 = vadd.f32 %v12405_v59, %v18671_v11  ;;  %10103 = vmatprep.mubr.bf16.mxu0 %v17265_v31 }
 0x446   : > { %10200 = vmatprep.mubr.bf16.mxu1 %v17267_v34  ;;  %v12407_v50 = vpop.f32.mrf.mxu0  ;;  %v20392_v34 = vld [vmem:[#allocation249_spill] sm:$0xff] }
 0x447   : > { %v12471_v2 = vpop.f32.mrf.mxu1  ;;  %v18751_v22 = vadd.f32 %v12469_v52, %v9511_v63  ;;  %v12408_v1 = vadd.f32 %v12407_v50, %v12406_v62 }
 0x448   : > { %v12472_v36 = vadd.f32 %v12471_v2, %v12470_v49  ;;  %v12409_v45 = vpop.f32.mrf.mxu0 }
 0x449   : > { %v12473_v46 = vpop.f32.mrf.mxu1  ;;  %v9516_v57 = vadd.f32 %v12408_v1, %v18674_v30 }
 0x44a   : > { %v12410_v5 = vpop.f32.mrf.mxu0 }
 0x44b   : > { %v12474_v4 = vpop.f32.mrf.mxu1  ;;  %v18754_v27 = vadd.f32 %v12472_v36, %v9516_v57  ;;  %v12411_v48 = vadd.f32 %v12410_v5, %v12409_v45 }
 0x44c   : > { %v12475_v11 = vadd.f32 %v12474_v4, %v12473_v46  ;;  %v12412_v9 = vpop.f32.mrf.mxu0  ;;  %10104 = vmatmul.mubr.bf16.gmra.mxu0 %v17282_v12 }
 0x44d   : > { %v12476_v31 = vpop.f32.mrf.mxu1  ;;  %10201 = vmatmul.mubr.bf16.gmra.mxu1 %v20392_v34  ;;  %v9519_v41 = vadd.f32 %v12411_v48, %v18681_v14 }
 0x44e   : > { %v12413_v8 = vpop.f32.mrf.mxu0 }
 0x44f   : > { %v12477_v3 = vpop.f32.mrf.mxu1  ;;  %v18759_v29 = vadd.f32 %v12475_v11, %v9519_v41  ;;  %v12414_v7 = vadd.f32 %v12413_v8, %v12412_v9 }
 0x450   : > { %v12478_v30 = vadd.f32 %v12477_v3, %v12476_v31  ;;  %v12415_v53 = vpop.f32.mrf.mxu0 }
 0x451   : > { %v12479_v54 = vpop.f32.mrf.mxu1  ;;  %v9524_v58 = vadd.f32 %v12414_v7, %v18684_v40 }
 0x452   : > { %v12416_v17 = vpop.f32.mrf.mxu0 }
 0x453   : > { %v12480_v60 = vpop.f32.mrf.mxu1  ;;  %v18762_v20 = vadd.f32 %v12478_v30, %v9524_v58  ;;  %v12417_v15 = vadd.f32 %v12416_v17, %v12415_v53 }
 0x454   : > { %v12481_v12 = vadd.f32 %v12480_v60, %v12479_v54  ;;  %v12498_v59 = vpop.f32.mrf.mxu0 }
 0x455   : > { %v12562_v52 = vpop.f32.mrf.mxu1  ;;  %v9527_v14 = vadd.f32 %v12417_v15, %v18691_v42 }
 0x456   : > { %v12499_v62 = vpop.f32.mrf.mxu0 }
 0x457   : > { %v12563_v49 = vpop.f32.mrf.mxu1  ;;  %v18765_v63 = vadd.f32 %v12481_v12, %v9527_v14  ;;  %v12500_v50 = vadd.f32 %v12499_v62, %v12498_v59 }
 0x458   : > { %v12564_v2 = vadd.f32 %v12563_v49, %v12562_v52  ;;  %v12501_v1 = vpop.f32.mrf.mxu0 }
 0x459   : > { %v12565_v36 = vpop.f32.mrf.mxu1  ;;  %v9662_v40 = vadd.f32 %v12500_v50, %v18694_v61 }
 0x45a   : > { %v12502_v45 = vpop.f32.mrf.mxu0 }
 0x45b   : > { %v12566_v46 = vpop.f32.mrf.mxu1  ;;  %v18768_v57 = vadd.f32 %v12564_v2, %v9662_v40  ;;  %v12503_v5 = vadd.f32 %v12502_v45, %v12501_v1 }
 0x45c   : > { %v12567_v4 = vadd.f32 %v12566_v46, %v12565_v36  ;;  %v12504_v48 = vpop.f32.mrf.mxu0 }
 0x45d   : > { %v12568_v11 = vpop.f32.mrf.mxu1  ;;  %v9665_v42 = vadd.f32 %v12503_v5, %v18701_v18 }
 0x45e   : > { %v12505_v9 = vpop.f32.mrf.mxu0 }
 0x45f   : > { %v12569_v31 = vpop.f32.mrf.mxu1  ;;  %v18771_v34 = vadd.f32 %v12567_v4, %v9665_v42  ;;  %v12506_v41 = vadd.f32 %v12505_v9, %v12504_v48 }
 0x460   : > { %v12570_v8 = vadd.f32 %v12569_v31, %v12568_v11  ;;  %v12507_v3 = vpop.f32.mrf.mxu0 }
 0x461   : > { %v12571_v7 = vpop.f32.mrf.mxu1  ;;  %v9670_v61 = vadd.f32 %v12506_v41, %v18704_v0 }
 0x462   : > { %v12508_v30 = vpop.f32.mrf.mxu0 }
 0x463   : > { %v12572_v53 = vpop.f32.mrf.mxu1  ;;  %v18774_v54 = vadd.f32 %v12570_v8, %v9670_v61  ;;  %v12509_v58 = vadd.f32 %v12508_v30, %v12507_v3 }
 0x464   : > { %v12573_v17 = vadd.f32 %v12572_v53, %v12571_v7  ;;  %v12510_v60 = vpop.f32.mrf.mxu0 }
 0x465   : > { %v12574_v15 = vpop.f32.mrf.mxu1  ;;  %v9673_v18 = vadd.f32 %v12509_v58, %v18711_v38 }
 0x466   : > { %v12511_v12 = vpop.f32.mrf.mxu0 }
 0x467   : > { %v12575_v59 = vpop.f32.mrf.mxu1  ;;  %v18777_v52 = vadd.f32 %v12573_v17, %v9673_v18  ;;  %v12512_v14 = vadd.f32 %v12511_v12, %v12510_v60 }
 0x468   : > { %v12576_v62 = vadd.f32 %v12575_v59, %v12574_v15  ;;  %v12513_v49 = vpop.f32.mrf.mxu0 }
 0x469   : > { %v12577_v50 = vpop.f32.mrf.mxu1  ;;  %v9678_v0 = vadd.f32 %v12512_v14, %v18714_v55 }
 0x46a   : > { %v12514_v2 = vpop.f32.mrf.mxu0 }
 0x46b   : > { %v12578_v1 = vpop.f32.mrf.mxu1  ;;  %v18780_v36 = vadd.f32 %v12576_v62, %v9678_v0  ;;  %v12515_v40 = vadd.f32 %v12514_v2, %v12513_v49 }
 0x46c   : > { %v12579_v45 = vadd.f32 %v12578_v1, %v12577_v50  ;;  %v12516_v46 = vpop.f32.mrf.mxu0 }
 0x46d   : > { %v12580_v5 = vpop.f32.mrf.mxu1  ;;  %v9681_v38 = vadd.f32 %v12515_v40, %v18721_v47 }
 0x46e   : > { %v12517_v4 = vpop.f32.mrf.mxu0 }
 0x46f   : > { %v12581_v48 = vpop.f32.mrf.mxu1  ;;  %v18783_v11 = vadd.f32 %v12579_v45, %v9681_v38  ;;  %v12518_v42 = vadd.f32 %v12517_v4, %v12516_v46 }
 0x470   : > { %v12582_v9 = vadd.f32 %v12581_v48, %v12580_v5  ;;  %v12519_v31 = vpop.f32.mrf.mxu0 }
 0x471   : > { %v12583_v41 = vpop.f32.mrf.mxu1  ;;  %v9686_v55 = vadd.f32 %v12518_v42, %v18724_v10 }
 0x472   : > { %v12520_v8 = vpop.f32.mrf.mxu0 }
 0x473   : > { %v12584_v3 = vpop.f32.mrf.mxu1  ;;  %v18786_v7 = vadd.f32 %v12582_v9, %v9686_v55  ;;  %v12521_v61 = vadd.f32 %v12520_v8, %v12519_v31 }
 0x474   : > { %v12585_v30 = vadd.f32 %v12584_v3, %v12583_v41  ;;  %v12522_v53 = vpop.f32.mrf.mxu0 }
 0x475   : > { %v12586_v58 = vpop.f32.mrf.mxu1  ;;  %v9689_v47 = vadd.f32 %v12521_v61, %v18731_v39 }
 0x476   : > { %v12523_v17 = vpop.f32.mrf.mxu0 }
 0x477   : > { %v12587_v60 = vpop.f32.mrf.mxu1  ;;  %v18789_v15 = vadd.f32 %v12585_v30, %v9689_v47  ;;  %v12524_v18 = vadd.f32 %v12523_v17, %v12522_v53 }
 0x478   : > { %v12588_v12 = vadd.f32 %v12587_v60, %v12586_v58  ;;  %v12525_v59 = vpop.f32.mrf.mxu0 }
 0x479   : > { %v12589_v14 = vpop.f32.mrf.mxu1  ;;  %v9694_v10 = vadd.f32 %v12524_v18, %v18734_v16 }
 0x47a   : > { %v12526_v62 = vpop.f32.mrf.mxu0 }
 0x47b   : > { %v12590_v49 = vpop.f32.mrf.mxu1  ;;  %v18792_v50 = vadd.f32 %v12588_v12, %v9694_v10  ;;  %v12527_v0 = vadd.f32 %v12526_v62, %v12525_v59 }
 0x47c   : > { %v12591_v2 = vadd.f32 %v12590_v49, %v12589_v14  ;;  %v12528_v1 = vpop.f32.mrf.mxu0 }
 0x47d   : > { %20393 = vst [vmem:[#allocation26_spill] sm:$0xff] %v18792_v50  ;;  %v12592_v40 = vpop.f32.mrf.mxu1  ;;  %v9697_v39 = vadd.f32 %v12527_v0, %v18741_v24 }
 0x47e   : > { %v12529_v45 = vpop.f32.mrf.mxu0 }
 0x47f   : > { %v12593_v46 = vpop.f32.mrf.mxu1  ;;  %v18795_v5 = vadd.f32 %v12591_v2, %v9697_v39  ;;  %v12530_v38 = vadd.f32 %v12529_v45, %v12528_v1 }
 0x480   : > { %v12594_v4 = vadd.f32 %v12593_v46, %v12592_v40  ;;  %v12531_v48 = vpop.f32.mrf.mxu0 }
 0x481   : > { %20394 = vst [vmem:[#allocation27_spill] sm:$0xff] %v18795_v5  ;;  %v12595_v42 = vpop.f32.mrf.mxu1  ;;  %v9702_v16 = vadd.f32 %v12530_v38, %v18744_v13 }
 0x482   : > { %v12532_v9 = vpop.f32.mrf.mxu0 }
 0x483   : > { %v12596_v31 = vpop.f32.mrf.mxu1  ;;  %v18798_v41 = vadd.f32 %v12594_v4, %v9702_v16  ;;  %v12533_v55 = vadd.f32 %v12532_v9, %v12531_v48 }
 0x484   : > { %v12597_v8 = vadd.f32 %v12596_v31, %v12595_v42  ;;  %v12534_v3 = vpop.f32.mrf.mxu0 }
 0x485   : > { %20395 = vst [vmem:[#allocation28_spill] sm:$0xff] %v18798_v41  ;;  %v12598_v61 = vpop.f32.mrf.mxu1  ;;  %v9705_v24 = vadd.f32 %v12533_v55, %v18751_v22 }
 0x486   : > { %v12535_v30 = vpop.f32.mrf.mxu0 }
 0x487   : > { %v12599_v53 = vpop.f32.mrf.mxu1  ;;  %v18801_v58 = vadd.f32 %v12597_v8, %v9705_v24  ;;  %v12536_v47 = vadd.f32 %v12535_v30, %v12534_v3 }
 0x488   : > { %v12600_v17 = vadd.f32 %v12599_v53, %v12598_v61  ;;  %v12537_v60 = vpop.f32.mrf.mxu0 }
 0x489   : > { %20396 = vst [vmem:[#allocation29_spill] sm:$0xff] %v18801_v58  ;;  %v12601_v18 = vpop.f32.mrf.mxu1  ;;  %v9710_v13 = vadd.f32 %v12536_v47, %v18754_v27 }
 0x48a   : > { %v12538_v12 = vpop.f32.mrf.mxu0 }
 0x48b   : > { %v12602_v59 = vpop.f32.mrf.mxu1  ;;  %v18804_v14 = vadd.f32 %v12600_v17, %v9710_v13  ;;  %v12539_v10 = vadd.f32 %v12538_v12, %v12537_v60 }
 0x48c   : > { %v12603_v62 = vadd.f32 %v12602_v59, %v12601_v18  ;;  %v12540_v49 = vpop.f32.mrf.mxu0 }
 0x48d   : > { %20397 = vst [vmem:[#allocation30_spill] sm:$0xff] %v18804_v14  ;;  %v12604_v0 = vpop.f32.mrf.mxu1  ;;  %v9713_v22 = vadd.f32 %v12539_v10, %v18759_v29 }
 0x48e   : > { %v12541_v2 = vpop.f32.mrf.mxu0 }
 0x48f   : > { %v12605_v1 = vpop.f32.mrf.mxu1  ;;  %v18807_v40 = vadd.f32 %v12603_v62, %v9713_v22  ;;  %v12542_v39 = vadd.f32 %v12541_v2, %v12540_v49 }
 0x490   : > { %v12606_v45 = vadd.f32 %v12605_v1, %v12604_v0  ;;  %v12543_v46 = vpop.f32.mrf.mxu0 }
 0x491   : > { %20398 = vst [vmem:[#allocation31_spill] sm:$0xff] %v18807_v40  ;;  %v12607_v38 = vpop.f32.mrf.mxu1  ;;  %v9718_v27 = vadd.f32 %v12542_v39, %v18762_v20 }
 0x492   : > { %v12544_v4 = vpop.f32.mrf.mxu0 }
 0x493   : > { %v12608_v48 = vpop.f32.mrf.mxu1  ;;  %v18810_v42 = vadd.f32 %v12606_v45, %v9718_v27  ;;  %v12545_v16 = vadd.f32 %v12544_v4, %v12543_v46 }
 0x494   : > { %v12609_v9 = vadd.f32 %v12608_v48, %v12607_v38  ;;  %v12626_v31 = vpop.f32.mrf.mxu0 }
 0x495   : > { %20399 = vst [vmem:[#allocation32_spill] sm:$0xff] %v18810_v42  ;;  %v18812_v55 = vpop.f32.mrf.mxu1  ;;  %v9721_v29 = vadd.f32 %v12545_v16, %v18765_v63 }
 0x496   : > { %v12627_v8 = vpop.f32.mrf.mxu0 }
 0x497   : > { %v18815_v3 = vpop.f32.mrf.mxu1  ;;  %v18817_v61 = vadd.f32 %v12609_v9, %v9721_v29 }
 0x498   : > { %v12629_v24 = vpop.f32.mrf.mxu0 }
 0x499   : > { %20400 = vst [vmem:[#allocation33_spill] sm:$0xff] %v18817_v61  ;;  %v18819_v30 = vpop.f32.mrf.mxu1 }
 0x49a   : > { %v12630_v20 = vpop.f32.mrf.mxu0 }
 0x49b   : > { %v18821_v53 = vpop.f32.mrf.mxu1 }
 0x49c   : > { %v18823_v47 = vpop.f32.mrf.mxu0 }
 0x49d   : > { %v18825_v17 = vpop.f32.mrf.mxu1 }
 0x49e   : > { %v18827_v60 = vpop.f32.mrf.mxu0 }
 0x49f   : > { %v18829_v18 = vpop.f32.mrf.mxu1 }
 0x4a0   : > { %v18831_v63 = vpop.f32.mrf.mxu0 }
 0x4a1   : > { %v18833_v13 = vpop.f32.mrf.mxu1 }
 0x4a2   : > { %v18835_v12 = vpop.f32.mrf.mxu0 }
 0x4a3   : > { %v18837_v59 = vpop.f32.mrf.mxu1 }
 0x4a4   : > { %v18839_v10 = vpop.f32.mrf.mxu0 }
 0x4a5   : > { %v18841_v62 = vpop.f32.mrf.mxu1 }
 0x4a6   : > { %v18843_v49 = vpop.f32.mrf.mxu0 }
 0x4a7   : > { %v18845_v0 = vpop.f32.mrf.mxu1 }
 0x4a8   : > { %v18847_v22 = vpop.f32.mrf.mxu0 }
 0x4a9   : > { %v18849_v2 = vpop.f32.mrf.mxu1 }
 0x4aa   : > { %v18851_v1 = vpop.f32.mrf.mxu0 }
 0x4ab   : > { %v18853_v39 = vpop.f32.mrf.mxu1 }
 0x4ac   : > { %v18855_v45 = vpop.f32.mrf.mxu0 }
 0x4ad   : > { %v18857_v46 = vpop.f32.mrf.mxu1 }
 0x4ae   : > { %v18859_v38 = vpop.f32.mrf.mxu0 }
 0x4af   : > { %v18861_v27 = vpop.f32.mrf.mxu1 }
 0x4b0   : > { %v18863_v4 = vpop.f32.mrf.mxu0 }
 0x4b1   : > { %v18865_v48 = vpop.f32.mrf.mxu1 }
 0x4b2   : > { %20401 = vst [vmem:[#allocation34_spill] sm:$0xff] %v18865_v48  ;;  %v18867_v16 = vpop.f32.mrf.mxu0 }
 0x4b3   : > { %v18869_v9 = vpop.f32.mrf.mxu1 }
 0x4b4   : > { %20402 = vst [vmem:[#allocation35_spill] sm:$0xff] %v18869_v9  ;;  %v18871_v29 = vpop.f32.mrf.mxu0 }
 0x4b5   : > { %20403 = vst [vmem:[#allocation36_spill] sm:$0xff] %v18871_v29  ;;  %v18873_v61 = vpop.f32.mrf.mxu1 }
 0x4b6   : > { %20404 = vst [vmem:[#allocation37_spill] sm:$0xff] %v18873_v61  ;;  %v18875_v42 = vpop.f32.mrf.mxu0 }
 0x4b7   : > { %20405 = vst [vmem:[#allocation38_spill] sm:$0xff] %v18875_v42  ;;  %v18877_v40 = vpop.f32.mrf.mxu1 }
 0x4b8   : > { %20406 = vst [vmem:[#allocation39_spill] sm:$0xff] %v18877_v40  ;;  %v18879_v14 = vpop.f32.mrf.mxu0 }
 0x4b9   : > { %20407 = vst [vmem:[#allocation40_spill] sm:$0xff] %v18879_v14  ;;  %v18881_v58 = vpop.f32.mrf.mxu1 }
 0x4ba   : > { %20408 = vst [vmem:[#allocation41_spill] sm:$0xff] %v18881_v58  ;;  %v18883_v41 = vpop.f32.mrf.mxu0 }
 0x4bb   : > { %20409 = vst [vmem:[#allocation42_spill] sm:$0xff] %v18883_v41  ;;  %v18885_v5 = vpop.f32.mrf.mxu1 }
 0x4bc   : > { %20410 = vst [vmem:[#allocation43_spill] sm:$0xff] %v18885_v5  ;;  %v18887_v19 = vpop.f32.mrf.mxu0 }
 0x4bd   : > { %20411 = vst [vmem:[#allocation44_spill] sm:$0xff] %v18887_v19  ;;  %v18889_v50 = vpop.f32.mrf.mxu1 }
 0x4be   : > { %20412 = vst [vmem:[#allocation45_spill] sm:$0xff] %v18889_v50  ;;  %v18891_v44 = vpop.f32.mrf.mxu0 }
 0x4bf   : > { %20413 = vst [vmem:[#allocation46_spill] sm:$0xff] %v18891_v44  ;;  %v18893_v51 = vpop.f32.mrf.mxu1 }
 0x4c0   : > { %20414 = vst [vmem:[#allocation47_spill] sm:$0xff] %v18893_v51  ;;  %v18895_v61 = vpop.f32.mrf.mxu0 }
 0x4c1   : > { %20415 = vst [vmem:[#allocation48_spill] sm:$0xff] %v18895_v61  ;;  %v18897_v9 = vpop.f32.mrf.mxu1 }
 0x4c2   : > { %20416 = vst [vmem:[#allocation49_spill] sm:$0xff] %v18897_v9  ;;  %v18899_v40 = vpop.f32.mrf.mxu0 }
 0x4c3   : > { %20417 = vst [vmem:[#allocation50_spill] sm:$0xff] %v18899_v40  ;;  %v18901_v14 = vpop.f32.mrf.mxu1 }
 0x4c4   : > { %20418 = vst [vmem:[#allocation51_spill] sm:$0xff] %v18901_v14  ;;  %v18903_v58 = vpop.f32.mrf.mxu0 }
 0x4c5   : > { %20419 = vst [vmem:[#allocation52_spill] sm:$0xff] %v18903_v58  ;;  %v18905_v41 = vpop.f32.mrf.mxu1 }
 0x4c6   : > { %20420 = vst [vmem:[#allocation53_spill] sm:$0xff] %v18905_v41  ;;  %v18907_v5 = vpop.f32.mrf.mxu0  ;;  %v12628_v41 = vadd.f32 %v12627_v8, %v12626_v31 }
 0x4c7   : > { %20421 = vst [vmem:[#allocation54_spill] sm:$0xff] %v18907_v5  ;;  %v18909_v19 = vpop.f32.mrf.mxu1 }
 0x4c8   : > { %20422 = vst [vmem:[#allocation55_spill] sm:$0xff] %v18909_v19  ;;  %v18911_v50 = vpop.f32.mrf.mxu0 }
 0x4c9   : > { %20423 = vst [vmem:[#allocation56_spill] sm:$0xff] %v18911_v50  ;;  %v18913_v44 = vpop.f32.mrf.mxu1  ;;  %v12631_v50 = vadd.f32 %v12630_v20, %v12629_v24  ;;  %v12695_v20 = vadd.f32 %v18821_v53, %v18819_v30 }
 0x4ca   : > { %20424 = vst [vmem:[#allocation57_spill] sm:$0xff] %v18913_v44  ;;  %v18915_v51 = vpop.f32.mrf.mxu0 }
 0x4cb   : > { %20425 = vst [vmem:[#allocation58_spill] sm:$0xff] %v18915_v51  ;;  %v18917_v61 = vpop.f32.mrf.mxu1 }
 0x4cc   : > { %20426 = vst [vmem:[#allocation59_spill] sm:$0xff] %v18917_v61  ;;  %v18919_v9 = vpop.f32.mrf.mxu0  ;;  %v9856_v61 = vadd.f32 %v12628_v41, %v18768_v57 }
 0x4cd   : > { %20427 = vst [vmem:[#allocation60_spill] sm:$0xff] %v18919_v9  ;;  %v18921_v40 = vpop.f32.mrf.mxu1 }
 0x4ce   : > { %20428 = vst [vmem:[#allocation61_spill] sm:$0xff] %v18921_v40  ;;  %v18923_v14 = vpop.f32.mrf.mxu0  ;;  %v12692_v40 = vadd.f32 %v18815_v3, %v18812_v55 }
 0x4cf   : > { %20429 = vst [vmem:[#allocation62_spill] sm:$0xff] %v18923_v14  ;;  %v18925_v58 = vpop.f32.mrf.mxu1  ;;  %v9859_v14 = vadd.f32 %v12631_v50, %v18771_v34  ;;  %v10209_v34 = vadd.f32 %v17790_v33, %v17787_v6 }
 0x4d0   : > { %20430 = vst [vmem:[#allocation63_spill] sm:$0xff] %v18925_v58  ;;  %v18927_v5 = vpop.f32.mrf.mxu0  ;;  %v9953_v8 = vadd.f32 %v12692_v40, %v9856_v61  ;;  %v12637_v40 = vadd.f32 %v18835_v12, %v18831_v63  ;;  %v12698_v61 = vadd.f32 %v18829_v18, %v18825_v17  ;;  %v12701_v18 = vadd.f32 %v18837_v59, %v18833_v13 }
 0x4d1   : > { %20431 = vst [vmem:[#allocation64_spill] sm:$0xff] %v18927_v5  ;;  %v18929_v19 = vpop.f32.mrf.mxu1  ;;  %v9956_v5 = vadd.f32 %v12695_v20, %v9859_v14  ;;  %v12704_v13 = vadd.f32 %v18845_v0, %v18841_v62 }
 0x4d2   : > { %20432 = vst [vmem:[#allocation65_spill] sm:$0xff] %v18929_v19  ;;  %v18931_v48 = vpop.f32.mrf.mxu0  ;;  %v12634_v19 = vadd.f32 %v18827_v60, %v18823_v47  ;;  %v12640_v47 = vadd.f32 %v18843_v49, %v18839_v10 }
 0x4d3   : > { %20433 = vst [vmem:[#allocation66_spill] sm:$0xff] %v18931_v48  ;;  %v18933_v44 = vpop.f32.mrf.mxu1 }
 0x4d4   : > { %20434 = vst [vmem:[#allocation67_spill] sm:$0xff] %v18933_v44  ;;  %v12754_v51 = vpop.f32.mrf.mxu0  ;;  %v9864_v50 = vadd.f32 %v12634_v19, %v18774_v54  ;;  %v10213_v54 = vadd.f32 %v17810_v26, %v17799_v43  ;;  %v9872_v49 = vadd.f32 %v12640_v47, %v18780_v36 }
 0x4d5   : > { %v12818_v9 = vpop.f32.mrf.mxu1 }
 0x4d6   : > { %v12755_v58 = vpop.f32.mrf.mxu0 }
 0x4d7   : > { %v12819_v31 = vpop.f32.mrf.mxu1  ;;  %v12756_v24 = vadd.f32 %v12755_v58, %v12754_v51 }
 0x4d8   : > { %v12757_v44 = vpop.f32.mrf.mxu0  ;;  %v12820_v41 = vadd.f32 %v12819_v31, %v12818_v9 }
 0x4d9   : > { %v12821_v48 = vpop.f32.mrf.mxu1  ;;  %v10050_v57 = vadd.f32 %v12756_v24, %v9953_v8  ;;  %v12643_v24 = vadd.f32 %v18851_v1, %v18847_v22  ;;  %v12646_v1 = vadd.f32 %v18859_v38, %v18855_v45 }
 0x4da   : > { %v12758_v42 = vpop.f32.mrf.mxu0 }
 0x4db   : > { %v12822_v29 = vpop.f32.mrf.mxu1  ;;  %v12759_v55 = vadd.f32 %v12758_v42, %v12757_v44  ;;  %v18948_v51 = vadd.f32 %v12820_v41, %v10050_v57  ;;  %v9961_v44 = vadd.f32 %v12698_v61, %v9864_v50  ;;  %v9867_v42 = vadd.f32 %v12637_v40, %v18777_v52 }
 0x4dc   : > { %v12760_v58 = vpop.f32.mrf.mxu0  ;;  %v12823_v14 = vadd.f32 %v12822_v29, %v12821_v48  ;;  %v10217_v52 = vadd.f32 %v17830_v28, %v17821_v25  ;;  %v9969_v40 = vadd.f32 %v12704_v13, %v9872_v49  ;;  %v9875_v22 = vadd.f32 %v12643_v24, %v18783_v11  ;;  %v20435_v49 = vld [vmem:[#allocation36_spill] sm:$0xff] }
 0x4dd   : > { %v12824_v3 = vpop.f32.mrf.mxu1  ;;  %v10053_v30 = vadd.f32 %v12759_v55, %v9956_v5  ;;  %v10210_v53 = vadd.f32 %v10209_v34, %v18948_v51  ;;  %v9964_v8 = vadd.f32 %v12701_v18, %v9867_v42  ;;  %v12649_v11 = vadd.f32 %v18867_v16, %v18863_v4 }
 0x4de   : > { %v12761_v60 = vpop.f32.mrf.mxu0 }
 0x4df   : > { %v12825_v19 = vpop.f32.mrf.mxu1  ;;  %v18958_v63 = vadd.f32 %v12823_v14, %v10053_v30  ;;  %v12762_v12 = vadd.f32 %v12761_v60, %v12760_v58  ;;  %10211 = vadd.xlane.f32.xlu0 %v10210_v53  ;;  %v12707_v14 = vadd.f32 %v18853_v39, %v18849_v2  ;;  %v9883_v4 = vadd.f32 %v12649_v11, %v18789_v15 }
 0x4e0   : > { %v12763_v17 = vpop.f32.mrf.mxu0  ;;  %v12826_v9 = vadd.f32 %v12825_v19, %v12824_v3  ;;  %v10221_v3 = vadd.f32 %v17850_v56, %v17839_v32  ;;  %v10225_v19 = vadd.f32 %v17870_v21, %v17861_v35 }
 0x4e1   : > { %v12827_v5 = vpop.f32.mrf.mxu1  ;;  %v10058_v48 = vadd.f32 %v12762_v12, %v9961_v44  ;;  %v10214_v10 = vadd.f32 %v10213_v54, %v18958_v63  ;;  %v9972_v54 = vadd.f32 %v12707_v14, %v9875_v22  ;;  %v9880_v44 = vadd.f32 %v12646_v1, %v18786_v7  ;;  %v20442_v1 = vld [vmem:[#allocation40_spill] sm:$0xff] }
 0x4e2   : > { %v12764_v29 = vpop.f32.mrf.mxu0  ;;  %v10229_v7 = vadd.f32 %v17890_v37, %v17879_v23 }
 0x4e3   : > { %v12828_v31 = vpop.f32.mrf.mxu1  ;;  %v12765_v20 = vadd.f32 %v12764_v29, %v12763_v17  ;;  %10215 = vadd.xlane.f32.xlu0 %v10214_v10  ;;  %v18968_v57 = vadd.f32 %v12826_v9, %v10058_v48  ;;  %v12710_v17 = vadd.f32 %v18861_v27, %v18857_v46  ;;  %v20436_v29 = vld [vmem:[#allocation38_spill] sm:$0xff]  ;;  %v20438_v27 = vld [vmem:[#allocation35_spill] sm:$0xff] }
 0x4e4   : > { %v12766_v59 = vpop.f32.mrf.mxu0  ;;  %v12829_v36 = vadd.f32 %v12828_v31, %v12827_v5  ;;  %v12652_v31 = vadd.f32 %v20436_v29, %v20435_v49  ;;  %v20437_v46 = vld [vmem:[#allocation34_spill] sm:$0xff] }
 0x4e5   : > { %v12830_v41 = vpop.f32.mrf.mxu1  ;;  %v10061_v34 = vadd.f32 %v12765_v20, %v9964_v8  ;;  %v10218_v50 = vadd.f32 %v10217_v52, %v18968_v57  ;;  %v9977_v10 = vadd.f32 %v12710_v17, %v9880_v44  ;;  %v12713_v24 = vadd.f32 %v20438_v27, %v20437_v46  ;;  %v20446_v44 = vld [vmem:[#allocation44_spill] sm:$0xff] }
 0x4e6   : > { %v12767_v55 = vpop.f32.mrf.mxu0 }
 0x4e7   : > { %v12831_v58 = vpop.f32.mrf.mxu1  ;;  %v18978_v61 = vadd.f32 %v12829_v36, %v10061_v34  ;;  %v12768_v62 = vadd.f32 %v12767_v55, %v12766_v59  ;;  %10219 = vadd.xlane.f32.xlu1 %v10218_v50  ;;  %v20439_v34 = vld [vmem:[#allocation5_spill] sm:$0xff]  ;;  %v20440_v36 = vld [vmem:[#allocation6_spill] sm:$0xff] }
 0x4e8   : > { %v12769_v0 = vpop.f32.mrf.mxu0  ;;  %v12832_v47 = vadd.f32 %v12831_v58, %v12830_v41  ;;  %v10233_v50 = vadd.f32 %v20440_v36, %v20439_v34 }
 0x4e9   : > { %v12833_v30 = vpop.f32.mrf.mxu1  ;;  %v10066_v53 = vadd.f32 %v12768_v62, %v9969_v40  ;;  %v10222_v60 = vadd.f32 %v10221_v3, %v18978_v61  ;;  %v9980_v40 = vadd.f32 %v12713_v24, %v9883_v4  ;;  %v20441_v3 = vld [vmem:[#allocation26_spill] sm:$0xff] }
 0x4ea   : > { %v12770_v45 = vpop.f32.mrf.mxu0  ;;  %v9888_v22 = vadd.f32 %v12652_v31, %v20441_v3  ;;  %v20443_v62 = vld [vmem:[#allocation42_spill] sm:$0xff]  ;;  %v20451_v31 = vld [vmem:[#allocation41_spill] sm:$0xff]  ;;  %v20456_v3 = vld [vmem:[#allocation48_spill] sm:$0xff] }
 0x4eb   : > { %v12834_v38 = vpop.f32.mrf.mxu1  ;;  %v18988_v42 = vadd.f32 %v12832_v47, %v10066_v53  ;;  %v12771_v12 = vadd.f32 %v12770_v45, %v12769_v0  ;;  %10223 = vadd.xlane.f32.xlu1 %v10222_v60  ;;  %v12655_v0 = vadd.f32 %v20443_v62, %v20442_v1  ;;  %v20444_v60 = vld [vmem:[#allocation37_spill] sm:$0xff] }
 0x4ec   : > { %v12772_v2 = vpop.f32.mrf.mxu0  ;;  %v12835_v18 = vadd.f32 %v12834_v38, %v12833_v30 }
 0x4ed   : > { %v12836_v39 = vpop.f32.mrf.mxu1  ;;  %v10069_v5 = vadd.f32 %v12771_v12, %v9972_v54  ;;  %v10226_v48 = vadd.f32 %v10225_v19, %v18988_v42  ;;  %v20445_v19 = vld [vmem:[#allocation39_spill] sm:$0xff]  ;;  %v20447_v12 = vld [vmem:[#allocation46_spill] sm:$0xff] }
 0x4ee   : > { %v12773_v16 = vpop.f32.mrf.mxu0  ;;  %v12716_v11 = vadd.f32 %v20445_v19, %v20444_v60 }
 0x4ef   : > { %v12837_v9 = vpop.f32.mrf.mxu1  ;;  %v18998_v52 = vadd.f32 %v12835_v18, %v10069_v5  ;;  %v12774_v8 = vadd.f32 %v12773_v16, %v12772_v2  ;;  %10227 = vadd.xlane.f32.xlu0 %v10226_v48  ;;  %v12658_v2 = vadd.f32 %v20447_v12, %v20446_v44  ;;  %v20448_v5 = vld [vmem:[#allocation7_spill] sm:$0xff]  ;;  %v20449_v18 = vld [vmem:[#allocation8_spill] sm:$0xff] }
 0x4f0   : > { %v12775_v20 = vpop.f32.mrf.mxu0  ;;  %v12838_v15 = vadd.f32 %v12837_v9, %v12836_v39  ;;  %v10237_v48 = vadd.f32 %v20449_v18, %v20448_v5  ;;  %v9985_v4 = vadd.f32 %v12716_v11, %v9888_v22  ;;  %v20450_v16 = vld [vmem:[#allocation27_spill] sm:$0xff]  ;;  %v20457_v22 = vld [vmem:[#allocation50_spill] sm:$0xff] }
 0x4f1   : > { %v12839_v13 = vpop.f32.mrf.mxu1  ;;  %v10074_v59 = vadd.f32 %v12774_v8, %v9977_v10  ;;  %v10230_v41 = vadd.f32 %v10229_v7, %v18998_v52  ;;  %v9891_v9 = vadd.f32 %v12655_v0, %v20450_v16  ;;  %v20452_v8 = vld [vmem:[#allocation43_spill] sm:$0xff]  ;;  %v12661_v1 = vadd.f32 %v20457_v22, %v20456_v3  ;;  %v20463_v16 = vld [vmem:[#allocation52_spill] sm:$0xff]  ;;  %v20470_v3 = vld [vmem:[#allocation58_spill] sm:$0xff] }
 0x4f2   : > { %v12776_v55 = vpop.f32.mrf.mxu0  ;;  %v12719_v46 = vadd.f32 %v20452_v8, %v20451_v31 }
 0x4f3   : > { %v12840_v58 = vpop.f32.mrf.mxu1  ;;  %v19008_v30 = vadd.f32 %v12838_v15, %v10074_v59  ;;  %v12777_v14 = vadd.f32 %v12776_v55, %v12775_v20  ;;  %10231 = vadd.xlane.f32.xlu1 %v10230_v41  ;;  %v20454_v59 = vld [vmem:[#allocation10_spill] sm:$0xff]  ;;  %v20455_v41 = vld [vmem:[#allocation28_spill] sm:$0xff] }
 0x4f4   : > { %v12778_v53 = vpop.f32.mrf.mxu0  ;;  %v12841_v38 = vadd.f32 %v12840_v58, %v12839_v13  ;;  %v20453_v13 = vld [vmem:[#allocation9_spill] sm:$0xff]  ;;  %v9988_v58 = vadd.f32 %v12719_v46, %v9891_v9  ;;  %v20464_v9 = vld [vmem:[#allocation54_spill] sm:$0xff] }
 0x4f5   : > { %v12842_v47 = vpop.f32.mrf.mxu1  ;;  %v10077_v45 = vadd.f32 %v12777_v14, %v9980_v40  ;;  %v10234_v54 = vadd.f32 %v10233_v50, %v19008_v30  ;;  %v10241_v15 = vadd.f32 %v20454_v59, %v20453_v13  ;;  %v9896_v50 = vadd.f32 %v12658_v2, %v20455_v41  ;;  %v20458_v14 = vld [vmem:[#allocation45_spill] sm:$0xff]  ;;  %v20460_v2 = vld [vmem:[#allocation11_spill] sm:$0xff] }
 0x4f6   : > { %v12779_v39 = vpop.f32.mrf.mxu0 }
 0x4f7   : > { %v12843_v17 = vpop.f32.mrf.mxu1  ;;  %v19018_v7 = vadd.f32 %v12841_v38, %v10077_v45  ;;  %v12780_v10 = vadd.f32 %v12779_v39, %v12778_v53  ;;  %10235 = vadd.xlane.f32.xlu0 %v10234_v54  ;;  %v20459_v53 = vld [vmem:[#allocation47_spill] sm:$0xff]  ;;  %v20461_v39 = vld [vmem:[#allocation12_spill] sm:$0xff] }
 0x4f8   : > { %v12781_v49 = vpop.f32.mrf.mxu0  ;;  %v12844_v24 = vadd.f32 %v12843_v17, %v12842_v47  ;;  %v12722_v47 = vadd.f32 %v20459_v53, %v20458_v14  ;;  %v10245_v17 = vadd.f32 %v20461_v39, %v20460_v2  ;;  %v20471_v53 = vld [vmem:[#allocation30_spill] sm:$0xff] }
 0x4f9   : > { %v12845_v29 = vpop.f32.mrf.mxu1  ;;  %v10082_v27 = vadd.f32 %v12780_v10, %v9985_v4  ;;  %v10238_v20 = vadd.f32 %v10237_v48, %v19018_v7  ;;  %v20462_v48 = vld [vmem:[#allocation29_spill] sm:$0xff]  ;;  %v12664_v10 = vadd.f32 %v20464_v9, %v20463_v16  ;;  %v20474_v16 = vld [vmem:[#allocation31_spill] sm:$0xff] }
 0x4fa   : > { %v12782_v40 = vpop.f32.mrf.mxu0  ;;  %v9993_v54 = vadd.f32 %v12722_v47, %v9896_v50  ;;  %v9899_v4 = vadd.f32 %v12661_v1, %v20462_v48  ;;  %v20467_v50 = vld [vmem:[#allocation13_spill] sm:$0xff] }
 0x4fb   : > { %v12846_v55 = vpop.f32.mrf.mxu1  ;;  %v19028_v62 = vadd.f32 %v12844_v24, %v10082_v27  ;;  %v12783_v0 = vadd.f32 %v12782_v40, %v12781_v49  ;;  %10239 = vadd.xlane.f32.xlu1 %v10238_v20  ;;  %v20466_v27 = vld [vmem:[#allocation51_spill] sm:$0xff]  ;;  %v20468_v40 = vld [vmem:[#allocation14_spill] sm:$0xff]  ;;  %v9904_v47 = vadd.f32 %v12664_v10, %v20471_v53 }
 0x4fc   : > { %v12784_v60 = vpop.f32.mrf.mxu0  ;;  %v12847_v45 = vadd.f32 %v12846_v55, %v12845_v29  ;;  %v20465_v29 = vld [vmem:[#allocation49_spill] sm:$0xff]  ;;  %v10249_v55 = vadd.f32 %v20468_v40, %v20467_v50 }
 0x4fd   : > { %v12848_v19 = vpop.f32.mrf.mxu1  ;;  %v10085_v11 = vadd.f32 %v12783_v0, %v9988_v58  ;;  %v10242_v38 = vadd.f32 %v10241_v15, %v19028_v62  ;;  %v12725_v24 = vadd.f32 %v20466_v27, %v20465_v29  ;;  %v20469_v58 = vld [vmem:[#allocation56_spill] sm:$0xff] }
 0x4fe   : > { %v12785_v44 = vpop.f32.mrf.mxu0  ;;  %v12667_v22 = vadd.f32 %v20470_v3, %v20469_v58  ;;  %v20476_v27 = vld [vmem:[#allocation16_spill] sm:$0xff]  ;;  %v20480_v3 = vld [vmem:[#allocation57_spill] sm:$0xff] }
 0x4ff   : > { %v12849_v12 = vpop.f32.mrf.mxu1  ;;  %v19038_v49 = vadd.f32 %v12847_v45, %v10085_v11  ;;  %v12786_v31 = vadd.f32 %v12785_v44, %v12784_v60  ;;  %10243 = vadd.xlane.f32.xlu0 %v10242_v38  ;;  %v9996_v14 = vadd.f32 %v12725_v24, %v9899_v4  ;;  %v20475_v4 = vld [vmem:[#allocation15_spill] sm:$0xff] }
 0x500   : > { %v12787_v8 = vpop.f32.mrf.mxu0  ;;  %v12850_v15 = vadd.f32 %v12849_v12, %v12848_v19  ;;  %v20472_v19 = vld [vmem:[#allocation53_spill] sm:$0xff]  ;;  %v9907_v9 = vadd.f32 %v12667_v22, %v20474_v16  ;;  %v10253_v10 = vadd.f32 %v20476_v27, %v20475_v4 }
 0x501   : > { %v12851_v46 = vpop.f32.mrf.mxu1  ;;  %v10090_v20 = vadd.f32 %v12786_v31, %v9993_v54  ;;  %v10246_v41 = vadd.f32 %v10245_v17, %v19038_v49  ;;  %v20473_v54 = vld [vmem:[#allocation55_spill] sm:$0xff] }
 0x502   : > { %v12788_v1 = vpop.f32.mrf.mxu0  ;;  %v12728_v44 = vadd.f32 %v20473_v54, %v20472_v19  ;;  %v20483_v19 = vld [vmem:[#allocation18_spill] sm:$0xff] }
 0x503   : > { %v12852_v0 = vpop.f32.mrf.mxu1  ;;  %v19048_v60 = vadd.f32 %v12850_v15, %v10090_v20  ;;  %v12789_v11 = vadd.f32 %v12788_v1, %v12787_v8  ;;  %10247 = vadd.xlane.f32.xlu1 %v10246_v41  ;;  %v20477_v20 = vld [vmem:[#allocation60_spill] sm:$0xff]  ;;  %v20478_v8 = vld [vmem:[#allocation62_spill] sm:$0xff]  ;;  %v20481_v1 = vld [vmem:[#allocation59_spill] sm:$0xff] }
 0x504   : > { %v12790_v45 = vpop.f32.mrf.mxu0  ;;  %v12853_v17 = vadd.f32 %v12852_v0, %v12851_v46  ;;  %v10001_v24 = vadd.f32 %v12728_v44, %v9904_v47  ;;  %v12670_v15 = vadd.f32 %v20478_v8, %v20477_v20  ;;  %v12731_v46 = vadd.f32 %v20481_v1, %v20480_v3  ;;  %v20484_v20 = vld [vmem:[#allocation32_spill] sm:$0xff] }
 0x505   : > { %v12854_v38 = vpop.f32.mrf.mxu1  ;;  %v10093_v12 = vadd.f32 %v12789_v11, %v9996_v14  ;;  %v10250_v48 = vadd.f32 %v10249_v55, %v19048_v60  ;;  %v20482_v11 = vld [vmem:[#allocation17_spill] sm:$0xff] }
 0x506   : > { %v12791_v31 = vpop.f32.mrf.mxu0  ;;  %v10257_v54 = vadd.f32 %v20483_v19, %v20482_v11  ;;  %v10004_v47 = vadd.f32 %v12731_v46, %v9907_v9  ;;  %v20490_v11 = vld [vmem:[#allocation19_spill] sm:$0xff] }
 0x507   : > { %v12855_v29 = vpop.f32.mrf.mxu1  ;;  %v19058_v41 = vadd.f32 %v12853_v17, %v10093_v12  ;;  %v12792_v58 = vadd.f32 %v12791_v31, %v12790_v45  ;;  %10251 = vadd.xlane.f32.xlu0 %v10250_v48  ;;  %v9912_v12 = vadd.f32 %v12670_v15, %v20484_v20  ;;  %v20485_v17 = vld [vmem:[#allocation64_spill] sm:$0xff]  ;;  %v20486_v45 = vld [vmem:[#allocation66_spill] sm:$0xff] }
 0x508   : > { %v12793_v0 = vpop.f32.mrf.mxu0  ;;  %v12856_v22 = vadd.f32 %v12855_v29, %v12854_v38  ;;  %v12673_v48 = vadd.f32 %v20486_v45, %v20485_v17  ;;  %v20488_v38 = vld [vmem:[#allocation61_spill] sm:$0xff]  ;;  %v20489_v29 = vld [vmem:[#allocation63_spill] sm:$0xff]  ;;  %v20491_v15 = vld [vmem:[#allocation20_spill] sm:$0xff] }
 0x509   : > { %20479 = vst [vmem:[#allocation68_spill] sm:$0xff] %v19058_v41  ;;  %v12857_v55 = vpop.f32.mrf.mxu1  ;;  %v10098_v14 = vadd.f32 %v12792_v58, %v10001_v24  ;;  %v10254_v53 = vadd.f32 %v10253_v10, %v19058_v41  ;;  %v12734_v10 = vadd.f32 %v20489_v29, %v20488_v38  ;;  %v10261_v20 = vadd.f32 %v20491_v15, %v20490_v11  ;;  %v20492_v17 = vld [vmem:[#allocation33_spill] sm:$0xff]  ;;  %v20494_v38 = vld [vmem:[#allocation67_spill] sm:$0xff]  ;;  %v20496_v15 = vld [vmem:[#allocation22_spill] sm:$0xff] }
 0x50a   : > { %v12794_v44 = vpop.f32.mrf.mxu0  ;;  %v20493_v45 = vld [vmem:[#allocation65_spill] sm:$0xff] }
 0x50b   : > { %v12858_v16 = vpop.f32.mrf.mxu1  ;;  %v19068_v31 = vadd.f32 %v12856_v22, %v10098_v14  ;;  %v12795_v8 = vadd.f32 %v12794_v44, %v12793_v0  ;;  %10255 = vadd.xlane.f32.xlu1 %v10254_v53  ;;  %v10009_v41 = vadd.f32 %v12734_v10, %v9912_v12  ;;  %v9915_v14 = vadd.f32 %v12673_v48, %v20492_v17 }
 0x50c   : > { %v12796_v3 = vpop.f32.mrf.mxu0  ;;  %v12859_v1 = vadd.f32 %v12858_v16, %v12857_v55 }
 0x50d   : > { %20487 = vst [vmem:[#allocation69_spill] sm:$0xff] %v19068_v31  ;;  %v12860_v24 = vpop.f32.mrf.mxu1  ;;  %v10101_v58 = vadd.f32 %v12795_v8, %v10004_v47  ;;  %v10258_v9 = vadd.f32 %v10257_v54, %v19068_v31  ;;  %v12737_v47 = vadd.f32 %v20494_v38, %v20493_v45  ;;  %v20495_v31 = vld [vmem:[#allocation21_spill] sm:$0xff] }
 0x50e   : > { %v12797_v46 = vpop.f32.mrf.mxu0  ;;  %v10265_v12 = vadd.f32 %v20496_v15, %v20495_v31 }
 0x50f   : > { %v12861_v19 = vpop.f32.mrf.mxu1  ;;  %v19076_v22 = vadd.f32 %v12859_v1, %v10101_v58  ;;  %v12798_v0 = vadd.f32 %v12797_v46, %v12796_v3  ;;  %10259 = vadd.xlane.f32.xlu0 %v10258_v9  ;;  %v10012_v10 = vadd.f32 %v12737_v47, %v9915_v14 }
 0x510   : > { %v12799_v53 = vpop.f32.mrf.mxu0  ;;  %v12862_v16 = vadd.f32 %v12861_v19, %v12860_v24  ;;  %v20498_v19 = vld [vmem:[#allocation25_spill] sm:$0xff] }
 0x511   : > { %v12863_v44 = vpop.f32.mrf.mxu1  ;;  %v10106_v55 = vadd.f32 %v12798_v0, %v10009_v41  ;;  %v10262_v54 = vadd.f32 %v10261_v20, %v19076_v22  ;;  %v20497_v41 = vld [vmem:[#allocation24_spill] sm:$0xff] }
 0x512   : > { %v12800_v8 = vpop.f32.mrf.mxu0  ;;  %v10269_v24 = vadd.f32 %v20498_v19, %v20497_v41 }
 0x513   : > { %v12864_v29 = vpop.f32.mrf.mxu1  ;;  %v19083_v48 = vadd.f32 %v12862_v16, %v10106_v55  ;;  %v12801_v58 = vadd.f32 %v12800_v8, %v12799_v53  ;;  %10263 = vadd.xlane.f32.xlu1 %v10262_v54 }
 0x514   : > { %v12865_v1 = vadd.f32 %v12864_v29, %v12863_v44 }
 0x515   : > { %v10109_v3 = vadd.f32 %v12801_v58, %v10012_v10  ;;  %v10266_v9 = vadd.f32 %v10265_v12, %v19083_v48 }
 0x517   : > { %v19086_v46 = vadd.f32 %v12865_v1, %v10109_v3  ;;  %10267 = vadd.xlane.f32.xlu0 %v10266_v9 }
 0x519   : > { %v10270_v20 = vadd.f32 %v10269_v24, %v19086_v46 }
 0x51b   : > { %10271 = vadd.xlane.f32.xlu1 %v10270_v20 }
 0x568   : > { %v10212_v17 = vpop.xlane.xlu0 %10211 }
 0x569   : > { %v10274_v0 = vmul.f32 0.0026041667, %v10212_v17 }
 0x56b   : > { %v19092_v14 = vsub.f32 %v17787_v6, %v10274_v0  ;;  %v19095_v53 = vsub.f32 %v17790_v33, %v10274_v0  ;;  %v19098_v44 = vsub.f32 %v18948_v51, %v10274_v0 }
 0x56c   : > { %v10216_v45 = vpop.xlane.xlu0 %10215 }
 0x56d   : > { %v10275_v38 = vmul.f32 0.0026041667, %v10216_v45  ;;  %v10338_v47 = vmul.f32 %v19092_v14, %v19092_v14  ;;  %v10339_v55 = vmul.f32 %v19095_v53, %v19095_v53  ;;  %v10340_v16 = vmul.f32 %v19098_v44, %v19098_v44 }
 0x56f   : > { %v19107_v6 = vsub.f32 %v17799_v43, %v10275_v38  ;;  %v19110_v33 = vsub.f32 %v17810_v26, %v10275_v38  ;;  %v19113_v51 = vsub.f32 %v18958_v63, %v10275_v38  ;;  %v10386_v54 = vadd.f32 %v10339_v55, %v10338_v47 }
 0x570   : > { %v10220_v8 = vpop.xlane.xlu1 %10219 }
 0x571   : > { %v10276_v29 = vmul.f32 0.0026041667, %v10220_v8  ;;  %v10387_v12 = vadd.f32 %v10386_v54, %v10340_v16  ;;  %v10341_v10 = vmul.f32 %v19107_v6, %v19107_v6  ;;  %v10342_v58 = vmul.f32 %v19110_v33, %v19110_v33 }
 0x572   : > { %v10343_v43 = vmul.f32 %v19113_v51, %v19113_v51 }
 0x573   : > { %v19122_v3 = vsub.f32 %v17821_v25, %v10276_v29  ;;  %v19125_v26 = vsub.f32 %v17830_v28, %v10276_v29  ;;  %v19128_v63 = vsub.f32 %v18968_v57, %v10276_v29  ;;  %10388 = vadd.xlane.f32.xlu0 %v10387_v12  ;;  %v10390_v1 = vadd.f32 %v10342_v58, %v10341_v10 }
 0x574   : > { %v10224_v9 = vpop.xlane.xlu1 %10223 }
 0x575   : > { %v10277_v24 = vmul.f32 0.0026041667, %v10224_v9  ;;  %v10391_v20 = vadd.f32 %v10390_v1, %v10343_v43  ;;  %v10344_v17 = vmul.f32 %v19122_v3, %v19122_v3  ;;  %v10345_v0 = vmul.f32 %v19125_v26, %v19125_v26 }
 0x576   : > { %v10346_v25 = vmul.f32 %v19128_v63, %v19128_v63 }
 0x577   : > { %v19137_v28 = vsub.f32 %v17839_v32, %v10277_v24  ;;  %v19140_v57 = vsub.f32 %v17850_v56, %v10277_v24  ;;  %v19143_v45 = vsub.f32 %v18978_v61, %v10277_v24  ;;  %10392 = vadd.xlane.f32.xlu1 %v10391_v20  ;;  %v10394_v38 = vadd.f32 %v10345_v0, %v10344_v17 }
 0x578   : > { %v10228_v47 = vpop.xlane.xlu0 %10227 }
 0x579   : > { %v10278_v55 = vmul.f32 0.0026041667, %v10228_v47  ;;  %v10395_v16 = vadd.f32 %v10394_v38, %v10346_v25  ;;  %v10347_v54 = vmul.f32 %v19137_v28, %v19137_v28  ;;  %v10348_v8 = vmul.f32 %v19140_v57, %v19140_v57 }
 0x57a   : > { %v10349_v32 = vmul.f32 %v19143_v45, %v19143_v45 }
 0x57b   : > { %v19152_v56 = vsub.f32 %v17861_v35, %v10278_v55  ;;  %v19155_v61 = vsub.f32 %v17870_v21, %v10278_v55  ;;  %v19158_v29 = vsub.f32 %v18988_v42, %v10278_v55  ;;  %10396 = vadd.xlane.f32.xlu0 %v10395_v16  ;;  %v10398_v12 = vadd.f32 %v10348_v8, %v10347_v54 }
 0x57c   : > { %v10232_v10 = vpop.xlane.xlu1 %10231 }
 0x57d   : > { %v10279_v58 = vmul.f32 0.0026041667, %v10232_v10  ;;  %v10399_v43 = vadd.f32 %v10398_v12, %v10349_v32  ;;  %v10350_v1 = vmul.f32 %v19152_v56, %v19152_v56  ;;  %v10351_v9 = vmul.f32 %v19155_v61, %v19155_v61 }
 0x57e   : > { %v10352_v35 = vmul.f32 %v19158_v29, %v19158_v29 }
 0x57f   : > { %v19167_v21 = vsub.f32 %v17879_v23, %v10279_v58  ;;  %v19170_v42 = vsub.f32 %v17890_v37, %v10279_v58  ;;  %v19173_v24 = vsub.f32 %v18998_v52, %v10279_v58  ;;  %10400 = vadd.xlane.f32.xlu1 %v10399_v43  ;;  %v10402_v20 = vadd.f32 %v10351_v9, %v10350_v1 }
 0x580   : > { %v10236_v17 = vpop.xlane.xlu0 %10235 }
 0x581   : > { %v10280_v0 = vmul.f32 0.0026041667, %v10236_v17  ;;  %v10403_v25 = vadd.f32 %v10402_v20, %v10352_v35  ;;  %v10353_v38 = vmul.f32 %v19167_v21, %v19167_v21  ;;  %v10354_v47 = vmul.f32 %v19170_v42, %v19170_v42 }
 0x582   : > { %v10355_v23 = vmul.f32 %v19173_v24, %v19173_v24 }
 0x583   : > { %v19182_v37 = vsub.f32 %v20439_v34, %v10280_v0  ;;  %v19185_v52 = vsub.f32 %v20440_v36, %v10280_v0  ;;  %v19188_v55 = vsub.f32 %v19008_v30, %v10280_v0  ;;  %10404 = vadd.xlane.f32.xlu0 %v10403_v25  ;;  %v10406_v16 = vadd.f32 %v10354_v47, %v10353_v38 }
 0x584   : > { %v10240_v54 = vpop.xlane.xlu1 %10239 }
 0x585   : > { %v10281_v8 = vmul.f32 0.0026041667, %v10240_v54  ;;  %v10407_v32 = vadd.f32 %v10406_v16, %v10355_v23  ;;  %v10356_v12 = vmul.f32 %v19182_v37, %v19182_v37  ;;  %v10357_v10 = vmul.f32 %v19185_v52, %v19185_v52 }
 0x586   : > { %v10358_v34 = vmul.f32 %v19188_v55, %v19188_v55 }
 0x587   : > { %v19197_v36 = vsub.f32 %v20448_v5, %v10281_v8  ;;  %v19200_v30 = vsub.f32 %v20449_v18, %v10281_v8  ;;  %v19203_v58 = vsub.f32 %v19018_v7, %v10281_v8  ;;  %10408 = vadd.xlane.f32.xlu1 %v10407_v32  ;;  %v10410_v43 = vadd.f32 %v10357_v10, %v10356_v12 }
 0x588   : > { %v10244_v1 = vpop.xlane.xlu0 %10243 }
 0x589   : > { %v10282_v9 = vmul.f32 0.0026041667, %v10244_v1  ;;  %v10411_v35 = vadd.f32 %v10410_v43, %v10358_v34  ;;  %v10359_v20 = vmul.f32 %v19197_v36, %v19197_v36  ;;  %v10360_v17 = vmul.f32 %v19200_v30, %v19200_v30 }
 0x58a   : > { %v10361_v5 = vmul.f32 %v19203_v58, %v19203_v58 }
 0x58b   : > { %v19212_v18 = vsub.f32 %v20453_v13, %v10282_v9  ;;  %v19215_v7 = vsub.f32 %v20454_v59, %v10282_v9  ;;  %v19218_v0 = vsub.f32 %v19028_v62, %v10282_v9  ;;  %10412 = vadd.xlane.f32.xlu0 %v10411_v35  ;;  %v10414_v25 = vadd.f32 %v10360_v17, %v10359_v20 }
 0x58c   : > { %v10248_v38 = vpop.xlane.xlu1 %10247 }
 0x58d   : > { %v10283_v47 = vmul.f32 0.0026041667, %v10248_v38  ;;  %v10415_v23 = vadd.f32 %v10414_v25, %v10361_v5  ;;  %v10362_v16 = vmul.f32 %v19212_v18, %v19212_v18  ;;  %v10363_v54 = vmul.f32 %v19215_v7, %v19215_v7 }
 0x58e   : > { %v10364_v13 = vmul.f32 %v19218_v0, %v19218_v0 }
 0x58f   : > { %v19227_v59 = vsub.f32 %v20460_v2, %v10283_v47  ;;  %v19230_v62 = vsub.f32 %v20461_v39, %v10283_v47  ;;  %v19233_v8 = vsub.f32 %v19038_v49, %v10283_v47  ;;  %10416 = vadd.xlane.f32.xlu1 %v10415_v23  ;;  %v10418_v32 = vadd.f32 %v10363_v54, %v10362_v16  ;;  %v20499_v47 = vld [vmem:[#allocation68_spill] sm:$0xff] }
 0x590   : > { %v10252_v12 = vpop.xlane.xlu0 %10251 }
 0x591   : > { %v10284_v10 = vmul.f32 0.0026041667, %v10252_v12  ;;  %v10419_v34 = vadd.f32 %v10418_v32, %v10364_v13  ;;  %v10365_v43 = vmul.f32 %v19227_v59, %v19227_v59  ;;  %v10366_v1 = vmul.f32 %v19230_v62, %v19230_v62 }
 0x592   : > { %v10367_v2 = vmul.f32 %v19233_v8, %v19233_v8 }
 0x593   : > { %v19242_v39 = vsub.f32 %v20467_v50, %v10284_v10  ;;  %v19245_v49 = vsub.f32 %v20468_v40, %v10284_v10  ;;  %v19248_v9 = vsub.f32 %v19048_v60, %v10284_v10  ;;  %10420 = vadd.xlane.f32.xlu0 %v10419_v34  ;;  %v10422_v35 = vadd.f32 %v10366_v1, %v10365_v43  ;;  %v20500_v34 = vld [vmem:[#allocation17_spill] sm:$0xff]  ;;  %v20501_v43 = vld [vmem:[#allocation18_spill] sm:$0xff] }
 0x594   : > { %v10256_v20 = vpop.xlane.xlu1 %10255 }
 0x595   : > { %v10285_v17 = vmul.f32 0.0026041667, %v10256_v20  ;;  %v10423_v5 = vadd.f32 %v10422_v35, %v10367_v2  ;;  %v10368_v25 = vmul.f32 %v19242_v39, %v19242_v39  ;;  %v10369_v38 = vmul.f32 %v19245_v49, %v19245_v49  ;;  %v20502_v2 = vld [vmem:[#allocation69_spill] sm:$0xff] }
 0x596   : > { %v10370_v50 = vmul.f32 %v19248_v9, %v19248_v9 }
 0x597   : > { %v19257_v40 = vsub.f32 %v20475_v4, %v10285_v17  ;;  %v19260_v60 = vsub.f32 %v20476_v27, %v10285_v17  ;;  %v19263_v23 = vsub.f32 %v20499_v47, %v10285_v17  ;;  %10424 = vadd.xlane.f32.xlu1 %v10423_v5  ;;  %v10426_v16 = vadd.f32 %v10369_v38, %v10368_v25 }
 0x598   : > { %v10260_v54 = vpop.xlane.xlu0 %10259 }
 0x599   : > { %v10286_v13 = vmul.f32 0.0026041667, %v10260_v54  ;;  %v10427_v32 = vadd.f32 %v10426_v16, %v10370_v50  ;;  %v10371_v12 = vmul.f32 %v19257_v40, %v19257_v40  ;;  %v10372_v10 = vmul.f32 %v19260_v60, %v19260_v60  ;;  %v20503_v54 = vld [vmem:[#allocation20_spill] sm:$0xff] }
 0x59a   : > { %v10373_v4 = vmul.f32 %v19263_v23, %v19263_v23 }
 0x59b   : > { %v19272_v27 = vsub.f32 %v20500_v34, %v10286_v13  ;;  %v19275_v1 = vsub.f32 %v20501_v43, %v10286_v13  ;;  %v19278_v35 = vsub.f32 %v20502_v2, %v10286_v13  ;;  %10428 = vadd.xlane.f32.xlu0 %v10427_v32  ;;  %v10430_v20 = vadd.f32 %v10372_v10, %v10371_v12 }
 0x59c   : > { %v10264_v17 = vpop.xlane.xlu1 %10263 }
 0x59d   : > { %v10287_v5 = vmul.f32 0.0026041667, %v10264_v17  ;;  %v10431_v25 = vadd.f32 %v10430_v20, %v10373_v4  ;;  %v10374_v38 = vmul.f32 %v19272_v27, %v19272_v27  ;;  %v10375_v50 = vmul.f32 %v19275_v1, %v19275_v1 }
 0x59e   : > { %v10376_v47 = vmul.f32 %v19278_v35, %v19278_v35 }
 0x59f   : > { %v19287_v16 = vsub.f32 %v20490_v11, %v10287_v5  ;;  %v19290_v13 = vsub.f32 %v20503_v54, %v10287_v5  ;;  %v19293_v32 = vsub.f32 %v19076_v22, %v10287_v5  ;;  %10432 = vadd.xlane.f32.xlu1 %v10431_v25  ;;  %v10434_v12 = vadd.f32 %v10375_v50, %v10374_v38 }
 0x5a0   : > { %v10268_v10 = vpop.xlane.xlu0 %10267 }
 0x5a1   : > { %v10288_v4 = vmul.f32 0.0026041667, %v10268_v10  ;;  %v10435_v34 = vadd.f32 %v10434_v12, %v10376_v47  ;;  %v10377_v43 = vmul.f32 %v19287_v16, %v19287_v16  ;;  %v10378_v2 = vmul.f32 %v19290_v13, %v19290_v13 }
 0x5a2   : > { %v10379_v11 = vmul.f32 %v19293_v32, %v19293_v32 }
 0x5a3   : > { %v19302_v20 = vsub.f32 %v20495_v31, %v10288_v4  ;;  %v19305_v22 = vsub.f32 %v20496_v15, %v10288_v4  ;;  %v19308_v17 = vsub.f32 %v19083_v48, %v10288_v4  ;;  %10436 = vadd.xlane.f32.xlu0 %v10435_v34  ;;  %v10438_v5 = vadd.f32 %v10378_v2, %v10377_v43 }
 0x5a4   : > { %v10272_v25 = vpop.xlane.xlu1 %10271 }
 0x5a5   : > { %20504 = vst [vmem:[#allocation70_spill] sm:$0xff] %v19308_v17  ;;  %v10289_v38 = vmul.f32 0.0026041667, %v10272_v25  ;;  %v10439_v50 = vadd.f32 %v10438_v5, %v10379_v11  ;;  %v10380_v47 = vmul.f32 %v19302_v20, %v19302_v20  ;;  %v10381_v54 = vmul.f32 %v19305_v22, %v19305_v22 }
 0x5a6   : > { %v10382_v31 = vmul.f32 %v19308_v17, %v19308_v17 }
 0x5a7   : > { %v19317_v15 = vsub.f32 %v20497_v41, %v10289_v38  ;;  %v19320_v48 = vsub.f32 %v20498_v19, %v10289_v38  ;;  %v19323_v12 = vsub.f32 %v19086_v46, %v10289_v38  ;;  %10440 = vadd.xlane.f32.xlu1 %v10439_v50  ;;  %v10442_v10 = vadd.f32 %v10381_v54, %v10380_v47 }
 0x5a9   : > { %20505 = vst [vmem:[#allocation71_spill] sm:$0xff] %v19317_v15  ;;  %20506 = vst [vmem:[#allocation72_spill] sm:$0xff] %v19320_v48  ;;  %v10443_v4 = vadd.f32 %v10442_v10, %v10382_v31  ;;  %v10383_v34 = vmul.f32 %v19317_v15, %v19317_v15  ;;  %v10384_v43 = vmul.f32 %v19320_v48, %v19320_v48 }
 0x5aa   : > { %20507 = vst [vmem:[#allocation73_spill] sm:$0xff] %v19323_v12  ;;  %v10385_v41 = vmul.f32 %v19323_v12, %v19323_v12 }
 0x5ab   : > { %10444 = vadd.xlane.f32.xlu0 %v10443_v4  ;;  %v10446_v2 = vadd.f32 %v10384_v43, %v10383_v34  ;;  %v11834_v4 = vld [vmem:[%s19605_s2 + $0x1] ss:$8 sm:$0x7]  ;;  %v11835_v43 = vld [vmem:[%s19605_s2 + $0x2] ss:$8 sm:$0x7] }
 0x5ad   : > { %v10447_v11 = vadd.f32 %v10446_v2, %v10385_v41  ;;  %v20508_v2 = vld [vmem:[#allocation101_spill] sm:$0xff] }
 0x5af   : > { %10448 = vadd.xlane.f32.xlu1 %v10447_v11  ;;  %v19339_v11 = vrot.slane %v11834_v4, %v20508_v2 }
 0x5fc   : > { %v10389_v19 = vpop.xlane.xlu0 %10388 }
 0x5fd   : > { %v10450_v46 = vmul.f32 0.0026041667, %v10389_v19 }
 0x5ff   : > { %v10466_v5 = vadd.f32 1e-05, %v10450_v46  ;;  %v20509_v46 = vld [vmem:[#allocation102_spill] sm:$0xff] }
 0x600   : > { %v10393_v25 = vpop.xlane.xlu1 %10392 }
 0x601   : > { %13933 = vrsqrt.f32 %v10466_v5  ;;  %v10451_v38 = vmul.f32 0.0026041667, %v10393_v25  ;;  %v19342_v5 = vrot.slane %v11834_v4, %v20509_v46  ;;  %v20510_v25 = vld [vmem:[#allocation23_spill] sm:$0xff] }
 0x603   : > { %v10467_v50 = vadd.f32 1e-05, %v10451_v38  ;;  %v19345_v38 = vrot.slane %v11834_v4, %v20510_v25 }
 0x604   : > { %v10397_v47 = vpop.xlane.xlu0 %10396 }
 0x605   : > { %13935 = vrsqrt.f32 %v10467_v50  ;;  %v10452_v54 = vmul.f32 0.0026041667, %v10397_v47 }
 0x607   : > { %v10468_v31 = vadd.f32 1e-05, %v10452_v54  ;;  %v19348_v54 = vrot.slane %v11835_v43, %v20508_v2 }
 0x608   : > { %v10401_v10 = vpop.xlane.xlu1 %10400 }
 0x609   : > { %13937 = vrsqrt.f32 %v10468_v31  ;;  %v10453_v34 = vmul.f32 0.0026041667, %v10401_v10  ;;  %v19351_v31 = vrot.slane %v11835_v43, %v20509_v46  ;;  %v19354_v10 = vrot.slane %v11835_v43, %v20510_v25 }
 0x60b   : > { %v10469_v41 = vadd.f32 1e-05, %v10453_v34 }
 0x60c   : > { %v10405_v19 = vpop.xlane.xlu0 %10404 }
 0x60d   : > { %13939 = vrsqrt.f32 %v10469_v41  ;;  %v10454_v50 = vmul.f32 0.0026041667, %v10405_v19 }
 0x60e   : > { %v13934_v47 = vpop.eup %13933 }
 0x60f   : > { %v10498_v34 = vmul.f32 %v13934_v47, %v19092_v14  ;;  %v10499_v12 = vmul.f32 %v13934_v47, %v19095_v53  ;;  %v10500_v4 = vmul.f32 %v13934_v47, %v19098_v44  ;;  %v10470_v41 = vadd.f32 1e-05, %v10454_v50 }
 0x610   : > { %v10409_v19 = vpop.xlane.xlu1 %10408 }
 0x611   : > { %v10564_v48 = vmul.f32 %v19339_v11, %v10498_v34  ;;  %v10565_v2 = vmul.f32 %v19342_v5, %v10499_v12  ;;  %v10566_v46 = vmul.f32 %v19345_v38, %v10500_v4  ;;  %13941 = vrsqrt.f32 %v10470_v41 }
 0x612   : > { %v13936_v15 = vpop.eup %13935  ;;  %v10455_v43 = vmul.f32 0.0026041667, %v10409_v19 }
 0x613   : > { %v10630_v25 = vadd.f32 %v19348_v54, %v10564_v48  ;;  %v10631_v17 = vadd.f32 %v19351_v31, %v10565_v2  ;;  %v10632_v14 = vadd.f32 %v19354_v10, %v10566_v46  ;;  %v10501_v53 = vmul.f32 %v13936_v15, %v19107_v6 }
 0x614   : > { %v10502_v44 = vmul.f32 %v13936_v15, %v19110_v33  ;;  %v10503_v50 = vmul.f32 %v13936_v15, %v19113_v51  ;;  %v10471_v47 = vadd.f32 1e-05, %v10455_v43  ;;  %v10413_v34 = vpop.xlane.xlu0 %10412 }
 0x615   : > { %10678 = vst [vmem:[%s19370_s5] sm:$0xff] %v10630_v25  ;;  %10679 = vst [vmem:[%s19370_s5 + $0x8] sm:$0xff] %v10631_v17  ;;  %v10567_v48 = vmul.f32 %v19339_v11, %v10501_v53  ;;  %v10456_v12 = vmul.f32 0.0026041667, %v10413_v34 }
 0x616   : > { %10680 = vst [vmem:[%s19370_s5 + $0x10] sm:$0xff] %v10632_v14  ;;  %v13938_v4 = vpop.eup %13937  ;;  %v10568_v6 = vmul.f32 %v19342_v5, %v10502_v44  ;;  %v10569_v33 = vmul.f32 %v19345_v38, %v10503_v50  ;;  %13943 = vrsqrt.f32 %v10471_v47 }
 0x617   : > { %v10633_v51 = vadd.f32 %v19348_v54, %v10567_v48  ;;  %v10504_v15 = vmul.f32 %v13938_v4, %v19122_v3  ;;  %v10505_v41 = vmul.f32 %v13938_v4, %v19125_v26  ;;  %v10506_v17 = vmul.f32 %v13938_v4, %v19128_v63 }
 0x618   : > { %v10634_v19 = vadd.f32 %v19351_v31, %v10568_v6  ;;  %v10635_v2 = vadd.f32 %v19354_v10, %v10569_v33  ;;  %v10472_v46 = vadd.f32 1e-05, %v10456_v12  ;;  %v10417_v43 = vpop.xlane.xlu1 %10416 }
 0x619   : > { %10681 = vst [vmem:[%s19370_s5 + $0x18] sm:$0xff] %v10633_v51  ;;  %v10570_v25 = vmul.f32 %v19339_v11, %v10504_v15  ;;  %v10571_v14 = vmul.f32 %v19342_v5, %v10505_v41  ;;  %v10572_v53 = vmul.f32 %v19345_v38, %v10506_v17  ;;  %v10457_v3 = vmul.f32 0.0026041667, %v10417_v43 }
 0x61a   : > { %v13940_v26 = vpop.eup %13939  ;;  %10682 = vst [vmem:[%s19370_s5 + $0x20] sm:$0xff] %v10634_v19  ;;  %10683 = vst [vmem:[%s19370_s5 + $0x28] sm:$0xff] %v10635_v2  ;;  %13945 = vrsqrt.f32 %v10472_v46 }
 0x61b   : > { %v10636_v63 = vadd.f32 %v19348_v54, %v10570_v25  ;;  %v10637_v44 = vadd.f32 %v19351_v31, %v10571_v14  ;;  %v10638_v50 = vadd.f32 %v19354_v10, %v10572_v53  ;;  %v10507_v47 = vmul.f32 %v13940_v26, %v19137_v28 }
 0x61c   : > { %v10508_v34 = vmul.f32 %v13940_v26, %v19140_v57  ;;  %v10509_v48 = vmul.f32 %v13940_v26, %v19143_v45  ;;  %v10473_v12 = vadd.f32 1e-05, %v10457_v3  ;;  %v10421_v4 = vpop.xlane.xlu0 %10420 }
 0x61d   : > { %10684 = vst [vmem:[%s19370_s5 + $0x30] sm:$0xff] %v10636_v63  ;;  %10685 = vst [vmem:[%s19370_s5 + $0x38] sm:$0xff] %v10637_v44  ;;  %v10573_v6 = vmul.f32 %v19339_v11, %v10507_v47  ;;  %v10458_v33 = vmul.f32 0.0026041667, %v10421_v4 }
 0x61e   : > { %10686 = vst [vmem:[%s19370_s5 + $0x40] sm:$0xff] %v10638_v50  ;;  %v13942_v51 = vpop.eup %13941  ;;  %v10574_v15 = vmul.f32 %v19342_v5, %v10508_v34  ;;  %v10575_v41 = vmul.f32 %v19345_v38, %v10509_v48  ;;  %13947 = vrsqrt.f32 %v10473_v12 }
 0x61f   : > { %v10639_v28 = vadd.f32 %v19348_v54, %v10573_v6  ;;  %v10510_v57 = vmul.f32 %v13942_v51, %v19152_v56  ;;  %v10511_v45 = vmul.f32 %v13942_v51, %v19155_v61  ;;  %v10512_v17 = vmul.f32 %v13942_v51, %v19158_v29 }
 0x620   : > { %v10640_v19 = vadd.f32 %v19351_v31, %v10574_v15  ;;  %v10641_v2 = vadd.f32 %v19354_v10, %v10575_v41  ;;  %v10474_v46 = vadd.f32 1e-05, %v10458_v33  ;;  %v10425_v43 = vpop.xlane.xlu1 %10424 }
 0x621   : > { %10687 = vst [vmem:[%s19370_s5 + $0x48] sm:$0xff] %v10639_v28  ;;  %v10576_v25 = vmul.f32 %v19339_v11, %v10510_v57  ;;  %v10577_v14 = vmul.f32 %v19342_v5, %v10511_v45  ;;  %v10578_v53 = vmul.f32 %v19345_v38, %v10512_v17  ;;  %v10459_v56 = vmul.f32 0.0026041667, %v10425_v43 }
 0x622   : > { %10688 = vst [vmem:[%s19370_s5 + $0x50] sm:$0xff] %v10640_v19  ;;  %10689 = vst [vmem:[%s19370_s5 + $0x58] sm:$0xff] %v10641_v2  ;;  %13949 = vrsqrt.f32 %v10474_v46 }
 0x623   : > { %v13944_v61 = vpop.eup %13943  ;;  %v10642_v29 = vadd.f32 %v19348_v54, %v10576_v25  ;;  %v10643_v3 = vadd.f32 %v19351_v31, %v10577_v14  ;;  %v10644_v26 = vadd.f32 %v19354_v10, %v10578_v53  ;;  %v10475_v63 = vadd.f32 1e-05, %v10459_v56 }
 0x624   : > { %v10513_v44 = vmul.f32 %v13944_v61, %v19167_v21  ;;  %v10514_v50 = vmul.f32 %v13944_v61, %v19170_v42  ;;  %v10515_v47 = vmul.f32 %v13944_v61, %v19173_v24  ;;  %v10429_v34 = vpop.xlane.xlu0 %10428 }
 0x625   : > { %10690 = vst [vmem:[%s19370_s5 + $0x60] sm:$0xff] %v10642_v29  ;;  %10691 = vst [vmem:[%s19370_s5 + $0x68] sm:$0xff] %v10643_v3  ;;  %13951 = vrsqrt.f32 %v10475_v63  ;;  %v10460_v48 = vmul.f32 0.0026041667, %v10429_v34 }
 0x626   : > { %10692 = vst [vmem:[%s19370_s5 + $0x70] sm:$0xff] %v10644_v26  ;;  %v10579_v12 = vmul.f32 %v19339_v11, %v10513_v44  ;;  %v10580_v4 = vmul.f32 %v19342_v5, %v10514_v50  ;;  %v10581_v6 = vmul.f32 %v19345_v38, %v10515_v47 }
 0x627   : > { %v13946_v21 = vpop.eup %13945  ;;  %v10476_v33 = vadd.f32 1e-05, %v10460_v48 }
 0x628   : > { %v10645_v42 = vadd.f32 %v19348_v54, %v10579_v12  ;;  %v10646_v24 = vadd.f32 %v19351_v31, %v10580_v4  ;;  %v10647_v51 = vadd.f32 %v19354_v10, %v10581_v6  ;;  %v10516_v15 = vmul.f32 %v13946_v21, %v19182_v37  ;;  %v10433_v41 = vpop.xlane.xlu1 %10432 }
 0x629   : > { %v10517_v28 = vmul.f32 %v13946_v21, %v19185_v52  ;;  %v10518_v57 = vmul.f32 %v13946_v21, %v19188_v55  ;;  %13953 = vrsqrt.f32 %v10476_v33  ;;  %v10461_v45 = vmul.f32 0.0026041667, %v10433_v41 }
 0x62a   : > { %10693 = vst [vmem:[%s19370_s5 + $0x78] sm:$0xff] %v10645_v42  ;;  %10694 = vst [vmem:[%s19370_s5 + $0x80] sm:$0xff] %v10646_v24  ;;  %v10582_v17 = vmul.f32 %v19339_v11, %v10516_v15 }
 0x62b   : > { %10695 = vst [vmem:[%s19370_s5 + $0x88] sm:$0xff] %v10647_v51  ;;  %v13948_v19 = vpop.eup %13947  ;;  %v10583_v2 = vmul.f32 %v19342_v5, %v10517_v28  ;;  %v10584_v46 = vmul.f32 %v19345_v38, %v10518_v57  ;;  %v10477_v37 = vadd.f32 1e-05, %v10461_v45 }
 0x62c   : > { %v10648_v52 = vadd.f32 %v19348_v54, %v10582_v17  ;;  %v10519_v55 = vmul.f32 %v13948_v19, %v19197_v36  ;;  %v10520_v43 = vmul.f32 %v13948_v19, %v19200_v30  ;;  %v10521_v25 = vmul.f32 %v13948_v19, %v19203_v58  ;;  %v10437_v14 = vpop.xlane.xlu0 %10436 }
 0x62d   : > { %v10649_v53 = vadd.f32 %v19351_v31, %v10583_v2  ;;  %v10650_v56 = vadd.f32 %v19354_v10, %v10584_v46  ;;  %13955 = vrsqrt.f32 %v10477_v37  ;;  %v10462_v61 = vmul.f32 0.0026041667, %v10437_v14 }
 0x62e   : > { %10696 = vst [vmem:[%s19370_s5 + $0x90] sm:$0xff] %v10648_v52  ;;  %v10585_v29 = vmul.f32 %v19339_v11, %v10519_v55  ;;  %v10586_v3 = vmul.f32 %v19342_v5, %v10520_v43  ;;  %v10587_v26 = vmul.f32 %v19345_v38, %v10521_v25 }
 0x62f   : > { %v13950_v36 = vpop.eup %13949  ;;  %10697 = vst [vmem:[%s19370_s5 + $0x98] sm:$0xff] %v10649_v53  ;;  %10698 = vst [vmem:[%s19370_s5 + $0xa0] sm:$0xff] %v10650_v56  ;;  %v10478_v30 = vadd.f32 1e-05, %v10462_v61 }
 0x630   : > { %v10651_v58 = vadd.f32 %v19348_v54, %v10585_v29  ;;  %v10652_v63 = vadd.f32 %v19351_v31, %v10586_v3  ;;  %v10653_v44 = vadd.f32 %v19354_v10, %v10587_v26  ;;  %v10522_v50 = vmul.f32 %v13950_v36, %v19212_v18  ;;  %v10441_v47 = vpop.xlane.xlu1 %10440 }
 0x631   : > { %v10523_v34 = vmul.f32 %v13950_v36, %v19215_v7  ;;  %v10524_v48 = vmul.f32 %v13950_v36, %v19218_v0  ;;  %13957 = vrsqrt.f32 %v10478_v30  ;;  %v10463_v12 = vmul.f32 0.0026041667, %v10441_v47 }
 0x632   : > { %v13952_v4 = vpop.eup %13951  ;;  %10699 = vst [vmem:[%s19370_s5 + $0xa8] sm:$0xff] %v10651_v58  ;;  %10700 = vst [vmem:[%s19370_s5 + $0xb0] sm:$0xff] %v10652_v63  ;;  %v10588_v6 = vmul.f32 %v19339_v11, %v10522_v50 }
 0x633   : > { %10701 = vst [vmem:[%s19370_s5 + $0xb8] sm:$0xff] %v10653_v44  ;;  %v10589_v21 = vmul.f32 %v19342_v5, %v10523_v34  ;;  %v10590_v33 = vmul.f32 %v19345_v38, %v10524_v48  ;;  %v10525_v18 = vmul.f32 %v13952_v4, %v19227_v59  ;;  %v10526_v7 = vmul.f32 %v13952_v4, %v19230_v62 }
 0x634   : > { %v10654_v0 = vadd.f32 %v19348_v54, %v10588_v6  ;;  %v10527_v42 = vmul.f32 %v13952_v4, %v19233_v8  ;;  %v10479_v24 = vadd.f32 1e-05, %v10463_v12  ;;  %v10445_v51 = vpop.xlane.xlu0 %10444 }
 0x635   : > { %v10655_v15 = vadd.f32 %v19351_v31, %v10589_v21  ;;  %v10656_v41 = vadd.f32 %v19354_v10, %v10590_v33  ;;  %v10591_v28 = vmul.f32 %v19339_v11, %v10525_v18  ;;  %v10592_v57 = vmul.f32 %v19342_v5, %v10526_v7 }
 0x636   : > { %v13954_v45 = vpop.eup %13953  ;;  %10702 = vst [vmem:[%s19370_s5 + $0xc0] sm:$0xff] %v10654_v0  ;;  %v10593_v59 = vmul.f32 %v19345_v38, %v10527_v42  ;;  %13959 = vrsqrt.f32 %v10479_v24  ;;  %v10464_v62 = vmul.f32 0.0026041667, %v10445_v51 }
 0x637   : > { %10703 = vst [vmem:[%s19370_s5 + $0xc8] sm:$0xff] %v10655_v15  ;;  %10704 = vst [vmem:[%s19370_s5 + $0xd0] sm:$0xff] %v10656_v41  ;;  %v10657_v8 = vadd.f32 %v19348_v54, %v10591_v28  ;;  %v10658_v17 = vadd.f32 %v19351_v31, %v10592_v57  ;;  %v10528_v19 = vmul.f32 %v13954_v45, %v19242_v39  ;;  %v20511_v15 = vld [vmem:[#allocation70_spill] sm:$0xff] }
 0x638   : > { %v10529_v2 = vmul.f32 %v13954_v45, %v19245_v49  ;;  %v10659_v46 = vadd.f32 %v19354_v10, %v10593_v59  ;;  %v10530_v37 = vmul.f32 %v13954_v45, %v19248_v9  ;;  %v10480_v52 = vadd.f32 1e-05, %v10464_v62  ;;  %v10449_v55 = vpop.xlane.xlu1 %10448  ;;  %v20512_v62 = vld [vmem:[#allocation71_spill] sm:$0xff] }
 0x639   : > { %10705 = vst [vmem:[%s19370_s5 + $0xd8] sm:$0xff] %v10657_v8  ;;  %10706 = vst [vmem:[%s19370_s5 + $0xe0] sm:$0xff] %v10658_v17  ;;  %v10594_v43 = vmul.f32 %v19339_v11, %v10528_v19  ;;  %v10465_v14 = vmul.f32 0.0026041667, %v10449_v55  ;;  %v20513_v8 = vld [vmem:[#allocation72_spill] sm:$0xff]  ;;  %v20514_v19 = vld [vmem:[#allocation73_spill] sm:$0xff] }
 0x63a   : > { %v10595_v25 = vmul.f32 %v19342_v5, %v10529_v2  ;;  %v13956_v53 = vpop.eup %13955  ;;  %10707 = vst [vmem:[%s19370_s5 + $0xe8] sm:$0xff] %v10659_v46  ;;  %v10596_v39 = vmul.f32 %v19345_v38, %v10530_v37  ;;  %13961 = vrsqrt.f32 %v10480_v52 }
 0x63b   : > { %v10660_v49 = vadd.f32 %v19348_v54, %v10594_v43  ;;  %v10531_v56 = vmul.f32 %v13956_v53, %v19257_v40  ;;  %v10532_v61 = vmul.f32 %v13956_v53, %v19260_v60  ;;  %v10533_v3 = vmul.f32 %v13956_v53, %v19263_v23 }
 0x63c   : > { %v10661_v9 = vadd.f32 %v19351_v31, %v10595_v25  ;;  %v10662_v29 = vadd.f32 %v19354_v10, %v10596_v39  ;;  %v10481_v26 = vadd.f32 1e-05, %v10465_v14 }
 0x63d   : > { %10708 = vst [vmem:[%s19370_s5 + $0xf0] sm:$0xff] %v10660_v49  ;;  %v10597_v36 = vmul.f32 %v19339_v11, %v10531_v56  ;;  %v10598_v30 = vmul.f32 %v19342_v5, %v10532_v61  ;;  %v10599_v40 = vmul.f32 %v19345_v38, %v10533_v3 }
 0x63e   : > { %10709 = vst [vmem:[%s19370_s5 + $0xf8] sm:$0xff] %v10661_v9  ;;  %v13958_v58 = vpop.eup %13957  ;;  %10710 = vst [vmem:[%s19370_s5 + $0x100] sm:$0xff] %v10662_v29  ;;  %13963 = vrsqrt.f32 %v10481_v26 }
 0x63f   : > { %v10663_v60 = vadd.f32 %v19348_v54, %v10597_v36  ;;  %v10664_v63 = vadd.f32 %v19351_v31, %v10598_v30  ;;  %v10534_v23 = vmul.f32 %v13958_v58, %v19272_v27  ;;  %v10535_v44 = vmul.f32 %v13958_v58, %v19275_v1 }
 0x640   : > { %v10665_v50 = vadd.f32 %v19354_v10, %v10599_v40  ;;  %v10536_v47 = vmul.f32 %v13958_v58, %v19278_v35 }
 0x641   : > { %10711 = vst [vmem:[%s19370_s5 + $0x108] sm:$0xff] %v10663_v60  ;;  %10712 = vst [vmem:[%s19370_s5 + $0x110] sm:$0xff] %v10664_v63  ;;  %v10600_v34 = vmul.f32 %v19339_v11, %v10534_v23  ;;  %v10601_v48 = vmul.f32 %v19342_v5, %v10535_v44 }
 0x642   : > { %10713 = vst [vmem:[%s19370_s5 + $0x118] sm:$0xff] %v10665_v50  ;;  %v10602_v12 = vmul.f32 %v19345_v38, %v10536_v47 }
 0x643   : > { %v13960_v4 = vpop.eup %13959  ;;  %v10666_v27 = vadd.f32 %v19348_v54, %v10600_v34  ;;  %v10667_v1 = vadd.f32 %v19351_v31, %v10601_v48 }
 0x644   : > { %v10668_v6 = vadd.f32 %v19354_v10, %v10602_v12  ;;  %v10537_v21 = vmul.f32 %v13960_v4, %v19287_v16  ;;  %v10538_v35 = vmul.f32 %v13960_v4, %v19290_v13  ;;  %v10539_v33 = vmul.f32 %v13960_v4, %v19293_v32 }
 0x645   : > { %10714 = vst [vmem:[%s19370_s5 + $0x120] sm:$0xff] %v10666_v27  ;;  %10715 = vst [vmem:[%s19370_s5 + $0x128] sm:$0xff] %v10667_v1 }
 0x646   : > { %10716 = vst [vmem:[%s19370_s5 + $0x130] sm:$0xff] %v10668_v6  ;;  %v10603_v18 = vmul.f32 %v19339_v11, %v10537_v21  ;;  %v10604_v7 = vmul.f32 %v19342_v5, %v10538_v35  ;;  %v10605_v0 = vmul.f32 %v19345_v38, %v10539_v33 }
 0x647   : > { %v13962_v42 = vpop.eup %13961 }
 0x648   : > { %v10669_v16 = vadd.f32 %v19348_v54, %v10603_v18  ;;  %v10670_v24 = vadd.f32 %v19351_v31, %v10604_v7  ;;  %v10671_v13 = vadd.f32 %v19354_v10, %v10605_v0  ;;  %v10540_v32 = vmul.f32 %v13962_v42, %v19302_v20 }
 0x649   : > { %v10541_v51 = vmul.f32 %v13962_v42, %v19305_v22  ;;  %v10542_v41 = vmul.f32 %v13962_v42, %v20511_v15 }
 0x64a   : > { %10717 = vst [vmem:[%s19370_s5 + $0x138] sm:$0xff] %v10669_v16  ;;  %10718 = vst [vmem:[%s19370_s5 + $0x140] sm:$0xff] %v10670_v24  ;;  %v10606_v28 = vmul.f32 %v19339_v11, %v10540_v32 }
 0x64b   : > { %10719 = vst [vmem:[%s19370_s5 + $0x148] sm:$0xff] %v10671_v13  ;;  %v13964_v57 = vpop.eup %13963  ;;  %v10607_v45 = vmul.f32 %v19342_v5, %v10541_v51  ;;  %v10608_v59 = vmul.f32 %v19345_v38, %v10542_v41 }
 0x64c   : > { %v10672_v20 = vadd.f32 %v19348_v54, %v10606_v28  ;;  %v10543_v22 = vmul.f32 %v13964_v57, %v20512_v62  ;;  %v10544_v17 = vmul.f32 %v13964_v57, %v20513_v8  ;;  %v10545_v2 = vmul.f32 %v13964_v57, %v20514_v19 }
 0x64d   : > { %v10673_v46 = vadd.f32 %v19351_v31, %v10607_v45  ;;  %v10674_v37 = vadd.f32 %v19354_v10, %v10608_v59 }
 0x64e   : > { %10720 = vst [vmem:[%s19370_s5 + $0x150] sm:$0xff] %v10672_v20  ;;  %v10609_v52 = vmul.f32 %v19339_v11, %v10543_v22  ;;  %v10610_v55 = vmul.f32 %v19342_v5, %v10544_v17  ;;  %v10611_v43 = vmul.f32 %v19345_v38, %v10545_v2 }
 0x64f   : > { %10721 = vst [vmem:[%s19370_s5 + $0x158] sm:$0xff] %v10673_v46  ;;  %10722 = vst [vmem:[%s19370_s5 + $0x160] sm:$0xff] %v10674_v37 }
 0x650   : > { %v10675_v25 = vadd.f32 %v19348_v54, %v10609_v52  ;;  %v10676_v11 = vadd.f32 %v19351_v31, %v10610_v55  ;;  %v10677_v5 = vadd.f32 %v19354_v10, %v10611_v43 }
 0x652   : > { %10723 = vst [vmem:[%s19370_s5 + $0x168] sm:$0xff] %v10675_v25  ;;  %10724 = vst [vmem:[%s19370_s5 + $0x170] sm:$0xff] %v10676_v11 }
 0x653   : > { %10725 = vst [vmem:[%s19370_s5 + $0x178] sm:$0xff] %v10677_v5 }
 0x654   : > { %13979 = shalt.err (!%p13976_p3)
}
 0x655   : > { %s13980_s24 = scalar_lea.hbm %s19551_s9, 6144  ;;  %s13984_s30 = scalar_lea.hbm %s19606_s3, 24576 }
 0x656   : > { %p13981_p4 = scmp.ne.s32.totalorder %s19551_s9, %s13980_s24  ;;  %p13985_p9 = scmp.lt.s32.totalorder %s19551_s9, %s19606_s3 }
 0x657   : > { %p13986_p10 = scmp.lt.s32.totalorder %s13984_s30, %s13980_s24 }
 0x658   : > { %p13982_p7 = pnand %p13981_p4, %p14089_p5 }
 0x659   : > { %p13987_p11 = por %p13986_p10, %p13985_p9 }
 0x65a   : > { %p13983_p8 = pneg %p13982_p7 }
 0x65c   : > { %p13988_p12 = pnand %p13987_p11, %p13983_p8 }
 0x65e   : > { %13991 = shalt.err (!%p13988_p12)
}
 0x65f   : > { %s14029_s27 = smov 384   ;;  %s14030_s4 = smov 24  }
 0x660   : > { %12868 = dma.vmem_to_hbm [thread:$0]  (%p14089_p5), %s19553_s7, 6144, %s19551_s9, %s19563_s10, %s14029_s27, %s14029_s27, %s14030_s4  }
 0x661 PF: > { %p12874_p13 = scmp.ge.s32.totalorder %s14026_s15, 2  ;;  %s10756_s5 = sand.u32 1, %s14014_s12  }
 0x662   : > { %s10757_s6 = scalar_lea.sflag [#allocation3], %s10756_s5 }
 0x663   : > { %p12871_p0 = pnand %p12874_p13, %p14093_p6 }
 0x665   : > { %p12872_p1 = pneg %p12871_p0 }
 0x667   : > { %14009 = dma.done.wait (%p12872_p1), %s10757_s6, 6144  }
 0x668   : > { %14011 = vsyncadd (%p12872_p1), %s10757_s6, 4294961152  ;;  %p13_p2 = scmp.ge.s32.totalorder %s14076_s18, 6   ;;  %s20515_s12 = smov %s14018_s13 }
 0x669   : > { %s20516_s13 = smov %s14022_s14  ;;  %s20517_s14 = smov %s14087_s21 }
 0x66a   : > { %s20518_s15 = smov %s14076_s18  ;;  %15 = sbr.rel (!%p13_p2) target bundleno = 3 (0x3), region = 69 }
 0x66f   :  { %10762 = vsyncpa [#allocation3], 1 }
 0x670   :  { %10764 = vsyncpa [#allocation3 + $0x1], 1 }

</bundles_post_ra>
